<compile_context>
chip_gen: v6e
topology: v6e:2x2x1
jax: 0.10.0
libtpu: 0.0.40
codegen_flags: <defaults>
</compile_context>

<pallas_src>
import functools
import math

import jax
import jax.numpy as jnp
from jax import lax
from jax.experimental import pallas as pl
from jax.experimental.pallas import tpu as pltpu


LANE = 128                      # output-channel padding target (lane width)
SUBLANE = 8                     # sublane alignment for row / contraction dims
TILE_P = 512                    # im2col rows per grid step (fits all gens:
                                #  ~2*(512*K*2B) + K*C*2B + 2*(512*C*4B) << 32MiB)
_VMEM_LIMIT = 32 * 1024 * 1024  # explicit scoped-VMEM budget (safe on v5e/v6e/v7x)


def _round_up(n, m):
    return ((n + m - 1) // m) * m


# ---------------------------------------------------------------------------
# Pallas kernels
# ---------------------------------------------------------------------------

def _matmul_bias_kernel(x_ref, w_ref, b_ref, o_ref, *, leaky):
    # conv-as-matmul: (tile, K)bf16 @ (K, C)bf16 -> f32, + bias, opt. LeakyReLU
    y = jnp.dot(x_ref[...], w_ref[...], preferred_element_type=jnp.float32)
    y = y + b_ref[...]
    if leaky:
        y = jnp.where(y >= 0, y, 0.01 * y)
    o_ref[...] = y


def _conv_gdn_skip_kernel(p_ref, xs_ref, w_ref, b_ref, ws_ref, bs_ref,
                          gT_ref, beta_ref, o_ref):
    # conv3x3 (im2col matmul) + bias
    y = jnp.dot(p_ref[...], w_ref[...], preferred_element_type=jnp.float32)
    y = y + b_ref[...]
    # fused 1x1 strided skip conv (identity branch), computed in-kernel
    idn = jnp.dot(xs_ref[...], ws_ref[...], preferred_element_type=jnp.float32)
    idn = idn + bs_ref[...]
    # GDN in f32: y * rsqrt(beta + gamma @ y^2), then residual add
    norm = jnp.dot(y * y, gT_ref[...], preferred_element_type=jnp.float32)
    norm = norm + beta_ref[...]
    o_ref[...] = y * lax.rsqrt(norm) + idn


# ---------------------------------------------------------------------------
# Row-tiled pallas_call wrapper
# ---------------------------------------------------------------------------

def _row_tiled_call(kernel, row_args, resident_args, out_cols, tile_p=TILE_P):
    """Run `kernel` over row tiles of the leading (patch) dimension.

    row_args      : 2-D arrays tiled along rows (streamed / pipelined).
    resident_args : 2-D arrays kept whole in VMEM (weights, bias, gamma, beta).
    """
    P = row_args[0].shape[0]
    tile = min(tile_p, _round_up(P, SUBLANE))
    P_pad = _round_up(P, tile)
    if P_pad != P:
        row_args = [jnp.pad(a, ((0, P_pad - P), (0, 0))) for a in row_args]

    def row_spec(a):
        return pl.BlockSpec((tile, a.shape[1]), lambda i: (i, 0))

    def res_spec(a):
        return pl.BlockSpec(a.shape, lambda i: (0, 0))

    out = pl.pallas_call(
        kernel,
        out_shape=jax.ShapeDtypeStruct((P_pad, out_cols), jnp.float32),
        grid=(P_pad // tile,),
        in_specs=[row_spec(a) for a in row_args]
                 + [res_spec(a) for a in resident_args],
        out_specs=pl.BlockSpec((tile, out_cols), lambda i: (i, 0)),
        compiler_params=pltpu.CompilerParams(
            dimension_semantics=("parallel",),
            vmem_limit_bytes=_VMEM_LIMIT),
    )(*row_args, *resident_args)
    return out[:P] if P_pad != P else out


def matmul_bias(x, w, b, *, leaky):
    kern = functools.partial(_matmul_bias_kernel, leaky=leaky)
    return _row_tiled_call(kern, [x], [w, b], out_cols=w.shape[1])


def conv_gdn_skip(patches, xs, w2, b2, ws, bs, gT, beta):
    return _row_tiled_call(_conv_gdn_skip_kernel, [patches, xs],
                           [w2, b2, ws, bs, gT, beta], out_cols=w2.shape[1])


# ---------------------------------------------------------------------------
# JAX glue: im2col, parameter re-layout (with channel / K padding)
# ---------------------------------------------------------------------------

def im2col3x3(x, stride):
    """x: (B,H,W,C) f32, pad=1 -> bf16 patches (B*Ho*Wo, round_up(9C,8)), Ho, Wo."""
    B, H, W, C = x.shape
    xp = jnp.pad(x, ((0, 0), (1, 1), (1, 1), (0, 0)))
    Ho = (H - 1) // stride + 1
    Wo = (W - 1) // stride + 1
    cols = [xp[:, kh:kh + stride * (Ho - 1) + 1:stride,
               kw:kw + stride * (Wo - 1) + 1:stride, :]
            for kh in range(3) for kw in range(3)]
    p = jnp.stack(cols, axis=3).reshape(B * Ho * Wo, 9 * C)
    Kp = _round_up(9 * C, SUBLANE)
    if Kp != 9 * C:
        p = jnp.pad(p, ((0, 0), (0, Kp - 9 * C)))
    return p.astype(jnp.bfloat16), Ho, Wo


def conv3x3_to_mat(w_oihw, cin_pad, cout_pad):
    """(Cout,Cin,3,3) -> bf16 (round_up(9*cin_pad,8), cout_pad), im2col ordering."""
    cout, cin = w_oihw.shape[:2]
    w = jnp.transpose(w_oihw, (2, 3, 1, 0))                       # (3,3,cin,cout)
    w = jnp.pad(w, ((0, 0), (0, 0), (0, cin_pad - cin), (0, cout_pad - cout)))
    w = w.reshape(9 * cin_pad, cout_pad)
    Kp = _round_up(9 * cin_pad, SUBLANE)
    if Kp != 9 * cin_pad:
        w = jnp.pad(w, ((0, Kp - 9 * cin_pad), (0, 0)))
    return w.astype(jnp.bfloat16)


def conv1x1_to_mat(w_oihw, cin_pad, cout_pad):
    cout, cin = w_oihw.shape[:2]
    w = jnp.transpose(w_oihw.reshape(cout, cin), (1, 0))          # (cin, cout)
    w = jnp.pad(w, ((0, cin_pad - cin), (0, cout_pad - cout)))
    return w.astype(jnp.bfloat16)


def pad_row_f32(v, cpad, fill=0.0):
    return jnp.pad(v, (0, cpad - v.shape[0]),
                   constant_values=fill).reshape(1, cpad).astype(jnp.float32)


# ---------------------------------------------------------------------------
# Encoder composition
# ---------------------------------------------------------------------------

def rbws_pallas(x, p, stride, cout_pad):
    """ResidualBlockWithStride on NHWC input (channels possibly zero-padded)."""
    B, H, W, Ci = x.shape
    w1, b1 = p["conv1"]
    w2, b2 = p["conv2"]
    ws, bs = p["skip"]
    gamma, beta = p["gdn"]
    C = gamma.shape[0]

    # conv1 (3x3, stride) + LeakyReLU(0.01)
    patches1, Ho, Wo = im2col3x3(x, stride)
    h = matmul_bias(patches1, conv3x3_to_mat(w1, Ci, cout_pad),
                    pad_row_f32(b1, cout_pad), leaky=True)
    h = h.reshape(B, Ho, Wo, cout_pad)

    # strided input for the fused 1x1 skip conv
    cskip = _round_up(Ci, SUBLANE)
    xs = x[:, ::stride, ::stride, :]
    if cskip != Ci:
        xs = jnp.pad(xs, ((0, 0), (0, 0), (0, 0), (0, cskip - Ci)))
    xs = xs.reshape(B * Ho * Wo, cskip).astype(jnp.bfloat16)

    # conv2 (3x3, stride 1) + GDN + 1x1 skip + residual add, one fused kernel.
    # TODO(synk): the stride-1 conv2 still materializes a 9x im2col in HBM;
    # a halo row-tiled variant (manual DMA of TR+2 input rows per step) would
    # remove that traffic entirely.
    patches2, _, _ = im2col3x3(h, 1)
    out = conv_gdn_skip(
        patches2, xs,
        conv3x3_to_mat(w2, cout_pad, cout_pad), pad_row_f32(b2, cout_pad),
        conv1x1_to_mat(ws, cskip, cout_pad), pad_row_f32(bs, cout_pad),
        jnp.pad(gamma.T, ((0, cout_pad - C), (0, cout_pad - C))).astype(jnp.float32),
        pad_row_f32(beta, cout_pad, fill=1.0))
    return out.reshape(B, Ho, Wo, cout_pad)


def reference_encoder_pallas(x_nchw, params):
    N = params["b1"]["conv1"][0].shape[0]
    M = params["b3"]["conv1"][0].shape[0]
    Np = _round_up(N, LANE)
    Mp = _round_up(M, LANE)

    x = jnp.transpose(x_nchw, (0, 2, 3, 1)).astype(jnp.float32)   # NCHW -> NHWC
    x = rbws_pallas(x, params["b1"], 2, Np)
    x = rbws_pallas(x, params["b2"], 2, Np)
    x = rbws_pallas(x, params["b3"], 2, Mp)

    w, b = params["final"]
    B = x.shape[0]
    patches, Ho, Wo = im2col3x3(x, 2)
    y = matmul_bias(patches, conv3x3_to_mat(w, Mp, Mp),
                    pad_row_f32(b, Mp), leaky=False)
    y = y[:, :M].reshape(B, Ho, Wo, M)
    return jnp.transpose(y, (0, 3, 1, 2))                         # NHWC -> NCHW


# ---------------------------------------------------------------------------
# Pure-JAX reference (correctness check) — uses the raw, unpadded parameters
# ---------------------------------------------------------------------------

def _conv_ref(x, w_oihw, b, stride, pad):
    w_hwio = jnp.transpose(w_oihw, (2, 3, 1, 0))
    y = lax.conv_general_dilated(
        x, w_hwio, (stride, stride), ((pad, pad), (pad, pad)),
        dimension_numbers=("NHWC", "HWIO", "NHWC"))
    return y + b


def _gdn_ref(x, gamma, beta):
    norm = jnp.einsum("bhwj,ij->bhwi", x * x, gamma) + beta
    return x / jnp.sqrt(norm)


def _rbws_ref(x, p, stride):
    w1, b1 = p["conv1"]
    w2, b2 = p["conv2"]
    ws, bs = p["skip"]
    gamma, beta = p["gdn"]
    out = _conv_ref(x, w1, b1, stride, 1)
    out = jnp.where(out >= 0, out, 0.01 * out)
    out = _conv_ref(out, w2, b2, 1, 1)
    out = _gdn_ref(out, gamma, beta)
    identity = _conv_ref(x, ws, bs, stride, 0)
    return out + identity


def reference_encoder_ref(x_nchw, params):
    x = jnp.transpose(x_nchw, (0, 2, 3, 1))
    x = _rbws_ref(x, params["b1"], 2)
    x = _rbws_ref(x, params["b2"], 2)
    x = _rbws_ref(x, params["b3"], 2)
    w, b = params["final"]
    y = _conv_ref(x, w, b, 2, 1)
    return jnp.transpose(y, (0, 3, 1, 2))


# ---------------------------------------------------------------------------
# Deterministic synthetic parameters
# ---------------------------------------------------------------------------

def init_params(key, N, M):
    def conv_p(k, cin, cout, ksz):
        k1, k2 = jax.random.split(k)
        fan_in = cin * ksz * ksz
        w = jax.random.normal(k1, (cout, cin, ksz, ksz), jnp.float32) / math.sqrt(fan_in)
        b = 0.01 * jax.random.normal(k2, (cout,), jnp.float32)
        return w, b

    def gdn_p(k, c):
        beta = jnp.ones((c,), jnp.float32)
        gamma = (0.1 * jnp.eye(c, dtype=jnp.float32)
                 + 0.01 * jnp.abs(jax.random.normal(k, (c, c), jnp.float32)))
        return gamma, beta

    def block(k, cin, cout):
        k1, k2, k3, k4 = jax.random.split(k, 4)
        return {"conv1": conv_p(k1, cin, cout, 3),
                "conv2": conv_p(k2, cout, cout, 3),
                "skip": conv_p(k3, cin, cout, 1),
                "gdn": gdn_p(k4, cout)}

    ks = jax.random.split(key, 4)
    return {"b1": block(ks[0], 3, N),
            "b2": block(ks[1], N, N),
            "b3": block(ks[2], N, M),
            "final": conv_p(ks[3], M, M, 3)}


# ---------------------------------------------------------------------------

if __name__ == "__main__":
    key = jax.random.PRNGKey(0)
    kp, kx = jax.random.split(key)

    # Small synthetic configuration (module defaults are N=128, M=320).
    N, M = 16, 24
    B, H, W = 2, 32, 32

    params = init_params(kp, N, M)
    x = jax.random.normal(kx, (B, 3, H, W), jnp.float32)   # NCHW, like PyTorch

    enc = jax.jit(reference_encoder_pallas)
    y = jax.block_until_ready(enc(x, params))
    assert y.shape == (B, M, H // 16, W // 16), y.shape

    y_ref = jax.block_until_ready(reference_encoder_ref(x, params))
    # Relative Frobenius error; loose-ish because conv operands are bf16 on the
    # MXU (f32 accumulate) while the reference runs XLA f32 convolutions.
    num = jnp.sqrt(jnp.sum((y - y_ref) ** 2))
    den = jnp.sqrt(jnp.sum(y_ref ** 2)) + 1e-12
    rel_err = float(num / den)
    assert rel_err < 5e-2, f"relative error too large: {rel_err}"

    print("KERNEL_OK")
</pallas_src>

<mosaic_0001>
module attributes {stable_mosaic.version = 11 : i64} {
  func.func @_matmul_bias_kernel(%arg0: i32, %arg1: memref<512x32xbf16, #tpu.memory_space<vmem>>, %arg2: memref<32x128xbf16, #tpu.memory_space<vmem>>, %arg3: memref<1x128xf32, #tpu.memory_space<vmem>>, %arg4: memref<512x128xf32, #tpu.memory_space<vmem>>) attributes {dimension_semantics = [#tpu.dimension_semantics<parallel>], iteration_bounds = array<i64: 1>, scalar_prefetch = 0 : i64, scratch_operands = 0 : i64, tpu.core_type = #tpu.core_type<tc>, window_params = [{transform_indices = @transform_0, window_bounds = array<i64: 512, 32>}, {pipeline_mode = #tpu.pipeline_mode<synchronous>, transform_indices = @transform_1, window_bounds = array<i64: 32, 128>}, {pipeline_mode = #tpu.pipeline_mode<synchronous>, transform_indices = @transform_2, window_bounds = array<i64: 1, 128>}, {transform_indices = @transform_3, window_bounds = array<i64: 512, 128>}]} {
    %c0 = arith.constant 0 : index
    %c0_0 = arith.constant 0 : index
    %0 = vector.load %arg1[%c0, %c0_0] : memref<512x32xbf16, #tpu.memory_space<vmem>>, vector<512x32xbf16>
    %c0_1 = arith.constant 0 : index
    %c0_2 = arith.constant 0 : index
    %1 = vector.load %arg2[%c0_1, %c0_2] : memref<32x128xbf16, #tpu.memory_space<vmem>>, vector<32x128xbf16>
    %cst = arith.constant dense<0.000000e+00> : vector<512x128xf32>
    %2 = tpu.matmul %0, %1, %cst {dimension_numbers = #tpu.dot_dimension_numbers<[1], [0], [0], [1], [0, 0, 1, 1], [], []>} : vector<512x32xbf16>, vector<32x128xbf16>, vector<512x128xf32> -> vector<512x128xf32>
    %c0_3 = arith.constant 0 : index
    %c0_4 = arith.constant 0 : index
    %3 = vector.load %arg3[%c0_3, %c0_4] : memref<1x128xf32, #tpu.memory_space<vmem>>, vector<1x128xf32>
    %4 = vector.broadcast %3 : vector<1x128xf32> to vector<512x128xf32>
    %5 = arith.addf %2, %4 : vector<512x128xf32>
    %cst_5 = arith.constant 0.000000e+00 : f32
    %6 = vector.broadcast %cst_5 : f32 to vector<512x128xf32>
    %7 = arith.cmpf oge, %5, %6 : vector<512x128xf32>
    %cst_6 = arith.constant 0.00999999977 : f32
    %8 = vector.broadcast %cst_6 : f32 to vector<512x128xf32>
    %9 = arith.mulf %8, %5 : vector<512x128xf32>
    %10 = arith.select %7, %5, %9 : vector<512x128xi1>, vector<512x128xf32>
    %c0_7 = arith.constant 0 : index
    %c0_8 = arith.constant 0 : index
    %11 = vector.load %arg4[%c0_7, %c0_8] : memref<512x128xf32, #tpu.memory_space<vmem>>, vector<512x128xf32>
    tpu.vector_store %arg4[%c0_7, %c0_8], %10 {strides = array<i32>} : memref<512x128xf32, #tpu.memory_space<vmem>>, vector<512x128xf32>,
    return
  }
  func.func @transform_0(%arg0: i32) -> (i32, i32) {
    %c0_i32 = arith.constant 0 : i32
    %c0_i32_0 = arith.constant 0 : i32
    return %arg0, %c0_i32 : i32, i32
  }
  func.func @transform_1(%arg0: i32) -> (i32, i32) {
    %c0_i32 = arith.constant 0 : i32
    %c0_i32_0 = arith.constant 0 : i32
    %c0_i32_1 = arith.constant 0 : i32
    return %c0_i32, %c0_i32_0 : i32, i32
  }
  func.func @transform_2(%arg0: i32) -> (i32, i32) {
    %c0_i32 = arith.constant 0 : i32
    %c0_i32_0 = arith.constant 0 : i32
    %c0_i32_1 = arith.constant 0 : i32
    return %c0_i32, %c0_i32_0 : i32, i32
  }
  func.func @transform_3(%arg0: i32) -> (i32, i32) {
    %c0_i32 = arith.constant 0 : i32
    %c0_i32_0 = arith.constant 0 : i32
    return %arg0, %c0_i32 : i32, i32
  }
}

module attributes {stable_mosaic.version = 11 : i64} {
  func.func @_conv_gdn_skip_kernel(%arg0: i32, %arg1: memref<512x1152xbf16, #tpu.memory_space<vmem>>, %arg2: memref<512x8xbf16, #tpu.memory_space<vmem>>, %arg3: memref<1152x128xbf16, #tpu.memory_space<vmem>>, %arg4: memref<1x128xf32, #tpu.memory_space<vmem>>, %arg5: memref<8x128xbf16, #tpu.memory_space<vmem>>, %arg6: memref<1x128xf32, #tpu.memory_space<vmem>>, %arg7: memref<128x128xf32, #tpu.memory_space<vmem>>, %arg8: memref<1x128xf32, #tpu.memory_space<vmem>>, %arg9: memref<512x128xf32, #tpu.memory_space<vmem>>) attributes {dimension_semantics = [#tpu.dimension_semantics<parallel>], iteration_bounds = array<i64: 1>, scalar_prefetch = 0 : i64, scratch_operands = 0 : i64, tpu.core_type = #tpu.core_type<tc>, window_params = [{transform_indices = @transform_0, window_bounds = array<i64: 512, 1152>}, {transform_indices = @transform_1, window_bounds = array<i64: 512, 8>}, {pipeline_mode = #tpu.pipeline_mode<synchronous>, transform_indices = @transform_2, window_bounds = array<i64: 1152, 128>}, {pipeline_mode = #tpu.pipeline_mode<synchronous>, transform_indices = @transform_3, window_bounds = array<i64: 1, 128>}, {pipeline_mode = #tpu.pipeline_mode<synchronous>, transform_indices = @transform_4, window_bounds = array<i64: 8, 128>}, {pipeline_mode = #tpu.pipeline_mode<synchronous>, transform_indices = @transform_5, window_bounds = array<i64: 1, 128>}, {pipeline_mode = #tpu.pipeline_mode<synchronous>, transform_indices = @transform_6, window_bounds = array<i64: 128, 128>}, {pipeline_mode = #tpu.pipeline_mode<synchronous>, transform_indices = @transform_7, window_bounds = array<i64: 1, 128>}, {transform_indices = @transform_8, window_bounds = array<i64: 512, 128>}]} {
    %c0 = arith.constant 0 : index
    %c0_0 = arith.constant 0 : index
    %0 = vector.load %arg1[%c0, %c0_0] : memref<512x1152xbf16, #tpu.memory_space<vmem>>, vector<512x1152xbf16>
    %c0_1 = arith.constant 0 : index
    %c0_2 = arith.constant 0 : index
    %1 = vector.load %arg3[%c0_1, %c0_2] : memref<1152x128xbf16, #tpu.memory_space<vmem>>, vector<1152x128xbf16>
    %cst = arith.constant dense<0.000000e+00> : vector<512x128xf32>
    %2 = tpu.matmul %0, %1, %cst {dimension_numbers = #tpu.dot_dimension_numbers<[1], [0], [0], [1], [0, 0, 1, 1], [], []>} : vector<512x1152xbf16>, vector<1152x128xbf16>, vector<512x128xf32> -> vector<512x128xf32>
    %c0_3 = arith.constant 0 : index
    %c0_4 = arith.constant 0 : index
    %3 = vector.load %arg4[%c0_3, %c0_4] : memref<1x128xf32, #tpu.memory_space<vmem>>, vector<1x128xf32>
    %4 = vector.broadcast %3 : vector<1x128xf32> to vector<512x128xf32>
    %5 = arith.addf %2, %4 : vector<512x128xf32>
    %c0_5 = arith.constant 0 : index
    %c0_6 = arith.constant 0 : index
    %6 = vector.load %arg2[%c0_5, %c0_6] : memref<512x8xbf16, #tpu.memory_space<vmem>>, vector<512x8xbf16>
    %c0_7 = arith.constant 0 : index
    %c0_8 = arith.constant 0 : index
    %7 = vector.load %arg5[%c0_7, %c0_8] : memref<8x128xbf16, #tpu.memory_space<vmem>>, vector<8x128xbf16>
    %cst_9 = arith.constant dense<0.000000e+00> : vector<512x128xf32>
    %8 = tpu.matmul %6, %7, %cst_9 {dimension_numbers = #tpu.dot_dimension_numbers<[1], [0], [0], [1], [0, 0, 1, 1], [], []>} : vector<512x8xbf16>, vector<8x128xbf16>, vector<512x128xf32> -> vector<512x128xf32>
    %c0_10 = arith.constant 0 : index
    %c0_11 = arith.constant 0 : index
    %9 = vector.load %arg6[%c0_10, %c0_11] : memref<1x128xf32, #tpu.memory_space<vmem>>, vector<1x128xf32>
    %10 = vector.broadcast %9 : vector<1x128xf32> to vector<512x128xf32>
    %11 = arith.addf %8, %10 : vector<512x128xf32>
    %12 = arith.mulf %5, %5 : vector<512x128xf32>
    %c0_12 = arith.constant 0 : index
    %c0_13 = arith.constant 0 : index
    %13 = vector.load %arg7[%c0_12, %c0_13] : memref<128x128xf32, #tpu.memory_space<vmem>>, vector<128x128xf32>
    %cst_14 = arith.constant dense<0.000000e+00> : vector<512x128xf32>
    %14 = tpu.matmul %12, %13, %cst_14 {dimension_numbers = #tpu.dot_dimension_numbers<[1], [0], [0], [1], [0, 0, 1, 1], [], []>} : vector<512x128xf32>, vector<128x128xf32>, vector<512x128xf32> -> vector<512x128xf32>
    %c0_15 = arith.constant 0 : index
    %c0_16 = arith.constant 0 : index
    %15 = vector.load %arg8[%c0_15, %c0_16] : memref<1x128xf32, #tpu.memory_space<vmem>>, vector<1x128xf32>
    %16 = vector.broadcast %15 : vector<1x128xf32> to vector<512x128xf32>
    %17 = arith.addf %14, %16 : vector<512x128xf32>
    %18 = math.rsqrt %17 : vector<512x128xf32>
    %19 = arith.mulf %5, %18 : vector<512x128xf32>
    %20 = arith.addf %19, %11 : vector<512x128xf32>
    %c0_17 = arith.constant 0 : index
    %c0_18 = arith.constant 0 : index
    %21 = vector.load %arg9[%c0_17, %c0_18] : memref<512x128xf32, #tpu.memory_space<vmem>>, vector<512x128xf32>
    tpu.vector_store %arg9[%c0_17, %c0_18], %20 {strides = array<i32>} : memref<512x128xf32, #tpu.memory_space<vmem>>, vector<512x128xf32>,
    return
  }
  func.func @transform_0(%arg0: i32) -> (i32, i32) {
    %c0_i32 = arith.constant 0 : i32
    %c0_i32_0 = arith.constant 0 : i32
    return %arg0, %c0_i32 : i32, i32
  }
  func.func @transform_1(%arg0: i32) -> (i32, i32) {
    %c0_i32 = arith.constant 0 : i32
    %c0_i32_0 = arith.constant 0 : i32
    return %arg0, %c0_i32 : i32, i32
  }
  func.func @transform_2(%arg0: i32) -> (i32, i32) {
    %c0_i32 = arith.constant 0 : i32
    %c0_i32_0 = arith.constant 0 : i32
    %c0_i32_1 = arith.constant 0 : i32
    return %c0_i32, %c0_i32_0 : i32, i32
  }
  func.func @transform_3(%arg0: i32) -> (i32, i32) {
    %c0_i32 = arith.constant 0 : i32
    %c0_i32_0 = arith.constant 0 : i32
    %c0_i32_1 = arith.constant 0 : i32
    return %c0_i32, %c0_i32_0 : i32, i32
  }
  func.func @transform_4(%arg0: i32) -> (i32, i32) {
    %c0_i32 = arith.constant 0 : i32
    %c0_i32_0 = arith.constant 0 : i32
    %c0_i32_1 = arith.constant 0 : i32
    return %c0_i32, %c0_i32_0 : i32, i32
  }
  func.func @transform_5(%arg0: i32) -> (i32, i32) {
    %c0_i32 = arith.constant 0 : i32
    %c0_i32_0 = arith.constant 0 : i32
    %c0_i32_1 = arith.constant 0 : i32
    return %c0_i32, %c0_i32_0 : i32, i32
  }
  func.func @transform_6(%arg0: i32) -> (i32, i32) {
    %c0_i32 = arith.constant 0 : i32
    %c0_i32_0 = arith.constant 0 : i32
    %c0_i32_1 = arith.constant 0 : i32
    return %c0_i32, %c0_i32_0 : i32, i32
  }
  func.func @transform_7(%arg0: i32) -> (i32, i32) {
    %c0_i32 = arith.constant 0 : i32
    %c0_i32_0 = arith.constant 0 : i32
    %c0_i32_1 = arith.constant 0 : i32
    return %c0_i32, %c0_i32_0 : i32, i32
  }
  func.func @transform_8(%arg0: i32) -> (i32, i32) {
    %c0_i32 = arith.constant 0 : i32
    %c0_i32_0 = arith.constant 0 : i32
    return %arg0, %c0_i32 : i32, i32
  }
}

module attributes {stable_mosaic.version = 11 : i64} {
  func.func @_matmul_bias_kernel(%arg0: i32, %arg1: memref<128x1152xbf16, #tpu.memory_space<vmem>>, %arg2: memref<1152x128xbf16, #tpu.memory_space<vmem>>, %arg3: memref<1x128xf32, #tpu.memory_space<vmem>>, %arg4: memref<128x128xf32, #tpu.memory_space<vmem>>) attributes {dimension_semantics = [#tpu.dimension_semantics<parallel>], iteration_bounds = array<i64: 1>, scalar_prefetch = 0 : i64, scratch_operands = 0 : i64, tpu.core_type = #tpu.core_type<tc>, window_params = [{transform_indices = @transform_0, window_bounds = array<i64: 128, 1152>}, {pipeline_mode = #tpu.pipeline_mode<synchronous>, transform_indices = @transform_1, window_bounds = array<i64: 1152, 128>}, {pipeline_mode = #tpu.pipeline_mode<synchronous>, transform_indices = @transform_2, window_bounds = array<i64: 1, 128>}, {transform_indices = @transform_3, window_bounds = array<i64: 128, 128>}]} {
    %c0 = arith.constant 0 : index
    %c0_0 = arith.constant 0 : index
    %0 = vector.load %arg1[%c0, %c0_0] : memref<128x1152xbf16, #tpu.memory_space<vmem>>, vector<128x1152xbf16>
    %c0_1 = arith.constant 0 : index
    %c0_2 = arith.constant 0 : index
    %1 = vector.load %arg2[%c0_1, %c0_2] : memref<1152x128xbf16, #tpu.memory_space<vmem>>, vector<1152x128xbf16>
    %cst = arith.constant dense<0.000000e+00> : vector<128x128xf32>
    %2 = tpu.matmul %0, %1, %cst {dimension_numbers = #tpu.dot_dimension_numbers<[1], [0], [0], [1], [0, 0, 1, 1], [], []>} : vector<128x1152xbf16>, vector<1152x128xbf16>, vector<128x128xf32> -> vector<128x128xf32>
    %c0_3 = arith.constant 0 : index
    %c0_4 = arith.constant 0 : index
    %3 = vector.load %arg3[%c0_3, %c0_4] : memref<1x128xf32, #tpu.memory_space<vmem>>, vector<1x128xf32>
    %4 = vector.broadcast %3 : vector<1x128xf32> to vector<128x128xf32>
    %5 = arith.addf %2, %4 : vector<128x128xf32>
    %cst_5 = arith.constant 0.000000e+00 : f32
    %6 = vector.broadcast %cst_5 : f32 to vector<128x128xf32>
    %7 = arith.cmpf oge, %5, %6 : vector<128x128xf32>
    %cst_6 = arith.constant 0.00999999977 : f32
    %8 = vector.broadcast %cst_6 : f32 to vector<128x128xf32>
    %9 = arith.mulf %8, %5 : vector<128x128xf32>
    %10 = arith.select %7, %5, %9 : vector<128x128xi1>, vector<128x128xf32>
    %c0_7 = arith.constant 0 : index
    %c0_8 = arith.constant 0 : index
    %11 = vector.load %arg4[%c0_7, %c0_8] : memref<128x128xf32, #tpu.memory_space<vmem>>, vector<128x128xf32>
    tpu.vector_store %arg4[%c0_7, %c0_8], %10 {strides = array<i32>} : memref<128x128xf32, #tpu.memory_space<vmem>>, vector<128x128xf32>,
    return
  }
  func.func @transform_0(%arg0: i32) -> (i32, i32) {
    %c0_i32 = arith.constant 0 : i32
    %c0_i32_0 = arith.constant 0 : i32
    return %arg0, %c0_i32 : i32, i32
  }
  func.func @transform_1(%arg0: i32) -> (i32, i32) {
    %c0_i32 = arith.constant 0 : i32
    %c0_i32_0 = arith.constant 0 : i32
    %c0_i32_1 = arith.constant 0 : i32
    return %c0_i32, %c0_i32_0 : i32, i32
  }
  func.func @transform_2(%arg0: i32) -> (i32, i32) {
    %c0_i32 = arith.constant 0 : i32
    %c0_i32_0 = arith.constant 0 : i32
    %c0_i32_1 = arith.constant 0 : i32
    return %c0_i32, %c0_i32_0 : i32, i32
  }
  func.func @transform_3(%arg0: i32) -> (i32, i32) {
    %c0_i32 = arith.constant 0 : i32
    %c0_i32_0 = arith.constant 0 : i32
    return %arg0, %c0_i32 : i32, i32
  }
}

module attributes {stable_mosaic.version = 11 : i64} {
  func.func @_conv_gdn_skip_kernel(%arg0: i32, %arg1: memref<128x1152xbf16, #tpu.memory_space<vmem>>, %arg2: memref<128x128xbf16, #tpu.memory_space<vmem>>, %arg3: memref<1152x128xbf16, #tpu.memory_space<vmem>>, %arg4: memref<1x128xf32, #tpu.memory_space<vmem>>, %arg5: memref<128x128xbf16, #tpu.memory_space<vmem>>, %arg6: memref<1x128xf32, #tpu.memory_space<vmem>>, %arg7: memref<128x128xf32, #tpu.memory_space<vmem>>, %arg8: memref<1x128xf32, #tpu.memory_space<vmem>>, %arg9: memref<128x128xf32, #tpu.memory_space<vmem>>) attributes {dimension_semantics = [#tpu.dimension_semantics<parallel>], iteration_bounds = array<i64: 1>, scalar_prefetch = 0 : i64, scratch_operands = 0 : i64, tpu.core_type = #tpu.core_type<tc>, window_params = [{transform_indices = @transform_0, window_bounds = array<i64: 128, 1152>}, {transform_indices = @transform_1, window_bounds = array<i64: 128, 128>}, {pipeline_mode = #tpu.pipeline_mode<synchronous>, transform_indices = @transform_2, window_bounds = array<i64: 1152, 128>}, {pipeline_mode = #tpu.pipeline_mode<synchronous>, transform_indices = @transform_3, window_bounds = array<i64: 1, 128>}, {pipeline_mode = #tpu.pipeline_mode<synchronous>, transform_indices = @transform_4, window_bounds = array<i64: 128, 128>}, {pipeline_mode = #tpu.pipeline_mode<synchronous>, transform_indices = @transform_5, window_bounds = array<i64: 1, 128>}, {pipeline_mode = #tpu.pipeline_mode<synchronous>, transform_indices = @transform_6, window_bounds = array<i64: 128, 128>}, {pipeline_mode = #tpu.pipeline_mode<synchronous>, transform_indices = @transform_7, window_bounds = array<i64: 1, 128>}, {transform_indices = @transform_8, window_bounds = array<i64: 128, 128>}]} {
    %c0 = arith.constant 0 : index
    %c0_0 = arith.constant 0 : index
    %0 = vector.load %arg1[%c0, %c0_0] : memref<128x1152xbf16, #tpu.memory_space<vmem>>, vector<128x1152xbf16>
    %c0_1 = arith.constant 0 : index
    %c0_2 = arith.constant 0 : index
    %1 = vector.load %arg3[%c0_1, %c0_2] : memref<1152x128xbf16, #tpu.memory_space<vmem>>, vector<1152x128xbf16>
    %cst = arith.constant dense<0.000000e+00> : vector<128x128xf32>
    %2 = tpu.matmul %0, %1, %cst {dimension_numbers = #tpu.dot_dimension_numbers<[1], [0], [0], [1], [0, 0, 1, 1], [], []>} : vector<128x1152xbf16>, vector<1152x128xbf16>, vector<128x128xf32> -> vector<128x128xf32>
    %c0_3 = arith.constant 0 : index
    %c0_4 = arith.constant 0 : index
    %3 = vector.load %arg4[%c0_3, %c0_4] : memref<1x128xf32, #tpu.memory_space<vmem>>, vector<1x128xf32>
    %4 = vector.broadcast %3 : vector<1x128xf32> to vector<128x128xf32>
    %5 = arith.addf %2, %4 : vector<128x128xf32>
    %c0_5 = arith.constant 0 : index
    %c0_6 = arith.constant 0 : index
    %6 = vector.load %arg2[%c0_5, %c0_6] : memref<128x128xbf16, #tpu.memory_space<vmem>>, vector<128x128xbf16>
    %c0_7 = arith.constant 0 : index
    %c0_8 = arith.constant 0 : index
    %7 = vector.load %arg5[%c0_7, %c0_8] : memref<128x128xbf16, #tpu.memory_space<vmem>>, vector<128x128xbf16>
    %cst_9 = arith.constant dense<0.000000e+00> : vector<128x128xf32>
    %8 = tpu.matmul %6, %7, %cst_9 {dimension_numbers = #tpu.dot_dimension_numbers<[1], [0], [0], [1], [0, 0, 1, 1], [], []>} : vector<128x128xbf16>, vector<128x128xbf16>, vector<128x128xf32> -> vector<128x128xf32>
    %c0_10 = arith.constant 0 : index
    %c0_11 = arith.constant 0 : index
    %9 = vector.load %arg6[%c0_10, %c0_11] : memref<1x128xf32, #tpu.memory_space<vmem>>, vector<1x128xf32>
    %10 = vector.broadcast %9 : vector<1x128xf32> to vector<128x128xf32>
    %11 = arith.addf %8, %10 : vector<128x128xf32>
    %12 = arith.mulf %5, %5 : vector<128x128xf32>
    %c0_12 = arith.constant 0 : index
    %c0_13 = arith.constant 0 : index
    %13 = vector.load %arg7[%c0_12, %c0_13] : memref<128x128xf32, #tpu.memory_space<vmem>>, vector<128x128xf32>
    %cst_14 = arith.constant dense<0.000000e+00> : vector<128x128xf32>
    %14 = tpu.matmul %12, %13, %cst_14 {dimension_numbers = #tpu.dot_dimension_numbers<[1], [0], [0], [1], [0, 0, 1, 1], [], []>} : vector<128x128xf32>, vector<128x128xf32>, vector<128x128xf32> -> vector<128x128xf32>
    %c0_15 = arith.constant 0 : index
    %c0_16 = arith.constant 0 : index
    %15 = vector.load %arg8[%c0_15, %c0_16] : memref<1x128xf32, #tpu.memory_space<vmem>>, vector<1x128xf32>
    %16 = vector.broadcast %15 : vector<1x128xf32> to vector<128x128xf32>
    %17 = arith.addf %14, %16 : vector<128x128xf32>
    %18 = math.rsqrt %17 : vector<128x128xf32>
    %19 = arith.mulf %5, %18 : vector<128x128xf32>
    %20 = arith.addf %19, %11 : vector<128x128xf32>
    %c0_17 = arith.constant 0 : index
    %c0_18 = arith.constant 0 : index
    %21 = vector.load %arg9[%c0_17, %c0_18] : memref<128x128xf32, #tpu.memory_space<vmem>>, vector<128x128xf32>
    tpu.vector_store %arg9[%c0_17, %c0_18], %20 {strides = array<i32>} : memref<128x128xf32, #tpu.memory_space<vmem>>, vector<128x128xf32>,
    return
  }
  func.func @transform_0(%arg0: i32) -> (i32, i32) {
    %c0_i32 = arith.constant 0 : i32
    %c0_i32_0 = arith.constant 0 : i32
    return %arg0, %c0_i32 : i32, i32
  }
  func.func @transform_1(%arg0: i32) -> (i32, i32) {
    %c0_i32 = arith.constant 0 : i32
    %c0_i32_0 = arith.constant 0 : i32
    return %arg0, %c0_i32 : i32, i32
  }
  func.func @transform_2(%arg0: i32) -> (i32, i32) {
    %c0_i32 = arith.constant 0 : i32
    %c0_i32_0 = arith.constant 0 : i32
    %c0_i32_1 = arith.constant 0 : i32
    return %c0_i32, %c0_i32_0 : i32, i32
  }
  func.func @transform_3(%arg0: i32) -> (i32, i32) {
    %c0_i32 = arith.constant 0 : i32
    %c0_i32_0 = arith.constant 0 : i32
    %c0_i32_1 = arith.constant 0 : i32
    return %c0_i32, %c0_i32_0 : i32, i32
  }
  func.func @transform_4(%arg0: i32) -> (i32, i32) {
    %c0_i32 = arith.constant 0 : i32
    %c0_i32_0 = arith.constant 0 : i32
    %c0_i32_1 = arith.constant 0 : i32
    return %c0_i32, %c0_i32_0 : i32, i32
  }
  func.func @transform_5(%arg0: i32) -> (i32, i32) {
    %c0_i32 = arith.constant 0 : i32
    %c0_i32_0 = arith.constant 0 : i32
    %c0_i32_1 = arith.constant 0 : i32
    return %c0_i32, %c0_i32_0 : i32, i32
  }
  func.func @transform_6(%arg0: i32) -> (i32, i32) {
    %c0_i32 = arith.constant 0 : i32
    %c0_i32_0 = arith.constant 0 : i32
    %c0_i32_1 = arith.constant 0 : i32
    return %c0_i32, %c0_i32_0 : i32, i32
  }
  func.func @transform_7(%arg0: i32) -> (i32, i32) {
    %c0_i32 = arith.constant 0 : i32
    %c0_i32_0 = arith.constant 0 : i32
    %c0_i32_1 = arith.constant 0 : i32
    return %c0_i32, %c0_i32_0 : i32, i32
  }
  func.func @transform_8(%arg0: i32) -> (i32, i32) {
    %c0_i32 = arith.constant 0 : i32
    %c0_i32_0 = arith.constant 0 : i32
    return %arg0, %c0_i32 : i32, i32
  }
}

module attributes {stable_mosaic.version = 11 : i64} {
  func.func @_matmul_bias_kernel(%arg0: i32, %arg1: memref<32x1152xbf16, #tpu.memory_space<vmem>>, %arg2: memref<1152x128xbf16, #tpu.memory_space<vmem>>, %arg3: memref<1x128xf32, #tpu.memory_space<vmem>>, %arg4: memref<32x128xf32, #tpu.memory_space<vmem>>) attributes {dimension_semantics = [#tpu.dimension_semantics<parallel>], iteration_bounds = array<i64: 1>, scalar_prefetch = 0 : i64, scratch_operands = 0 : i64, tpu.core_type = #tpu.core_type<tc>, window_params = [{transform_indices = @transform_0, window_bounds = array<i64: 32, 1152>}, {pipeline_mode = #tpu.pipeline_mode<synchronous>, transform_indices = @transform_1, window_bounds = array<i64: 1152, 128>}, {pipeline_mode = #tpu.pipeline_mode<synchronous>, transform_indices = @transform_2, window_bounds = array<i64: 1, 128>}, {transform_indices = @transform_3, window_bounds = array<i64: 32, 128>}]} {
    %c0 = arith.constant 0 : index
    %c0_0 = arith.constant 0 : index
    %0 = vector.load %arg1[%c0, %c0_0] : memref<32x1152xbf16, #tpu.memory_space<vmem>>, vector<32x1152xbf16>
    %c0_1 = arith.constant 0 : index
    %c0_2 = arith.constant 0 : index
    %1 = vector.load %arg2[%c0_1, %c0_2] : memref<1152x128xbf16, #tpu.memory_space<vmem>>, vector<1152x128xbf16>
    %cst = arith.constant dense<0.000000e+00> : vector<32x128xf32>
    %2 = tpu.matmul %0, %1, %cst {dimension_numbers = #tpu.dot_dimension_numbers<[1], [0], [0], [1], [0, 0, 1, 1], [], []>} : vector<32x1152xbf16>, vector<1152x128xbf16>, vector<32x128xf32> -> vector<32x128xf32>
    %c0_3 = arith.constant 0 : index
    %c0_4 = arith.constant 0 : index
    %3 = vector.load %arg3[%c0_3, %c0_4] : memref<1x128xf32, #tpu.memory_space<vmem>>, vector<1x128xf32>
    %4 = vector.broadcast %3 : vector<1x128xf32> to vector<32x128xf32>
    %5 = arith.addf %2, %4 : vector<32x128xf32>
    %cst_5 = arith.constant 0.000000e+00 : f32
    %6 = vector.broadcast %cst_5 : f32 to vector<32x128xf32>
    %7 = arith.cmpf oge, %5, %6 : vector<32x128xf32>
    %cst_6 = arith.constant 0.00999999977 : f32
    %8 = vector.broadcast %cst_6 : f32 to vector<32x128xf32>
    %9 = arith.mulf %8, %5 : vector<32x128xf32>
    %10 = arith.select %7, %5, %9 : vector<32x128xi1>, vector<32x128xf32>
    %c0_7 = arith.constant 0 : index
    %c0_8 = arith.constant 0 : index
    %11 = vector.load %arg4[%c0_7, %c0_8] : memref<32x128xf32, #tpu.memory_space<vmem>>, vector<32x128xf32>
    tpu.vector_store %arg4[%c0_7, %c0_8], %10 {strides = array<i32>} : memref<32x128xf32, #tpu.memory_space<vmem>>, vector<32x128xf32>,
    return
  }
  func.func @transform_0(%arg0: i32) -> (i32, i32) {
    %c0_i32 = arith.constant 0 : i32
    %c0_i32_0 = arith.constant 0 : i32
    return %arg0, %c0_i32 : i32, i32
  }
  func.func @transform_1(%arg0: i32) -> (i32, i32) {
    %c0_i32 = arith.constant 0 : i32
    %c0_i32_0 = arith.constant 0 : i32
    %c0_i32_1 = arith.constant 0 : i32
    return %c0_i32, %c0_i32_0 : i32, i32
  }
  func.func @transform_2(%arg0: i32) -> (i32, i32) {
    %c0_i32 = arith.constant 0 : i32
    %c0_i32_0 = arith.constant 0 : i32
    %c0_i32_1 = arith.constant 0 : i32
    return %c0_i32, %c0_i32_0 : i32, i32
  }
  func.func @transform_3(%arg0: i32) -> (i32, i32) {
    %c0_i32 = arith.constant 0 : i32
    %c0_i32_0 = arith.constant 0 : i32
    return %arg0, %c0_i32 : i32, i32
  }
}

module attributes {stable_mosaic.version = 11 : i64} {
  func.func @_conv_gdn_skip_kernel(%arg0: i32, %arg1: memref<32x1152xbf16, #tpu.memory_space<vmem>>, %arg2: memref<32x128xbf16, #tpu.memory_space<vmem>>, %arg3: memref<1152x128xbf16, #tpu.memory_space<vmem>>, %arg4: memref<1x128xf32, #tpu.memory_space<vmem>>, %arg5: memref<128x128xbf16, #tpu.memory_space<vmem>>, %arg6: memref<1x128xf32, #tpu.memory_space<vmem>>, %arg7: memref<128x128xf32, #tpu.memory_space<vmem>>, %arg8: memref<1x128xf32, #tpu.memory_space<vmem>>, %arg9: memref<32x128xf32, #tpu.memory_space<vmem>>) attributes {dimension_semantics = [#tpu.dimension_semantics<parallel>], iteration_bounds = array<i64: 1>, scalar_prefetch = 0 : i64, scratch_operands = 0 : i64, tpu.core_type = #tpu.core_type<tc>, window_params = [{transform_indices = @transform_0, window_bounds = array<i64: 32, 1152>}, {transform_indices = @transform_1, window_bounds = array<i64: 32, 128>}, {pipeline_mode = #tpu.pipeline_mode<synchronous>, transform_indices = @transform_2, window_bounds = array<i64: 1152, 128>}, {pipeline_mode = #tpu.pipeline_mode<synchronous>, transform_indices = @transform_3, window_bounds = array<i64: 1, 128>}, {pipeline_mode = #tpu.pipeline_mode<synchronous>, transform_indices = @transform_4, window_bounds = array<i64: 128, 128>}, {pipeline_mode = #tpu.pipeline_mode<synchronous>, transform_indices = @transform_5, window_bounds = array<i64: 1, 128>}, {pipeline_mode = #tpu.pipeline_mode<synchronous>, transform_indices = @transform_6, window_bounds = array<i64: 128, 128>}, {pipeline_mode = #tpu.pipeline_mode<synchronous>, transform_indices = @transform_7, window_bounds = array<i64: 1, 128>}, {transform_indices = @transform_8, window_bounds = array<i64: 32, 128>}]} {
    %c0 = arith.constant 0 : index
    %c0_0 = arith.constant 0 : index
    %0 = vector.load %arg1[%c0, %c0_0] : memref<32x1152xbf16, #tpu.memory_space<vmem>>, vector<32x1152xbf16>
    %c0_1 = arith.constant 0 : index
    %c0_2 = arith.constant 0 : index
    %1 = vector.load %arg3[%c0_1, %c0_2] : memref<1152x128xbf16, #tpu.memory_space<vmem>>, vector<1152x128xbf16>
    %cst = arith.constant dense<0.000000e+00> : vector<32x128xf32>
    %2 = tpu.matmul %0, %1, %cst {dimension_numbers = #tpu.dot_dimension_numbers<[1], [0], [0], [1], [0, 0, 1, 1], [], []>} : vector<32x1152xbf16>, vector<1152x128xbf16>, vector<32x128xf32> -> vector<32x128xf32>
    %c0_3 = arith.constant 0 : index
    %c0_4 = arith.constant 0 : index
    %3 = vector.load %arg4[%c0_3, %c0_4] : memref<1x128xf32, #tpu.memory_space<vmem>>, vector<1x128xf32>
    %4 = vector.broadcast %3 : vector<1x128xf32> to vector<32x128xf32>
    %5 = arith.addf %2, %4 : vector<32x128xf32>
    %c0_5 = arith.constant 0 : index
    %c0_6 = arith.constant 0 : index
    %6 = vector.load %arg2[%c0_5, %c0_6] : memref<32x128xbf16, #tpu.memory_space<vmem>>, vector<32x128xbf16>
    %c0_7 = arith.constant 0 : index
    %c0_8 = arith.constant 0 : index
    %7 = vector.load %arg5[%c0_7, %c0_8] : memref<128x128xbf16, #tpu.memory_space<vmem>>, vector<128x128xbf16>
    %cst_9 = arith.constant dense<0.000000e+00> : vector<32x128xf32>
    %8 = tpu.matmul %6, %7, %cst_9 {dimension_numbers = #tpu.dot_dimension_numbers<[1], [0], [0], [1], [0, 0, 1, 1], [], []>} : vector<32x128xbf16>, vector<128x128xbf16>, vector<32x128xf32> -> vector<32x128xf32>
    %c0_10 = arith.constant 0 : index
    %c0_11 = arith.constant 0 : index
    %9 = vector.load %arg6[%c0_10, %c0_11] : memref<1x128xf32, #tpu.memory_space<vmem>>, vector<1x128xf32>
    %10 = vector.broadcast %9 : vector<1x128xf32> to vector<32x128xf32>
    %11 = arith.addf %8, %10 : vector<32x128xf32>
    %12 = arith.mulf %5, %5 : vector<32x128xf32>
    %c0_12 = arith.constant 0 : index
    %c0_13 = arith.constant 0 : index
    %13 = vector.load %arg7[%c0_12, %c0_13] : memref<128x128xf32, #tpu.memory_space<vmem>>, vector<128x128xf32>
    %cst_14 = arith.constant dense<0.000000e+00> : vector<32x128xf32>
    %14 = tpu.matmul %12, %13, %cst_14 {dimension_numbers = #tpu.dot_dimension_numbers<[1], [0], [0], [1], [0, 0, 1, 1], [], []>} : vector<32x128xf32>, vector<128x128xf32>, vector<32x128xf32> -> vector<32x128xf32>
    %c0_15 = arith.constant 0 : index
    %c0_16 = arith.constant 0 : index
    %15 = vector.load %arg8[%c0_15, %c0_16] : memref<1x128xf32, #tpu.memory_space<vmem>>, vector<1x128xf32>
    %16 = vector.broadcast %15 : vector<1x128xf32> to vector<32x128xf32>
    %17 = arith.addf %14, %16 : vector<32x128xf32>
    %18 = math.rsqrt %17 : vector<32x128xf32>
    %19 = arith.mulf %5, %18 : vector<32x128xf32>
    %20 = arith.addf %19, %11 : vector<32x128xf32>
    %c0_17 = arith.constant 0 : index
    %c0_18 = arith.constant 0 : index
    %21 = vector.load %arg9[%c0_17, %c0_18] : memref<32x128xf32, #tpu.memory_space<vmem>>, vector<32x128xf32>
    tpu.vector_store %arg9[%c0_17, %c0_18], %20 {strides = array<i32>} : memref<32x128xf32, #tpu.memory_space<vmem>>, vector<32x128xf32>,
    return
  }
  func.func @transform_0(%arg0: i32) -> (i32, i32) {
    %c0_i32 = arith.constant 0 : i32
    %c0_i32_0 = arith.constant 0 : i32
    return %arg0, %c0_i32 : i32, i32
  }
  func.func @transform_1(%arg0: i32) -> (i32, i32) {
    %c0_i32 = arith.constant 0 : i32
    %c0_i32_0 = arith.constant 0 : i32
    return %arg0, %c0_i32 : i32, i32
  }
  func.func @transform_2(%arg0: i32) -> (i32, i32) {
    %c0_i32 = arith.constant 0 : i32
    %c0_i32_0 = arith.constant 0 : i32
    %c0_i32_1 = arith.constant 0 : i32
    return %c0_i32, %c0_i32_0 : i32, i32
  }
  func.func @transform_3(%arg0: i32) -> (i32, i32) {
    %c0_i32 = arith.constant 0 : i32
    %c0_i32_0 = arith.constant 0 : i32
    %c0_i32_1 = arith.constant 0 : i32
    return %c0_i32, %c0_i32_0 : i32, i32
  }
  func.func @transform_4(%arg0: i32) -> (i32, i32) {
    %c0_i32 = arith.constant 0 : i32
    %c0_i32_0 = arith.constant 0 : i32
    %c0_i32_1 = arith.constant 0 : i32
    return %c0_i32, %c0_i32_0 : i32, i32
  }
  func.func @transform_5(%arg0: i32) -> (i32, i32) {
    %c0_i32 = arith.constant 0 : i32
    %c0_i32_0 = arith.constant 0 : i32
    %c0_i32_1 = arith.constant 0 : i32
    return %c0_i32, %c0_i32_0 : i32, i32
  }
  func.func @transform_6(%arg0: i32) -> (i32, i32) {
    %c0_i32 = arith.constant 0 : i32
    %c0_i32_0 = arith.constant 0 : i32
    %c0_i32_1 = arith.constant 0 : i32
    return %c0_i32, %c0_i32_0 : i32, i32
  }
  func.func @transform_7(%arg0: i32) -> (i32, i32) {
    %c0_i32 = arith.constant 0 : i32
    %c0_i32_0 = arith.constant 0 : i32
    %c0_i32_1 = arith.constant 0 : i32
    return %c0_i32, %c0_i32_0 : i32, i32
  }
  func.func @transform_8(%arg0: i32) -> (i32, i32) {
    %c0_i32 = arith.constant 0 : i32
    %c0_i32_0 = arith.constant 0 : i32
    return %arg0, %c0_i32 : i32, i32
  }
}

module attributes {stable_mosaic.version = 11 : i64} {
  func.func @_matmul_bias_kernel(%arg0: i32, %arg1: memref<8x1152xbf16, #tpu.memory_space<vmem>>, %arg2: memref<1152x128xbf16, #tpu.memory_space<vmem>>, %arg3: memref<1x128xf32, #tpu.memory_space<vmem>>, %arg4: memref<8x128xf32, #tpu.memory_space<vmem>>) attributes {dimension_semantics = [#tpu.dimension_semantics<parallel>], iteration_bounds = array<i64: 1>, scalar_prefetch = 0 : i64, scratch_operands = 0 : i64, tpu.core_type = #tpu.core_type<tc>, window_params = [{transform_indices = @transform_0, window_bounds = array<i64: 8, 1152>}, {pipeline_mode = #tpu.pipeline_mode<synchronous>, transform_indices = @transform_1, window_bounds = array<i64: 1152, 128>}, {pipeline_mode = #tpu.pipeline_mode<synchronous>, transform_indices = @transform_2, window_bounds = array<i64: 1, 128>}, {transform_indices = @transform_3, window_bounds = array<i64: 8, 128>}]} {
    %c0 = arith.constant 0 : index
    %c0_0 = arith.constant 0 : index
    %0 = vector.load %arg1[%c0, %c0_0] : memref<8x1152xbf16, #tpu.memory_space<vmem>>, vector<8x1152xbf16>
    %c0_1 = arith.constant 0 : index
    %c0_2 = arith.constant 0 : index
    %1 = vector.load %arg2[%c0_1, %c0_2] : memref<1152x128xbf16, #tpu.memory_space<vmem>>, vector<1152x128xbf16>
    %cst = arith.constant dense<0.000000e+00> : vector<8x128xf32>
    %2 = tpu.matmul %0, %1, %cst {dimension_numbers = #tpu.dot_dimension_numbers<[1], [0], [0], [1], [0, 0, 1, 1], [], []>} : vector<8x1152xbf16>, vector<1152x128xbf16>, vector<8x128xf32> -> vector<8x128xf32>
    %c0_3 = arith.constant 0 : index
    %c0_4 = arith.constant 0 : index
    %3 = vector.load %arg3[%c0_3, %c0_4] : memref<1x128xf32, #tpu.memory_space<vmem>>, vector<1x128xf32>
    %4 = vector.broadcast %3 : vector<1x128xf32> to vector<8x128xf32>
    %5 = arith.addf %2, %4 : vector<8x128xf32>
    %c0_5 = arith.constant 0 : index
    %c0_6 = arith.constant 0 : index
    %6 = vector.load %arg4[%c0_5, %c0_6] : memref<8x128xf32, #tpu.memory_space<vmem>>, vector<8x128xf32>
    tpu.vector_store %arg4[%c0_5, %c0_6], %5 {strides = array<i32>} : memref<8x128xf32, #tpu.memory_space<vmem>>, vector<8x128xf32>,
    return
  }
  func.func @transform_0(%arg0: i32) -> (i32, i32) {
    %c0_i32 = arith.constant 0 : i32
    %c0_i32_0 = arith.constant 0 : i32
    return %arg0, %c0_i32 : i32, i32
  }
  func.func @transform_1(%arg0: i32) -> (i32, i32) {
    %c0_i32 = arith.constant 0 : i32
    %c0_i32_0 = arith.constant 0 : i32
    %c0_i32_1 = arith.constant 0 : i32
    return %c0_i32, %c0_i32_0 : i32, i32
  }
  func.func @transform_2(%arg0: i32) -> (i32, i32) {
    %c0_i32 = arith.constant 0 : i32
    %c0_i32_0 = arith.constant 0 : i32
    %c0_i32_1 = arith.constant 0 : i32
    return %c0_i32, %c0_i32_0 : i32, i32
  }
  func.func @transform_3(%arg0: i32) -> (i32, i32) {
    %c0_i32 = arith.constant 0 : i32
    %c0_i32_0 = arith.constant 0 : i32
    return %arg0, %c0_i32 : i32, i32
  }
}

</mosaic_0001>

<bundles_post_ra>
// kernel: reference_encoder_pallas.7
= control target key start
LH: loop header
LB: loop body
LE: loop exit
PB: predicated region body
PF: predicated region fallthrough
CT: control target
= control target key end

     0   :  { %vm262_vm0 = vcmask 261120   ;;  %s1530_s1 = inlined_call_operand.vmem [shape: bf16[32,128], index: 1, kind: input, shape index: {}]   ;;  %s1531_s0 = inlined_call_operand.vmem [shape: bf16[512,32], index: 0, kind: input, shape index: {}]   ;;  %s1532_s2 = inlined_call_operand.vmem [shape: f32[1,128], index: 2, kind: input, shape index: {}]   ;;  %s1533_s3 = inlined_call_operand.vmem [shape: f32[512,128], index: 3, kind: output, shape index: {}]  }
   0x1   :  { %v1081_v0 = vld [vmem:[%s1530_s1 + $0x8] sm:$0xff]   ;;  %v1082_v1 = vld [vmem:[%s1530_s1] sm:$0xff]   ;;  %v1087_v6 = vld [vmem:[%s1531_s0 + $0x10] sm:$0xff]  }
   0x2   :  { %1009 = vmatprep.subr.bf16.mxu0 %v1081_v0  ;;  %1077 = vmatprep.subr.bf16.mxu1 %v1081_v0  ;;  %v1083_v2 = vld [vmem:[%s1531_s0] sm:$0xff]   ;;  %v1085_v4 = vld [vmem:[%s1531_s0 + $0x8] sm:$0xff]   ;;  %v1088_v7 = vld [vmem:[%s1531_s0 + $0x90] sm:$0xff]  }
   0x3   :  { %1010 = vmatpush3.bf16.msra.mxu0 %v1081_v0  ;;  %1079 = vmatpush3.bf16.msra.mxu1 %v1081_v0  ;;  %v1084_v3 = vld [vmem:[%s1531_s0 + $0x80] sm:$0xff]   ;;  %v1086_v5 = vld [vmem:[%s1531_s0 + $0x88] sm:$0xff]   ;;  %v1089_v8 = vld [vmem:[%s1531_s0 + $0x18] sm:$0xff]  }
   0x4   :  { %1011 = vmatprep.subr.bf16.mxu0 %v1082_v1  ;;  %1078 = vmatprep.subr.bf16.mxu1 %v1082_v1  ;;  %v1090_v9 = vld [vmem:[%s1531_s0 + $0x98] sm:$0xff]   ;;  %v1091_v10 = vld [vmem:[%s1531_s0 + $0x20] sm:$0xff]   ;;  %v1093_v12 = vld [vmem:[%s1531_s0 + $0x28] sm:$0xff]  }
   0x5   :  { %1013 = vmatprep.mubr.msk.bf16.mxu0 %vm262_vm0, %v1083_v2  ;;  %1045 = vmatprep.mubr.msk.bf16.mxu1 %vm262_vm0, %v1084_v3  ;;  %v1092_v11 = vld [vmem:[%s1531_s0 + $0xa0] sm:$0xff]   ;;  %v1094_v13 = vld [vmem:[%s1531_s0 + $0xa8] sm:$0xff]   ;;  %v1095_v14 = vld [vmem:[%s1531_s0 + $0x30] sm:$0xff]  }
   0x6   :  { %v1096_v15 = vld [vmem:[%s1531_s0 + $0xb0] sm:$0xff]   ;;  %v1097_v16 = vld [vmem:[%s1531_s0 + $0x38] sm:$0xff]   ;;  %v1099_v18 = vld [vmem:[%s1531_s0 + $0x40] sm:$0xff]  }
   0x7   :  { %1012 = vmatpush3.bf16.msra.mxu0 %v1082_v1  ;;  %1080 = vmatpush3.bf16.msra.mxu1 %v1082_v1  ;;  %v1098_v17 = vld [vmem:[%s1531_s0 + $0xb8] sm:$0xff]   ;;  %v1100_v19 = vld [vmem:[%s1531_s0 + $0xc0] sm:$0xff]   ;;  %v1101_v20 = vld [vmem:[%s1531_s0 + $0x48] sm:$0xff]  }
   0x8   :  { %v1102_v21 = vld [vmem:[%s1531_s0 + $0xc8] sm:$0xff]   ;;  %v1103_v22 = vld [vmem:[%s1531_s0 + $0x50] sm:$0xff]   ;;  %v1105_v24 = vld [vmem:[%s1531_s0 + $0x58] sm:$0xff]  }
   0x9   :  { %v1104_v23 = vld [vmem:[%s1531_s0 + $0xd0] sm:$0xff]   ;;  %v1106_v25 = vld [vmem:[%s1531_s0 + $0xd8] sm:$0xff]   ;;  %v1107_v26 = vld [vmem:[%s1531_s0 + $0x60] sm:$0xff]  }
   0xa   :  { %1014 = vmatmul.mubr.msk.bf16.vlgmr.msra.gmra.mxu0 %vm262_vm0, %v1085_v4  ;;  %1046 = vmatmul.mubr.msk.bf16.vlgmr.msra.gmra.mxu1 %vm262_vm0, %v1086_v5  ;;  %v1108_v27 = vld [vmem:[%s1531_s0 + $0xe0] sm:$0xff]   ;;  %v1109_v28 = vld [vmem:[%s1531_s0 + $0x68] sm:$0xff]   ;;  %v1111_v30 = vld [vmem:[%s1531_s0 + $0x70] sm:$0xff]  }
   0xb   :  { %1017 = vmatprep.mubr.msk.bf16.mxu0 %vm262_vm0, %v1087_v6  ;;  %1049 = vmatprep.mubr.msk.bf16.mxu1 %vm262_vm0, %v1088_v7  ;;  %v1110_v29 = vld [vmem:[%s1531_s0 + $0xe8] sm:$0xff]   ;;  %v1112_v31 = vld [vmem:[%s1531_s0 + $0xf0] sm:$0xff]   ;;  %v1113_v32 = vld [vmem:[%s1531_s0 + $0x78] sm:$0xff]  }
   0xc   :  { %v1114_v33 = vld [vmem:[%s1531_s0 + $0xf8] sm:$0xff]   ;;  %v1272_v34 = vld [vmem:[%s1532_s2] ss:$0 sm:$0xff] }
  0x12   :  { %1018 = vmatmul.mubr.msk.bf16.gmra.mxu0 %vm262_vm0, %v1089_v8  ;;  %1050 = vmatmul.mubr.msk.bf16.gmra.mxu1 %vm262_vm0, %v1090_v9 }
  0x13   :  { %1021 = vmatprep.mubr.msk.bf16.mxu0 %vm262_vm0, %v1091_v10  ;;  %1053 = vmatprep.mubr.msk.bf16.mxu1 %vm262_vm0, %v1092_v11 }
  0x1a   :  { %1022 = vmatmul.mubr.msk.bf16.gmra.mxu0 %vm262_vm0, %v1093_v12  ;;  %1054 = vmatmul.mubr.msk.bf16.gmra.mxu1 %vm262_vm0, %v1094_v13 }
  0x1b   :  { %1025 = vmatprep.mubr.msk.bf16.mxu0 %vm262_vm0, %v1095_v14  ;;  %1057 = vmatprep.mubr.msk.bf16.mxu1 %vm262_vm0, %v1096_v15 }
  0x22   :  { %1026 = vmatmul.mubr.msk.bf16.gmra.mxu0 %vm262_vm0, %v1097_v16  ;;  %1058 = vmatmul.mubr.msk.bf16.gmra.mxu1 %vm262_vm0, %v1098_v17 }
  0x23   :  { %1029 = vmatprep.mubr.msk.bf16.mxu0 %vm262_vm0, %v1099_v18  ;;  %1061 = vmatprep.mubr.msk.bf16.mxu1 %vm262_vm0, %v1100_v19 }
  0x2a   :  { %1030 = vmatmul.mubr.msk.bf16.gmra.mxu0 %vm262_vm0, %v1101_v20  ;;  %1062 = vmatmul.mubr.msk.bf16.gmra.mxu1 %vm262_vm0, %v1102_v21 }
  0x2b   :  { %1033 = vmatprep.mubr.msk.bf16.mxu0 %vm262_vm0, %v1103_v22  ;;  %1065 = vmatprep.mubr.msk.bf16.mxu1 %vm262_vm0, %v1104_v23 }
  0x32   :  { %1034 = vmatmul.mubr.msk.bf16.gmra.mxu0 %vm262_vm0, %v1105_v24  ;;  %1066 = vmatmul.mubr.msk.bf16.gmra.mxu1 %vm262_vm0, %v1106_v25 }
  0x33   :  { %1037 = vmatprep.mubr.msk.bf16.mxu0 %vm262_vm0, %v1107_v26  ;;  %1069 = vmatprep.mubr.msk.bf16.mxu1 %vm262_vm0, %v1108_v27 }
  0x3a   :  { %1038 = vmatmul.mubr.msk.bf16.gmra.mxu0 %vm262_vm0, %v1109_v28  ;;  %1070 = vmatmul.mubr.msk.bf16.gmra.mxu1 %vm262_vm0, %v1110_v29 }
  0x3b   :  { %1041 = vmatprep.mubr.msk.bf16.mxu0 %vm262_vm0, %v1111_v30  ;;  %1073 = vmatprep.mubr.msk.bf16.mxu1 %vm262_vm0, %v1112_v31 }
  0x42   :  { %1042 = vmatmul.mubr.msk.bf16.gmra.mxu0 %vm262_vm0, %v1113_v32  ;;  %1074 = vmatmul.mubr.msk.bf16.gmra.mxu1 %vm262_vm0, %v1114_v33 }
  0xca   :  { %v1015_v35 = vpop.f32.mrf.mxu0  ;;  %v1047_v36 = vpop.f32.mrf.mxu1 }
  0xcb   :  { %v402_v37 = vadd.f32 %v1015_v35, %v1272_v34  ;;  %v530_v38 = vadd.f32 %v1047_v36, %v1272_v34 }
  0xcc   :  { %v393_v39 = vpop.f32.mrf.mxu0  ;;  %v521_v40 = vpop.f32.mrf.mxu1 }
  0xcd   :  { %vm650_vm1 = vcmp.ge.f32.partialorder %v402_v37, 0.0  ;;  %v714_v41 = vmul.f32 0.01, %v402_v37  ;;  %vm682_vm2 = vcmp.ge.f32.partialorder %v530_v38, 0.0  ;;  %v746_v42 = vmul.f32 0.01, %v530_v38 }
  0xce   :  { %v394_v43 = vadd.f32 %v1272_v34, %v393_v39  ;;  %v522_v44 = vadd.f32 %v1272_v34, %v521_v40  ;;  %v1016_v45 = vpop.f32.mrf.mxu0  ;;  %v1048_v46 = vpop.f32.mrf.mxu1 }
  0xcf   :  { %v778_v47 = vsel %vm650_vm1, %v402_v37, %v714_v41  ;;  %v810_v48 = vsel %vm682_vm2, %v530_v38, %v746_v42  ;;  %v405_v49 = vadd.f32 %v1016_v45, %v1272_v34  ;;  %v533_v50 = vadd.f32 %v1048_v46, %v1272_v34 }
  0xd0   :  { %842 = vst [vmem:[%s1533_s3 + $0x10] sm:$0xff] %v778_v47  ;;  %874 = vst [vmem:[%s1533_s3 + $0x110] sm:$0xff] %v810_v48  ;;  %vm648_vm3 = vcmp.ge.f32.partialorder %v394_v43, 0.0  ;;  %v712_v51 = vmul.f32 0.01, %v394_v43  ;;  %vm680_vm4 = vcmp.ge.f32.partialorder %v522_v44, 0.0  ;;  %v396_v53 = vpop.f32.mrf.mxu0  ;;  %v524_v54 = vpop.f32.mrf.mxu1 }
  0xd1   :  { %v744_v52 = vmul.f32 0.01, %v522_v44  ;;  %vm651_vm5 = vcmp.ge.f32.partialorder %v405_v49, 0.0  ;;  %v715_v55 = vmul.f32 0.01, %v405_v49  ;;  %vm683_vm6 = vcmp.ge.f32.partialorder %v533_v50, 0.0 }
  0xd2   :  { %v747_v56 = vmul.f32 0.01, %v533_v50  ;;  %v776_v57 = vsel %vm648_vm3, %v394_v43, %v712_v51  ;;  %v397_v59 = vadd.f32 %v1272_v34, %v396_v53  ;;  %v525_v60 = vadd.f32 %v1272_v34, %v524_v54  ;;  %v1019_v61 = vpop.f32.mrf.mxu0  ;;  %v1051_v62 = vpop.f32.mrf.mxu1 }
  0xd3   :  { %v808_v58 = vsel %vm680_vm4, %v522_v44, %v744_v52  ;;  %840 = vst [vmem:[%s1533_s3] sm:$0xff] %v776_v57  ;;  %v779_v63 = vsel %vm651_vm5, %v405_v49, %v715_v55  ;;  %v418_v1 = vadd.f32 %v1019_v61, %v1272_v34  ;;  %v546_v2 = vadd.f32 %v1051_v62, %v1272_v34 }
  0xd4   :  { %872 = vst [vmem:[%s1533_s3 + $0x100] sm:$0xff] %v808_v58  ;;  %v811_v0 = vsel %vm683_vm6, %v533_v50, %v747_v56  ;;  %843 = vst [vmem:[%s1533_s3 + $0x18] sm:$0xff] %v779_v63  ;;  %vm649_vm7 = vcmp.ge.f32.partialorder %v397_v59, 0.0  ;;  %v713_v3 = vmul.f32 0.01, %v397_v59  ;;  %vm681_vm8 = vcmp.ge.f32.partialorder %v525_v60, 0.0  ;;  %v409_v5 = vpop.f32.mrf.mxu0  ;;  %v537_v6 = vpop.f32.mrf.mxu1 }
  0xd5   :  { %875 = vst [vmem:[%s1533_s3 + $0x118] sm:$0xff] %v811_v0  ;;  %v745_v4 = vmul.f32 0.01, %v525_v60  ;;  %vm654_vm9 = vcmp.ge.f32.partialorder %v418_v1, 0.0  ;;  %v718_v7 = vmul.f32 0.01, %v418_v1  ;;  %v410_v11 = vadd.f32 %v1272_v34, %v409_v5 }
  0xd6   :  { %vm686_vm10 = vcmp.ge.f32.partialorder %v546_v2, 0.0  ;;  %v750_v8 = vmul.f32 0.01, %v546_v2  ;;  %v777_v9 = vsel %vm649_vm7, %v397_v59, %v713_v3  ;;  %v538_v12 = vadd.f32 %v1272_v34, %v537_v6  ;;  %v1020_v13 = vpop.f32.mrf.mxu0  ;;  %v1052_v14 = vpop.f32.mrf.mxu1 }
  0xd7   :  { %v809_v10 = vsel %vm681_vm8, %v525_v60, %v745_v4  ;;  %841 = vst [vmem:[%s1533_s3 + $0x8] sm:$0xff] %v777_v9  ;;  %v782_v15 = vsel %vm654_vm9, %v418_v1, %v718_v7  ;;  %v421_v17 = vadd.f32 %v1020_v13, %v1272_v34  ;;  %v549_v18 = vadd.f32 %v1052_v14, %v1272_v34 }
  0xd8   :  { %873 = vst [vmem:[%s1533_s3 + $0x108] sm:$0xff] %v809_v10  ;;  %v814_v16 = vsel %vm686_vm10, %v546_v2, %v750_v8  ;;  %846 = vst [vmem:[%s1533_s3 + $0x30] sm:$0xff] %v782_v15  ;;  %vm652_vm11 = vcmp.ge.f32.partialorder %v410_v11, 0.0  ;;  %v716_v19 = vmul.f32 0.01, %v410_v11  ;;  %vm684_vm12 = vcmp.ge.f32.partialorder %v538_v12, 0.0  ;;  %v412_v21 = vpop.f32.mrf.mxu0  ;;  %v540_v22 = vpop.f32.mrf.mxu1 }
  0xd9   :  { %878 = vst [vmem:[%s1533_s3 + $0x130] sm:$0xff] %v814_v16  ;;  %v748_v20 = vmul.f32 0.01, %v538_v12  ;;  %vm655_vm13 = vcmp.ge.f32.partialorder %v421_v17, 0.0  ;;  %v719_v23 = vmul.f32 0.01, %v421_v17  ;;  %v413_v27 = vadd.f32 %v1272_v34, %v412_v21 }
  0xda   :  { %vm687_vm14 = vcmp.ge.f32.partialorder %v549_v18, 0.0  ;;  %v751_v24 = vmul.f32 0.01, %v549_v18  ;;  %v780_v25 = vsel %vm652_vm11, %v410_v11, %v716_v19  ;;  %v541_v28 = vadd.f32 %v1272_v34, %v540_v22  ;;  %v1023_v29 = vpop.f32.mrf.mxu0  ;;  %v1055_v30 = vpop.f32.mrf.mxu1 }
  0xdb   :  { %v812_v26 = vsel %vm684_vm12, %v538_v12, %v748_v20  ;;  %844 = vst [vmem:[%s1533_s3 + $0x20] sm:$0xff] %v780_v25  ;;  %v783_v31 = vsel %vm655_vm13, %v421_v17, %v719_v23  ;;  %v434_v33 = vadd.f32 %v1023_v29, %v1272_v34  ;;  %v562_v35 = vadd.f32 %v1055_v30, %v1272_v34 }
  0xdc   :  { %876 = vst [vmem:[%s1533_s3 + $0x120] sm:$0xff] %v812_v26  ;;  %v815_v32 = vsel %vm687_vm14, %v549_v18, %v751_v24  ;;  %847 = vst [vmem:[%s1533_s3 + $0x38] sm:$0xff] %v783_v31  ;;  %vm653_vm15 = vcmp.ge.f32.partialorder %v413_v27, 0.0  ;;  %v717_v36 = vmul.f32 0.01, %v413_v27  ;;  %vm685_vm0 = vcmp.ge.f32.partialorder %v541_v28, 0.0  ;;  %v425_v38 = vpop.f32.mrf.mxu0  ;;  %v553_v39 = vpop.f32.mrf.mxu1 }
  0xdd   :  { %879 = vst [vmem:[%s1533_s3 + $0x138] sm:$0xff] %v815_v32  ;;  %v749_v37 = vmul.f32 0.01, %v541_v28  ;;  %vm658_vm1 = vcmp.ge.f32.partialorder %v434_v33, 0.0  ;;  %v722_v40 = vmul.f32 0.01, %v434_v33  ;;  %v426_v44 = vadd.f32 %v1272_v34, %v425_v38 }
  0xde   :  { %vm690_vm2 = vcmp.ge.f32.partialorder %v562_v35, 0.0  ;;  %v754_v41 = vmul.f32 0.01, %v562_v35  ;;  %v781_v42 = vsel %vm653_vm15, %v413_v27, %v717_v36  ;;  %v554_v45 = vadd.f32 %v1272_v34, %v553_v39  ;;  %v1024_v46 = vpop.f32.mrf.mxu0  ;;  %v1056_v47 = vpop.f32.mrf.mxu1 }
  0xdf   :  { %v813_v43 = vsel %vm685_vm0, %v541_v28, %v749_v37  ;;  %845 = vst [vmem:[%s1533_s3 + $0x28] sm:$0xff] %v781_v42  ;;  %v786_v48 = vsel %vm658_vm1, %v434_v33, %v722_v40  ;;  %v437_v50 = vadd.f32 %v1024_v46, %v1272_v34  ;;  %v565_v51 = vadd.f32 %v1056_v47, %v1272_v34 }
  0xe0   :  { %877 = vst [vmem:[%s1533_s3 + $0x128] sm:$0xff] %v813_v43  ;;  %v818_v49 = vsel %vm690_vm2, %v562_v35, %v754_v41  ;;  %850 = vst [vmem:[%s1533_s3 + $0x50] sm:$0xff] %v786_v48  ;;  %vm656_vm3 = vcmp.ge.f32.partialorder %v426_v44, 0.0  ;;  %v720_v52 = vmul.f32 0.01, %v426_v44  ;;  %vm688_vm4 = vcmp.ge.f32.partialorder %v554_v45, 0.0  ;;  %v428_v54 = vpop.f32.mrf.mxu0  ;;  %v556_v55 = vpop.f32.mrf.mxu1 }
  0xe1   :  { %882 = vst [vmem:[%s1533_s3 + $0x150] sm:$0xff] %v818_v49  ;;  %v752_v53 = vmul.f32 0.01, %v554_v45  ;;  %vm659_vm5 = vcmp.ge.f32.partialorder %v437_v50, 0.0  ;;  %v723_v56 = vmul.f32 0.01, %v437_v50  ;;  %v429_v60 = vadd.f32 %v1272_v34, %v428_v54 }
  0xe2   :  { %vm691_vm6 = vcmp.ge.f32.partialorder %v565_v51, 0.0  ;;  %v755_v57 = vmul.f32 0.01, %v565_v51  ;;  %v784_v58 = vsel %vm656_vm3, %v426_v44, %v720_v52  ;;  %v557_v61 = vadd.f32 %v1272_v34, %v556_v55  ;;  %v1027_v62 = vpop.f32.mrf.mxu0  ;;  %v1059_v63 = vpop.f32.mrf.mxu1 }
  0xe3   :  { %v816_v59 = vsel %vm688_vm4, %v554_v45, %v752_v53  ;;  %848 = vst [vmem:[%s1533_s3 + $0x40] sm:$0xff] %v784_v58  ;;  %v787_v0 = vsel %vm659_vm5, %v437_v50, %v723_v56  ;;  %v450_v2 = vadd.f32 %v1027_v62, %v1272_v34  ;;  %v578_v3 = vadd.f32 %v1059_v63, %v1272_v34 }
  0xe4   :  { %880 = vst [vmem:[%s1533_s3 + $0x140] sm:$0xff] %v816_v59  ;;  %v819_v1 = vsel %vm691_vm6, %v565_v51, %v755_v57  ;;  %851 = vst [vmem:[%s1533_s3 + $0x58] sm:$0xff] %v787_v0  ;;  %vm657_vm7 = vcmp.ge.f32.partialorder %v429_v60, 0.0  ;;  %v721_v4 = vmul.f32 0.01, %v429_v60  ;;  %vm689_vm8 = vcmp.ge.f32.partialorder %v557_v61, 0.0  ;;  %v441_v6 = vpop.f32.mrf.mxu0  ;;  %v569_v7 = vpop.f32.mrf.mxu1 }
  0xe5   :  { %883 = vst [vmem:[%s1533_s3 + $0x158] sm:$0xff] %v819_v1  ;;  %v753_v5 = vmul.f32 0.01, %v557_v61  ;;  %vm662_vm9 = vcmp.ge.f32.partialorder %v450_v2, 0.0  ;;  %v726_v8 = vmul.f32 0.01, %v450_v2  ;;  %v442_v12 = vadd.f32 %v1272_v34, %v441_v6 }
  0xe6   :  { %vm694_vm10 = vcmp.ge.f32.partialorder %v578_v3, 0.0  ;;  %v758_v9 = vmul.f32 0.01, %v578_v3  ;;  %v785_v10 = vsel %vm657_vm7, %v429_v60, %v721_v4  ;;  %v570_v13 = vadd.f32 %v1272_v34, %v569_v7  ;;  %v1028_v14 = vpop.f32.mrf.mxu0  ;;  %v1060_v15 = vpop.f32.mrf.mxu1 }
  0xe7   :  { %v817_v11 = vsel %vm689_vm8, %v557_v61, %v753_v5  ;;  %849 = vst [vmem:[%s1533_s3 + $0x48] sm:$0xff] %v785_v10  ;;  %v790_v16 = vsel %vm662_vm9, %v450_v2, %v726_v8  ;;  %v453_v18 = vadd.f32 %v1028_v14, %v1272_v34  ;;  %v581_v19 = vadd.f32 %v1060_v15, %v1272_v34 }
  0xe8   :  { %881 = vst [vmem:[%s1533_s3 + $0x148] sm:$0xff] %v817_v11  ;;  %v822_v17 = vsel %vm694_vm10, %v578_v3, %v758_v9  ;;  %854 = vst [vmem:[%s1533_s3 + $0x70] sm:$0xff] %v790_v16  ;;  %vm660_vm11 = vcmp.ge.f32.partialorder %v442_v12, 0.0  ;;  %v724_v20 = vmul.f32 0.01, %v442_v12  ;;  %vm692_vm12 = vcmp.ge.f32.partialorder %v570_v13, 0.0  ;;  %v444_v22 = vpop.f32.mrf.mxu0  ;;  %v572_v23 = vpop.f32.mrf.mxu1 }
  0xe9   :  { %886 = vst [vmem:[%s1533_s3 + $0x170] sm:$0xff] %v822_v17  ;;  %v756_v21 = vmul.f32 0.01, %v570_v13  ;;  %vm663_vm13 = vcmp.ge.f32.partialorder %v453_v18, 0.0  ;;  %v727_v24 = vmul.f32 0.01, %v453_v18  ;;  %v445_v28 = vadd.f32 %v1272_v34, %v444_v22 }
  0xea   :  { %vm695_vm14 = vcmp.ge.f32.partialorder %v581_v19, 0.0  ;;  %v759_v25 = vmul.f32 0.01, %v581_v19  ;;  %v788_v26 = vsel %vm660_vm11, %v442_v12, %v724_v20  ;;  %v573_v29 = vadd.f32 %v1272_v34, %v572_v23  ;;  %v1031_v30 = vpop.f32.mrf.mxu0  ;;  %v1063_v31 = vpop.f32.mrf.mxu1 }
  0xeb   :  { %v820_v27 = vsel %vm692_vm12, %v570_v13, %v756_v21  ;;  %852 = vst [vmem:[%s1533_s3 + $0x60] sm:$0xff] %v788_v26  ;;  %v791_v32 = vsel %vm663_vm13, %v453_v18, %v727_v24  ;;  %v466_v35 = vadd.f32 %v1031_v30, %v1272_v34  ;;  %v594_v36 = vadd.f32 %v1063_v31, %v1272_v34 }
  0xec   :  { %884 = vst [vmem:[%s1533_s3 + $0x160] sm:$0xff] %v820_v27  ;;  %v823_v33 = vsel %vm695_vm14, %v581_v19, %v759_v25  ;;  %855 = vst [vmem:[%s1533_s3 + $0x78] sm:$0xff] %v791_v32  ;;  %vm661_vm15 = vcmp.ge.f32.partialorder %v445_v28, 0.0  ;;  %v725_v37 = vmul.f32 0.01, %v445_v28  ;;  %vm693_vm0 = vcmp.ge.f32.partialorder %v573_v29, 0.0  ;;  %v457_v39 = vpop.f32.mrf.mxu0  ;;  %v585_v40 = vpop.f32.mrf.mxu1 }
  0xed   :  { %887 = vst [vmem:[%s1533_s3 + $0x178] sm:$0xff] %v823_v33  ;;  %v757_v38 = vmul.f32 0.01, %v573_v29  ;;  %vm666_vm1 = vcmp.ge.f32.partialorder %v466_v35, 0.0  ;;  %v730_v41 = vmul.f32 0.01, %v466_v35  ;;  %v458_v45 = vadd.f32 %v1272_v34, %v457_v39 }
  0xee   :  { %vm698_vm2 = vcmp.ge.f32.partialorder %v594_v36, 0.0  ;;  %v762_v42 = vmul.f32 0.01, %v594_v36  ;;  %v789_v43 = vsel %vm661_vm15, %v445_v28, %v725_v37  ;;  %v586_v46 = vadd.f32 %v1272_v34, %v585_v40  ;;  %v1032_v47 = vpop.f32.mrf.mxu0  ;;  %v1064_v48 = vpop.f32.mrf.mxu1 }
  0xef   :  { %v821_v44 = vsel %vm693_vm0, %v573_v29, %v757_v38  ;;  %853 = vst [vmem:[%s1533_s3 + $0x68] sm:$0xff] %v789_v43  ;;  %v794_v49 = vsel %vm666_vm1, %v466_v35, %v730_v41  ;;  %v469_v51 = vadd.f32 %v1032_v47, %v1272_v34  ;;  %v597_v52 = vadd.f32 %v1064_v48, %v1272_v34 }
  0xf0   :  { %885 = vst [vmem:[%s1533_s3 + $0x168] sm:$0xff] %v821_v44  ;;  %v826_v50 = vsel %vm698_vm2, %v594_v36, %v762_v42  ;;  %858 = vst [vmem:[%s1533_s3 + $0x90] sm:$0xff] %v794_v49  ;;  %vm664_vm3 = vcmp.ge.f32.partialorder %v458_v45, 0.0  ;;  %v728_v53 = vmul.f32 0.01, %v458_v45  ;;  %vm696_vm4 = vcmp.ge.f32.partialorder %v586_v46, 0.0  ;;  %v460_v55 = vpop.f32.mrf.mxu0  ;;  %v588_v56 = vpop.f32.mrf.mxu1 }
  0xf1   :  { %890 = vst [vmem:[%s1533_s3 + $0x190] sm:$0xff] %v826_v50  ;;  %v760_v54 = vmul.f32 0.01, %v586_v46  ;;  %vm667_vm5 = vcmp.ge.f32.partialorder %v469_v51, 0.0  ;;  %v731_v57 = vmul.f32 0.01, %v469_v51  ;;  %v461_v61 = vadd.f32 %v1272_v34, %v460_v55 }
  0xf2   :  { %vm699_vm6 = vcmp.ge.f32.partialorder %v597_v52, 0.0  ;;  %v763_v58 = vmul.f32 0.01, %v597_v52  ;;  %v792_v59 = vsel %vm664_vm3, %v458_v45, %v728_v53  ;;  %v589_v62 = vadd.f32 %v1272_v34, %v588_v56  ;;  %v1035_v63 = vpop.f32.mrf.mxu0  ;;  %v1067_v0 = vpop.f32.mrf.mxu1 }
  0xf3   :  { %v824_v60 = vsel %vm696_vm4, %v586_v46, %v760_v54  ;;  %856 = vst [vmem:[%s1533_s3 + $0x80] sm:$0xff] %v792_v59  ;;  %v795_v1 = vsel %vm667_vm5, %v469_v51, %v731_v57  ;;  %v482_v3 = vadd.f32 %v1035_v63, %v1272_v34  ;;  %v610_v4 = vadd.f32 %v1067_v0, %v1272_v34 }
  0xf4   :  { %888 = vst [vmem:[%s1533_s3 + $0x180] sm:$0xff] %v824_v60  ;;  %v827_v2 = vsel %vm699_vm6, %v597_v52, %v763_v58  ;;  %859 = vst [vmem:[%s1533_s3 + $0x98] sm:$0xff] %v795_v1  ;;  %vm665_vm7 = vcmp.ge.f32.partialorder %v461_v61, 0.0  ;;  %v729_v5 = vmul.f32 0.01, %v461_v61  ;;  %vm697_vm8 = vcmp.ge.f32.partialorder %v589_v62, 0.0  ;;  %v473_v7 = vpop.f32.mrf.mxu0  ;;  %v601_v8 = vpop.f32.mrf.mxu1 }
  0xf5   :  { %891 = vst [vmem:[%s1533_s3 + $0x198] sm:$0xff] %v827_v2  ;;  %v761_v6 = vmul.f32 0.01, %v589_v62  ;;  %vm670_vm9 = vcmp.ge.f32.partialorder %v482_v3, 0.0  ;;  %v734_v9 = vmul.f32 0.01, %v482_v3  ;;  %v474_v13 = vadd.f32 %v1272_v34, %v473_v7 }
  0xf6   :  { %vm702_vm10 = vcmp.ge.f32.partialorder %v610_v4, 0.0  ;;  %v766_v10 = vmul.f32 0.01, %v610_v4  ;;  %v793_v11 = vsel %vm665_vm7, %v461_v61, %v729_v5  ;;  %v602_v14 = vadd.f32 %v1272_v34, %v601_v8  ;;  %v1036_v15 = vpop.f32.mrf.mxu0  ;;  %v1068_v16 = vpop.f32.mrf.mxu1 }
  0xf7   :  { %v825_v12 = vsel %vm697_vm8, %v589_v62, %v761_v6  ;;  %857 = vst [vmem:[%s1533_s3 + $0x88] sm:$0xff] %v793_v11  ;;  %v798_v17 = vsel %vm670_vm9, %v482_v3, %v734_v9  ;;  %v485_v19 = vadd.f32 %v1036_v15, %v1272_v34  ;;  %v613_v20 = vadd.f32 %v1068_v16, %v1272_v34 }
  0xf8   :  { %889 = vst [vmem:[%s1533_s3 + $0x188] sm:$0xff] %v825_v12  ;;  %v830_v18 = vsel %vm702_vm10, %v610_v4, %v766_v10  ;;  %862 = vst [vmem:[%s1533_s3 + $0xb0] sm:$0xff] %v798_v17  ;;  %vm668_vm11 = vcmp.ge.f32.partialorder %v474_v13, 0.0  ;;  %v732_v21 = vmul.f32 0.01, %v474_v13  ;;  %vm700_vm12 = vcmp.ge.f32.partialorder %v602_v14, 0.0  ;;  %v476_v23 = vpop.f32.mrf.mxu0  ;;  %v604_v24 = vpop.f32.mrf.mxu1 }
  0xf9   :  { %894 = vst [vmem:[%s1533_s3 + $0x1b0] sm:$0xff] %v830_v18  ;;  %v764_v22 = vmul.f32 0.01, %v602_v14  ;;  %vm671_vm13 = vcmp.ge.f32.partialorder %v485_v19, 0.0  ;;  %v735_v25 = vmul.f32 0.01, %v485_v19  ;;  %v477_v29 = vadd.f32 %v1272_v34, %v476_v23 }
  0xfa   :  { %vm703_vm14 = vcmp.ge.f32.partialorder %v613_v20, 0.0  ;;  %v767_v26 = vmul.f32 0.01, %v613_v20  ;;  %v796_v27 = vsel %vm668_vm11, %v474_v13, %v732_v21  ;;  %v605_v30 = vadd.f32 %v1272_v34, %v604_v24  ;;  %v1039_v31 = vpop.f32.mrf.mxu0  ;;  %v1071_v32 = vpop.f32.mrf.mxu1 }
  0xfb   :  { %v828_v28 = vsel %vm700_vm12, %v602_v14, %v764_v22  ;;  %860 = vst [vmem:[%s1533_s3 + $0xa0] sm:$0xff] %v796_v27  ;;  %v799_v33 = vsel %vm671_vm13, %v485_v19, %v735_v25  ;;  %v498_v36 = vadd.f32 %v1039_v31, %v1272_v34  ;;  %v626_v37 = vadd.f32 %v1071_v32, %v1272_v34 }
  0xfc   :  { %892 = vst [vmem:[%s1533_s3 + $0x1a0] sm:$0xff] %v828_v28  ;;  %v831_v35 = vsel %vm703_vm14, %v613_v20, %v767_v26  ;;  %863 = vst [vmem:[%s1533_s3 + $0xb8] sm:$0xff] %v799_v33  ;;  %vm669_vm15 = vcmp.ge.f32.partialorder %v477_v29, 0.0  ;;  %v733_v38 = vmul.f32 0.01, %v477_v29  ;;  %vm701_vm0 = vcmp.ge.f32.partialorder %v605_v30, 0.0  ;;  %v489_v40 = vpop.f32.mrf.mxu0  ;;  %v617_v41 = vpop.f32.mrf.mxu1 }
  0xfd   :  { %895 = vst [vmem:[%s1533_s3 + $0x1b8] sm:$0xff] %v831_v35  ;;  %v765_v39 = vmul.f32 0.01, %v605_v30  ;;  %vm674_vm1 = vcmp.ge.f32.partialorder %v498_v36, 0.0  ;;  %v738_v42 = vmul.f32 0.01, %v498_v36  ;;  %v490_v46 = vadd.f32 %v1272_v34, %v489_v40 }
  0xfe   :  { %vm706_vm2 = vcmp.ge.f32.partialorder %v626_v37, 0.0  ;;  %v770_v43 = vmul.f32 0.01, %v626_v37  ;;  %v797_v44 = vsel %vm669_vm15, %v477_v29, %v733_v38  ;;  %v618_v47 = vadd.f32 %v1272_v34, %v617_v41  ;;  %v1040_v48 = vpop.f32.mrf.mxu0  ;;  %v1072_v49 = vpop.f32.mrf.mxu1 }
  0xff   :  { %v829_v45 = vsel %vm701_vm0, %v605_v30, %v765_v39  ;;  %861 = vst [vmem:[%s1533_s3 + $0xa8] sm:$0xff] %v797_v44  ;;  %v802_v50 = vsel %vm674_vm1, %v498_v36, %v738_v42  ;;  %v501_v52 = vadd.f32 %v1040_v48, %v1272_v34  ;;  %v629_v53 = vadd.f32 %v1072_v49, %v1272_v34 }
 0x100   :  { %893 = vst [vmem:[%s1533_s3 + $0x1a8] sm:$0xff] %v829_v45  ;;  %v834_v51 = vsel %vm706_vm2, %v626_v37, %v770_v43  ;;  %866 = vst [vmem:[%s1533_s3 + $0xd0] sm:$0xff] %v802_v50  ;;  %vm672_vm3 = vcmp.ge.f32.partialorder %v490_v46, 0.0  ;;  %v736_v54 = vmul.f32 0.01, %v490_v46  ;;  %vm704_vm4 = vcmp.ge.f32.partialorder %v618_v47, 0.0  ;;  %v492_v56 = vpop.f32.mrf.mxu0  ;;  %v620_v57 = vpop.f32.mrf.mxu1 }
 0x101   :  { %898 = vst [vmem:[%s1533_s3 + $0x1d0] sm:$0xff] %v834_v51  ;;  %v768_v55 = vmul.f32 0.01, %v618_v47  ;;  %vm675_vm5 = vcmp.ge.f32.partialorder %v501_v52, 0.0  ;;  %v739_v58 = vmul.f32 0.01, %v501_v52  ;;  %v493_v62 = vadd.f32 %v1272_v34, %v492_v56 }
 0x102   :  { %vm707_vm6 = vcmp.ge.f32.partialorder %v629_v53, 0.0  ;;  %v771_v59 = vmul.f32 0.01, %v629_v53  ;;  %v800_v60 = vsel %vm672_vm3, %v490_v46, %v736_v54  ;;  %v621_v63 = vadd.f32 %v1272_v34, %v620_v57  ;;  %v1043_v0 = vpop.f32.mrf.mxu0  ;;  %v1075_v1 = vpop.f32.mrf.mxu1 }
 0x103   :  { %v832_v61 = vsel %vm704_vm4, %v618_v47, %v768_v55  ;;  %864 = vst [vmem:[%s1533_s3 + $0xc0] sm:$0xff] %v800_v60  ;;  %v803_v2 = vsel %vm675_vm5, %v501_v52, %v739_v58  ;;  %v514_v4 = vadd.f32 %v1043_v0, %v1272_v34  ;;  %v642_v5 = vadd.f32 %v1075_v1, %v1272_v34 }
 0x104   :  { %896 = vst [vmem:[%s1533_s3 + $0x1c0] sm:$0xff] %v832_v61  ;;  %v835_v3 = vsel %vm707_vm6, %v629_v53, %v771_v59  ;;  %867 = vst [vmem:[%s1533_s3 + $0xd8] sm:$0xff] %v803_v2  ;;  %vm673_vm7 = vcmp.ge.f32.partialorder %v493_v62, 0.0  ;;  %v737_v6 = vmul.f32 0.01, %v493_v62  ;;  %vm705_vm8 = vcmp.ge.f32.partialorder %v621_v63, 0.0  ;;  %v505_v8 = vpop.f32.mrf.mxu0  ;;  %v633_v9 = vpop.f32.mrf.mxu1 }
 0x105   :  { %899 = vst [vmem:[%s1533_s3 + $0x1d8] sm:$0xff] %v835_v3  ;;  %v769_v7 = vmul.f32 0.01, %v621_v63  ;;  %vm678_vm9 = vcmp.ge.f32.partialorder %v514_v4, 0.0  ;;  %v742_v10 = vmul.f32 0.01, %v514_v4  ;;  %v506_v14 = vadd.f32 %v1272_v34, %v505_v8 }
 0x106   :  { %vm710_vm10 = vcmp.ge.f32.partialorder %v642_v5, 0.0  ;;  %v774_v11 = vmul.f32 0.01, %v642_v5  ;;  %v801_v12 = vsel %vm673_vm7, %v493_v62, %v737_v6  ;;  %v634_v15 = vadd.f32 %v1272_v34, %v633_v9  ;;  %v1044_v16 = vpop.f32.mrf.mxu0  ;;  %v1076_v17 = vpop.f32.mrf.mxu1 }
 0x107   :  { %v833_v13 = vsel %vm705_vm8, %v621_v63, %v769_v7  ;;  %865 = vst [vmem:[%s1533_s3 + $0xc8] sm:$0xff] %v801_v12  ;;  %v806_v18 = vsel %vm678_vm9, %v514_v4, %v742_v10  ;;  %v517_v20 = vadd.f32 %v1044_v16, %v1272_v34  ;;  %v645_v21 = vadd.f32 %v1076_v17, %v1272_v34 }
 0x108   :  { %897 = vst [vmem:[%s1533_s3 + $0x1c8] sm:$0xff] %v833_v13  ;;  %v838_v19 = vsel %vm710_vm10, %v642_v5, %v774_v11  ;;  %870 = vst [vmem:[%s1533_s3 + $0xf0] sm:$0xff] %v806_v18  ;;  %vm676_vm11 = vcmp.ge.f32.partialorder %v506_v14, 0.0  ;;  %v740_v22 = vmul.f32 0.01, %v506_v14  ;;  %vm708_vm12 = vcmp.ge.f32.partialorder %v634_v15, 0.0  ;;  %v508_v24 = vpop.f32.mrf.mxu0  ;;  %v636_v25 = vpop.f32.mrf.mxu1 }
 0x109   :  { %902 = vst [vmem:[%s1533_s3 + $0x1f0] sm:$0xff] %v838_v19  ;;  %v772_v23 = vmul.f32 0.01, %v634_v15  ;;  %vm679_vm13 = vcmp.ge.f32.partialorder %v517_v20, 0.0  ;;  %v743_v26 = vmul.f32 0.01, %v517_v20  ;;  %v509_v30 = vadd.f32 %v1272_v34, %v508_v24 }
 0x10a   :  { %vm711_vm14 = vcmp.ge.f32.partialorder %v645_v21, 0.0  ;;  %v775_v27 = vmul.f32 0.01, %v645_v21  ;;  %v804_v28 = vsel %vm676_vm11, %v506_v14, %v740_v22  ;;  %v637_v31 = vadd.f32 %v1272_v34, %v636_v25 }
 0x10b   :  { %v836_v29 = vsel %vm708_vm12, %v634_v15, %v772_v23  ;;  %868 = vst [vmem:[%s1533_s3 + $0xe0] sm:$0xff] %v804_v28  ;;  %v807_v32 = vsel %vm679_vm13, %v517_v20, %v743_v26  ;;  %vm677_vm15 = vcmp.ge.f32.partialorder %v509_v30, 0.0  ;;  %v741_v34 = vmul.f32 0.01, %v509_v30 }
 0x10c   :  { %900 = vst [vmem:[%s1533_s3 + $0x1e0] sm:$0xff] %v836_v29  ;;  %v839_v33 = vsel %vm711_vm14, %v645_v21, %v775_v27  ;;  %871 = vst [vmem:[%s1533_s3 + $0xf8] sm:$0xff] %v807_v32  ;;  %vm709_vm0 = vcmp.ge.f32.partialorder %v637_v31, 0.0  ;;  %v773_v35 = vmul.f32 0.01, %v637_v31 }
 0x10d   :  { %903 = vst [vmem:[%s1533_s3 + $0x1f8] sm:$0xff] %v839_v33  ;;  %v805_v36 = vsel %vm677_vm15, %v509_v30, %v741_v34 }
 0x10e   :  { %v837_v37 = vsel %vm709_vm0, %v637_v31, %v773_v35  ;;  %869 = vst [vmem:[%s1533_s3 + $0xe8] sm:$0xff] %v805_v36 }
 0x10f   :  { %901 = vst [vmem:[%s1533_s3 + $0x1e8] sm:$0xff] %v837_v37 }

// kernel: reference_encoder_pallas.9
= control target key start
LH: loop header
LB: loop body
LE: loop exit
PB: predicated region body
PF: predicated region fallthrough
CT: control target
= control target key end

     0   :  { %s2875_s1 = inlined_call_operand.vmem [shape: bf16[1152,128], index: 1, kind: input, shape index: {}]   ;;  %s2876_s0 = inlined_call_operand.vmem [shape: bf16[128,1152], index: 0, kind: input, shape index: {}]   ;;  %s2877_s2 = inlined_call_operand.vmem [shape: f32[1,128], index: 2, kind: input, shape index: {}]   ;;  %s2878_s3 = inlined_call_operand.vmem [shape: f32[128,128], index: 3, kind: output, shape index: {}]  }
   0x1   :  { %v2064_v0 = vld [vmem:[%s2875_s1 + $0x78] sm:$0xff]   ;;  %v2068_v4 = vld [vmem:[%s2875_s1 + $0x70] sm:$0xff]   ;;  %v2072_v8 = vld [vmem:[%s2875_s1 + $0x68] sm:$0xff]  }
   0x2   :  { %v2065_v1 = vld [vmem:[%s2875_s1 + $0xf8] sm:$0xff]   ;;  %1744 = vmatprep.subr.bf16.mxu0 %v2064_v0  ;;  %v2069_v5 = vld [vmem:[%s2875_s1 + $0xf0] sm:$0xff]   ;;  %v2073_v9 = vld [vmem:[%s2875_s1 + $0xe8] sm:$0xff]  }
   0x3   :  { %v2066_v2 = vld [vmem:[%s2875_s1 + $0x38] sm:$0xff]   ;;  %1808 = vmatprep.subr.bf16.mxu1 %v2065_v1  ;;  %v2070_v6 = vld [vmem:[%s2875_s1 + $0x30] sm:$0xff]   ;;  %v2074_v10 = vld [vmem:[%s2875_s1 + $0x28] sm:$0xff]  }
   0x4   :  { %v2067_v3 = vld [vmem:[%s2875_s1 + $0xb8] sm:$0xff]   ;;  %1745 = vmatpush3.bf16.msra.mxu0 %v2066_v2  ;;  %v2071_v7 = vld [vmem:[%s2875_s1 + $0xb0] sm:$0xff]   ;;  %v2075_v11 = vld [vmem:[%s2875_s1 + $0xa8] sm:$0xff]  }
   0x5   :  { %1809 = vmatpush3.bf16.msra.mxu1 %v2067_v3  ;;  %1746 = vmatprep.subr.bf16.mxu0 %v2068_v4  ;;  %v2076_v12 = vld [vmem:[%s2875_s1 + $0x60] sm:$0xff]   ;;  %v2080_v16 = vld [vmem:[%s2875_s1 + $0x58] sm:$0xff]   ;;  %v2084_v20 = vld [vmem:[%s2875_s1 + $0x50] sm:$0xff]  }
   0x6   :  { %1810 = vmatprep.subr.bf16.mxu1 %v2069_v5  ;;  %v2077_v13 = vld [vmem:[%s2875_s1 + $0xe0] sm:$0xff]   ;;  %v2081_v17 = vld [vmem:[%s2875_s1 + $0xd8] sm:$0xff]   ;;  %v2085_v21 = vld [vmem:[%s2875_s1 + $0xd0] sm:$0xff]  }
   0x7   :  { %v2078_v14 = vld [vmem:[%s2875_s1 + $0x20] sm:$0xff]   ;;  %v2082_v18 = vld [vmem:[%s2875_s1 + $0x18] sm:$0xff]   ;;  %v2086_v22 = vld [vmem:[%s2875_s1 + $0x10] sm:$0xff]  }
   0x8   :  { %1747 = vmatpush3.bf16.msra.mxu0 %v2070_v6  ;;  %v2079_v15 = vld [vmem:[%s2875_s1 + $0xa0] sm:$0xff]   ;;  %v2083_v19 = vld [vmem:[%s2875_s1 + $0x98] sm:$0xff]   ;;  %v2087_v23 = vld [vmem:[%s2875_s1 + $0x90] sm:$0xff]  }
   0x9   :  { %1811 = vmatpush3.bf16.msra.mxu1 %v2071_v7  ;;  %1748 = vmatprep.subr.bf16.mxu0 %v2072_v8  ;;  %v2088_v24 = vld [vmem:[%s2875_s1 + $0x48] sm:$0xff]   ;;  %v2092_v28 = vld [vmem:[%s2875_s1 + $0x40] sm:$0xff]   ;;  %v2102_v36 = vld [vmem:[%s2875_s1 + $0x178] sm:$0xff]  }
   0xa   :  { %1812 = vmatprep.subr.bf16.mxu1 %v2073_v9  ;;  %v2089_v25 = vld [vmem:[%s2875_s1 + $0xc8] sm:$0xff]   ;;  %v2093_v29 = vld [vmem:[%s2875_s1 + $0xc0] sm:$0xff]   ;;  %v2103_v37 = vld [vmem:[%s2875_s1 + $0x1f8] sm:$0xff]  }
   0xb   :  { %v2090_v26 = vld [vmem:[%s2875_s1 + $0x8] sm:$0xff]   ;;  %v2094_v30 = vld [vmem:[%s2875_s1] sm:$0xff]   ;;  %v2104_v38 = vld [vmem:[%s2875_s1 + $0x138] sm:$0xff]  }
   0xc   :  { %1749 = vmatpush3.bf16.msra.mxu0 %v2074_v10  ;;  %v2091_v27 = vld [vmem:[%s2875_s1 + $0x88] sm:$0xff]   ;;  %v2095_v31 = vld [vmem:[%s2875_s1 + $0x80] sm:$0xff]   ;;  %v2105_v39 = vld [vmem:[%s2875_s1 + $0x1b8] sm:$0xff]  }
   0xd   :  { %1813 = vmatpush3.bf16.msra.mxu1 %v2075_v11  ;;  %1750 = vmatprep.subr.bf16.mxu0 %v2076_v12  ;;  %v2096_v32 = vld [vmem:[%s2876_s0] ss:$36 sps:$4 sm:$0xff]   ;;  %v2099_v34 = vld [vmem:[%s2876_s0 + $0x8] ss:$36 sps:$4 sm:$0xff]   ;;  %v2108_v41 = vld [vmem:[%s2876_s0 + $0x54] ss:$36 sps:$4 sm:$0xff]  }
   0xe   :  { %1814 = vmatprep.subr.bf16.mxu1 %v2077_v13  ;;  %v2098_v33 = vld [vmem:[%s2876_s0 + $0x4] ss:$36 sps:$4 sm:$0xff]   ;;  %v2101_v35 = vld [vmem:[%s2876_s0 + $0xc] ss:$36 sps:$4 sm:$0xff]   ;;  %v2116_v48 = vld [vmem:[%s2876_s0 + $0x94] ss:$36 sps:$4 sm:$0xff]  }
   0xf   :  { %1078 = vmatprep.mubr.bf16.mxu0 %v2098_v33  ;;  %1175 = vmatprep.mubr.bf16.mxu1 %v2101_v35  ;;  %v2106_v40 = vld [vmem:[%s2876_s0 + $0x4c] ss:$36 sps:$4 sm:$0xff]   ;;  %v2118_v49 = vld [vmem:[%s2876_s0 + $0x9c] ss:$36 sps:$4 sm:$0xff]   ;;  %v2128_v57 = vld [vmem:[%s2876_s0 + $0xe4] ss:$36 sps:$4 sm:$0xff]  }
  0x10   :  { %1751 = vmatpush3.bf16.msra.mxu0 %v2078_v14  ;;  %v2110_v42 = vld [vmem:[%s2876_s0 + $0x48] ss:$36 sps:$4 sm:$0xff]   ;;  %v2111_v43 = vld [vmem:[%s2876_s0 + $0x50] ss:$36 sps:$4 sm:$0xff]   ;;  %v2121_v51 = vld [vmem:[%s2876_s0 + $0x98] ss:$36 sps:$4 sm:$0xff]  }
  0x11   :  { %1815 = vmatpush3.bf16.msra.mxu1 %v2079_v15  ;;  %1752 = vmatprep.subr.bf16.mxu0 %v2080_v16  ;;  %v2112_v44 = vld [vmem:[%s2875_s1 + $0x170] sm:$0xff]   ;;  %v2122_v52 = vld [vmem:[%s2875_s1 + $0x168] sm:$0xff]   ;;  %v2126_v56 = vld [vmem:[%s2876_s0 + $0xdc] ss:$36 sps:$4 sm:$0xff]  }
  0x12   :  { %1816 = vmatprep.subr.bf16.mxu1 %v2081_v17  ;;  %v2113_v45 = vld [vmem:[%s2875_s1 + $0x1f0] sm:$0xff]   ;;  %v2123_v53 = vld [vmem:[%s2875_s1 + $0x1e8] sm:$0xff]   ;;  %v2130_v58 = vld [vmem:[%s2876_s0 + $0xd8] ss:$36 sps:$4 sm:$0xff]  }
  0x13   :  { %v2114_v46 = vld [vmem:[%s2875_s1 + $0x130] sm:$0xff]   ;;  %v2124_v54 = vld [vmem:[%s2875_s1 + $0x128] sm:$0xff]   ;;  %v2131_v59 = vld [vmem:[%s2876_s0 + $0xe0] ss:$36 sps:$4 sm:$0xff]  }
  0x14   :  { %1753 = vmatpush3.bf16.msra.mxu0 %v2082_v18  ;;  %v2115_v47 = vld [vmem:[%s2875_s1 + $0x1b0] sm:$0xff]   ;;  %v2125_v55 = vld [vmem:[%s2875_s1 + $0x1a8] sm:$0xff]   ;;  %v2132_v60 = vld [vmem:[%s2875_s1 + $0x160] sm:$0xff]  }
  0x15   :  { %1817 = vmatpush3.bf16.msra.mxu1 %v2083_v19  ;;  %1754 = vmatprep.subr.bf16.mxu0 %v2084_v20  ;;  %v2120_v50 = vld [vmem:[%s2876_s0 + $0x90] ss:$36 sps:$4 sm:$0xff]   ;;  %v2133_v61 = vld [vmem:[%s2875_s1 + $0x1e0] sm:$0xff]   ;;  %v2142_v3 = vld [vmem:[%s2875_s1 + $0x158] sm:$0xff]  }
  0x16   :  { %1818 = vmatprep.subr.bf16.mxu1 %v2085_v21  ;;  %v2134_v62 = vld [vmem:[%s2875_s1 + $0x120] sm:$0xff]   ;;  %v2138_v1 = vld [vmem:[%s2876_s0 + $0x12c] ss:$36 sps:$4 sm:$0xff]   ;;  %v2143_v5 = vld [vmem:[%s2875_s1 + $0x1d8] sm:$0xff]  }
  0x17   :  { %v2135_v63 = vld [vmem:[%s2875_s1 + $0x1a0] sm:$0xff]   ;;  %v2141_v4 = vld [vmem:[%s2876_s0 + $0x128] ss:$36 sps:$4 sm:$0xff]   ;;  %v2144_v6 = vld [vmem:[%s2875_s1 + $0x118] sm:$0xff]  }
  0x18   :  { %1755 = vmatpush3.bf16.msra.mxu0 %v2086_v22  ;;  %v2136_v0 = vld [vmem:[%s2876_s0 + $0x124] ss:$36 sps:$4 sm:$0xff]   ;;  %v2145_v7 = vld [vmem:[%s2875_s1 + $0x198] sm:$0xff]   ;;  %v2146_v8 = vld [vmem:[%s2876_s0 + $0x16c] ss:$36 sps:$4 sm:$0xff]  }
  0x19   :  { %1819 = vmatpush3.bf16.msra.mxu1 %v2087_v23  ;;  %1756 = vmatprep.subr.bf16.mxu0 %v2088_v24  ;;  %v2140_v2 = vld [vmem:[%s2876_s0 + $0x120] ss:$36 sps:$4 sm:$0xff]   ;;  %v2148_v9 = vld [vmem:[%s2876_s0 + $0x174] ss:$36 sps:$4 sm:$0xff]   ;;  %v2150_v12 = vld [vmem:[%s2876_s0 + $0x168] ss:$36 sps:$4 sm:$0xff]  }
  0x1a   :  { %1820 = vmatprep.subr.bf16.mxu1 %v2089_v25  ;;  %v2152_v10 = vld [vmem:[%s2875_s1 + $0x150] sm:$0xff]   ;;  %v2158_v17 = vld [vmem:[%s2876_s0 + $0x1bc] ss:$36 sps:$4 sm:$0xff]   ;;  %v2162_v18 = vld [vmem:[%s2875_s1 + $0x148] sm:$0xff]  }
  0x1b   :  { %v2153_v11 = vld [vmem:[%s2875_s1 + $0x1d0] sm:$0xff]   ;;  %v2163_v19 = vld [vmem:[%s2875_s1 + $0x1c8] sm:$0xff]   ;;  %v2161_v23 = vld [vmem:[%s2876_s0 + $0x1b8] ss:$36 sps:$4 sm:$0xff]  }
  0x1c   :  { %1757 = vmatpush3.bf16.msra.mxu0 %v2090_v26  ;;  %v2154_v13 = vld [vmem:[%s2875_s1 + $0x110] sm:$0xff]   ;;  %v2164_v20 = vld [vmem:[%s2875_s1 + $0x108] sm:$0xff]   ;;  %v2166_v24 = vld [vmem:[%s2876_s0 + $0x1fc] ss:$36 sps:$4 sm:$0xff]  }
  0x1d   :  { %1821 = vmatpush3.bf16.msra.mxu1 %v2091_v27  ;;  %1758 = vmatprep.subr.bf16.mxu0 %v2092_v28  ;;  %v2155_v14 = vld [vmem:[%s2875_s1 + $0x190] sm:$0xff]   ;;  %v2165_v21 = vld [vmem:[%s2875_s1 + $0x188] sm:$0xff]   ;;  %v2172_v26 = vld [vmem:[%s2875_s1 + $0x140] sm:$0xff]  }
  0x1e   :  { %1822 = vmatprep.subr.bf16.mxu1 %v2093_v29  ;;  %v2151_v15 = vld [vmem:[%s2876_s0 + $0x170] ss:$36 sps:$4 sm:$0xff]   ;;  %v2168_v25 = vld [vmem:[%s2876_s0 + $0x204] ss:$36 sps:$4 sm:$0xff]  }
  0x1f   :  { %v2156_v16 = vld [vmem:[%s2876_s0 + $0x1b4] ss:$36 sps:$4 sm:$0xff]   ;;  %v2173_v27 = vld [vmem:[%s2875_s1 + $0x1c0] sm:$0xff]  }
  0x20   :  { %1759 = vmatpush3.bf16.msra.mxu0 %v2094_v30  ;;  %v2160_v22 = vld [vmem:[%s2876_s0 + $0x1b0] ss:$36 sps:$4 sm:$0xff]   ;;  %v2174_v28 = vld [vmem:[%s2875_s1 + $0x100] sm:$0xff]   ;;  %v2170_v30 = vld [vmem:[%s2876_s0 + $0x1f8] ss:$36 sps:$4 sm:$0xff]  }
  0x21   :  { %1823 = vmatpush3.bf16.msra.mxu1 %v2095_v31  ;;  %1872 = vmatprep.subr.bf16.mxu0 %v2102_v36  ;;  %v2175_v29 = vld [vmem:[%s2875_s1 + $0x180] sm:$0xff]   ;;  %v2178_v33 = vld [vmem:[%s2876_s0 + $0x14] ss:$36 sps:$4 sm:$0xff]  }
  0x22   :  { %1936 = vmatprep.subr.bf16.mxu1 %v2103_v37  ;;  %v2171_v31 = vld [vmem:[%s2876_s0 + $0x200] ss:$36 sps:$4 sm:$0xff]   ;;  %v2176_v35 = vld [vmem:[%s2876_s0 + $0x10] ss:$36 sps:$4 sm:$0xff]   ;;  %v2179_v36 = vld [vmem:[%s2876_s0 + $0x18] ss:$36 sps:$4 sm:$0xff]  }
  0x23   :  { %1079 = vmatmul.mubr.bf16.vlgmr.msra.gmra.mxu0 %v2096_v32  ;;  %v2182_v32 = vld [vmem:[%s2875_s1 + $0x238] sm:$0xff]  }
  0x24   :  { %1176 = vmatmul.mubr.bf16.vlgmr.msra.gmra.mxu1 %v2099_v34  ;;  %1873 = vmatpush3.bf16.msra.mxu0 %v2104_v38  ;;  %v2181_v34 = vld [vmem:[%s2876_s0 + $0x1c] ss:$36 sps:$4 sm:$0xff]   ;;  %v2185_v38 = vld [vmem:[%s2876_s0 + $0x64] ss:$36 sps:$4 sm:$0xff]  }
  0x25   :  { %1937 = vmatpush3.bf16.msra.mxu1 %v2105_v39  ;;  %1086 = vmatprep.mubr.bf16.mxu0 %v2106_v40  ;;  %v2183_v37 = vld [vmem:[%s2876_s0 + $0x5c] ss:$36 sps:$4 sm:$0xff]   ;;  %v2189_v39 = vld [vmem:[%s2875_s1 + $0x230] sm:$0xff]   ;;  %v2196_v40 = vld [vmem:[%s2875_s1 + $0x228] sm:$0xff]  }
  0x26   :  { %1183 = vmatprep.mubr.bf16.mxu1 %v2108_v41  ;;  %1874 = vmatprep.subr.bf16.mxu0 %v2112_v44  ;;  %v2187_v41 = vld [vmem:[%s2876_s0 + $0x58] ss:$36 sps:$4 sm:$0xff]   ;;  %v2192_v44 = vld [vmem:[%s2876_s0 + $0xac] ss:$36 sps:$4 sm:$0xff]  }
  0x27   :  { %1938 = vmatprep.subr.bf16.mxu1 %v2113_v45  ;;  %v2203_v45 = vld [vmem:[%s2875_s1 + $0x220] sm:$0xff]  }
  0x28   :  { %1875 = vmatpush3.bf16.msra.mxu0 %v2114_v46  ;;  %v2210_v46 = vld [vmem:[%s2875_s1 + $0x218] sm:$0xff]  }
  0x29   :  { %1939 = vmatpush3.bf16.msra.mxu1 %v2115_v47  ;;  %1876 = vmatprep.subr.bf16.mxu0 %v2122_v52  ;;  %v2194_v47 = vld [vmem:[%s2876_s0 + $0xa0] ss:$36 sps:$4 sm:$0xff]   ;;  %v2201_v52 = vld [vmem:[%s2876_s0 + $0xe8] ss:$36 sps:$4 sm:$0xff]  }
  0x2a   :  { %1940 = vmatprep.subr.bf16.mxu1 %v2123_v53  ;;  %v2224_v53 = vld [vmem:[%s2875_s1 + $0x208] sm:$0xff]  }
  0x2b   :  { %1087 = vmatmul.mubr.bf16.gmra.mxu0 %v2110_v42  ;;  %v2188_v42 = vld [vmem:[%s2876_s0 + $0x60] ss:$36 sps:$4 sm:$0xff]  }
  0x2c   :  { %1184 = vmatmul.mubr.bf16.gmra.mxu1 %v2111_v43  ;;  %1094 = vmatprep.mubr.bf16.mxu0 %v2116_v48  ;;  %v2190_v43 = vld [vmem:[%s2876_s0 + $0xa4] ss:$36 sps:$4 sm:$0xff]  }
  0x2d   :  { %1191 = vmatprep.mubr.bf16.mxu1 %v2118_v49  ;;  %1877 = vmatpush3.bf16.msra.mxu0 %v2124_v54  ;;  %v2195_v48 = vld [vmem:[%s2876_s0 + $0xa8] ss:$36 sps:$4 sm:$0xff]   ;;  %v2202_v54 = vld [vmem:[%s2876_s0 + $0xf0] ss:$36 sps:$4 sm:$0xff]  }
  0x2e   :  { %1941 = vmatpush3.bf16.msra.mxu1 %v2125_v55  ;;  %1878 = vmatprep.subr.bf16.mxu0 %v2132_v60  ;;  %v2197_v49 = vld [vmem:[%s2876_s0 + $0xec] ss:$36 sps:$4 sm:$0xff]   ;;  %v2204_v55 = vld [vmem:[%s2876_s0 + $0x134] ss:$36 sps:$4 sm:$0xff]   ;;  %v2211_v60 = vld [vmem:[%s2876_s0 + $0x17c] ss:$36 sps:$4 sm:$0xff]  }
  0x2f   :  { %1942 = vmatprep.subr.bf16.mxu1 %v2133_v61  ;;  %v2213_v61 = vld [vmem:[%s2876_s0 + $0x184] ss:$36 sps:$4 sm:$0xff]  }
  0x31   :  { %1879 = vmatpush3.bf16.msra.mxu0 %v2134_v62  ;;  %v2215_v62 = vld [vmem:[%s2876_s0 + $0x178] ss:$36 sps:$4 sm:$0xff]  }
  0x32   :  { %1943 = vmatpush3.bf16.msra.mxu1 %v2135_v63  ;;  %1880 = vmatprep.subr.bf16.mxu0 %v2142_v3  ;;  %v2216_v63 = vld [vmem:[%s2876_s0 + $0x180] ss:$36 sps:$4 sm:$0xff]   ;;  %v2223_v3 = vld [vmem:[%s2876_s0 + $0x1c8] ss:$36 sps:$4 sm:$0xff]  }
  0x33   :  { %1095 = vmatmul.mubr.bf16.gmra.mxu0 %v2120_v50  ;;  %1944 = vmatprep.subr.bf16.mxu1 %v2143_v5  ;;  %v2199_v50 = vld [vmem:[%s2876_s0 + $0xf4] ss:$36 sps:$4 sm:$0xff]  }
  0x34   :  { %1192 = vmatmul.mubr.bf16.gmra.mxu1 %v2121_v51  ;;  %1102 = vmatprep.mubr.bf16.mxu0 %v2126_v56  ;;  %v2217_v51 = vld [vmem:[%s2875_s1 + $0x210] sm:$0xff]   ;;  %v2206_v56 = vld [vmem:[%s2876_s0 + $0x13c] ss:$36 sps:$4 sm:$0xff]  }
  0x35   :  { %1199 = vmatprep.mubr.bf16.mxu1 %v2128_v57  ;;  %1881 = vmatpush3.bf16.msra.mxu0 %v2144_v6  ;;  %v2231_v57 = vld [vmem:[%s2875_s1 + $0x200] sm:$0xff]   ;;  %v2227_v5 = vld [vmem:[%s2876_s0 + $0x214] ss:$36 sps:$4 sm:$0xff]   ;;  %v2229_v6 = vld [vmem:[%s2876_s0 + $0x208] ss:$36 sps:$4 sm:$0xff]  }
  0x36   :  { %1945 = vmatpush3.bf16.msra.mxu1 %v2145_v7  ;;  %1882 = vmatprep.subr.bf16.mxu0 %v2152_v10  ;;  %v2230_v7 = vld [vmem:[%s2876_s0 + $0x210] ss:$36 sps:$4 sm:$0xff]   ;;  %v2234_v10 = vld [vmem:[%s2876_s0 + $0x68] ss:$36 sps:$4 sm:$0xff]  }
  0x37   :  { %1946 = vmatprep.subr.bf16.mxu1 %v2153_v11  ;;  %v2235_v11 = vld [vmem:[%s2876_s0 + $0x188] ss:$36 sps:$4 sm:$0xff]  }
  0x39   :  { %1883 = vmatpush3.bf16.msra.mxu0 %v2154_v13  ;;  %v2237_v13 = vld [vmem:[%s2876_s0 + $0x1d0] ss:$36 sps:$4 sm:$0xff]  }
  0x3a   :  { %1947 = vmatpush3.bf16.msra.mxu1 %v2155_v14  ;;  %1884 = vmatprep.subr.bf16.mxu0 %v2162_v18  ;;  %v2238_v14 = vld [vmem:[%s2876_s0 + $0xf8] ss:$36 sps:$4 sm:$0xff]   ;;  %v2695_v18 = vld [vmem:[%s2877_s2] ss:$0 sm:$0xff] }
  0x3b   :  { %1103 = vmatmul.mubr.bf16.gmra.mxu0 %v2130_v58  ;;  %1948 = vmatprep.subr.bf16.mxu1 %v2163_v19  ;;  %v2208_v58 = vld [vmem:[%s2876_s0 + $0x130] ss:$36 sps:$4 sm:$0xff]  }
  0x3c   :  { %1200 = vmatmul.mubr.bf16.gmra.mxu1 %v2131_v59  ;;  %1110 = vmatprep.mubr.bf16.mxu0 %v2136_v0  ;;  %v2209_v59 = vld [vmem:[%s2876_s0 + $0x138] ss:$36 sps:$4 sm:$0xff]   ;;  %v2218_v0 = vld [vmem:[%s2876_s0 + $0x1c4] ss:$36 sps:$4 sm:$0xff]  }
  0x3d   :  { %1207 = vmatprep.mubr.bf16.mxu1 %v2138_v1  ;;  %1885 = vmatpush3.bf16.msra.mxu0 %v2164_v20  ;;  %v2220_v1 = vld [vmem:[%s2876_s0 + $0x1cc] ss:$36 sps:$4 sm:$0xff]  }
  0x3e   :  { %1949 = vmatpush3.bf16.msra.mxu1 %v2165_v21  ;;  %1886 = vmatprep.subr.bf16.mxu0 %v2172_v26 }
  0x3f   :  { %1950 = vmatprep.subr.bf16.mxu1 %v2173_v27 }
  0x41   :  { %1887 = vmatpush3.bf16.msra.mxu0 %v2174_v28 }
  0x42   :  { %1951 = vmatpush3.bf16.msra.mxu1 %v2175_v29  ;;  %2016 = vmatprep.subr.bf16.mxu0 %v2182_v32 }
  0x43   :  { %1111 = vmatmul.mubr.bf16.gmra.mxu0 %v2140_v2  ;;  %2048 = vmatprep.subr.bf16.mxu1 %v2182_v32  ;;  %v2222_v2 = vld [vmem:[%s2876_s0 + $0x1c0] ss:$36 sps:$4 sm:$0xff]  }
  0x44   :  { %1208 = vmatmul.mubr.bf16.gmra.mxu1 %v2141_v4  ;;  %1118 = vmatprep.mubr.bf16.mxu0 %v2146_v8  ;;  %v2225_v4 = vld [vmem:[%s2876_s0 + $0x20c] ss:$36 sps:$4 sm:$0xff]   ;;  %v2232_v8 = vld [vmem:[%s2876_s0 + $0x20] ss:$36 sps:$4 sm:$0xff]  }
  0x45   :  { %1215 = vmatprep.mubr.bf16.mxu1 %v2148_v9  ;;  %v2233_v9 = vld [vmem:[%s2876_s0 + $0x140] ss:$36 sps:$4 sm:$0xff]  }
  0x4b   :  { %1119 = vmatmul.mubr.bf16.gmra.mxu0 %v2150_v12  ;;  %v2236_v12 = vld [vmem:[%s2876_s0 + $0xb0] ss:$36 sps:$4 sm:$0xff]  }
  0x4c   :  { %1216 = vmatmul.mubr.bf16.gmra.mxu1 %v2151_v15  ;;  %1126 = vmatprep.mubr.bf16.mxu0 %v2156_v16  ;;  %v2239_v15 = vld [vmem:[%s2876_s0 + $0x218] ss:$36 sps:$4 sm:$0xff]  }
  0x4d   :  { %1223 = vmatprep.mubr.bf16.mxu1 %v2158_v17 }
  0x53   :  { %1127 = vmatmul.mubr.bf16.gmra.mxu0 %v2160_v22 }
  0x54   :  { %1224 = vmatmul.mubr.bf16.gmra.mxu1 %v2161_v23  ;;  %1134 = vmatprep.mubr.bf16.mxu0 %v2166_v24 }
  0x55   :  { %1231 = vmatprep.mubr.bf16.mxu1 %v2168_v25 }
  0x5b   :  { %1135 = vmatmul.mubr.bf16.gmra.mxu0 %v2170_v30 }
  0x5c   :  { %1232 = vmatmul.mubr.bf16.gmra.mxu1 %v2171_v31  ;;  %1272 = vmatprep.mubr.bf16.mxu0 %v2178_v33 }
  0x5d   :  { %1369 = vmatprep.mubr.bf16.mxu1 %v2181_v34 }
  0x63   :  { %1273 = vmatmul.mubr.bf16.vlgmr.msra.gmra.mxu0 %v2176_v35 }
  0x64   :  { %1370 = vmatmul.mubr.bf16.vlgmr.msra.gmra.mxu1 %v2179_v36  ;;  %2017 = vmatpush3.bf16.msra.mxu0 %v2182_v32 }
  0x65   :  { %2056 = vmatpush3.bf16.msra.mxu1 %v2182_v32  ;;  %1280 = vmatprep.mubr.bf16.mxu0 %v2183_v37 }
  0x66   :  { %1377 = vmatprep.mubr.bf16.mxu1 %v2185_v38  ;;  %2018 = vmatprep.subr.bf16.mxu0 %v2189_v39 }
  0x67   :  { %2049 = vmatprep.subr.bf16.mxu1 %v2189_v39 }
  0x68   :  { %2019 = vmatpush3.bf16.msra.mxu0 %v2189_v39 }
  0x69   :  { %2057 = vmatpush3.bf16.msra.mxu1 %v2189_v39  ;;  %2020 = vmatprep.subr.bf16.mxu0 %v2196_v40 }
  0x6a   :  { %2050 = vmatprep.subr.bf16.mxu1 %v2196_v40 }
  0x6b   :  { %1281 = vmatmul.mubr.bf16.gmra.mxu0 %v2187_v41 }
  0x6c   :  { %1378 = vmatmul.mubr.bf16.gmra.mxu1 %v2188_v42  ;;  %1288 = vmatprep.mubr.bf16.mxu0 %v2190_v43 }
  0x6d   :  { %1385 = vmatprep.mubr.bf16.mxu1 %v2192_v44  ;;  %2021 = vmatpush3.bf16.msra.mxu0 %v2196_v40 }
  0x6e   :  { %2058 = vmatpush3.bf16.msra.mxu1 %v2196_v40  ;;  %2022 = vmatprep.subr.bf16.mxu0 %v2203_v45 }
  0x6f   :  { %2051 = vmatprep.subr.bf16.mxu1 %v2203_v45 }
  0x71   :  { %2023 = vmatpush3.bf16.msra.mxu0 %v2203_v45 }
  0x72   :  { %2059 = vmatpush3.bf16.msra.mxu1 %v2203_v45  ;;  %2024 = vmatprep.subr.bf16.mxu0 %v2210_v46 }
  0x73   :  { %1289 = vmatmul.mubr.bf16.gmra.mxu0 %v2194_v47  ;;  %2052 = vmatprep.subr.bf16.mxu1 %v2210_v46 }
  0x74   :  { %1386 = vmatmul.mubr.bf16.gmra.mxu1 %v2195_v48  ;;  %1296 = vmatprep.mubr.bf16.mxu0 %v2197_v49 }
  0x75   :  { %1393 = vmatprep.mubr.bf16.mxu1 %v2199_v50  ;;  %2025 = vmatpush3.bf16.msra.mxu0 %v2210_v46 }
  0x76   :  { %2060 = vmatpush3.bf16.msra.mxu1 %v2210_v46  ;;  %2026 = vmatprep.subr.bf16.mxu0 %v2217_v51 }
  0x77   :  { %2053 = vmatprep.subr.bf16.mxu1 %v2217_v51 }
  0x79   :  { %2027 = vmatpush3.bf16.msra.mxu0 %v2217_v51 }
  0x7a   :  { %2061 = vmatpush3.bf16.msra.mxu1 %v2217_v51  ;;  %2028 = vmatprep.subr.bf16.mxu0 %v2224_v53 }
  0x7b   :  { %1297 = vmatmul.mubr.bf16.gmra.mxu0 %v2201_v52  ;;  %2054 = vmatprep.subr.bf16.mxu1 %v2224_v53 }
  0x7c   :  { %1394 = vmatmul.mubr.bf16.gmra.mxu1 %v2202_v54  ;;  %1304 = vmatprep.mubr.bf16.mxu0 %v2204_v55 }
  0x7d   :  { %1401 = vmatprep.mubr.bf16.mxu1 %v2206_v56  ;;  %2029 = vmatpush3.bf16.msra.mxu0 %v2224_v53 }
  0x7e   :  { %2062 = vmatpush3.bf16.msra.mxu1 %v2224_v53  ;;  %2030 = vmatprep.subr.bf16.mxu0 %v2231_v57 }
  0x7f   :  { %2055 = vmatprep.subr.bf16.mxu1 %v2231_v57 }
  0x81   :  { %2031 = vmatpush3.bf16.msra.mxu0 %v2231_v57 }
  0x82   :  { %2063 = vmatpush3.bf16.msra.mxu1 %v2231_v57 }
  0x83   :  { %1305 = vmatmul.mubr.bf16.gmra.mxu0 %v2208_v58 }
  0x84   :  { %1402 = vmatmul.mubr.bf16.gmra.mxu1 %v2209_v59  ;;  %1312 = vmatprep.mubr.bf16.mxu0 %v2211_v60 }
  0x85   :  { %1409 = vmatprep.mubr.bf16.mxu1 %v2213_v61 }
  0x8b   :  { %1313 = vmatmul.mubr.bf16.gmra.mxu0 %v2215_v62 }
  0x8c   :  { %1410 = vmatmul.mubr.bf16.gmra.mxu1 %v2216_v63  ;;  %1320 = vmatprep.mubr.bf16.mxu0 %v2218_v0 }
  0x8d   :  { %1417 = vmatprep.mubr.bf16.mxu1 %v2220_v1 }
  0x93   :  { %1321 = vmatmul.mubr.bf16.gmra.mxu0 %v2222_v2 }
  0x94   :  { %1418 = vmatmul.mubr.bf16.gmra.mxu1 %v2223_v3  ;;  %1328 = vmatprep.mubr.bf16.mxu0 %v2225_v4 }
  0x95   :  { %1425 = vmatprep.mubr.bf16.mxu1 %v2227_v5 }
  0x9b   :  { %1329 = vmatmul.mubr.bf16.gmra.mxu0 %v2229_v6 }
  0x9c   :  { %1426 = vmatmul.mubr.bf16.gmra.mxu1 %v2230_v7  ;;  %2032 = vmatprep.mubr.bf16.mxu0 %v2232_v8 }
  0x9d   :  { %2040 = vmatprep.mubr.bf16.mxu1 %v2233_v9 }
  0xa3   :  { %2033 = vmatmul.mubr.bf16.vlgmr.msra.gmra.mxu0 %v2234_v10 }
  0xa4   :  { %2041 = vmatmul.mubr.bf16.vlgmr.msra.gmra.mxu1 %v2235_v11  ;;  %2036 = vmatprep.mubr.bf16.mxu0 %v2236_v12 }
  0xa5   :  { %2044 = vmatprep.mubr.bf16.mxu1 %v2237_v13 }
  0xab   :  { %2037 = vmatmul.mubr.bf16.gmra.mxu0 %v2238_v14 }
  0xac   :  { %2045 = vmatmul.mubr.bf16.gmra.mxu1 %v2239_v15 }
  0xe3   :  { %v1760_v16 = vpop.f32.mrf.mxu0 }
  0xe4   :  { %v1824_v17 = vpop.f32.mrf.mxu1 }
  0xe5   :  { %v1761_v19 = vpop.f32.mrf.mxu0 }
  0xe6   :  { %v1762_v20 = vadd.f32 %v1761_v19, %v1760_v16  ;;  %v1825_v21 = vpop.f32.mrf.mxu1 }
  0xe7   :  { %v1826_v22 = vadd.f32 %v1825_v21, %v1824_v17  ;;  %v1763_v23 = vpop.f32.mrf.mxu0 }
  0xe8   :  { %v1081_v24 = vadd.f32 %v1762_v20, %v2695_v18  ;;  %v1827_v25 = vpop.f32.mrf.mxu1 }
  0xe9   :  { %v1764_v26 = vpop.f32.mrf.mxu0 }
  0xea   :  { %v2698_v27 = vadd.f32 %v1826_v22, %v1081_v24  ;;  %v1765_v28 = vadd.f32 %v1764_v26, %v1763_v23  ;;  %v1828_v29 = vpop.f32.mrf.mxu1 }
  0xeb   :  { %v1829_v30 = vadd.f32 %v1828_v29, %v1827_v25  ;;  %v1766_v31 = vpop.f32.mrf.mxu0 }
  0xec   :  { %v1084_v32 = vadd.f32 %v1765_v28, %v2695_v18  ;;  %v1830_v33 = vpop.f32.mrf.mxu1 }
  0xed   :  { %v1767_v34 = vpop.f32.mrf.mxu0 }
  0xee   :  { %v2701_v35 = vadd.f32 %v1829_v30, %v1084_v32  ;;  %v1768_v36 = vadd.f32 %v1767_v34, %v1766_v31  ;;  %v1831_v37 = vpop.f32.mrf.mxu1 }
  0xef   :  { %v1832_v38 = vadd.f32 %v1831_v37, %v1830_v33  ;;  %v1769_v39 = vpop.f32.mrf.mxu0 }
  0xf0   :  { %v1089_v40 = vadd.f32 %v1768_v36, %v2695_v18  ;;  %v1833_v41 = vpop.f32.mrf.mxu1 }
  0xf1   :  { %v1770_v42 = vpop.f32.mrf.mxu0 }
  0xf2   :  { %v2704_v43 = vadd.f32 %v1832_v38, %v1089_v40  ;;  %v1771_v44 = vadd.f32 %v1770_v42, %v1769_v39  ;;  %v1834_v45 = vpop.f32.mrf.mxu1 }
  0xf3   :  { %v1835_v46 = vadd.f32 %v1834_v45, %v1833_v41  ;;  %v1772_v47 = vpop.f32.mrf.mxu0 }
  0xf4   :  { %v1092_v48 = vadd.f32 %v1771_v44, %v2695_v18  ;;  %v1836_v49 = vpop.f32.mrf.mxu1 }
  0xf5   :  { %v1773_v50 = vpop.f32.mrf.mxu0 }
  0xf6   :  { %v2707_v51 = vadd.f32 %v1835_v46, %v1092_v48  ;;  %v1774_v52 = vadd.f32 %v1773_v50, %v1772_v47  ;;  %v1837_v53 = vpop.f32.mrf.mxu1 }
  0xf7   :  { %v1838_v54 = vadd.f32 %v1837_v53, %v1836_v49  ;;  %v1775_v55 = vpop.f32.mrf.mxu0 }
  0xf8   :  { %v1097_v56 = vadd.f32 %v1774_v52, %v2695_v18  ;;  %v1839_v57 = vpop.f32.mrf.mxu1 }
  0xf9   :  { %v1776_v58 = vpop.f32.mrf.mxu0 }
  0xfa   :  { %v2710_v59 = vadd.f32 %v1838_v54, %v1097_v56  ;;  %v1777_v60 = vadd.f32 %v1776_v58, %v1775_v55  ;;  %v1840_v61 = vpop.f32.mrf.mxu1 }
  0xfb   :  { %v1841_v62 = vadd.f32 %v1840_v61, %v1839_v57  ;;  %v1778_v63 = vpop.f32.mrf.mxu0 }
  0xfc   :  { %v1100_v0 = vadd.f32 %v1777_v60, %v2695_v18  ;;  %v1842_v1 = vpop.f32.mrf.mxu1 }
  0xfd   :  { %v1779_v2 = vpop.f32.mrf.mxu0 }
  0xfe   :  { %v2713_v3 = vadd.f32 %v1841_v62, %v1100_v0  ;;  %v1780_v4 = vadd.f32 %v1779_v2, %v1778_v63  ;;  %v1843_v5 = vpop.f32.mrf.mxu1 }
  0xff   :  { %v1844_v6 = vadd.f32 %v1843_v5, %v1842_v1  ;;  %v1781_v7 = vpop.f32.mrf.mxu0 }
 0x100   :  { %v1105_v8 = vadd.f32 %v1780_v4, %v2695_v18  ;;  %v1845_v9 = vpop.f32.mrf.mxu1 }
 0x101   :  { %v1782_v10 = vpop.f32.mrf.mxu0 }
 0x102   :  { %v2716_v11 = vadd.f32 %v1844_v6, %v1105_v8  ;;  %v1783_v12 = vadd.f32 %v1782_v10, %v1781_v7  ;;  %v1846_v13 = vpop.f32.mrf.mxu1 }
 0x103   :  { %v1847_v14 = vadd.f32 %v1846_v13, %v1845_v9  ;;  %v1784_v15 = vpop.f32.mrf.mxu0 }
 0x104   :  { %v1108_v16 = vadd.f32 %v1783_v12, %v2695_v18  ;;  %v1848_v17 = vpop.f32.mrf.mxu1 }
 0x105   :  { %v1785_v19 = vpop.f32.mrf.mxu0 }
 0x106   :  { %v2719_v20 = vadd.f32 %v1847_v14, %v1108_v16  ;;  %v1786_v21 = vadd.f32 %v1785_v19, %v1784_v15  ;;  %v1849_v22 = vpop.f32.mrf.mxu1 }
 0x107   :  { %v1850_v23 = vadd.f32 %v1849_v22, %v1848_v17  ;;  %v1787_v24 = vpop.f32.mrf.mxu0 }
 0x108   :  { %v1113_v25 = vadd.f32 %v1786_v21, %v2695_v18  ;;  %v1851_v26 = vpop.f32.mrf.mxu1 }
 0x109   :  { %v1788_v28 = vpop.f32.mrf.mxu0 }
 0x10a   :  { %v2722_v29 = vadd.f32 %v1850_v23, %v1113_v25  ;;  %v1789_v30 = vadd.f32 %v1788_v28, %v1787_v24  ;;  %v1852_v31 = vpop.f32.mrf.mxu1 }
 0x10b   :  { %v1853_v32 = vadd.f32 %v1852_v31, %v1851_v26  ;;  %v1790_v33 = vpop.f32.mrf.mxu0 }
 0x10c   :  { %v1116_v34 = vadd.f32 %v1789_v30, %v2695_v18  ;;  %v1854_v36 = vpop.f32.mrf.mxu1 }
 0x10d   :  { %v1791_v37 = vpop.f32.mrf.mxu0 }
 0x10e   :  { %v2725_v38 = vadd.f32 %v1853_v32, %v1116_v34  ;;  %v1792_v39 = vadd.f32 %v1791_v37, %v1790_v33  ;;  %v1855_v40 = vpop.f32.mrf.mxu1 }
 0x10f   :  { %v1856_v41 = vadd.f32 %v1855_v40, %v1854_v36  ;;  %v1793_v42 = vpop.f32.mrf.mxu0 }
 0x110   :  { %2879 = vst [vmem:[#allocation2_spill] sm:$0xff] %v2725_v38  ;;  %v1121_v44 = vadd.f32 %v1792_v39, %v2695_v18  ;;  %v1857_v45 = vpop.f32.mrf.mxu1 }
 0x111   :  { %v1794_v46 = vpop.f32.mrf.mxu0 }
 0x112   :  { %v2728_v47 = vadd.f32 %v1856_v41, %v1121_v44  ;;  %v1795_v48 = vadd.f32 %v1794_v46, %v1793_v42  ;;  %v1858_v49 = vpop.f32.mrf.mxu1 }
 0x113   :  { %v1859_v50 = vadd.f32 %v1858_v49, %v1857_v45  ;;  %v1796_v52 = vpop.f32.mrf.mxu0 }
 0x114   :  { %2880 = vst [vmem:[#allocation3_spill] sm:$0xff] %v2728_v47  ;;  %v1124_v53 = vadd.f32 %v1795_v48, %v2695_v18  ;;  %v1860_v54 = vpop.f32.mrf.mxu1 }
 0x115   :  { %v1797_v55 = vpop.f32.mrf.mxu0 }
 0x116   :  { %v2731_v56 = vadd.f32 %v1859_v50, %v1124_v53  ;;  %v1798_v57 = vadd.f32 %v1797_v55, %v1796_v52  ;;  %v1861_v58 = vpop.f32.mrf.mxu1 }
 0x117   :  { %v1862_v60 = vadd.f32 %v1861_v58, %v1860_v54  ;;  %v1799_v61 = vpop.f32.mrf.mxu0 }
 0x118   :  { %2881 = vst [vmem:[#allocation4_spill] sm:$0xff] %v2731_v56  ;;  %v1129_v62 = vadd.f32 %v1798_v57, %v2695_v18  ;;  %v1863_v63 = vpop.f32.mrf.mxu1 }
 0x119   :  { %v1800_v0 = vpop.f32.mrf.mxu0 }
 0x11a   :  { %v2734_v1 = vadd.f32 %v1862_v60, %v1129_v62  ;;  %v1801_v2 = vadd.f32 %v1800_v0, %v1799_v61  ;;  %v1864_v4 = vpop.f32.mrf.mxu1 }
 0x11b   :  { %v1865_v5 = vadd.f32 %v1864_v4, %v1863_v63  ;;  %v1802_v6 = vpop.f32.mrf.mxu0 }
 0x11c   :  { %2882 = vst [vmem:[#allocation5_spill] sm:$0xff] %v2734_v1  ;;  %v1132_v7 = vadd.f32 %v1801_v2, %v2695_v18  ;;  %v1866_v8 = vpop.f32.mrf.mxu1 }
 0x11d   :  { %v1803_v9 = vpop.f32.mrf.mxu0 }
 0x11e   :  { %v2737_v10 = vadd.f32 %v1865_v5, %v1132_v7  ;;  %v1804_v12 = vadd.f32 %v1803_v9, %v1802_v6  ;;  %v1867_v13 = vpop.f32.mrf.mxu1 }
 0x11f   :  { %v1868_v14 = vadd.f32 %v1867_v13, %v1866_v8  ;;  %v1805_v15 = vpop.f32.mrf.mxu0 }
 0x120   :  { %2883 = vst [vmem:[#allocation6_spill] sm:$0xff] %v2737_v10  ;;  %v1137_v16 = vadd.f32 %v1804_v12, %v2695_v18  ;;  %v1869_v17 = vpop.f32.mrf.mxu1 }
 0x121   :  { %v1806_v19 = vpop.f32.mrf.mxu0 }
 0x122   :  { %v2740_v21 = vadd.f32 %v1868_v14, %v1137_v16  ;;  %v1807_v22 = vadd.f32 %v1806_v19, %v1805_v15  ;;  %v1870_v23 = vpop.f32.mrf.mxu1 }
 0x123   :  { %v1871_v24 = vadd.f32 %v1870_v23, %v1869_v17  ;;  %v1888_v25 = vpop.f32.mrf.mxu0 }
 0x124   :  { %2884 = vst [vmem:[#allocation7_spill] sm:$0xff] %v2740_v21  ;;  %v1140_v26 = vadd.f32 %v1807_v22, %v2695_v18  ;;  %v1952_v28 = vpop.f32.mrf.mxu1 }
 0x125   :  { %v1889_v30 = vpop.f32.mrf.mxu0 }
 0x126   :  { %v2743_v31 = vadd.f32 %v1871_v24, %v1140_v26  ;;  %v1953_v32 = vpop.f32.mrf.mxu1  ;;  %v1890_v24 = vadd.f32 %v1889_v30, %v1888_v25 }
 0x127   :  { %v1891_v33 = vpop.f32.mrf.mxu0  ;;  %v1954_v47 = vadd.f32 %v1953_v32, %v1952_v28 }
 0x128   :  { %2885 = vst [vmem:[#allocation8_spill] sm:$0xff] %v2743_v31  ;;  %v1955_v34 = vpop.f32.mrf.mxu1 }
 0x129   :  { %v1892_v36 = vpop.f32.mrf.mxu0 }
 0x12a   :  { %v1956_v37 = vpop.f32.mrf.mxu1  ;;  %v1893_v31 = vadd.f32 %v1892_v36, %v1891_v33 }
 0x12b   :  { %v1894_v39 = vpop.f32.mrf.mxu0  ;;  %v1957_v38 = vadd.f32 %v1956_v37, %v1955_v34 }
 0x12c   :  { %v1958_v40 = vpop.f32.mrf.mxu1 }
 0x12d   :  { %v1895_v41 = vpop.f32.mrf.mxu0 }
 0x12e   :  { %v1959_v42 = vpop.f32.mrf.mxu1  ;;  %v1896_v21 = vadd.f32 %v1895_v41, %v1894_v39 }
 0x12f   :  { %v1897_v44 = vpop.f32.mrf.mxu0  ;;  %v1960_v33 = vadd.f32 %v1959_v42, %v1958_v40 }
 0x130   :  { %v1961_v45 = vpop.f32.mrf.mxu1 }
 0x131   :  { %v1898_v46 = vpop.f32.mrf.mxu0 }
 0x132   :  { %v1962_v48 = vpop.f32.mrf.mxu1  ;;  %v1899_v56 = vadd.f32 %v1898_v46, %v1897_v44 }
 0x133   :  { %v1900_v49 = vpop.f32.mrf.mxu0 }
 0x134   :  { %v2745_v50 = vpop.f32.mrf.mxu1  ;;  %v1286_v36 = vadd.f32 %v1899_v56, %v2707_v51 }
 0x135   :  { %v1901_v18 = vpop.f32.mrf.mxu0 }
 0x136   :  { %v2747_v52 = vpop.f32.mrf.mxu1 }
 0x137   :  { %v1903_v53 = vpop.f32.mrf.mxu0 }
 0x138   :  { %v2749_v54 = vpop.f32.mrf.mxu1 }
 0x139   :  { %v1904_v55 = vpop.f32.mrf.mxu0 }
 0x13a   :  { %v2751_v57 = vpop.f32.mrf.mxu1  ;;  %v1905_v25 = vadd.f32 %v1904_v55, %v1903_v53  ;;  %v2894_v55 = vld [vmem:[#allocation2_spill] sm:$0xff] }
 0x13b   :  { %v1906_v58 = vpop.f32.mrf.mxu0 }
 0x13c   :  { %v2753_v60 = vpop.f32.mrf.mxu1  ;;  %v1294_v28 = vadd.f32 %v1905_v25, %v2713_v3  ;;  %v2906_v25 = vld [vmem:[#allocation7_spill] sm:$0xff] }
 0x13d   :  { %v1907_v61 = vpop.f32.mrf.mxu0 }
 0x13e   :  { %v2755_v62 = vpop.f32.mrf.mxu1  ;;  %v1908_v39 = vadd.f32 %v1907_v61, %v1906_v58  ;;  %v2895_v61 = vld [vmem:[#allocation3_spill] sm:$0xff] }
 0x13f   :  { %v1909_v63 = vpop.f32.mrf.mxu0  ;;  %v1972_v3 = vadd.f32 %v2755_v62, %v2753_v60 }
 0x140   :  { %v2757_v0 = vpop.f32.mrf.mxu1  ;;  %v1299_v51 = vadd.f32 %v1908_v39, %v2716_v11 }
 0x141   :  { %v1910_v2 = vpop.f32.mrf.mxu0 }
 0x142   :  { %v1974_v4 = vpop.f32.mrf.mxu1  ;;  %v1911_v41 = vadd.f32 %v1910_v2, %v1909_v63 }
 0x143   :  { %v1912_v5 = vpop.f32.mrf.mxu0 }
 0x144   :  { %v2759_v6 = vpop.f32.mrf.mxu1  ;;  %v1302_v56 = vadd.f32 %v1911_v41, %v2719_v20 }
 0x145   :  { %2886 = vst [vmem:[#allocation9_spill] sm:$0xff] %v2759_v6  ;;  %v1913_v7 = vpop.f32.mrf.mxu0  ;;  %v1283_v6 = vadd.f32 %v1896_v21, %v2704_v43 }
 0x146   :  { %v2761_v8 = vpop.f32.mrf.mxu1 }
 0x147   :  { %2887 = vst [vmem:[#allocation10_spill] sm:$0xff] %v2761_v8  ;;  %v1915_v9 = vpop.f32.mrf.mxu0 }
 0x148   :  { %v2763_v12 = vpop.f32.mrf.mxu1 }
 0x149   :  { %2888 = vst [vmem:[#allocation11_spill] sm:$0xff] %v2763_v12  ;;  %v1916_v13 = vpop.f32.mrf.mxu0 }
 0x14a   :  { %v2765_v14 = vpop.f32.mrf.mxu1  ;;  %v1917_v32 = vadd.f32 %v1916_v13, %v1915_v9 }
 0x14b   :  { %2889 = vst [vmem:[#allocation12_spill] sm:$0xff] %v2765_v14  ;;  %v1918_v15 = vpop.f32.mrf.mxu0  ;;  %v1275_v14 = vadd.f32 %v1890_v24, %v2698_v27  ;;  %v1963_v27 = vadd.f32 %v1962_v48, %v1961_v45  ;;  %v1914_v24 = vadd.f32 %v1913_v7, %v1912_v5  ;;  %v1966_v45 = vadd.f32 %v2747_v52, %v2745_v50  ;;  %v2898_v5 = vld [vmem:[#allocation4_spill] sm:$0xff] }
 0x14c   :  { %v2767_v16 = vpop.f32.mrf.mxu1  ;;  %v1310_v58 = vadd.f32 %v1917_v32, %v2894_v55 }
 0x14d   :  { %2890 = vst [vmem:[#allocation13_spill] sm:$0xff] %v2767_v16  ;;  %v1919_v17 = vpop.f32.mrf.mxu0  ;;  %v1278_v16 = vadd.f32 %v1893_v31, %v2701_v35  ;;  %v1380_v31 = vadd.f32 %v1960_v33, %v1283_v6  ;;  %v1383_v42 = vadd.f32 %v1963_v27, %v1286_v36  ;;  %v1307_v11 = vadd.f32 %v1914_v24, %v2722_v29 }
 0x14e   :  { %v2769_v19 = vpop.f32.mrf.mxu1  ;;  %v1920_v34 = vadd.f32 %v1919_v17, %v1918_v15 }
 0x14f   :  { %2891 = vst [vmem:[#allocation14_spill] sm:$0xff] %v2769_v19  ;;  %v1921_v22 = vpop.f32.mrf.mxu0  ;;  %v2781_v43 = vadd.f32 %v1957_v38, %v1278_v16  ;;  %v1969_v38 = vadd.f32 %v2751_v57, %v2749_v54  ;;  %v2897_v57 = vld [vmem:[#allocation10_spill] sm:$0xff] }
 0x150   :  { %v2771_v23 = vpop.f32.mrf.mxu1  ;;  %v1315_v63 = vadd.f32 %v1920_v34, %v2895_v61  ;;  %v2904_v16 = vld [vmem:[#allocation6_spill] sm:$0xff]  ;;  %v2908_v34 = vld [vmem:[#allocation8_spill] sm:$0xff] }
 0x151   :  { %2892 = vst [vmem:[#allocation15_spill] sm:$0xff] %v2771_v23  ;;  %v1922_v26 = vpop.f32.mrf.mxu0  ;;  %v1902_v23 = vadd.f32 %v1901_v18, %v1900_v49  ;;  %v1975_v18 = vadd.f32 %v1974_v4, %v2757_v0  ;;  %v2799_v54 = vadd.f32 %v1969_v38, %v1294_v28  ;;  %v2804_v0 = vadd.f32 %v1972_v3, %v1299_v51  ;;  %v2899_v4 = vld [vmem:[#allocation11_spill] sm:$0xff] }
 0x152   :  { %v1986_v10 = vpop.f32.mrf.mxu1  ;;  %v1923_v40 = vadd.f32 %v1922_v26, %v1921_v22  ;;  %v2900_v6 = vld [vmem:[#allocation12_spill] sm:$0xff] }
 0x153   :  { %v1924_v1 = vpop.f32.mrf.mxu0  ;;  %v1291_v21 = vadd.f32 %v1902_v23, %v2710_v59  ;;  %v2806_v29 = vadd.f32 %v1975_v18, %v1302_v56  ;;  %v1981_v7 = vadd.f32 %v2900_v6, %v2899_v4 }
 0x154   :  { %v2773_v12 = vpop.f32.mrf.mxu1  ;;  %v1318_v60 = vadd.f32 %v1923_v40, %v2898_v5 }
 0x155   :  { %2893 = vst [vmem:[#allocation16_spill] sm:$0xff] %v2773_v12  ;;  %v1925_v8 = vpop.f32.mrf.mxu0  ;;  %v2779_v12 = vadd.f32 %v1954_v47, %v1275_v14  ;;  %v2797_v52 = vadd.f32 %v1966_v45, %v1291_v21  ;;  %v2903_v14 = vld [vmem:[#allocation5_spill] sm:$0xff]  ;;  %v1407_v28 = vadd.f32 %v1981_v7, %v1310_v58 }
 0x156   :  { %v1989_v19 = vpop.f32.mrf.mxu1  ;;  %v1926_v48 = vadd.f32 %v1925_v8, %v1924_v1  ;;  %v2896_v1 = vld [vmem:[#allocation9_spill] sm:$0xff]  ;;  %v2902_v9 = vld [vmem:[#allocation14_spill] sm:$0xff] }
 0x157   :  { %v1927_v30 = vpop.f32.mrf.mxu0  ;;  %v1978_v2 = vadd.f32 %v2897_v57, %v2896_v1  ;;  %v2901_v8 = vld [vmem:[#allocation13_spill] sm:$0xff] }
 0x158   :  { %v1991_v44 = vpop.f32.mrf.mxu1  ;;  %v1984_v13 = vadd.f32 %v2902_v9, %v2901_v8  ;;  %v1323_v15 = vadd.f32 %v1926_v48, %v2903_v14  ;;  %v2905_v23 = vld [vmem:[#allocation15_spill] sm:$0xff] }
 0x159   :  { %v1928_v46 = vpop.f32.mrf.mxu0  ;;  %v1987_v26 = vadd.f32 %v1986_v10, %v2905_v23  ;;  %v1404_v39 = vadd.f32 %v1978_v2, %v1307_v11 }
 0x15a   :  { %v1992_v35 = vpop.f32.mrf.mxu1  ;;  %v1929_v59 = vadd.f32 %v1928_v46, %v1927_v30  ;;  %v1412_v21 = vadd.f32 %v1984_v13, %v1315_v63 }
 0x15b   :  { %v1930_v37 = vpop.f32.mrf.mxu0  ;;  %v1993_v27 = vadd.f32 %v1992_v35, %v1991_v44  ;;  %v1415_v40 = vadd.f32 %v1987_v26, %v1318_v60 }
 0x15c   :  { %v1994_v47 = vpop.f32.mrf.mxu1  ;;  %v1326_v17 = vadd.f32 %v1929_v59, %v2904_v16  ;;  %v2907_v41 = vld [vmem:[#allocation16_spill] sm:$0xff] }
 0x15d   :  { %v1931_v49 = vpop.f32.mrf.mxu0  ;;  %v1990_v46 = vadd.f32 %v1989_v19, %v2907_v41 }
 0x15e   :  { %v1932_v20 = vadd.f32 %v1931_v49, %v1930_v37  ;;  %v1995_v53 = vpop.f32.mrf.mxu1  ;;  %v2818_v59 = vadd.f32 %v1993_v27, %v1326_v17 }
 0x15f   :  { %v1933_v50 = vpop.f32.mrf.mxu0  ;;  %v1996_v32 = vadd.f32 %v1995_v53, %v1994_v47  ;;  %v1420_v48 = vadd.f32 %v1990_v46, %v1323_v15 }
 0x160   :  { %v1997_v62 = vpop.f32.mrf.mxu1  ;;  %v1331_v30 = vadd.f32 %v1932_v20, %v2906_v25 }
 0x161   :  { %v1934_v22 = vpop.f32.mrf.mxu0 }
 0x162   :  { %v1935_v33 = vadd.f32 %v1934_v22, %v1933_v50  ;;  %v1998_v36 = vpop.f32.mrf.mxu1  ;;  %v1428_v35 = vadd.f32 %v1996_v32, %v1331_v30 }
 0x163   :  { %v2034_v24 = vpop.f32.mrf.mxu0  ;;  %v1999_v45 = vadd.f32 %v1998_v36, %v1997_v62 }
 0x164   :  { %v1334_v37 = vadd.f32 %v1935_v33, %v2908_v34  ;;  %v1477_v51 = vadd.f32 %v2034_v24, %v1380_v31  ;;  %v2042_v56 = vpop.f32.mrf.mxu1 }
 0x165   :  { %v1509_v38 = vadd.f32 %v2042_v56, %v1412_v21  ;;  %v1468_v10 = vpop.f32.mrf.mxu0 }
 0x166   :  { %vm1533_vm0 = vcmp.ge.f32.partialorder %v1477_v51, 0.0  ;;  %v1549_v49 = vmul.f32 0.01, %v1477_v51  ;;  %v1469_v19 = vadd.f32 %v1468_v10, %v2779_v12  ;;  %v1500_v44 = vpop.f32.mrf.mxu1  ;;  %v1431_v11 = vadd.f32 %v1999_v45, %v1334_v37 }
 0x167   :  { %vm1541_vm1 = vcmp.ge.f32.partialorder %v1509_v38, 0.0  ;;  %v1557_v3 = vmul.f32 0.01, %v1509_v38  ;;  %v1501_v47 = vadd.f32 %v1500_v44, %v1404_v39  ;;  %v2035_v18 = vpop.f32.mrf.mxu0 }
 0x168   :  { %v1565_v31 = vsel %vm1533_vm0, %v1477_v51, %v1549_v49  ;;  %vm1531_vm2 = vcmp.ge.f32.partialorder %v1469_v19, 0.0  ;;  %v1547_v20 = vmul.f32 0.01, %v1469_v19  ;;  %v1480_v53 = vadd.f32 %v2035_v18, %v1383_v42  ;;  %v2043_v55 = vpop.f32.mrf.mxu1 }
 0x169   :  { %1581 = vst [vmem:[%s2878_s3 + $0x10] sm:$0xff] %v1565_v31  ;;  %v1573_v58 = vsel %vm1541_vm1, %v1509_v38, %v1557_v3  ;;  %vm1539_vm3 = vcmp.ge.f32.partialorder %v1501_v47, 0.0  ;;  %v1555_v61 = vmul.f32 0.01, %v1501_v47  ;;  %v1512_v12 = vadd.f32 %v2043_v55, %v1415_v40  ;;  %v1471_v63 = vpop.f32.mrf.mxu0 }
 0x16a   :  { %1589 = vst [vmem:[%s2878_s3 + $0x50] sm:$0xff] %v1573_v58  ;;  %v1563_v50 = vsel %vm1531_vm2, %v1469_v19, %v1547_v20  ;;  %vm1534_vm4 = vcmp.ge.f32.partialorder %v1480_v53, 0.0  ;;  %v1550_v1 = vmul.f32 0.01, %v1480_v53  ;;  %v1472_v57 = vadd.f32 %v1471_v63, %v2781_v43  ;;  %v1503_v42 = vpop.f32.mrf.mxu1 }
 0x16b   :  { %1579 = vst [vmem:[%s2878_s3] sm:$0xff] %v1563_v50  ;;  %v1571_v2 = vsel %vm1539_vm3, %v1501_v47, %v1555_v61  ;;  %vm1542_vm5 = vcmp.ge.f32.partialorder %v1512_v12, 0.0  ;;  %v1558_v5 = vmul.f32 0.01, %v1512_v12  ;;  %v1504_v60 = vadd.f32 %v1503_v42, %v1407_v28  ;;  %v2038_v62 = vpop.f32.mrf.mxu0 }
 0x16c   :  { %1587 = vst [vmem:[%s2878_s3 + $0x40] sm:$0xff] %v1571_v2  ;;  %v1566_v4 = vsel %vm1534_vm4, %v1480_v53, %v1550_v1  ;;  %vm1532_vm6 = vcmp.ge.f32.partialorder %v1472_v57, 0.0  ;;  %v1548_v6 = vmul.f32 0.01, %v1472_v57  ;;  %v1493_v7 = vadd.f32 %v2038_v62, %v2804_v0  ;;  %v2046_v43 = vpop.f32.mrf.mxu1 }
 0x16d   :  { %1582 = vst [vmem:[%s2878_s3 + $0x18] sm:$0xff] %v1566_v4  ;;  %v1574_v8 = vsel %vm1542_vm5, %v1512_v12, %v1558_v5  ;;  %vm1540_vm7 = vcmp.ge.f32.partialorder %v1504_v60, 0.0  ;;  %v1556_v9 = vmul.f32 0.01, %v1504_v60  ;;  %v1525_v13 = vadd.f32 %v2046_v43, %v1428_v35  ;;  %v1484_v14 = vpop.f32.mrf.mxu0 }
 0x16e   :  { %1590 = vst [vmem:[%s2878_s3 + $0x58] sm:$0xff] %v1574_v8  ;;  %v1564_v15 = vsel %vm1532_vm6, %v1472_v57, %v1548_v6  ;;  %vm1537_vm8 = vcmp.ge.f32.partialorder %v1493_v7, 0.0  ;;  %v1553_v16 = vmul.f32 0.01, %v1493_v7  ;;  %v1485_v17 = vadd.f32 %v1484_v14, %v2797_v52  ;;  %v1516_v0 = vpop.f32.mrf.mxu1 }
 0x16f   :  { %1580 = vst [vmem:[%s2878_s3 + $0x8] sm:$0xff] %v1564_v15  ;;  %v1572_v22 = vsel %vm1540_vm7, %v1504_v60, %v1556_v9  ;;  %vm1545_vm9 = vcmp.ge.f32.partialorder %v1525_v13, 0.0  ;;  %v1561_v23 = vmul.f32 0.01, %v1525_v13  ;;  %v1517_v26 = vadd.f32 %v1516_v0, %v1420_v48  ;;  %v2039_v25 = vpop.f32.mrf.mxu0 }
 0x170   :  { %1588 = vst [vmem:[%s2878_s3 + $0x48] sm:$0xff] %v1572_v22  ;;  %v1569_v30 = vsel %vm1537_vm8, %v1493_v7, %v1553_v16  ;;  %vm1535_vm10 = vcmp.ge.f32.partialorder %v1485_v17, 0.0  ;;  %v1551_v33 = vmul.f32 0.01, %v1485_v17  ;;  %v1496_v36 = vadd.f32 %v2039_v25, %v2806_v29  ;;  %v2047_v52 = vpop.f32.mrf.mxu1 }
 0x171   :  { %1585 = vst [vmem:[%s2878_s3 + $0x30] sm:$0xff] %v1569_v30  ;;  %v1577_v39 = vsel %vm1545_vm9, %v1525_v13, %v1561_v23  ;;  %vm1543_vm11 = vcmp.ge.f32.partialorder %v1517_v26, 0.0  ;;  %v1559_v41 = vmul.f32 0.01, %v1517_v26  ;;  %v1528_v46 = vadd.f32 %v2047_v52, %v1431_v11  ;;  %v1487_v27 = vpop.f32.mrf.mxu0 }
 0x172   :  { %1593 = vst [vmem:[%s2878_s3 + $0x70] sm:$0xff] %v1577_v39  ;;  %v1567_v24 = vsel %vm1535_vm10, %v1485_v17, %v1551_v33  ;;  %vm1538_vm12 = vcmp.ge.f32.partialorder %v1496_v36, 0.0  ;;  %v1554_v21 = vmul.f32 0.01, %v1496_v36  ;;  %v1488_v28 = vadd.f32 %v1487_v27, %v2799_v54  ;;  %v1519_v29 = vpop.f32.mrf.mxu1 }
 0x173   :  { %1583 = vst [vmem:[%s2878_s3 + $0x20] sm:$0xff] %v1567_v24  ;;  %v1575_v32 = vsel %vm1543_vm11, %v1517_v26, %v1559_v41  ;;  %vm1546_vm13 = vcmp.ge.f32.partialorder %v1528_v46, 0.0  ;;  %v1562_v34 = vmul.f32 0.01, %v1528_v46  ;;  %v1520_v37 = vadd.f32 %v1519_v29, %v2818_v59 }
 0x174   :  { %1591 = vst [vmem:[%s2878_s3 + $0x60] sm:$0xff] %v1575_v32  ;;  %v1570_v51 = vsel %vm1538_vm12, %v1496_v36, %v1554_v21  ;;  %vm1536_vm14 = vcmp.ge.f32.partialorder %v1488_v28, 0.0  ;;  %v1552_v56 = vmul.f32 0.01, %v1488_v28 }
 0x175   :  { %1586 = vst [vmem:[%s2878_s3 + $0x38] sm:$0xff] %v1570_v51  ;;  %v1578_v54 = vsel %vm1546_vm13, %v1528_v46, %v1562_v34  ;;  %vm1544_vm15 = vcmp.ge.f32.partialorder %v1520_v37, 0.0  ;;  %v1560_v40 = vmul.f32 0.01, %v1520_v37 }
 0x176   :  { %1594 = vst [vmem:[%s2878_s3 + $0x78] sm:$0xff] %v1578_v54  ;;  %v1568_v45 = vsel %vm1536_vm14, %v1488_v28, %v1552_v56 }
 0x177   :  { %1584 = vst [vmem:[%s2878_s3 + $0x28] sm:$0xff] %v1568_v45  ;;  %v1576_v38 = vsel %vm1544_vm15, %v1520_v37, %v1560_v40 }
 0x178   :  { %1592 = vst [vmem:[%s2878_s3 + $0x68] sm:$0xff] %v1576_v38 }

// kernel: reference_encoder_pallas.8
= control target key start
LH: loop header
LB: loop body
LE: loop exit
PB: predicated region body
PF: predicated region fallthrough
CT: control target
= control target key end

     0   :  { %v6742_v0 = vmov 0   ;;  %vm4179_vm0 = vcmask 1043456   ;;  %vm4082_vm1 = vcmask 64512   ;;  %s9780_s2 = inlined_call_operand.vmem [shape: bf16[1152,128], index: 2, kind: input, shape index: {}]   ;;  %s9781_s0 = inlined_call_operand.vmem [shape: bf16[512,1152], index: 0, kind: input, shape index: {}]   ;;  %s9782_s3 = inlined_call_operand.vmem [shape: f32[1,128], index: 3, kind: input, shape index: {}]   ;;  %s9783_s4 = inlined_call_operand.vmem [shape: bf16[8,128], index: 4, kind: input, shape index: {}]   ;;  %s9784_s6 = inlined_call_operand.vmem [shape: f32[128,128], index: 6, kind: input, shape index: {}]   ;;  %s9785_s1 = inlined_call_operand.vmem [shape: bf16[512,8], index: 1, kind: input, shape index: {}]   ;;  %s9786_s7 = inlined_call_operand.vmem [shape: f32[1,128], index: 7, kind: input, shape index: {}]   ;;  %s9787_s5 = inlined_call_operand.vmem [shape: f32[1,128], index: 5, kind: input, shape index: {}]   ;;  %s9788_s8 = inlined_call_operand.vmem [shape: f32[512,128], index: 8, kind: output, shape index: {}]  }
   0x1   :  { %2405 = vmatprep.subr.bf16.mxu0 %v6742_v0  ;;  %6058 = vmatprep.subr.bf16.mxu1 %v6742_v0  ;;  %v6092_v1 = vld [vmem:[%s9780_s2 + $0x38] sm:$0xff]   ;;  %v6093_v2 = vld [vmem:[%s9780_s2 + $0x30] sm:$0xff]   ;;  %v6094_v3 = vld [vmem:[%s9780_s2 + $0x28] sm:$0xff]  }
   0x2   :  { %2406 = vmatpush1.bf16.msra.mxu0 %v6092_v1  ;;  %6074 = vmatpush1.bf16.msra.mxu1 %v6092_v1  ;;  %v6095_v4 = vld [vmem:[%s9780_s2 + $0x20] sm:$0xff]   ;;  %v6096_v5 = vld [vmem:[%s9780_s2 + $0x18] sm:$0xff]   ;;  %v6097_v7 = vld [vmem:[%s9780_s2 + $0x10] sm:$0xff]  }
   0x3   :  { %2407 = vmatprep.subr.bf16.mxu0 %v6742_v0  ;;  %6059 = vmatprep.subr.bf16.mxu1 %v6742_v0  ;;  %v6110_v6 = vld [vmem:[%s9781_s0 + $0x4] ss:$36 sps:$4 sm:$0xff]   ;;  %v6100_v11 = vld [vmem:[%s9780_s2 + $0x78] sm:$0xff]   ;;  %v6101_v12 = vld [vmem:[%s9780_s2 + $0x70] sm:$0xff]  }
   0x4   :  { %v6113_v8 = vld [vmem:[%s9781_s0 + $0x6c4] ss:$36 sps:$4 sm:$0xff]   ;;  %2437 = vmatprep.mubr.bf16.mxu0 %v6110_v6  ;;  %v6104_v15 = vld [vmem:[%s9780_s2 + $0x58] sm:$0xff]   ;;  %v6105_v16 = vld [vmem:[%s9780_s2 + $0x50] sm:$0xff]  }
   0x5   :  { %2629 = vmatprep.mubr.bf16.mxu1 %v6113_v8  ;;  %v6098_v9 = vld [vmem:[%s9780_s2 + $0x8] sm:$0xff]   ;;  %v6099_v10 = vld [vmem:[%s9780_s2] sm:$0xff]   ;;  %v6114_v21 = vld [vmem:[%s9780_s2 + $0xb8] sm:$0xff]  }
   0x6   :  { %2408 = vmatpush1.bf16.msra.mxu0 %v6093_v2  ;;  %6075 = vmatpush1.bf16.msra.mxu1 %v6093_v2  ;;  %v6102_v13 = vld [vmem:[%s9780_s2 + $0x68] sm:$0xff]   ;;  %v6103_v14 = vld [vmem:[%s9780_s2 + $0x60] sm:$0xff]   ;;  %v6115_v22 = vld [vmem:[%s9780_s2 + $0x138] sm:$0xff]  }
   0x7   :  { %2409 = vmatprep.subr.bf16.mxu0 %v6742_v0  ;;  %6060 = vmatprep.subr.bf16.mxu1 %v6742_v0  ;;  %v6106_v17 = vld [vmem:[%s9780_s2 + $0x48] sm:$0xff]   ;;  %v6107_v18 = vld [vmem:[%s9780_s2 + $0x40] sm:$0xff]   ;;  %v6116_v25 = vld [vmem:[%s9780_s2 + $0xb0] sm:$0xff]  }
   0x8   :  { %v6108_v19 = vld [vmem:[%s9781_s0] ss:$36 sps:$4 sm:$0xff]   ;;  %v6117_v23 = vld [vmem:[%s9781_s0 + $0x4c] ss:$36 sps:$4 sm:$0xff]   ;;  %v6126_v30 = vld [vmem:[%s9781_s0 + $0x94] ss:$36 sps:$4 sm:$0xff]  }
   0x9   :  { %v6111_v20 = vld [vmem:[%s9781_s0 + $0x6c0] ss:$36 sps:$4 sm:$0xff]   ;;  %v6119_v24 = vld [vmem:[%s9781_s0 + $0x70c] ss:$36 sps:$4 sm:$0xff]   ;;  %v6128_v31 = vld [vmem:[%s9781_s0 + $0x754] ss:$36 sps:$4 sm:$0xff]  }
   0xa   :  { %2410 = vmatpush1.bf16.msra.mxu0 %v6094_v3  ;;  %6076 = vmatpush1.bf16.msra.mxu1 %v6094_v3  ;;  %v6125_v26 = vld [vmem:[%s9780_s2 + $0x130] sm:$0xff]   ;;  %v6121_v27 = vld [vmem:[%s9781_s0 + $0x48] ss:$36 sps:$4 sm:$0xff]   ;;  %v6124_v33 = vld [vmem:[%s9780_s2 + $0xa0] sm:$0xff]  }
   0xb   :  { %2411 = vmatprep.subr.bf16.mxu0 %v6742_v0  ;;  %6061 = vmatprep.subr.bf16.mxu1 %v6742_v0  ;;  %v6122_v28 = vld [vmem:[%s9781_s0 + $0x708] ss:$36 sps:$4 sm:$0xff]   ;;  %v6130_v34 = vld [vmem:[%s9781_s0 + $0x90] ss:$36 sps:$4 sm:$0xff]   ;;  %v6151_v36 = vld [vmem:[%s9780_s2 + $0x120] sm:$0xff]  }
   0xc   :  { %v6123_v29 = vld [vmem:[%s9780_s2 + $0xa8] sm:$0xff]   ;;  %v6131_v35 = vld [vmem:[%s9781_s0 + $0x750] ss:$36 sps:$4 sm:$0xff]   ;;  %v6132_v37 = vld [vmem:[%s9780_s2 + $0x98] sm:$0xff]  }
   0xd   :  { %v6141_v32 = vld [vmem:[%s9780_s2 + $0x128] sm:$0xff]   ;;  %v6134_v38 = vld [vmem:[%s9781_s0 + $0xdc] ss:$36 sps:$4 sm:$0xff]   ;;  %v6133_v41 = vld [vmem:[%s9780_s2 + $0x90] sm:$0xff]  }
   0xe   :  { %2412 = vmatpush1.bf16.msra.mxu0 %v6095_v4  ;;  %6077 = vmatpush1.bf16.msra.mxu1 %v6095_v4  ;;  %v6136_v39 = vld [vmem:[%s9781_s0 + $0x79c] ss:$36 sps:$4 sm:$0xff]   ;;  %v6140_v44 = vld [vmem:[%s9780_s2 + $0x88] sm:$0xff]   ;;  %v6177_v47 = vld [vmem:[%s9780_s2 + $0x110] sm:$0xff]  }
   0xf   :  { %2413 = vmatprep.subr.bf16.mxu0 %v6742_v0  ;;  %6062 = vmatprep.subr.bf16.mxu1 %v6742_v0  ;;  %v6167_v40 = vld [vmem:[%s9780_s2 + $0x118] sm:$0xff]   ;;  %v6143_v45 = vld [vmem:[%s9781_s0 + $0x124] ss:$36 sps:$4 sm:$0xff]   ;;  %v6152_v53 = vld [vmem:[%s9781_s0 + $0x16c] ss:$36 sps:$4 sm:$0xff]  }
  0x10   :  { %v6138_v42 = vld [vmem:[%s9781_s0 + $0xd8] ss:$36 sps:$4 sm:$0xff]   ;;  %v6145_v46 = vld [vmem:[%s9781_s0 + $0x7e4] ss:$36 sps:$4 sm:$0xff]   ;;  %v6154_v54 = vld [vmem:[%s9781_s0 + $0x82c] ss:$36 sps:$4 sm:$0xff]  }
  0x11   :  { %v6139_v43 = vld [vmem:[%s9781_s0 + $0x798] ss:$36 sps:$4 sm:$0xff]   ;;  %v6142_v48 = vld [vmem:[%s9780_s2 + $0x80] sm:$0xff]   ;;  %v6191_v51 = vld [vmem:[%s9780_s2 + $0x108] sm:$0xff]  }
  0x12   :  { %2414 = vmatpush1.bf16.msra.mxu0 %v6096_v5  ;;  %6078 = vmatpush1.bf16.msra.mxu1 %v6096_v5  ;;  %v6147_v49 = vld [vmem:[%s9781_s0 + $0x120] ss:$36 sps:$4 sm:$0xff]   ;;  %v6149_v52 = vld [vmem:[%s9780_s2 + $0xf8] sm:$0xff]   ;;  %v6150_v56 = vld [vmem:[%s9780_s2 + $0xf0] sm:$0xff]  }
  0x13   :  { %2415 = vmatprep.subr.bf16.mxu0 %v6742_v0  ;;  %6063 = vmatprep.subr.bf16.mxu1 %v6742_v0  ;;  %v6148_v50 = vld [vmem:[%s9781_s0 + $0x7e0] ss:$36 sps:$4 sm:$0xff]   ;;  %v6156_v57 = vld [vmem:[%s9781_s0 + $0x168] ss:$36 sps:$4 sm:$0xff]   ;;  %v6160_v60 = vld [vmem:[%s9781_s0 + $0x1b4] ss:$36 sps:$4 sm:$0xff]  }
  0x14   :  { %v6198_v55 = vld [vmem:[%s9780_s2 + $0x100] sm:$0xff]   ;;  %v6157_v58 = vld [vmem:[%s9781_s0 + $0x828] ss:$36 sps:$4 sm:$0xff]   ;;  %v6162_v61 = vld [vmem:[%s9781_s0 + $0x874] ss:$36 sps:$4 sm:$0xff]  }
  0x15   :  { %v6158_v59 = vld [vmem:[%s9780_s2 + $0xe8] sm:$0xff]   ;;  %v6212_v62 = vld [vmem:[%s9780_s2 + $0x178] sm:$0xff]   ;;  %v6159_v63 = vld [vmem:[%s9780_s2 + $0xe0] sm:$0xff]  }
  0x16   :  { %2416 = vmatpush1.bf16.msra.mxu0 %v6097_v7  ;;  %6079 = vmatpush1.bf16.msra.mxu1 %v6097_v7  ;;  %v6164_v1 = vld [vmem:[%s9781_s0 + $0x1b0] ss:$36 sps:$4 sm:$0xff]   ;;  %v6166_v4 = vld [vmem:[%s9780_s2 + $0xd8] sm:$0xff]   ;;  %v6234_v7 = vld [vmem:[%s9780_s2 + $0x168] sm:$0xff]  }
  0x17   :  { %2417 = vmatprep.subr.bf16.mxu0 %v6742_v0  ;;  %6064 = vmatprep.subr.bf16.mxu1 %v6742_v0  ;;  %v6165_v2 = vld [vmem:[%s9781_s0 + $0x870] ss:$36 sps:$4 sm:$0xff]   ;;  %v6169_v5 = vld [vmem:[%s9781_s0 + $0x1fc] ss:$36 sps:$4 sm:$0xff]  }
  0x18   :  { %v6220_v3 = vld [vmem:[%s9780_s2 + $0x170] sm:$0xff]   ;;  %v6171_v6 = vld [vmem:[%s9781_s0 + $0x8bc] ss:$36 sps:$4 sm:$0xff]  }
  0x19   :  { %v6168_v8 = vld [vmem:[%s9780_s2 + $0xd0] sm:$0xff]  }
  0x1a   :  { %2418 = vmatpush1.bf16.msra.mxu0 %v6098_v9  ;;  %6080 = vmatpush1.bf16.msra.mxu1 %v6098_v9  ;;  %v6173_v9 = vld [vmem:[%s9781_s0 + $0x1f8] ss:$36 sps:$4 sm:$0xff]  }
  0x1b   :  { %2419 = vmatprep.subr.bf16.mxu0 %v6742_v0  ;;  %6065 = vmatprep.subr.bf16.mxu1 %v6742_v0 }
  0x1e   :  { %2420 = vmatpush1.bf16.msra.mxu0 %v6099_v10  ;;  %6081 = vmatpush1.bf16.msra.mxu1 %v6099_v10  ;;  %v6174_v10 = vld [vmem:[%s9781_s0 + $0x8b8] ss:$36 sps:$4 sm:$0xff]  }
  0x1f   :  { %2421 = vmatprep.subr.bf16.mxu0 %v6742_v0  ;;  %6066 = vmatprep.subr.bf16.mxu1 %v6742_v0 }
  0x22   :  { %2422 = vmatpush2.bf16.msra.mxu0 %v6100_v11  ;;  %6082 = vmatpush2.bf16.msra.mxu1 %v6100_v11  ;;  %v6175_v11 = vld [vmem:[%s9780_s2 + $0xc8] sm:$0xff]  }
  0x23   :  { %2423 = vmatprep.subr.bf16.mxu0 %v6742_v0  ;;  %6067 = vmatprep.subr.bf16.mxu1 %v6742_v0 }
  0x26   :  { %2424 = vmatpush2.bf16.msra.mxu0 %v6101_v12  ;;  %6083 = vmatpush2.bf16.msra.mxu1 %v6101_v12  ;;  %v6178_v12 = vld [vmem:[%s9781_s0 + $0x244] ss:$36 sps:$4 sm:$0xff]  }
  0x27   :  { %2425 = vmatprep.subr.bf16.mxu0 %v6742_v0  ;;  %6068 = vmatprep.subr.bf16.mxu1 %v6742_v0 }
  0x2a   :  { %2426 = vmatpush2.bf16.msra.mxu0 %v6102_v13  ;;  %6084 = vmatpush2.bf16.msra.mxu1 %v6102_v13  ;;  %v6182_v13 = vld [vmem:[%s9781_s0 + $0xc] ss:$36 sps:$4 sm:$0xff]  }
  0x2b   :  { %2427 = vmatprep.subr.bf16.mxu0 %v6742_v0  ;;  %6069 = vmatprep.subr.bf16.mxu1 %v6742_v0 }
  0x2e   :  { %2428 = vmatpush2.bf16.msra.mxu0 %v6103_v14  ;;  %6085 = vmatpush2.bf16.msra.mxu1 %v6103_v14  ;;  %v6241_v14 = vld [vmem:[%s9780_s2 + $0x160] sm:$0xff]  }
  0x2f   :  { %2429 = vmatprep.subr.bf16.mxu0 %v6742_v0  ;;  %6070 = vmatprep.subr.bf16.mxu1 %v6742_v0 }
  0x32   :  { %2430 = vmatpush2.bf16.msra.mxu0 %v6104_v15  ;;  %6086 = vmatpush2.bf16.msra.mxu1 %v6104_v15  ;;  %v6176_v15 = vld [vmem:[%s9780_s2 + $0xc0] sm:$0xff]  }
  0x33   :  { %2431 = vmatprep.subr.bf16.mxu0 %v6742_v0  ;;  %6071 = vmatprep.subr.bf16.mxu1 %v6742_v0 }
  0x36   :  { %2432 = vmatpush2.bf16.msra.mxu0 %v6105_v16  ;;  %6087 = vmatpush2.bf16.msra.mxu1 %v6105_v16  ;;  %v6180_v16 = vld [vmem:[%s9781_s0 + $0x8] ss:$36 sps:$4 sm:$0xff]  }
  0x37   :  { %2433 = vmatprep.subr.bf16.mxu0 %v6742_v0  ;;  %6072 = vmatprep.subr.bf16.mxu1 %v6742_v0 }
  0x3a   :  { %2434 = vmatpush2.bf16.msra.mxu0 %v6106_v17  ;;  %6088 = vmatpush2.bf16.msra.mxu1 %v6106_v17  ;;  %v6183_v17 = vld [vmem:[%s9781_s0 + $0x240] ss:$36 sps:$4 sm:$0xff]  }
  0x3b   :  { %2435 = vmatprep.subr.bf16.mxu0 %v6742_v0  ;;  %6073 = vmatprep.subr.bf16.mxu1 %v6742_v0 }
  0x3e   :  { %2436 = vmatpush2.bf16.msra.mxu0 %v6107_v18  ;;  %6089 = vmatpush2.bf16.msra.mxu1 %v6107_v18  ;;  %v6255_v18 = vld [vmem:[%s9780_s2 + $0x158] sm:$0xff]  }
  0x3f   :  { %2694 = vmatprep.subr.bf16.mxu1 %v6742_v0  ;;  %2983 = vmatprep.subr.bf16.mxu0 %v6742_v0 }
  0x41   :  { %2438 = vmatmul.mubr.bf16.vlgmr.msra.gmra.mxu0 %v6108_v19  ;;  %2630 = vmatmul.mubr.bf16.vlgmr.msra.gmra.mxu1 %v6111_v20  ;;  %v6184_v19 = vld [vmem:[%s9780_s2 + $0x1b8] sm:$0xff]   ;;  %v6185_v20 = vld [vmem:[%s9781_s0 + $0x28c] ss:$36 sps:$4 sm:$0xff]  }
  0x42   :  { %2695 = vmatpush1.bf16.msra.mxu1 %v6114_v21  ;;  %2984 = vmatpush1.bf16.msra.mxu0 %v6115_v22  ;;  %v6187_v21 = vld [vmem:[%s9781_s0 + $0x54] ss:$36 sps:$4 sm:$0xff]  }
  0x43   :  { %2696 = vmatprep.subr.bf16.mxu1 %v6742_v0  ;;  %2445 = vmatprep.mubr.bf16.mxu0 %v6117_v23  ;;  %v6263_v22 = vld [vmem:[%s9780_s2 + $0x150] sm:$0xff]  }
  0x44   :  { %2637 = vmatprep.mubr.bf16.mxu1 %v6119_v24  ;;  %2985 = vmatprep.subr.bf16.mxu0 %v6742_v0  ;;  %v6199_v23 = vld [vmem:[%s9780_s2 + $0x1b0] sm:$0xff]   ;;  %v6189_v24 = vld [vmem:[%s9781_s0 + $0x288] ss:$36 sps:$4 sm:$0xff]  }
  0x46   :  { %2697 = vmatpush1.bf16.msra.mxu1 %v6116_v25  ;;  %2986 = vmatpush1.bf16.msra.mxu0 %v6125_v26  ;;  %v6190_v25 = vld [vmem:[%s9781_s0 + $0x50] ss:$36 sps:$4 sm:$0xff]  }
  0x47   :  { %2698 = vmatprep.subr.bf16.mxu1 %v6742_v0  ;;  %2987 = vmatprep.subr.bf16.mxu0 %v6742_v0  ;;  %v6192_v26 = vld [vmem:[%s9781_s0 + $0x2d4] ss:$36 sps:$4 sm:$0xff]  }
  0x49   :  { %2446 = vmatmul.mubr.bf16.gmra.mxu0 %v6121_v27  ;;  %2638 = vmatmul.mubr.bf16.gmra.mxu1 %v6122_v28  ;;  %v6194_v27 = vld [vmem:[%s9781_s0 + $0x9c] ss:$36 sps:$4 sm:$0xff]   ;;  %v6213_v28 = vld [vmem:[%s9780_s2 + $0x1a8] sm:$0xff]  }
  0x4a   :  { %2699 = vmatpush1.bf16.msra.mxu1 %v6123_v29  ;;  %2453 = vmatprep.mubr.bf16.mxu0 %v6126_v30  ;;  %v6277_v29 = vld [vmem:[%s9780_s2 + $0x148] sm:$0xff]   ;;  %v6227_v30 = vld [vmem:[%s9780_s2 + $0x1a0] sm:$0xff]  }
  0x4b   :  { %2700 = vmatprep.subr.bf16.mxu1 %v6742_v0  ;;  %2645 = vmatprep.mubr.bf16.mxu1 %v6128_v31  ;;  %v6284_v31 = vld [vmem:[%s9780_s2 + $0x140] sm:$0xff]  }
  0x4c   :  { %2988 = vmatpush1.bf16.msra.mxu0 %v6141_v32  ;;  %v7139_v32 = vld [vmem:[%s9780_s2 + $0x238] sm:$0xff]  }
  0x4d   :  { %2989 = vmatprep.subr.bf16.mxu0 %v6742_v0 }
  0x4e   :  { %2701 = vmatpush1.bf16.msra.mxu1 %v6124_v33  ;;  %v6196_v33 = vld [vmem:[%s9781_s0 + $0x2d0] ss:$36 sps:$4 sm:$0xff]  }
  0x4f   :  { %2702 = vmatprep.subr.bf16.mxu1 %v6742_v0 }
  0x50   :  { %2990 = vmatpush1.bf16.msra.mxu0 %v6151_v36  ;;  %v6202_v36 = vld [vmem:[%s9781_s0 + $0xe4] ss:$36 sps:$4 sm:$0xff]  }
  0x51   :  { %2454 = vmatmul.mubr.bf16.gmra.mxu0 %v6130_v34  ;;  %2646 = vmatmul.mubr.bf16.gmra.mxu1 %v6131_v35  ;;  %v6197_v34 = vld [vmem:[%s9781_s0 + $0x98] ss:$36 sps:$4 sm:$0xff]  }
  0x52   :  { %2703 = vmatpush1.bf16.msra.mxu1 %v6132_v37  ;;  %2461 = vmatprep.mubr.bf16.mxu0 %v6134_v38  ;;  %v6200_v35 = vld [vmem:[%s9781_s0 + $0x31c] ss:$36 sps:$4 sm:$0xff]   ;;  %v6256_v38 = vld [vmem:[%s9780_s2 + $0x190] sm:$0xff]  }
  0x53   :  { %2704 = vmatprep.subr.bf16.mxu1 %v6742_v0  ;;  %2653 = vmatprep.mubr.bf16.mxu1 %v6136_v39  ;;  %v6242_v37 = vld [vmem:[%s9780_s2 + $0x198] sm:$0xff]  }
  0x54   :  { %2991 = vmatprep.subr.bf16.mxu0 %v6742_v0  ;;  %v6204_v39 = vld [vmem:[%s9781_s0 + $0x318] ss:$36 sps:$4 sm:$0xff]  }
  0x55   :  { %2992 = vmatpush1.bf16.msra.mxu0 %v6167_v40  ;;  %v6205_v40 = vld [vmem:[%s9781_s0 + $0xe0] ss:$36 sps:$4 sm:$0xff]  }
  0x56   :  { %2705 = vmatpush1.bf16.msra.mxu1 %v6133_v41  ;;  %2993 = vmatprep.subr.bf16.mxu0 %v6742_v0  ;;  %v6206_v41 = vld [vmem:[%s9781_s0 + $0x364] ss:$36 sps:$4 sm:$0xff]  }
  0x57   :  { %2706 = vmatprep.subr.bf16.mxu1 %v6742_v0 }
  0x59   :  { %2462 = vmatmul.mubr.bf16.gmra.mxu0 %v6138_v42  ;;  %2654 = vmatmul.mubr.bf16.gmra.mxu1 %v6139_v43  ;;  %v6208_v42 = vld [vmem:[%s9781_s0 + $0x12c] ss:$36 sps:$4 sm:$0xff]  }
  0x5a   :  { %2707 = vmatpush1.bf16.msra.mxu1 %v6140_v44  ;;  %2469 = vmatprep.mubr.bf16.mxu0 %v6143_v45  ;;  %v6270_v43 = vld [vmem:[%s9780_s2 + $0x188] sm:$0xff]   ;;  %v6285_v44 = vld [vmem:[%s9780_s2 + $0x180] sm:$0xff]  }
  0x5b   :  { %2708 = vmatprep.subr.bf16.mxu1 %v6742_v0  ;;  %2661 = vmatprep.mubr.bf16.mxu1 %v6145_v46  ;;  %v6210_v45 = vld [vmem:[%s9781_s0 + $0x360] ss:$36 sps:$4 sm:$0xff]   ;;  %v6211_v46 = vld [vmem:[%s9781_s0 + $0x128] ss:$36 sps:$4 sm:$0xff]  }
  0x5c   :  { %2994 = vmatpush1.bf16.msra.mxu0 %v6177_v47  ;;  %v6214_v47 = vld [vmem:[%s9781_s0 + $0x3ac] ss:$36 sps:$4 sm:$0xff]  }
  0x5d   :  { %2995 = vmatprep.subr.bf16.mxu0 %v6742_v0 }
  0x5e   :  { %2709 = vmatpush1.bf16.msra.mxu1 %v6142_v48  ;;  %v6216_v48 = vld [vmem:[%s9781_s0 + $0x174] ss:$36 sps:$4 sm:$0xff]  }
  0x5f   :  { %2710 = vmatprep.subr.bf16.mxu1 %v6742_v0 }
  0x60   :  { %2996 = vmatpush1.bf16.msra.mxu0 %v6191_v51  ;;  %v6218_v51 = vld [vmem:[%s9781_s0 + $0x3a8] ss:$36 sps:$4 sm:$0xff]  }
  0x61   :  { %2470 = vmatmul.mubr.bf16.gmra.mxu0 %v6147_v49  ;;  %2662 = vmatmul.mubr.bf16.gmra.mxu1 %v6148_v50  ;;  %v6299_v49 = vld [vmem:[%s9780_s2 + $0x1f8] sm:$0xff]   ;;  %v6312_v50 = vld [vmem:[%s9780_s2 + $0x1f0] sm:$0xff]  }
  0x62   :  { %2711 = vmatpush2.bf16.msra.mxu1 %v6149_v52  ;;  %2477 = vmatprep.mubr.bf16.mxu0 %v6152_v53  ;;  %v6219_v52 = vld [vmem:[%s9781_s0 + $0x170] ss:$36 sps:$4 sm:$0xff]  }
  0x63   :  { %2712 = vmatprep.subr.bf16.mxu1 %v6742_v0  ;;  %2669 = vmatprep.mubr.bf16.mxu1 %v6154_v54  ;;  %v6221_v53 = vld [vmem:[%s9781_s0 + $0x3f4] ss:$36 sps:$4 sm:$0xff]   ;;  %v6223_v54 = vld [vmem:[%s9781_s0 + $0x1bc] ss:$36 sps:$4 sm:$0xff]  }
  0x64   :  { %2997 = vmatprep.subr.bf16.mxu0 %v6742_v0 }
  0x65   :  { %2998 = vmatpush1.bf16.msra.mxu0 %v6198_v55  ;;  %v6326_v55 = vld [vmem:[%s9780_s2 + $0x1e8] sm:$0xff]  }
  0x66   :  { %2713 = vmatpush2.bf16.msra.mxu1 %v6150_v56  ;;  %2999 = vmatprep.subr.bf16.mxu0 %v6742_v0  ;;  %v6225_v56 = vld [vmem:[%s9781_s0 + $0x3f0] ss:$36 sps:$4 sm:$0xff]  }
  0x67   :  { %2714 = vmatprep.subr.bf16.mxu1 %v6742_v0 }
  0x69   :  { %2478 = vmatmul.mubr.bf16.gmra.mxu0 %v6156_v57  ;;  %2670 = vmatmul.mubr.bf16.gmra.mxu1 %v6157_v58  ;;  %v6226_v57 = vld [vmem:[%s9781_s0 + $0x1b8] ss:$36 sps:$4 sm:$0xff]  }
  0x6a   :  { %2715 = vmatpush2.bf16.msra.mxu1 %v6158_v59  ;;  %2485 = vmatprep.mubr.bf16.mxu0 %v6160_v60  ;;  %v6228_v58 = vld [vmem:[%s9781_s0 + $0x43c] ss:$36 sps:$4 sm:$0xff]   ;;  %v6230_v59 = vld [vmem:[%s9781_s0 + $0x204] ss:$36 sps:$4 sm:$0xff]  }
  0x6b   :  { %2716 = vmatprep.subr.bf16.mxu1 %v6742_v0  ;;  %2677 = vmatprep.mubr.bf16.mxu1 %v6162_v61  ;;  %v6232_v60 = vld [vmem:[%s9781_s0 + $0x438] ss:$36 sps:$4 sm:$0xff]   ;;  %v6233_v61 = vld [vmem:[%s9781_s0 + $0x200] ss:$36 sps:$4 sm:$0xff]  }
  0x6c   :  { %3000 = vmatpush2.bf16.msra.mxu0 %v6212_v62  ;;  %v6235_v62 = vld [vmem:[%s9781_s0 + $0x484] ss:$36 sps:$4 sm:$0xff]  }
  0x6d   :  { %3001 = vmatprep.subr.bf16.mxu0 %v6742_v0 }
  0x6e   :  { %2717 = vmatpush2.bf16.msra.mxu1 %v6159_v63  ;;  %v6237_v63 = vld [vmem:[%s9781_s0 + $0x24c] ss:$36 sps:$4 sm:$0xff]  }
  0x6f   :  { %2718 = vmatprep.subr.bf16.mxu1 %v6742_v0 }
  0x70   :  { %3002 = vmatpush2.bf16.msra.mxu0 %v6220_v3  ;;  %v6240_v3 = vld [vmem:[%s9781_s0 + $0x248] ss:$36 sps:$4 sm:$0xff]  }
  0x71   :  { %2486 = vmatmul.mubr.bf16.gmra.mxu0 %v6164_v1  ;;  %2678 = vmatmul.mubr.bf16.gmra.mxu1 %v6165_v2  ;;  %v6339_v1 = vld [vmem:[%s9780_s2 + $0x1e0] sm:$0xff]  }
  0x72   :  { %2719 = vmatpush2.bf16.msra.mxu1 %v6166_v4  ;;  %2493 = vmatprep.mubr.bf16.mxu0 %v6169_v5  ;;  %v6239_v2 = vld [vmem:[%s9781_s0 + $0x480] ss:$36 sps:$4 sm:$0xff]   ;;  %v6243_v4 = vld [vmem:[%s9781_s0 + $0x4cc] ss:$36 sps:$4 sm:$0xff]   ;;  %v6245_v5 = vld [vmem:[%s9781_s0 + $0x294] ss:$36 sps:$4 sm:$0xff]  }
  0x73   :  { %2720 = vmatprep.subr.bf16.mxu1 %v6742_v0  ;;  %2685 = vmatprep.mubr.bf16.mxu1 %v6171_v6  ;;  %v6247_v6 = vld [vmem:[%s9781_s0 + $0x4c8] ss:$36 sps:$4 sm:$0xff]  }
  0x74   :  { %3003 = vmatprep.subr.bf16.mxu0 %v6742_v0 }
  0x75   :  { %3004 = vmatpush2.bf16.msra.mxu0 %v6234_v7  ;;  %v6248_v7 = vld [vmem:[%s9781_s0 + $0x290] ss:$36 sps:$4 sm:$0xff]  }
  0x76   :  { %2721 = vmatpush2.bf16.msra.mxu1 %v6168_v8  ;;  %3005 = vmatprep.subr.bf16.mxu0 %v6742_v0  ;;  %v6249_v8 = vld [vmem:[%s9781_s0 + $0x514] ss:$36 sps:$4 sm:$0xff]  }
  0x77   :  { %2722 = vmatprep.subr.bf16.mxu1 %v6742_v0 }
  0x79   :  { %2494 = vmatmul.mubr.bf16.gmra.mxu0 %v6173_v9  ;;  %2686 = vmatmul.mubr.bf16.gmra.mxu1 %v6174_v10  ;;  %v6251_v9 = vld [vmem:[%s9781_s0 + $0x2dc] ss:$36 sps:$4 sm:$0xff]  }
  0x7a   :  { %2723 = vmatpush2.bf16.msra.mxu1 %v6175_v11  ;;  %2501 = vmatprep.mubr.bf16.mxu0 %v6178_v12  ;;  %v6353_v10 = vld [vmem:[%s9780_s2 + $0x1d8] sm:$0xff]   ;;  %v6253_v11 = vld [vmem:[%s9781_s0 + $0x510] ss:$36 sps:$4 sm:$0xff]  }
  0x7b   :  { %2724 = vmatprep.subr.bf16.mxu1 %v6742_v0  ;;  %2726 = vmatprep.mubr.bf16.mxu1 %v6182_v13  ;;  %v6254_v12 = vld [vmem:[%s9781_s0 + $0x2d8] ss:$36 sps:$4 sm:$0xff]  }
  0x7c   :  { %3006 = vmatpush2.bf16.msra.mxu0 %v6241_v14  ;;  %v6257_v13 = vld [vmem:[%s9781_s0 + $0x55c] ss:$36 sps:$4 sm:$0xff]   ;;  %v6259_v14 = vld [vmem:[%s9781_s0 + $0x324] ss:$36 sps:$4 sm:$0xff]  }
  0x7d   :  { %3007 = vmatprep.subr.bf16.mxu0 %v6742_v0 }
  0x7e   :  { %2725 = vmatpush2.bf16.msra.mxu1 %v6176_v15  ;;  %v6261_v15 = vld [vmem:[%s9781_s0 + $0x558] ss:$36 sps:$4 sm:$0xff]  }
  0x7f   :  { %3272 = vmatprep.subr.bf16.mxu1 %v6742_v0 }
  0x80   :  { %3008 = vmatpush2.bf16.msra.mxu0 %v6255_v18  ;;  %v6266_v18 = vld [vmem:[%s9781_s0 + $0x36c] ss:$36 sps:$4 sm:$0xff]  }
  0x81   :  { %2502 = vmatmul.mubr.bf16.gmra.mxu0 %v6183_v17  ;;  %2727 = vmatmul.mubr.bf16.vlgmr.msra.gmra.mxu1 %v6180_v16  ;;  %v6262_v16 = vld [vmem:[%s9781_s0 + $0x320] ss:$36 sps:$4 sm:$0xff]  }
  0x82   :  { %3273 = vmatpush1.bf16.msra.mxu1 %v6184_v19  ;;  %2509 = vmatprep.mubr.bf16.mxu0 %v6185_v20  ;;  %v6264_v17 = vld [vmem:[%s9781_s0 + $0x5a4] ss:$36 sps:$4 sm:$0xff]   ;;  %v6366_v19 = vld [vmem:[%s9780_s2 + $0x1d0] sm:$0xff]  }
  0x83   :  { %2734 = vmatprep.mubr.bf16.mxu1 %v6187_v21  ;;  %3274 = vmatprep.subr.bf16.mxu1 %v6742_v0  ;;  %v6268_v20 = vld [vmem:[%s9781_s0 + $0x5a0] ss:$36 sps:$4 sm:$0xff]   ;;  %v6269_v21 = vld [vmem:[%s9781_s0 + $0x368] ss:$36 sps:$4 sm:$0xff]  }
  0x84   :  { %3009 = vmatprep.subr.bf16.mxu0 %v6742_v0 }
  0x85   :  { %3010 = vmatpush2.bf16.msra.mxu0 %v6263_v22  ;;  %v6271_v22 = vld [vmem:[%s9781_s0 + $0x5ec] ss:$36 sps:$4 sm:$0xff]  }
  0x86   :  { %3275 = vmatpush1.bf16.msra.mxu1 %v6199_v23  ;;  %3011 = vmatprep.subr.bf16.mxu0 %v6742_v0  ;;  %v6273_v23 = vld [vmem:[%s9781_s0 + $0x3b4] ss:$36 sps:$4 sm:$0xff]  }
  0x87   :  { %3276 = vmatprep.subr.bf16.mxu1 %v6742_v0 }
  0x89   :  { %2510 = vmatmul.mubr.bf16.gmra.mxu0 %v6189_v24  ;;  %2735 = vmatmul.mubr.bf16.gmra.mxu1 %v6190_v25  ;;  %v6275_v24 = vld [vmem:[%s9781_s0 + $0x5e8] ss:$36 sps:$4 sm:$0xff]   ;;  %v6276_v25 = vld [vmem:[%s9781_s0 + $0x3b0] ss:$36 sps:$4 sm:$0xff]  }
  0x8a   :  { %2517 = vmatprep.mubr.bf16.mxu0 %v6192_v26  ;;  %2742 = vmatprep.mubr.bf16.mxu1 %v6194_v27  ;;  %v6278_v26 = vld [vmem:[%s9781_s0 + $0x634] ss:$36 sps:$4 sm:$0xff]   ;;  %v6280_v27 = vld [vmem:[%s9781_s0 + $0x3fc] ss:$36 sps:$4 sm:$0xff]  }
  0x8b   :  { %3277 = vmatpush1.bf16.msra.mxu1 %v6213_v28  ;;  %3012 = vmatpush2.bf16.msra.mxu0 %v6277_v29  ;;  %v6380_v28 = vld [vmem:[%s9780_s2 + $0x1c8] sm:$0xff]   ;;  %v6282_v29 = vld [vmem:[%s9781_s0 + $0x630] ss:$36 sps:$4 sm:$0xff]  }
  0x8c   :  { %3278 = vmatprep.subr.bf16.mxu1 %v6742_v0  ;;  %3013 = vmatprep.subr.bf16.mxu0 %v6742_v0 }
  0x8f   :  { %3279 = vmatpush1.bf16.msra.mxu1 %v6227_v30  ;;  %3014 = vmatpush2.bf16.msra.mxu0 %v6284_v31  ;;  %v6283_v30 = vld [vmem:[%s9781_s0 + $0x3f8] ss:$36 sps:$4 sm:$0xff]  }
  0x90   :  { %3280 = vmatprep.subr.bf16.mxu1 %v6742_v0  ;;  %5784 = vmatprep.subr.bf16.mxu0 %v7139_v32  ;;  %v6286_v31 = vld [vmem:[%s9781_s0 + $0x67c] ss:$36 sps:$4 sm:$0xff]  }
  0x91   :  { %2518 = vmatmul.mubr.bf16.gmra.mxu0 %v6196_v33  ;;  %2743 = vmatmul.mubr.bf16.gmra.mxu1 %v6197_v34  ;;  %v6288_v33 = vld [vmem:[%s9781_s0 + $0x444] ss:$36 sps:$4 sm:$0xff]  }
  0x92   :  { %2525 = vmatprep.mubr.bf16.mxu0 %v6200_v35  ;;  %2750 = vmatprep.mubr.bf16.mxu1 %v6202_v36  ;;  %v6291_v34 = vld [vmem:[%s9781_s0 + $0x440] ss:$36 sps:$4 sm:$0xff]   ;;  %v6292_v35 = vld [vmem:[%s9781_s0 + $0x48c] ss:$36 sps:$4 sm:$0xff]   ;;  %v6296_v36 = vld [vmem:[%s9781_s0 + $0x14] ss:$36 sps:$4 sm:$0xff]  }
  0x93   :  { %3281 = vmatpush1.bf16.msra.mxu1 %v6242_v37  ;;  %v6393_v37 = vld [vmem:[%s9780_s2 + $0x1c0] sm:$0xff]  }
  0x94   :  { %3282 = vmatprep.subr.bf16.mxu1 %v6742_v0 }
  0x97   :  { %3283 = vmatpush1.bf16.msra.mxu1 %v6256_v38  ;;  %v6294_v38 = vld [vmem:[%s9781_s0 + $0x10] ss:$36 sps:$4 sm:$0xff]  }
  0x98   :  { %3284 = vmatprep.subr.bf16.mxu1 %v6742_v0 }
  0x99   :  { %2526 = vmatmul.mubr.bf16.gmra.mxu0 %v6204_v39  ;;  %2751 = vmatmul.mubr.bf16.gmra.mxu1 %v6205_v40  ;;  %v6297_v39 = vld [vmem:[%s9781_s0 + $0x488] ss:$36 sps:$4 sm:$0xff]   ;;  %v6300_v40 = vld [vmem:[%s9781_s0 + $0x4d4] ss:$36 sps:$4 sm:$0xff]  }
  0x9a   :  { %2533 = vmatprep.mubr.bf16.mxu0 %v6206_v41  ;;  %2758 = vmatprep.mubr.bf16.mxu1 %v6208_v42  ;;  %v6302_v41 = vld [vmem:[%s9781_s0 + $0x5c] ss:$36 sps:$4 sm:$0xff]   ;;  %v6325_v42 = vld [vmem:[%s9780_s2 + $0x230] sm:$0xff]  }
  0x9b   :  { %3285 = vmatpush1.bf16.msra.mxu1 %v6270_v43 }
  0x9c   :  { %3286 = vmatprep.subr.bf16.mxu1 %v6742_v0 }
  0x9f   :  { %3287 = vmatpush1.bf16.msra.mxu1 %v6285_v44 }
  0xa0   :  { %3288 = vmatprep.subr.bf16.mxu1 %v6742_v0 }
  0xa1   :  { %2534 = vmatmul.mubr.bf16.gmra.mxu0 %v6210_v45  ;;  %2759 = vmatmul.mubr.bf16.gmra.mxu1 %v6211_v46 }
  0xa2   :  { %2541 = vmatprep.mubr.bf16.mxu0 %v6214_v47  ;;  %2766 = vmatprep.mubr.bf16.mxu1 %v6216_v48  ;;  %v6352_v47 = vld [vmem:[%s9780_s2 + $0x228] sm:$0xff]  }
  0xa3   :  { %3289 = vmatpush2.bf16.msra.mxu1 %v6299_v49 }
  0xa4   :  { %3290 = vmatprep.subr.bf16.mxu1 %v6742_v0 }
  0xa7   :  { %3291 = vmatpush2.bf16.msra.mxu1 %v6312_v50  ;;  %v6304_v50 = vld [vmem:[%s9781_s0 + $0x4d0] ss:$36 sps:$4 sm:$0xff]  }
  0xa8   :  { %3292 = vmatprep.subr.bf16.mxu1 %v6742_v0 }
  0xa9   :  { %2542 = vmatmul.mubr.bf16.gmra.mxu0 %v6218_v51  ;;  %2767 = vmatmul.mubr.bf16.gmra.mxu1 %v6219_v52  ;;  %v6306_v51 = vld [vmem:[%s9781_s0 + $0x51c] ss:$36 sps:$4 sm:$0xff]   ;;  %v6308_v52 = vld [vmem:[%s9781_s0 + $0xa4] ss:$36 sps:$4 sm:$0xff]  }
  0xaa   :  { %2549 = vmatprep.mubr.bf16.mxu0 %v6221_v53  ;;  %2774 = vmatprep.mubr.bf16.mxu1 %v6223_v54 }
  0xab   :  { %3293 = vmatpush2.bf16.msra.mxu1 %v6326_v55  ;;  %v6379_v55 = vld [vmem:[%s9780_s2 + $0x220] sm:$0xff]  }
  0xac   :  { %3294 = vmatprep.subr.bf16.mxu1 %v6742_v0 }
  0xaf   :  { %3295 = vmatpush2.bf16.msra.mxu1 %v6339_v1  ;;  %v6311_v1 = vld [vmem:[%s9781_s0 + $0xa0] ss:$36 sps:$4 sm:$0xff]  }
  0xb0   :  { %3296 = vmatprep.subr.bf16.mxu1 %v6742_v0 }
  0xb1   :  { %2550 = vmatmul.mubr.bf16.gmra.mxu0 %v6225_v56  ;;  %2775 = vmatmul.mubr.bf16.gmra.mxu1 %v6226_v57 }
  0xb2   :  { %2557 = vmatprep.mubr.bf16.mxu0 %v6228_v58  ;;  %2782 = vmatprep.mubr.bf16.mxu1 %v6230_v59 }
  0xb3   :  { %3297 = vmatpush2.bf16.msra.mxu1 %v6353_v10 }
  0xb4   :  { %3298 = vmatprep.subr.bf16.mxu1 %v6742_v0 }
  0xb7   :  { %3299 = vmatpush2.bf16.msra.mxu1 %v6366_v19 }
  0xb8   :  { %3300 = vmatprep.subr.bf16.mxu1 %v6742_v0 }
  0xb9   :  { %2558 = vmatmul.mubr.bf16.gmra.mxu0 %v6232_v60  ;;  %2783 = vmatmul.mubr.bf16.gmra.mxu1 %v6233_v61  ;;  %v6406_v60 = vld [vmem:[%s9780_s2 + $0x218] sm:$0xff]  }
  0xba   :  { %2565 = vmatprep.mubr.bf16.mxu0 %v6235_v62  ;;  %2790 = vmatprep.mubr.bf16.mxu1 %v6237_v63  ;;  %v6310_v63 = vld [vmem:[%s9781_s0 + $0x518] ss:$36 sps:$4 sm:$0xff]  }
  0xbb   :  { %3301 = vmatpush2.bf16.msra.mxu1 %v6380_v28 }
  0xbc   :  { %3302 = vmatprep.subr.bf16.mxu1 %v6742_v0  ;;  %v6290_v0 = vld [vmem:[%s9781_s0 + $0x678] ss:$36 sps:$4 sm:$0xff]  }
  0xbf   :  { %3303 = vmatpush2.bf16.msra.mxu1 %v6393_v37  ;;  %v6327_v37 = vld [vmem:[%s9781_s0 + $0x5f0] ss:$36 sps:$4 sm:$0xff]  }
  0xc1   :  { %2566 = vmatmul.mubr.bf16.gmra.mxu0 %v6239_v2  ;;  %2791 = vmatmul.mubr.bf16.gmra.mxu1 %v6240_v3  ;;  %v6313_v2 = vld [vmem:[%s9781_s0 + $0x564] ss:$36 sps:$4 sm:$0xff]   ;;  %v6315_v3 = vld [vmem:[%s9781_s0 + $0xec] ss:$36 sps:$4 sm:$0xff]  }
  0xc2   :  { %2573 = vmatprep.mubr.bf16.mxu0 %v6243_v4  ;;  %2798 = vmatprep.mubr.bf16.mxu1 %v6245_v5 }
  0xc9   :  { %2574 = vmatmul.mubr.bf16.gmra.mxu0 %v6247_v6  ;;  %2799 = vmatmul.mubr.bf16.gmra.mxu1 %v6248_v7 }
  0xca   :  { %2581 = vmatprep.mubr.bf16.mxu0 %v6249_v8  ;;  %2806 = vmatprep.mubr.bf16.mxu1 %v6251_v9 }
  0xd1   :  { %2582 = vmatmul.mubr.bf16.gmra.mxu0 %v6253_v11  ;;  %2807 = vmatmul.mubr.bf16.gmra.mxu1 %v6254_v12  ;;  %v6317_v12 = vld [vmem:[%s9781_s0 + $0x560] ss:$36 sps:$4 sm:$0xff]  }
  0xd2   :  { %2589 = vmatprep.mubr.bf16.mxu0 %v6257_v13  ;;  %2814 = vmatprep.mubr.bf16.mxu1 %v6259_v14  ;;  %v6318_v13 = vld [vmem:[%s9781_s0 + $0xe8] ss:$36 sps:$4 sm:$0xff]  }
  0xd3   :  { %v6321_v14 = vld [vmem:[%s9781_s0 + $0x5ac] ss:$36 sps:$4 sm:$0xff]  }
  0xd9   :  { %2590 = vmatmul.mubr.bf16.gmra.mxu0 %v6261_v15  ;;  %2815 = vmatmul.mubr.bf16.gmra.mxu1 %v6262_v16  ;;  %v6324_v15 = vld [vmem:[%s9781_s0 + $0x134] ss:$36 sps:$4 sm:$0xff]  }
  0xda   :  { %2597 = vmatprep.mubr.bf16.mxu0 %v6264_v17  ;;  %2822 = vmatprep.mubr.bf16.mxu1 %v6266_v18 }
  0xe1   :  { %2598 = vmatmul.mubr.bf16.gmra.mxu0 %v6268_v20  ;;  %2823 = vmatmul.mubr.bf16.gmra.mxu1 %v6269_v21 }
  0xe2   :  { %2605 = vmatprep.mubr.bf16.mxu0 %v6271_v22  ;;  %2830 = vmatprep.mubr.bf16.mxu1 %v6273_v23 }
  0xe9   :  { %2606 = vmatmul.mubr.bf16.gmra.mxu0 %v6275_v24  ;;  %2831 = vmatmul.mubr.bf16.gmra.mxu1 %v6276_v25  ;;  %v6319_v24 = vld [vmem:[%s9781_s0 + $0x5a8] ss:$36 sps:$4 sm:$0xff]   ;;  %v6322_v25 = vld [vmem:[%s9781_s0 + $0x130] ss:$36 sps:$4 sm:$0xff]  }
  0xea   :  { %2613 = vmatprep.mubr.bf16.mxu0 %v6278_v26  ;;  %2838 = vmatprep.mubr.bf16.mxu1 %v6280_v27  ;;  %v6329_v26 = vld [vmem:[%s9781_s0 + $0x5f4] ss:$36 sps:$4 sm:$0xff]   ;;  %v6332_v27 = vld [vmem:[%s9781_s0 + $0x17c] ss:$36 sps:$4 sm:$0xff]  }
  0xf1   :  { %2614 = vmatmul.mubr.bf16.gmra.mxu0 %v6282_v29  ;;  %2839 = vmatmul.mubr.bf16.gmra.mxu1 %v6283_v30 }
  0xf2   :  { %2621 = vmatprep.mubr.bf16.mxu0 %v6286_v31  ;;  %2846 = vmatprep.mubr.bf16.mxu1 %v6288_v33  ;;  %v6431_v33 = vld [vmem:[%s9780_s2 + $0x210] sm:$0xff]  }
  0xf9   :  { %2622 = vmatmul.mubr.bf16.gmra.mxu0 %v6290_v0  ;;  %2847 = vmatmul.mubr.bf16.gmra.mxu1 %v6291_v34 }
  0xfa   :  { %2854 = vmatprep.mubr.bf16.mxu1 %v6292_v35  ;;  %3015 = vmatprep.mubr.bf16.mxu0 %v6296_v36 }
 0x101   :  { %v7375_v43 = vpop.f32.mrf.mxu0  ;;  %v7377_v44 = vpop.f32.mrf.mxu1  ;;  %2855 = vmatmul.mubr.bf16.gmra.mxu1 %v6297_v39  ;;  %3016 = vmatmul.mubr.bf16.vlgmr.msra.gmra.mxu0 %v6294_v38  ;;  %v6330_v38 = vld [vmem:[%s9781_s0 + $0x178] ss:$36 sps:$4 sm:$0xff]  }
 0x102   :  { %5785 = vmatpush3.bf16.msra.mxu0 %v7139_v32  ;;  %2862 = vmatprep.mubr.bf16.mxu1 %v6300_v40  ;;  %v6305_v32 = vld [vmem:[%s9781_s0 + $0x58] ss:$36 sps:$4 sm:$0xff]   ;;  %v6338_v40 = vld [vmem:[%s9781_s0 + $0x1c4] ss:$36 sps:$4 sm:$0xff]  }
 0x103   :  { %v2441_v45 = vpop.f32.mrf.mxu0  ;;  %v2633_v46 = vpop.f32.mrf.mxu1  ;;  %3023 = vmatprep.mubr.bf16.mxu0 %v6302_v41  ;;  %5786 = vmatprep.subr.bf16.mxu0 %v6325_v42  ;;  %v6335_v39 = vld [vmem:[%s9781_s0 + $0x63c] ss:$36 sps:$4 sm:$0xff]  }
 0x105   :  { %v7383_v48 = vpop.f32.mrf.mxu0  ;;  %v7385_v49 = vpop.f32.mrf.mxu1 }
 0x106   :  { %5787 = vmatpush3.bf16.msra.mxu0 %v6325_v42 }
 0x107   :  { %v2444_v53 = vpop.f32.mrf.mxu0  ;;  %v2636_v54 = vpop.f32.mrf.mxu1  ;;  %5788 = vmatprep.subr.bf16.mxu0 %v6352_v47 }
 0x108   :  { %v6336_v53 = vld [vmem:[%s9781_s0 + $0x1c0] ss:$36 sps:$4 sm:$0xff]  }
 0x109   :  { %v7402_v56 = vpop.f32.mrf.mxu0  ;;  %v7404_v57 = vpop.f32.mrf.mxu1  ;;  %2863 = vmatmul.mubr.bf16.gmra.mxu1 %v6304_v50  ;;  %3024 = vmatmul.mubr.bf16.gmra.mxu0 %v6305_v32  ;;  %v6342_v54 = vld [vmem:[%s9781_s0 + $0x684] ss:$36 sps:$4 sm:$0xff]  }
 0x10a   :  { %2870 = vmatprep.mubr.bf16.mxu1 %v6306_v51  ;;  %3031 = vmatprep.mubr.bf16.mxu0 %v6308_v52  ;;  %v6333_v52 = vld [vmem:[%s9781_s0 + $0x638] ss:$36 sps:$4 sm:$0xff]  }
 0x10b   :  { %v2449_v58 = vpop.f32.mrf.mxu0  ;;  %v2641_v59 = vpop.f32.mrf.mxu1  ;;  %5789 = vmatpush3.bf16.msra.mxu0 %v6352_v47 }
 0x10c   :  { %5790 = vmatprep.subr.bf16.mxu0 %v6379_v55 }
 0x10d   :  { %v7409_v61 = vpop.f32.mrf.mxu0  ;;  %v7411_v62 = vpop.f32.mrf.mxu1 }
 0x10f   :  { %v2452_v4 = vpop.f32.mrf.mxu0  ;;  %v2644_v5 = vpop.f32.mrf.mxu1  ;;  %5791 = vmatpush3.bf16.msra.mxu0 %v6379_v55  ;;  %v6345_v55 = vld [vmem:[%s9781_s0 + $0x20c] ss:$36 sps:$4 sm:$0xff]  }
 0x110   :  { %5792 = vmatprep.subr.bf16.mxu0 %v6406_v60  ;;  %v6340_v5 = vld [vmem:[%s9781_s0 + $0x680] ss:$36 sps:$4 sm:$0xff]  }
 0x111   :  { %v7425_v6 = vpop.f32.mrf.mxu0  ;;  %v7427_v7 = vpop.f32.mrf.mxu1  ;;  %2871 = vmatmul.mubr.bf16.gmra.mxu1 %v6310_v63  ;;  %3032 = vmatmul.mubr.bf16.gmra.mxu0 %v6311_v1 }
 0x112   :  { %2878 = vmatprep.mubr.bf16.mxu1 %v6313_v2  ;;  %3039 = vmatprep.mubr.bf16.mxu0 %v6315_v3 }
 0x113   :  { %v2457_v8 = vpop.f32.mrf.mxu0  ;;  %v2649_v9 = vpop.f32.mrf.mxu1  ;;  %5793 = vmatpush3.bf16.msra.mxu0 %v6406_v60 }
 0x114   :  { %5794 = vmatprep.subr.bf16.mxu0 %v6431_v33  ;;  %v6343_v8 = vld [vmem:[%s9781_s0 + $0x208] ss:$36 sps:$4 sm:$0xff]  }
 0x115   :  { %v7429_v10 = vpop.f32.mrf.mxu0  ;;  %v7431_v11 = vpop.f32.mrf.mxu1  ;;  %v6348_v9 = vld [vmem:[%s9781_s0 + $0x6cc] ss:$36 sps:$4 sm:$0xff]  }
 0x117   :  { %v2460_v16 = vpop.f32.mrf.mxu0  ;;  %v2652_v17 = vpop.f32.mrf.mxu1  ;;  %5795 = vmatpush3.bf16.msra.mxu0 %v6431_v33 }
 0x119   :  { %v7445_v18 = vpop.f32.mrf.mxu0  ;;  %v7447_v19 = vpop.f32.mrf.mxu1  ;;  %2879 = vmatmul.mubr.bf16.gmra.mxu1 %v6317_v12  ;;  %3040 = vmatmul.mubr.bf16.gmra.mxu0 %v6318_v13  ;;  %v6351_v12 = vld [vmem:[%s9781_s0 + $0x254] ss:$36 sps:$4 sm:$0xff]  }
 0x11a   :  { %2886 = vmatprep.mubr.bf16.mxu1 %v6321_v14  ;;  %3047 = vmatprep.mubr.bf16.mxu0 %v6324_v15 }
 0x11b   :  { %v2465_v20 = vpop.f32.mrf.mxu0  ;;  %v2657_v21 = vpop.f32.mrf.mxu1 }
 0x11c   :  { %v7535_v21 = vld [vmem:[%s9782_s3] ss:$0 sm:$0xff] }
 0x11d   :  { %v7449_v22 = vpop.f32.mrf.mxu0  ;;  %v7451_v23 = vpop.f32.mrf.mxu1 }
 0x11f   :  { %v2468_v28 = vpop.f32.mrf.mxu0  ;;  %v2660_v29 = vpop.f32.mrf.mxu1 }
 0x120   :  { %v6356_v28 = vld [vmem:[%s9781_s0 + $0x714] ss:$36 sps:$4 sm:$0xff]   ;;  %v6359_v29 = vld [vmem:[%s9781_s0 + $0x29c] ss:$36 sps:$4 sm:$0xff]  }
 0x121   :  { %v7465_v30 = vpop.f32.mrf.mxu0  ;;  %v7467_v31 = vpop.f32.mrf.mxu1  ;;  %2887 = vmatmul.mubr.bf16.gmra.mxu1 %v6319_v24  ;;  %3048 = vmatmul.mubr.bf16.gmra.mxu0 %v6322_v25 }
 0x122   :  { %2894 = vmatprep.mubr.bf16.mxu1 %v6329_v26  ;;  %3055 = vmatprep.mubr.bf16.mxu0 %v6332_v27  ;;  %v6346_v26 = vld [vmem:[%s9781_s0 + $0x6c8] ss:$36 sps:$4 sm:$0xff]   ;;  %v6349_v27 = vld [vmem:[%s9781_s0 + $0x250] ss:$36 sps:$4 sm:$0xff]  }
 0x123   :  { %v2473_v0 = vpop.f32.mrf.mxu0  ;;  %v2665_v34 = vpop.f32.mrf.mxu1 }
 0x124   :  { %v2440_v34 = vadd.f32 %v7535_v21, %v7375_v43 }
 0x125   :  { %v7472_v35 = vpop.f32.mrf.mxu0  ;;  %v7474_v36 = vpop.f32.mrf.mxu1 }
 0x126   :  { %9837 = vst [vmem:[#allocation2_spill] sm:$0xff] %v7474_v36 }
 0x127   :  { %v2476_v41 = vpop.f32.mrf.mxu0  ;;  %v2668_v42 = vpop.f32.mrf.mxu1 }
 0x129   :  { %v7488_v45 = vpop.f32.mrf.mxu0  ;;  %v7490_v46 = vpop.f32.mrf.mxu1  ;;  %2895 = vmatmul.mubr.bf16.gmra.mxu1 %v6327_v37  ;;  %3056 = vmatmul.mubr.bf16.gmra.mxu0 %v6330_v38 }
 0x12a   :  { %9838 = vst [vmem:[#allocation3_spill] sm:$0xff] %v7490_v46  ;;  %2902 = vmatprep.mubr.bf16.mxu1 %v6335_v39  ;;  %3063 = vmatprep.mubr.bf16.mxu0 %v6338_v40  ;;  %v6456_v40 = vld [vmem:[%s9780_s2 + $0x208] sm:$0xff]  }
 0x12b   :  { %v2481_v47 = vpop.f32.mrf.mxu0  ;;  %v2673_v50 = vpop.f32.mrf.mxu1  ;;  %5796 = vmatprep.subr.bf16.mxu0 %v6456_v40 }
 0x12c   :  { %v2443_v47 = vadd.f32 %v7535_v21, %v7383_v48  ;;  %5797 = vmatpush3.bf16.msra.mxu0 %v6456_v40  ;;  %v6365_v48 = vld [vmem:[%s9781_s0 + $0x2e4] ss:$36 sps:$4 sm:$0xff]  }
 0x12d   :  { %v7492_v32 = vpop.f32.mrf.mxu0  ;;  %v7494_v51 = vpop.f32.mrf.mxu1 }
 0x12e   :  { %9839 = vst [vmem:[#allocation4_spill] sm:$0xff] %v7494_v51 }
 0x12f   :  { %v2484_v58 = vpop.f32.mrf.mxu0  ;;  %v2676_v59 = vpop.f32.mrf.mxu1 }
 0x131   :  { %v7508_v60 = vpop.f32.mrf.mxu0  ;;  %v7510_v63 = vpop.f32.mrf.mxu1  ;;  %2903 = vmatmul.mubr.bf16.gmra.mxu1 %v6333_v52  ;;  %3064 = vmatmul.mubr.bf16.gmra.mxu0 %v6336_v53  ;;  %v6354_v52 = vld [vmem:[%s9781_s0 + $0x710] ss:$36 sps:$4 sm:$0xff]   ;;  %v6357_v53 = vld [vmem:[%s9781_s0 + $0x298] ss:$36 sps:$4 sm:$0xff]  }
 0x132   :  { %9840 = vst [vmem:[#allocation5_spill] sm:$0xff] %v7510_v63  ;;  %2910 = vmatprep.mubr.bf16.mxu1 %v6342_v54  ;;  %3071 = vmatprep.mubr.bf16.mxu0 %v6345_v55  ;;  %v6362_v55 = vld [vmem:[%s9781_s0 + $0x75c] ss:$36 sps:$4 sm:$0xff]  }
 0x133   :  { %v2489_v1 = vpop.f32.mrf.mxu0  ;;  %v2681_v2 = vpop.f32.mrf.mxu1 }
 0x134   :  { %v2448_v1 = vadd.f32 %v7535_v21, %v7402_v56  ;;  %v6360_v56 = vld [vmem:[%s9781_s0 + $0x758] ss:$36 sps:$4 sm:$0xff]  }
 0x135   :  { %v7512_v3 = vpop.f32.mrf.mxu0  ;;  %v7514_v4 = vpop.f32.mrf.mxu1 }
 0x136   :  { %9841 = vst [vmem:[#allocation6_spill] sm:$0xff] %v7514_v4 }
 0x137   :  { %v2492_v13 = vpop.f32.mrf.mxu0  ;;  %v2684_v14 = vpop.f32.mrf.mxu1 }
 0x138   :  { %v2451_v13 = vadd.f32 %v7535_v21, %v7409_v61  ;;  %v6372_v61 = vld [vmem:[%s9781_s0 + $0x32c] ss:$36 sps:$4 sm:$0xff]  }
 0x139   :  { %v7528_v15 = vpop.f32.mrf.mxu0  ;;  %v7530_v16 = vpop.f32.mrf.mxu1  ;;  %2911 = vmatmul.mubr.bf16.gmra.mxu1 %v6340_v5  ;;  %3072 = vmatmul.mubr.bf16.gmra.mxu0 %v6343_v8 }
 0x13a   :  { %9842 = vst [vmem:[#allocation7_spill] sm:$0xff] %v7530_v16  ;;  %2918 = vmatprep.mubr.bf16.mxu1 %v6348_v9  ;;  %3079 = vmatprep.mubr.bf16.mxu0 %v6351_v12 }
 0x13b   :  { %v2497_v17 = vpop.f32.mrf.mxu0  ;;  %v2689_v20 = vpop.f32.mrf.mxu1 }
 0x13c   :  { %v6363_v20 = vld [vmem:[%s9781_s0 + $0x2e0] ss:$36 sps:$4 sm:$0xff]  }
 0x13d   :  { %v7537_v24 = vpop.f32.mrf.mxu0  ;;  %v7539_v25 = vpop.f32.mrf.mxu1 }
 0x13e   :  { %9843 = vst [vmem:[#allocation8_spill] sm:$0xff] %v7539_v25 }
 0x13f   :  { %v2500_v33 = vpop.f32.mrf.mxu0  ;;  %v2692_v0 = vpop.f32.mrf.mxu1 }
 0x140   :  { %v2456_v33 = vadd.f32 %v7535_v21, %v7425_v6  ;;  %v6367_v6 = vld [vmem:[%s9781_s0 + $0x7a0] ss:$36 sps:$4 sm:$0xff]  }
 0x141   :  { %v7555_v37 = vpop.f32.mrf.mxu0  ;;  %v2728_v38 = vpop.f32.mrf.mxu1  ;;  %2919 = vmatmul.mubr.bf16.gmra.mxu1 %v6346_v26  ;;  %3080 = vmatmul.mubr.bf16.gmra.mxu0 %v6349_v27  ;;  %v6369_v27 = vld [vmem:[%s9781_s0 + $0x7a4] ss:$36 sps:$4 sm:$0xff]  }
 0x142   :  { %v7557_v39 = vadd.f32 %v2728_v38, %v2440_v34  ;;  %2926 = vmatprep.mubr.bf16.mxu1 %v6356_v28  ;;  %3087 = vmatprep.mubr.bf16.mxu0 %v6359_v29 }
 0x143   :  { %v2505_v41 = vpop.f32.mrf.mxu0  ;;  %v2730_v42 = vpop.f32.mrf.mxu1 }
 0x144   :  { %v2459_v42 = vadd.f32 %v7535_v21, %v7429_v10  ;;  %v6378_v10 = vld [vmem:[%s9781_s0 + $0x374] ss:$36 sps:$4 sm:$0xff]  }
 0x145   :  { %v7564_v43 = vpop.f32.mrf.mxu0  ;;  %v2731_v50 = vpop.f32.mrf.mxu1 }
 0x146   :  { %v7572_v54 = vadd.f32 %v2731_v50, %v2443_v47 }
 0x147   :  { %v2508_v58 = vpop.f32.mrf.mxu0  ;;  %v2733_v59 = vpop.f32.mrf.mxu1 }
 0x148   :  { %v2464_v59 = vadd.f32 %v7535_v21, %v7445_v18 }
 0x149   :  { %v7582_v2 = vpop.f32.mrf.mxu0  ;;  %v2736_v5 = vpop.f32.mrf.mxu1  ;;  %2927 = vmatmul.mubr.bf16.gmra.mxu1 %v6354_v52  ;;  %3088 = vmatmul.mubr.bf16.gmra.mxu0 %v6357_v53  ;;  %v6370_v52 = vld [vmem:[%s9781_s0 + $0x328] ss:$36 sps:$4 sm:$0xff]  }
 0x14a   :  { %v7584_v8 = vadd.f32 %v2736_v5, %v2448_v1  ;;  %2934 = vmatprep.mubr.bf16.mxu1 %v6362_v55  ;;  %3095 = vmatprep.mubr.bf16.mxu0 %v6365_v48  ;;  %v6375_v55 = vld [vmem:[%s9781_s0 + $0x7ec] ss:$36 sps:$4 sm:$0xff]  }
 0x14b   :  { %v2513_v9 = vpop.f32.mrf.mxu0  ;;  %v2738_v12 = vpop.f32.mrf.mxu1 }
 0x14d   :  { %v7588_v14 = vpop.f32.mrf.mxu0  ;;  %v2739_v17 = vpop.f32.mrf.mxu1 }
 0x14e   :  { %v7596_v26 = vadd.f32 %v2739_v17, %v2451_v13  ;;  %v2467_v17 = vadd.f32 %v7535_v21, %v7449_v22 }
 0x14f   :  { %v2516_v28 = vpop.f32.mrf.mxu0  ;;  %v2741_v29 = vpop.f32.mrf.mxu1 }
 0x150   :  { %v6383_v28 = vld [vmem:[%s9781_s0 + $0x834] ss:$36 sps:$4 sm:$0xff]   ;;  %v6386_v29 = vld [vmem:[%s9781_s0 + $0x3bc] ss:$36 sps:$4 sm:$0xff]  }
 0x151   :  { %v7606_v0 = vpop.f32.mrf.mxu0  ;;  %v2744_v34 = vpop.f32.mrf.mxu1  ;;  %2935 = vmatmul.mubr.bf16.gmra.mxu1 %v6360_v56  ;;  %3096 = vmatmul.mubr.bf16.gmra.mxu0 %v6363_v20  ;;  %v7639_v56 = vld [vmem:[%s9783_s4] sm:$0xf] }
 0x152   :  { %v7608_v38 = vadd.f32 %v2744_v34, %v2456_v33  ;;  %2942 = vmatprep.mubr.bf16.mxu1 %v6369_v27  ;;  %3103 = vmatprep.mubr.bf16.mxu0 %v6372_v61  ;;  %v6373_v27 = vld [vmem:[%s9781_s0 + $0x7e8] ss:$36 sps:$4 sm:$0xff]   ;;  %v6376_v61 = vld [vmem:[%s9781_s0 + $0x370] ss:$36 sps:$4 sm:$0xff]  }
 0x153   :  { %v2521_v40 = vpop.f32.mrf.mxu0  ;;  %v2746_v41 = vpop.f32.mrf.mxu1  ;;  %6090 = vmatprep.subr.msk.bf16.mxu1 %vm4179_vm0, %v7639_v56 }
 0x154   :  { %v2472_v40 = vadd.f32 %v7535_v21, %v7465_v30 }
 0x155   :  { %v7612_v47 = vpop.f32.mrf.mxu0  ;;  %v2747_v50 = vpop.f32.mrf.mxu1 }
 0x156   :  { %v7620_v53 = vadd.f32 %v2747_v50, %v2459_v42  ;;  %v2523_v16 = vadd.f32 %v7535_v21, %v7612_v47  ;;  %v6430_v47 = vld [vmem:[%s9781_s0 + $0x13c] ss:$36 sps:$4 sm:$0xff]  }
 0x157   :  { %v2524_v48 = vpop.f32.mrf.mxu0  ;;  %v2749_v58 = vpop.f32.mrf.mxu1 }
 0x158   :  { %v6381_v58 = vld [vmem:[%s9781_s0 + $0x830] ss:$36 sps:$4 sm:$0xff]  }
 0x159   :  { %v7630_v1 = vpop.f32.mrf.mxu0  ;;  %v2752_v5 = vpop.f32.mrf.mxu1  ;;  %2943 = vmatmul.mubr.bf16.gmra.mxu1 %v6367_v6  ;;  %3104 = vmatmul.mubr.bf16.gmra.mxu0 %v6370_v52  ;;  %v6481_v6 = vld [vmem:[%s9780_s2 + $0x200] sm:$0xff]  }
 0x15a   :  { %v7632_v9 = vadd.f32 %v2752_v5, %v2464_v59  ;;  %2950 = vmatprep.mubr.bf16.mxu1 %v6375_v55  ;;  %3111 = vmatprep.mubr.bf16.mxu0 %v6378_v10  ;;  %v2475_v10 = vadd.f32 %v7535_v21, %v7472_v35  ;;  %v6384_v59 = vld [vmem:[%s9781_s0 + $0x3b8] ss:$36 sps:$4 sm:$0xff]   ;;  %v6392_v35 = vld [vmem:[%s9781_s0 + $0x404] ss:$36 sps:$4 sm:$0xff]  }
 0x15b   :  { %v2529_v12 = vpop.f32.mrf.mxu0  ;;  %v2754_v13 = vpop.f32.mrf.mxu1  ;;  %5798 = vmatprep.subr.bf16.mxu0 %v6481_v6 }
 0x15c   :  { %5799 = vmatpush3.bf16.msra.mxu0 %v6481_v6  ;;  %v6389_v12 = vld [vmem:[%s9781_s0 + $0x87c] ss:$36 sps:$4 sm:$0xff]  }
 0x15d   :  { %v7641_v18 = vpop.f32.mrf.mxu0  ;;  %v2755_v20 = vpop.f32.mrf.mxu1  ;;  %v6390_v6 = vld [vmem:[%s9781_s0 + $0x400] ss:$36 sps:$4 sm:$0xff]  }
 0x15e   :  { %v7651_v22 = vadd.f32 %v2755_v20, %v2467_v17  ;;  %v2480_v20 = vadd.f32 %v7535_v21, %v7488_v45  ;;  %v6387_v45 = vld [vmem:[%s9781_s0 + $0x878] ss:$36 sps:$4 sm:$0xff]   ;;  %v2531_v63 = vadd.f32 %v7535_v21, %v7641_v18  ;;  %v6437_v18 = vld [vmem:[%s9781_s0 + $0x184] ss:$36 sps:$4 sm:$0xff]  }
 0x15f   :  { %v2532_v33 = vpop.f32.mrf.mxu0  ;;  %v2757_v34 = vpop.f32.mrf.mxu1 }
 0x160   :  { %v2483_v34 = vadd.f32 %v7535_v21, %v7492_v32  ;;  %v6399_v32 = vld [vmem:[%s9781_s0 + $0x44c] ss:$36 sps:$4 sm:$0xff]  }
 0x161   :  { %v7661_v41 = vpop.f32.mrf.mxu0  ;;  %v2760_v42 = vpop.f32.mrf.mxu1  ;;  %2951 = vmatmul.mubr.bf16.gmra.mxu1 %v6373_v27  ;;  %3112 = vmatmul.mubr.bf16.gmra.mxu0 %v6376_v61 }
 0x162   :  { %v7663_v50 = vadd.f32 %v2760_v42, %v2472_v40  ;;  %2958 = vmatprep.mubr.bf16.mxu1 %v6383_v28  ;;  %3119 = vmatprep.mubr.bf16.mxu0 %v6386_v29 }
 0x163   :  { %v2537_v52 = vpop.f32.mrf.mxu0  ;;  %v2762_v55 = vpop.f32.mrf.mxu1 }
 0x164   :  { %v6396_v55 = vld [vmem:[%s9781_s0 + $0x8c4] ss:$36 sps:$4 sm:$0xff]  }
 0x165   :  { %v7670_v30 = vpop.f32.mrf.mxu0  ;;  %v2763_v48 = vpop.f32.mrf.mxu1 }
 0x166   :  { %v7678_v5 = vadd.f32 %v2763_v48, %v2475_v10  ;;  %v2539_v46 = vadd.f32 %v7535_v21, %v7670_v30  ;;  %v6443_v30 = vld [vmem:[%s9781_s0 + $0x1cc] ss:$36 sps:$4 sm:$0xff]  }
 0x167   :  { %v2540_v13 = vpop.f32.mrf.mxu0  ;;  %v2765_v17 = vpop.f32.mrf.mxu1 }
 0x169   :  { %v7688_v27 = vpop.f32.mrf.mxu0  ;;  %v2768_v61 = vpop.f32.mrf.mxu1  ;;  %2959 = vmatmul.mubr.bf16.gmra.mxu1 %v6381_v58  ;;  %3120 = vmatmul.mubr.bf16.gmra.mxu0 %v6384_v59  ;;  %v2488_v58 = vadd.f32 %v7535_v21, %v7508_v60  ;;  %v6394_v60 = vld [vmem:[%s9781_s0 + $0x8c0] ss:$36 sps:$4 sm:$0xff]  }
 0x16a   :  { %v7690_v28 = vadd.f32 %v2768_v61, %v2480_v20  ;;  %2966 = vmatprep.mubr.bf16.mxu1 %v6389_v12  ;;  %3127 = vmatprep.mubr.bf16.mxu0 %v6392_v35  ;;  %v2491_v20 = vadd.f32 %v7535_v21, %v7512_v3  ;;  %v6405_v3 = vld [vmem:[%s9781_s0 + $0x1c] ss:$36 sps:$4 sm:$0xff]  }
 0x16b   :  { %v2545_v29 = vpop.f32.mrf.mxu0  ;;  %v2770_v33 = vpop.f32.mrf.mxu1 }
 0x16c   :  { %v6397_v33 = vld [vmem:[%s9781_s0 + $0x448] ss:$36 sps:$4 sm:$0xff]  }
 0x16d   :  { %v7694_v40 = vpop.f32.mrf.mxu0  ;;  %v2771_v42 = vpop.f32.mrf.mxu1 }
 0x16e   :  { %v7702_v52 = vadd.f32 %v2771_v42, %v2483_v34  ;;  %v6402_v42 = vld [vmem:[%s9781_s0 + $0x494] ss:$36 sps:$4 sm:$0xff]  }
 0x16f   :  { %v2548_v10 = vpop.f32.mrf.mxu0  ;;  %v2773_v48 = vpop.f32.mrf.mxu1 }
 0x171   :  { %v7712_v59 = vpop.f32.mrf.mxu0  ;;  %v2776_v12 = vpop.f32.mrf.mxu1  ;;  %2967 = vmatmul.mubr.bf16.gmra.mxu1 %v6387_v45  ;;  %3128 = vmatmul.mubr.bf16.gmra.mxu0 %v6390_v6 }
 0x172   :  { %v7714_v35 = vadd.f32 %v2776_v12, %v2488_v58  ;;  %2974 = vmatprep.mubr.bf16.mxu1 %v6396_v55  ;;  %3135 = vmatprep.mubr.bf16.mxu0 %v6399_v32  ;;  %v2496_v55 = vadd.f32 %v7535_v21, %v7528_v15  ;;  %v6400_v15 = vld [vmem:[%s9781_s0 + $0x490] ss:$36 sps:$4 sm:$0xff]  }
 0x173   :  { %v2553_v13 = vpop.f32.mrf.mxu0  ;;  %v2778_v17 = vpop.f32.mrf.mxu1 }
 0x174   :  { %v2499_v13 = vadd.f32 %v7535_v21, %v7537_v24  ;;  %v6412_v24 = vld [vmem:[%s9781_s0 + $0x64] ss:$36 sps:$4 sm:$0xff]  }
 0x175   :  { %v7718_v61 = vpop.f32.mrf.mxu0  ;;  %v2779_v29 = vpop.f32.mrf.mxu1 }
 0x176   :  { %v7726_v34 = vadd.f32 %v2779_v29, %v2491_v20  ;;  %v6403_v29 = vld [vmem:[%s9781_s0 + $0x18] ss:$36 sps:$4 sm:$0xff]  }
 0x177   :  { %v2556_v45 = vpop.f32.mrf.mxu0  ;;  %v2781_v6 = vpop.f32.mrf.mxu1 }
 0x178   :  { %v2504_v45 = vadd.f32 %v7535_v21, %v7555_v37  ;;  %v4181_v6 = vsel %vm4179_vm0, %v7639_v56, 0  ;;  %v6407_v56 = vld [vmem:[%s9781_s0 + $0x4d8] ss:$36 sps:$4 sm:$0xff]  }
 0x179   :  { %v7736_v32 = vpop.f32.mrf.mxu0  ;;  %v2784_v10 = vpop.f32.mrf.mxu1  ;;  %2975 = vmatmul.mubr.bf16.gmra.mxu1 %v6394_v60  ;;  %3136 = vmatmul.mubr.bf16.gmra.mxu0 %v6397_v33  ;;  %v6409_v33 = vld [vmem:[%s9781_s0 + $0x4dc] ss:$36 sps:$4 sm:$0xff]  }
 0x17a   :  { %v7738_v48 = vadd.f32 %v2784_v10, %v2496_v55  ;;  %3143 = vmatprep.mubr.bf16.mxu0 %v6402_v42  ;;  %3304 = vmatprep.mubr.bf16.mxu1 %v6405_v3 }
 0x17b   :  { %v2561_v58 = vpop.f32.mrf.mxu0  ;;  %v2786_v12 = vpop.f32.mrf.mxu1 }
 0x17d   :  { %v7742_v17 = vpop.f32.mrf.mxu0  ;;  %v2787_v20 = vpop.f32.mrf.mxu1 }
 0x17e   :  { %v7750_v60 = vadd.f32 %v2787_v20, %v2499_v13  ;;  %v2507_v20 = vadd.f32 %v7535_v21, %v7564_v43  ;;  %v6418_v43 = vld [vmem:[%s9781_s0 + $0xac] ss:$36 sps:$4 sm:$0xff]  }
 0x17f   :  { %v2564_v42 = vpop.f32.mrf.mxu0  ;;  %v2789_v3 = vpop.f32.mrf.mxu1 }
 0x181   :  { %v7762_v55 = vpop.f32.mrf.mxu0  ;;  %v2792_v10 = vpop.f32.mrf.mxu1  ;;  %3144 = vmatmul.mubr.bf16.gmra.mxu0 %v6400_v15  ;;  %3305 = vmatmul.mubr.bf16.vlgmr.msra.gmra.mxu1 %v6403_v29  ;;  %v6410_v15 = vld [vmem:[%s9781_s0 + $0x60] ss:$36 sps:$4 sm:$0xff]  }
 0x182   :  { %v7764_v58 = vadd.f32 %v2792_v10, %v2504_v45  ;;  %3151 = vmatprep.mubr.bf16.mxu0 %v6409_v33  ;;  %3312 = vmatprep.mubr.bf16.mxu1 %v6412_v24  ;;  %v6415_v33 = vld [vmem:[%s9781_s0 + $0x524] ss:$36 sps:$4 sm:$0xff]   ;;  %v2512_v45 = vadd.f32 %v7535_v21, %v7582_v2 }
 0x183   :  { %v2569_v12 = vpop.f32.mrf.mxu0  ;;  %v2794_v13 = vpop.f32.mrf.mxu1  ;;  %5865 = vmatpush3.bf16.msra.mxu1 %v4181_v6  ;;  %v6413_v2 = vld [vmem:[%s9781_s0 + $0x520] ss:$36 sps:$4 sm:$0xff]  }
 0x185   :  { %v7768_v42 = vpop.f32.mrf.mxu0  ;;  %v2795_v37 = vpop.f32.mrf.mxu1 }
 0x186   :  { %v7776_v29 = vadd.f32 %v2795_v37, %v2507_v20  ;;  %v2515_v37 = vadd.f32 %v7535_v21, %v7588_v14  ;;  %v6424_v14 = vld [vmem:[%s9781_s0 + $0xf4] ss:$36 sps:$4 sm:$0xff]  }
 0x187   :  { %v2572_v24 = vpop.f32.mrf.mxu0  ;;  %v2797_v3 = vpop.f32.mrf.mxu1 }
 0x189   :  { %v7786_v6 = vpop.f32.mrf.mxu0  ;;  %v2800_v10 = vpop.f32.mrf.mxu1  ;;  %3152 = vmatmul.mubr.bf16.gmra.mxu0 %v6407_v56  ;;  %3313 = vmatmul.mubr.bf16.gmra.mxu1 %v6410_v15  ;;  %v6416_v56 = vld [vmem:[%s9781_s0 + $0xa8] ss:$36 sps:$4 sm:$0xff]  }
 0x18a   :  { %v7788_v12 = vadd.f32 %v2800_v10, %v2512_v45  ;;  %3159 = vmatprep.mubr.bf16.mxu0 %v6415_v33  ;;  %3320 = vmatprep.mubr.bf16.mxu1 %v6418_v43  ;;  %v6421_v33 = vld [vmem:[%s9781_s0 + $0x56c] ss:$36 sps:$4 sm:$0xff]   ;;  %v2520_v45 = vadd.f32 %v7535_v21, %v7606_v0 }
 0x18b   :  { %v2577_v13 = vpop.f32.mrf.mxu0  ;;  %v2802_v20 = vpop.f32.mrf.mxu1  ;;  %v6419_v0 = vld [vmem:[%s9781_s0 + $0x568] ss:$36 sps:$4 sm:$0xff]  }
 0x18d   :  { %v7792_v25 = vpop.f32.mrf.mxu0  ;;  %v2803_v24 = vpop.f32.mrf.mxu1 }
 0x18e   :  { %v7800_v15 = vadd.f32 %v2803_v24, %v2515_v37 }
 0x18f   :  { %v2580_v43 = vpop.f32.mrf.mxu0  ;;  %v2805_v3 = vpop.f32.mrf.mxu1 }
 0x191   :  { %v7810_v10 = vpop.f32.mrf.mxu0  ;;  %v2808_v13 = vpop.f32.mrf.mxu1  ;;  %3160 = vmatmul.mubr.bf16.gmra.mxu0 %v6413_v2  ;;  %3321 = vmatmul.mubr.bf16.gmra.mxu1 %v6416_v56  ;;  %v6422_v2 = vld [vmem:[%s9781_s0 + $0xf0] ss:$36 sps:$4 sm:$0xff]  }
 0x192   :  { %v7812_v20 = vadd.f32 %v2808_v13, %v2520_v45  ;;  %3167 = vmatprep.mubr.bf16.mxu0 %v6421_v33  ;;  %3328 = vmatprep.mubr.bf16.mxu1 %v6424_v14  ;;  %v6427_v33 = vld [vmem:[%s9781_s0 + $0x5b4] ss:$36 sps:$4 sm:$0xff]   ;;  %v2528_v45 = vadd.f32 %v7535_v21, %v7630_v1 }
 0x193   :  { %v2585_v37 = vpop.f32.mrf.mxu0  ;;  %v2810_v24 = vpop.f32.mrf.mxu1  ;;  %v6425_v1 = vld [vmem:[%s9781_s0 + $0x5b0] ss:$36 sps:$4 sm:$0xff]  }
 0x195   :  { %v7816_v4 = vpop.f32.mrf.mxu0  ;;  %v2811_v43 = vpop.f32.mrf.mxu1 }
 0x196   :  { %v7824_v56 = vadd.f32 %v2811_v43, %v2523_v16 }
 0x197   :  { %v2588_v14 = vpop.f32.mrf.mxu0  ;;  %v2813_v3 = vpop.f32.mrf.mxu1 }
 0x199   :  { %v7834_v13 = vpop.f32.mrf.mxu0  ;;  %v2816_v37 = vpop.f32.mrf.mxu1  ;;  %3168 = vmatmul.mubr.bf16.gmra.mxu0 %v6419_v0  ;;  %3329 = vmatmul.mubr.bf16.gmra.mxu1 %v6422_v2  ;;  %v6428_v0 = vld [vmem:[%s9781_s0 + $0x138] ss:$36 sps:$4 sm:$0xff]  }
 0x19a   :  { %v7836_v16 = vadd.f32 %v2816_v37, %v2528_v45  ;;  %3175 = vmatprep.mubr.bf16.mxu0 %v6427_v33  ;;  %3336 = vmatprep.mubr.bf16.mxu1 %v6430_v47  ;;  %v6434_v33 = vld [vmem:[%s9781_s0 + $0x5fc] ss:$36 sps:$4 sm:$0xff]   ;;  %v2536_v45 = vadd.f32 %v7535_v21, %v7661_v41 }
 0x19b   :  { %v2593_v24 = vpop.f32.mrf.mxu0  ;;  %v2818_v43 = vpop.f32.mrf.mxu1  ;;  %v6432_v41 = vld [vmem:[%s9781_s0 + $0x5f8] ss:$36 sps:$4 sm:$0xff]  }
 0x19d   :  { %v7840_v51 = vpop.f32.mrf.mxu0  ;;  %v2819_v14 = vpop.f32.mrf.mxu1 }
 0x19e   :  { %v7848_v2 = vadd.f32 %v2819_v14, %v2531_v63 }
 0x19f   :  { %v2596_v47 = vpop.f32.mrf.mxu0  ;;  %v2821_v3 = vpop.f32.mrf.mxu1 }
 0x1a1   :  { %v7858_v37 = vpop.f32.mrf.mxu0  ;;  %v2824_v24 = vpop.f32.mrf.mxu1  ;;  %3176 = vmatmul.mubr.bf16.gmra.mxu0 %v6425_v1  ;;  %3337 = vmatmul.mubr.bf16.gmra.mxu1 %v6428_v0  ;;  %v6435_v1 = vld [vmem:[%s9781_s0 + $0x180] ss:$36 sps:$4 sm:$0xff]  }
 0x1a2   :  { %v7860_v63 = vadd.f32 %v2824_v24, %v2536_v45  ;;  %3183 = vmatprep.mubr.bf16.mxu0 %v6434_v33  ;;  %3344 = vmatprep.mubr.bf16.mxu1 %v6437_v18  ;;  %v6440_v33 = vld [vmem:[%s9781_s0 + $0x644] ss:$36 sps:$4 sm:$0xff]   ;;  %v2544_v45 = vadd.f32 %v7535_v21, %v7688_v27 }
 0x1a3   :  { %v2601_v43 = vpop.f32.mrf.mxu0  ;;  %v2826_v14 = vpop.f32.mrf.mxu1  ;;  %v6438_v27 = vld [vmem:[%s9781_s0 + $0x640] ss:$36 sps:$4 sm:$0xff]  }
 0x1a4   :  { %9844 = vst [vmem:[#allocation9_spill] sm:$0xff] %v7860_v63 }
 0x1a5   :  { %v7864_v36 = vpop.f32.mrf.mxu0  ;;  %v2827_v47 = vpop.f32.mrf.mxu1 }
 0x1a6   :  { %v7872_v0 = vadd.f32 %v2827_v47, %v2539_v46 }
 0x1a7   :  { %v2604_v18 = vpop.f32.mrf.mxu0  ;;  %v2829_v3 = vpop.f32.mrf.mxu1 }
 0x1a8   :  { %9845 = vst [vmem:[#allocation10_spill] sm:$0xff] %v7872_v0  ;;  %v2547_v0 = vadd.f32 %v7535_v21, %v7694_v40  ;;  %v6449_v40 = vld [vmem:[%s9781_s0 + $0x214] ss:$36 sps:$4 sm:$0xff]  }
 0x1a9   :  { %v7882_v24 = vpop.f32.mrf.mxu0  ;;  %v2832_v43 = vpop.f32.mrf.mxu1  ;;  %3184 = vmatmul.mubr.bf16.gmra.mxu0 %v6432_v41  ;;  %3345 = vmatmul.mubr.bf16.gmra.mxu1 %v6435_v1  ;;  %v6441_v41 = vld [vmem:[%s9781_s0 + $0x1c8] ss:$36 sps:$4 sm:$0xff]  }
 0x1aa   :  { %v7884_v46 = vadd.f32 %v2832_v43, %v2544_v45  ;;  %3191 = vmatprep.mubr.bf16.mxu0 %v6440_v33  ;;  %3352 = vmatprep.mubr.bf16.mxu1 %v6443_v30  ;;  %v6446_v33 = vld [vmem:[%s9781_s0 + $0x68c] ss:$36 sps:$4 sm:$0xff]   ;;  %v2552_v45 = vadd.f32 %v7535_v21, %v7712_v59 }
 0x1ab   :  { %v2609_v14 = vpop.f32.mrf.mxu0  ;;  %v2834_v47 = vpop.f32.mrf.mxu1  ;;  %v6444_v59 = vld [vmem:[%s9781_s0 + $0x688] ss:$36 sps:$4 sm:$0xff]  }
 0x1ac   :  { %9846 = vst [vmem:[#allocation11_spill] sm:$0xff] %v7884_v46 }
 0x1ad   :  { %v7888_v63 = vpop.f32.mrf.mxu0  ;;  %v2835_v18 = vpop.f32.mrf.mxu1 }
 0x1ae   :  { %v7896_v1 = vadd.f32 %v2835_v18, %v2547_v0 }
 0x1af   :  { %v2612_v30 = vpop.f32.mrf.mxu0  ;;  %v2837_v3 = vpop.f32.mrf.mxu1 }
 0x1b0   :  { %9847 = vst [vmem:[#allocation12_spill] sm:$0xff] %v7896_v1  ;;  %v2555_v1 = vadd.f32 %v7535_v21, %v7718_v61  ;;  %v6455_v61 = vld [vmem:[%s9781_s0 + $0x25c] ss:$36 sps:$4 sm:$0xff]  }
 0x1b1   :  { %v7906_v43 = vpop.f32.mrf.mxu0  ;;  %v2840_v14 = vpop.f32.mrf.mxu1  ;;  %3192 = vmatmul.mubr.bf16.gmra.mxu0 %v6438_v27  ;;  %3353 = vmatmul.mubr.bf16.gmra.mxu1 %v6441_v41  ;;  %v6447_v27 = vld [vmem:[%s9781_s0 + $0x210] ss:$36 sps:$4 sm:$0xff]  }
 0x1b2   :  { %v7908_v0 = vadd.f32 %v2840_v14, %v2552_v45  ;;  %3199 = vmatprep.mubr.bf16.mxu0 %v6446_v33  ;;  %3360 = vmatprep.mubr.bf16.mxu1 %v6449_v40  ;;  %v6452_v33 = vld [vmem:[%s9781_s0 + $0x6d4] ss:$36 sps:$4 sm:$0xff]   ;;  %v2560_v45 = vadd.f32 %v7535_v21, %v7736_v32 }
 0x1b3   :  { %v2617_v47 = vpop.f32.mrf.mxu0  ;;  %v2842_v18 = vpop.f32.mrf.mxu1  ;;  %v6450_v32 = vld [vmem:[%s9781_s0 + $0x6d0] ss:$36 sps:$4 sm:$0xff]  }
 0x1b4   :  { %9848 = vst [vmem:[#allocation13_spill] sm:$0xff] %v7908_v0 }
 0x1b5   :  { %v7912_v46 = vpop.f32.mrf.mxu0  ;;  %v2843_v30 = vpop.f32.mrf.mxu1 }
 0x1b6   :  { %v7920_v41 = vadd.f32 %v2843_v30, %v2555_v1 }
 0x1b7   :  { %v2620_v40 = vpop.f32.mrf.mxu0  ;;  %v2845_v3 = vpop.f32.mrf.mxu1 }
 0x1b8   :  { %9849 = vst [vmem:[#allocation14_spill] sm:$0xff] %v7920_v41  ;;  %v2563_v41 = vadd.f32 %v7535_v21, %v7742_v17  ;;  %v6462_v17 = vld [vmem:[%s9781_s0 + $0x2a4] ss:$36 sps:$4 sm:$0xff]  }
 0x1b9   :  { %v7930_v14 = vpop.f32.mrf.mxu0  ;;  %v2848_v47 = vpop.f32.mrf.mxu1  ;;  %3200 = vmatmul.mubr.bf16.gmra.mxu0 %v6444_v59  ;;  %3361 = vmatmul.mubr.bf16.gmra.mxu1 %v6447_v27  ;;  %v6453_v59 = vld [vmem:[%s9781_s0 + $0x258] ss:$36 sps:$4 sm:$0xff]  }
 0x1ba   :  { %v7932_v1 = vadd.f32 %v2848_v47, %v2560_v45  ;;  %3207 = vmatprep.mubr.bf16.mxu0 %v6452_v33  ;;  %3368 = vmatprep.mubr.bf16.mxu1 %v6455_v61  ;;  %v6459_v33 = vld [vmem:[%s9781_s0 + $0x71c] ss:$36 sps:$4 sm:$0xff]   ;;  %v2568_v45 = vadd.f32 %v7535_v21, %v7762_v55 }
 0x1bb   :  { %v2625_v18 = vpop.f32.mrf.mxu0  ;;  %v2850_v30 = vpop.f32.mrf.mxu1  ;;  %v6457_v55 = vld [vmem:[%s9781_s0 + $0x718] ss:$36 sps:$4 sm:$0xff]  }
 0x1bc   :  { %9850 = vst [vmem:[#allocation15_spill] sm:$0xff] %v7932_v1 }
 0x1bd   :  { %v7936_v0 = vpop.f32.mrf.mxu0  ;;  %v2851_v40 = vpop.f32.mrf.mxu1 }
 0x1be   :  { %v7944_v27 = vadd.f32 %v2851_v40, %v2563_v41 }
 0x1bf   :  { %v2628_v61 = vpop.f32.mrf.mxu0  ;;  %v2853_v3 = vpop.f32.mrf.mxu1 }
 0x1c0   :  { %9851 = vst [vmem:[#allocation16_spill] sm:$0xff] %v7944_v27  ;;  %v2571_v61 = vadd.f32 %v7535_v21, %v7768_v42  ;;  %v6468_v42 = vld [vmem:[%s9781_s0 + $0x2ec] ss:$36 sps:$4 sm:$0xff]  }
 0x1c1   :  { %v2856_v47 = vpop.f32.mrf.mxu1  ;;  %v3017_v18 = vpop.f32.mrf.mxu0  ;;  %3208 = vmatmul.mubr.bf16.gmra.mxu0 %v6450_v32  ;;  %3369 = vmatmul.mubr.bf16.gmra.mxu1 %v6453_v59  ;;  %v6460_v32 = vld [vmem:[%s9781_s0 + $0x2a0] ss:$36 sps:$4 sm:$0xff]  }
 0x1c2   :  { %v7954_v30 = vadd.f32 %v2856_v47, %v2568_v45  ;;  %v7957_v41 = vadd.f32 %v3017_v18, %v7557_v39  ;;  %3215 = vmatprep.mubr.bf16.mxu0 %v6459_v33  ;;  %3376 = vmatprep.mubr.bf16.mxu1 %v6462_v17  ;;  %v2576_v45 = vadd.f32 %v7535_v21, %v7786_v6  ;;  %v7990_v6 = vld [vmem:[%s9784_s6 + $0x78] sm:$0xff] }
 0x1c3   :  { %v2858_v40 = vpop.f32.mrf.mxu1  ;;  %v3019_v27 = vpop.f32.mrf.mxu0  ;;  %5930 = vmatprep.subr.mxu0 %v7990_v6 }
 0x1c4   :  { %v6465_v27 = vld [vmem:[%s9781_s0 + $0x764] ss:$36 sps:$4 sm:$0xff]  }
 0x1c5   :  { %v2859_v3 = vpop.f32.mrf.mxu1  ;;  %v3020_v1 = vpop.f32.mrf.mxu0 }
 0x1c6   :  { %v7967_v59 = vadd.f32 %v2859_v3, %v2571_v61  ;;  %v7970_v39 = vadd.f32 %v3020_v1, %v7572_v54  ;;  %v2579_v3 = vadd.f32 %v7535_v21, %v7792_v25 }
 0x1c7   :  { %v2861_v33 = vpop.f32.mrf.mxu1  ;;  %v3022_v17 = vpop.f32.mrf.mxu0 }
 0x1c8   :  { %v6474_v17 = vld [vmem:[%s9781_s0 + $0x334] ss:$36 sps:$4 sm:$0xff]  }
 0x1c9   :  { %v2864_v47 = vpop.f32.mrf.mxu1  ;;  %v3025_v18 = vpop.f32.mrf.mxu0  ;;  %3216 = vmatmul.mubr.bf16.gmra.mxu0 %v6457_v55  ;;  %3377 = vmatmul.mubr.bf16.gmra.mxu1 %v6460_v32  ;;  %v6463_v32 = vld [vmem:[%s9781_s0 + $0x760] ss:$36 sps:$4 sm:$0xff]  }
 0x1ca   :  { %v7980_v40 = vadd.f32 %v2864_v47, %v2576_v45  ;;  %v7983_v54 = vadd.f32 %v3025_v18, %v7584_v8  ;;  %3223 = vmatprep.mubr.bf16.mxu0 %v6465_v27  ;;  %3384 = vmatprep.mubr.bf16.mxu1 %v6468_v42  ;;  %v6466_v8 = vld [vmem:[%s9781_s0 + $0x2e8] ss:$36 sps:$4 sm:$0xff]   ;;  %v2584_v18 = vadd.f32 %v7535_v21, %v7810_v10 }
 0x1cb   :  { %v2866_v1 = vpop.f32.mrf.mxu1  ;;  %v3027_v61 = vpop.f32.mrf.mxu0  ;;  %v6471_v42 = vld [vmem:[%s9781_s0 + $0x7ac] ss:$36 sps:$4 sm:$0xff]  }
 0x1cc   :  { %v6469_v10 = vld [vmem:[%s9781_s0 + $0x7a8] ss:$36 sps:$4 sm:$0xff]  }
 0x1cd   :  { %v2867_v33 = vpop.f32.mrf.mxu1  ;;  %v3028_v55 = vpop.f32.mrf.mxu0 }
 0x1ce   :  { %v7999_v27 = vadd.f32 %v2867_v33, %v2579_v3  ;;  %v8002_v25 = vadd.f32 %v3028_v55, %v7596_v26 }
 0x1cf   :  { %v2869_v45 = vpop.f32.mrf.mxu1  ;;  %v3030_v47 = vpop.f32.mrf.mxu0 }
 0x1d0   :  { %9852 = vst [vmem:[#allocation17_spill] sm:$0xff] %v8002_v25  ;;  %v2587_v45 = vadd.f32 %v7535_v21, %v7816_v4  ;;  %v6480_v4 = vld [vmem:[%s9781_s0 + $0x37c] ss:$36 sps:$4 sm:$0xff]  }
 0x1d1   :  { %v2872_v1 = vpop.f32.mrf.mxu1  ;;  %v3033_v61 = vpop.f32.mrf.mxu0  ;;  %3224 = vmatmul.mubr.bf16.gmra.mxu0 %v6463_v32  ;;  %3385 = vmatmul.mubr.bf16.gmra.mxu1 %v6466_v8  ;;  %v6472_v32 = vld [vmem:[%s9781_s0 + $0x330] ss:$36 sps:$4 sm:$0xff]  }
 0x1d2   :  { %v8012_v3 = vadd.f32 %v2872_v1, %v2584_v18  ;;  %v8015_v26 = vadd.f32 %v3033_v61, %v7608_v38  ;;  %3231 = vmatprep.mubr.bf16.mxu0 %v6471_v42  ;;  %3392 = vmatprep.mubr.bf16.mxu1 %v6474_v17  ;;  %v6477_v42 = vld [vmem:[%s9781_s0 + $0x7f4] ss:$36 sps:$4 sm:$0xff]   ;;  %v2592_v1 = vadd.f32 %v7535_v21, %v7834_v13 }
 0x1d3   :  { %v2874_v33 = vpop.f32.mrf.mxu1  ;;  %v3035_v55 = vpop.f32.mrf.mxu0  ;;  %v6475_v13 = vld [vmem:[%s9781_s0 + $0x7f0] ss:$36 sps:$4 sm:$0xff]  }
 0x1d5   :  { %v2875_v47 = vpop.f32.mrf.mxu1  ;;  %v3036_v25 = vpop.f32.mrf.mxu0 }
 0x1d6   :  { %v8025_v8 = vadd.f32 %v2875_v47, %v2587_v45  ;;  %v8028_v38 = vadd.f32 %v3036_v25, %v7620_v53  ;;  %v2595_v47 = vadd.f32 %v7535_v21, %v7840_v51  ;;  %v6487_v51 = vld [vmem:[%s9781_s0 + $0x3c4] ss:$36 sps:$4 sm:$0xff]  }
 0x1d7   :  { %v2877_v17 = vpop.f32.mrf.mxu1  ;;  %v3038_v18 = vpop.f32.mrf.mxu0 }
 0x1d9   :  { %v2880_v61 = vpop.f32.mrf.mxu1  ;;  %v3041_v33 = vpop.f32.mrf.mxu0  ;;  %3232 = vmatmul.mubr.bf16.gmra.mxu0 %v6469_v10  ;;  %3393 = vmatmul.mubr.bf16.gmra.mxu1 %v6472_v32  ;;  %v6478_v10 = vld [vmem:[%s9781_s0 + $0x378] ss:$36 sps:$4 sm:$0xff]  }
 0x1da   :  { %v8038_v55 = vadd.f32 %v2880_v61, %v2592_v1  ;;  %v8041_v53 = vadd.f32 %v3041_v33, %v7632_v9  ;;  %3239 = vmatprep.mubr.bf16.mxu0 %v6477_v42  ;;  %3400 = vmatprep.mubr.bf16.mxu1 %v6480_v4  ;;  %v6484_v42 = vld [vmem:[%s9781_s0 + $0x83c] ss:$36 sps:$4 sm:$0xff]   ;;  %v2600_v61 = vadd.f32 %v7535_v21, %v7858_v37 }
 0x1db   :  { %v2882_v25 = vpop.f32.mrf.mxu1  ;;  %v3043_v45 = vpop.f32.mrf.mxu0  ;;  %v6482_v37 = vld [vmem:[%s9781_s0 + $0x838] ss:$36 sps:$4 sm:$0xff]  }
 0x1dd   :  { %v2883_v17 = vpop.f32.mrf.mxu1  ;;  %v3044_v18 = vpop.f32.mrf.mxu0 }
 0x1de   :  { %v8051_v32 = vadd.f32 %v2883_v17, %v2595_v47  ;;  %v8054_v9 = vadd.f32 %v3044_v18, %v7651_v22  ;;  %v2603_v18 = vadd.f32 %v7535_v21, %v7864_v36  ;;  %v6493_v36 = vld [vmem:[%s9781_s0 + $0x40c] ss:$36 sps:$4 sm:$0xff]  }
 0x1df   :  { %v2885_v4 = vpop.f32.mrf.mxu1  ;;  %v3046_v1 = vpop.f32.mrf.mxu0 }
 0x1e1   :  { %v2888_v33 = vpop.f32.mrf.mxu1  ;;  %v3049_v25 = vpop.f32.mrf.mxu0  ;;  %3240 = vmatmul.mubr.bf16.gmra.mxu0 %v6475_v13  ;;  %3401 = vmatmul.mubr.bf16.gmra.mxu1 %v6478_v10  ;;  %v6485_v13 = vld [vmem:[%s9781_s0 + $0x3c0] ss:$36 sps:$4 sm:$0xff]  }
 0x1e2   :  { %v8064_v45 = vadd.f32 %v2888_v33, %v2600_v61  ;;  %v8067_v22 = vadd.f32 %v3049_v25, %v7663_v50  ;;  %3247 = vmatprep.mubr.bf16.mxu0 %v6484_v42  ;;  %3408 = vmatprep.mubr.bf16.mxu1 %v6487_v51  ;;  %v6490_v42 = vld [vmem:[%s9781_s0 + $0x884] ss:$36 sps:$4 sm:$0xff]   ;;  %v2608_v33 = vadd.f32 %v7535_v21, %v7882_v24 }
 0x1e3   :  { %v2890_v47 = vpop.f32.mrf.mxu1  ;;  %v3051_v17 = vpop.f32.mrf.mxu0  ;;  %v6488_v24 = vld [vmem:[%s9781_s0 + $0x880] ss:$36 sps:$4 sm:$0xff]  }
 0x1e5   :  { %v2891_v4 = vpop.f32.mrf.mxu1  ;;  %v3052_v1 = vpop.f32.mrf.mxu0 }
 0x1e6   :  { %v8077_v10 = vadd.f32 %v2891_v4, %v2603_v18  ;;  %v8080_v50 = vadd.f32 %v3052_v1, %v7678_v5  ;;  %v2611_v1 = vadd.f32 %v7535_v21, %v7888_v63  ;;  %v6499_v63 = vld [vmem:[%s9781_s0 + $0x454] ss:$36 sps:$4 sm:$0xff]  }
 0x1e7   :  { %v2893_v51 = vpop.f32.mrf.mxu1  ;;  %v3054_v61 = vpop.f32.mrf.mxu0 }
 0x1e9   :  { %v2896_v25 = vpop.f32.mrf.mxu1  ;;  %v3057_v47 = vpop.f32.mrf.mxu0  ;;  %3248 = vmatmul.mubr.bf16.gmra.mxu0 %v6482_v37  ;;  %3409 = vmatmul.mubr.bf16.gmra.mxu1 %v6485_v13  ;;  %v6491_v37 = vld [vmem:[%s9781_s0 + $0x408] ss:$36 sps:$4 sm:$0xff]  }
 0x1ea   :  { %v8090_v17 = vadd.f32 %v2896_v25, %v2608_v33  ;;  %v8093_v5 = vadd.f32 %v3057_v47, %v7690_v28  ;;  %3255 = vmatprep.mubr.bf16.mxu0 %v6490_v42  ;;  %3416 = vmatprep.mubr.bf16.mxu1 %v6493_v36  ;;  %v6496_v42 = vld [vmem:[%s9781_s0 + $0x8cc] ss:$36 sps:$4 sm:$0xff]   ;;  %v2616_v25 = vadd.f32 %v7535_v21, %v7906_v43 }
 0x1eb   :  { %v2898_v18 = vpop.f32.mrf.mxu1  ;;  %v3059_v4 = vpop.f32.mrf.mxu0  ;;  %v6494_v43 = vld [vmem:[%s9781_s0 + $0x8c8] ss:$36 sps:$4 sm:$0xff]  }
 0x1ed   :  { %v2899_v51 = vpop.f32.mrf.mxu1  ;;  %v3060_v61 = vpop.f32.mrf.mxu0 }
 0x1ee   :  { %v8103_v13 = vadd.f32 %v2899_v51, %v2611_v1  ;;  %v8106_v28 = vadd.f32 %v3060_v61, %v7702_v52  ;;  %v2619_v61 = vadd.f32 %v7535_v21, %v7912_v46  ;;  %v6503_v46 = vld [vmem:[%s9781_s0 + $0x20] ss:$36 sps:$4 sm:$0xff]  }
 0x1ef   :  { %v2901_v36 = vpop.f32.mrf.mxu1  ;;  %v3062_v33 = vpop.f32.mrf.mxu0 }
 0x1f1   :  { %v2904_v47 = vpop.f32.mrf.mxu1  ;;  %v3065_v18 = vpop.f32.mrf.mxu0  ;;  %3256 = vmatmul.mubr.bf16.gmra.mxu0 %v6488_v24  ;;  %3417 = vmatmul.mubr.bf16.gmra.mxu1 %v6491_v37  ;;  %v6497_v24 = vld [vmem:[%s9781_s0 + $0x450] ss:$36 sps:$4 sm:$0xff]  }
 0x1f2   :  { %v8116_v4 = vadd.f32 %v2904_v47, %v2616_v25  ;;  %v8119_v52 = vadd.f32 %v3065_v18, %v7714_v35  ;;  %3263 = vmatprep.mubr.bf16.mxu0 %v6496_v42  ;;  %3424 = vmatprep.mubr.bf16.mxu1 %v6499_v63  ;;  %v6502_v42 = vld [vmem:[%s9781_s0 + $0x49c] ss:$36 sps:$4 sm:$0xff]   ;;  %v2624_v47 = vadd.f32 %v7535_v21, %v7930_v14 }
 0x1f3   :  { %v2906_v1 = vpop.f32.mrf.mxu1  ;;  %v3067_v51 = vpop.f32.mrf.mxu0  ;;  %v6500_v14 = vld [vmem:[%s9781_s0 + $0x498] ss:$36 sps:$4 sm:$0xff]  }
 0x1f5   :  { %v2907_v36 = vpop.f32.mrf.mxu1  ;;  %v3068_v33 = vpop.f32.mrf.mxu0 }
 0x1f6   :  { %v8129_v37 = vadd.f32 %v2907_v36, %v2619_v61  ;;  %v8132_v35 = vadd.f32 %v3068_v33, %v7726_v34  ;;  %v2627_v33 = vadd.f32 %v7535_v21, %v7936_v0  ;;  %v6508_v21 = vld [vmem:[%s9781_s0 + $0xb0] ss:$36 sps:$4 sm:$0xff]  }
 0x1f7   :  { %v2909_v63 = vpop.f32.mrf.mxu1  ;;  %v3070_v25 = vpop.f32.mrf.mxu0 }
 0x1f9   :  { %v2912_v18 = vpop.f32.mrf.mxu1  ;;  %v3073_v1 = vpop.f32.mrf.mxu0  ;;  %3264 = vmatmul.mubr.bf16.gmra.mxu0 %v6494_v43  ;;  %3425 = vmatmul.mubr.bf16.gmra.mxu1 %v6497_v24  ;;  %v6504_v43 = vld [vmem:[%s9781_s0 + $0x68] ss:$36 sps:$4 sm:$0xff]  }
 0x1fa   :  { %v8142_v51 = vadd.f32 %v2912_v18, %v2624_v47  ;;  %v8145_v34 = vadd.f32 %v3073_v1, %v7738_v48  ;;  %3432 = vmatprep.mubr.bf16.mxu1 %v6502_v42  ;;  %5800 = vmatprep.mubr.bf16.mxu0 %v6503_v46  ;;  %v6507_v42 = vld [vmem:[%s9781_s0 + $0x4e4] ss:$36 sps:$4 sm:$0xff]   ;;  %v8169_v47 = vld [vmem:[%s9782_s3] ss:$0 sm:$0xff] }
 0x1fb   :  { %v2914_v61 = vpop.f32.mrf.mxu1  ;;  %v3075_v36 = vpop.f32.mrf.mxu0  ;;  %v2632_v18 = vadd.f32 %v8169_v47, %v7377_v44  ;;  %v4549_v44 = vld [vmem:[%s9784_s6 + $0x68] sm:$0xff] }
 0x1fc   :  { %v4550_v61 = vld [vmem:[%s9784_s6 + $0x70] sm:$0xff] }
 0x1fd   :  { %v2915_v63 = vpop.f32.mrf.mxu1  ;;  %v3076_v25 = vpop.f32.mrf.mxu0 }
 0x1fe   :  { %v8155_v24 = vadd.f32 %v2915_v63, %v2627_v33  ;;  %v8158_v48 = vadd.f32 %v3076_v25, %v7750_v60 }
 0x1ff   :  { %v2917_v0 = vpop.f32.mrf.mxu1  ;;  %v3078_v46 = vpop.f32.mrf.mxu0 }
 0x200   :  { %v6512_v46 = vld [vmem:[%s9781_s0 + $0x52c] ss:$36 sps:$4 sm:$0xff]  }
 0x201   :  { %v2920_v60 = vpop.f32.mrf.mxu1  ;;  %v3081_v1 = vpop.f32.mrf.mxu0  ;;  %3433 = vmatmul.mubr.bf16.gmra.mxu1 %v6500_v14  ;;  %5801 = vmatmul.mubr.bf16.vlgmr.msra.gmra.mxu0 %v6504_v43  ;;  %v2635_v14 = vadd.f32 %v8169_v47, %v7385_v49 }
 0x202   :  { %v8176_v36 = vadd.f32 %v2920_v60, %v2632_v18  ;;  %v8179_v33 = vadd.f32 %v3081_v1, %v7764_v58  ;;  %3440 = vmatprep.mubr.bf16.mxu1 %v6507_v42  ;;  %5804 = vmatprep.mubr.bf16.mxu0 %v6508_v21  ;;  %v6505_v58 = vld [vmem:[%s9781_s0 + $0x4e0] ss:$36 sps:$4 sm:$0xff]   ;;  %v6509_v42 = vld [vmem:[%s9781_s0 + $0xf8] ss:$36 sps:$4 sm:$0xff]  }
 0x203   :  { %v2922_v63 = vpop.f32.mrf.mxu1  ;;  %v3083_v25 = vpop.f32.mrf.mxu0  ;;  %5931 = vmatpush3.msra.mxu0 %v7990_v6  ;;  %v4548_v6 = vld [vmem:[%s9784_s6 + $0x60] sm:$0xff] }
 0x204   :  { %5932 = vmatprep.subr.mxu0 %v4550_v61  ;;  %v6513_v18 = vld [vmem:[%s9781_s0 + $0x140] ss:$36 sps:$4 sm:$0xff]  }
 0x205   :  { %v2923_v43 = vpop.f32.mrf.mxu1  ;;  %v3084_v0 = vpop.f32.mrf.mxu0  ;;  %5933 = vmatpush3.msra.mxu0 %v4550_v61  ;;  %v2640_v61 = vadd.f32 %v8169_v47, %v7404_v57  ;;  %v4546_v57 = vld [vmem:[%s9784_s6 + $0x50] sm:$0xff] }
 0x206   :  { %v8196_v21 = vadd.f32 %v2923_v43, %v2635_v14  ;;  %v8199_v49 = vadd.f32 %v3084_v0, %v7776_v29  ;;  %5934 = vmatprep.subr.mxu0 %v4549_v44  ;;  %v4547_v29 = vld [vmem:[%s9784_s6 + $0x58] sm:$0xff] }
 0x207   :  { %v2925_v60 = vpop.f32.mrf.mxu1  ;;  %v3086_v1 = vpop.f32.mrf.mxu0  ;;  %5935 = vmatpush3.msra.mxu0 %v4549_v44 }
 0x208   :  { %5936 = vmatprep.subr.mxu0 %v4548_v6  ;;  %v6517_v1 = vld [vmem:[%s9781_s0 + $0x574] ss:$36 sps:$4 sm:$0xff]  }
 0x209   :  { %v2928_v63 = vpop.f32.mrf.mxu1  ;;  %v3089_v25 = vpop.f32.mrf.mxu0  ;;  %3441 = vmatmul.mubr.bf16.gmra.mxu1 %v6505_v58  ;;  %5805 = vmatmul.mubr.bf16.gmra.mxu0 %v6509_v42  ;;  %v2643_v58 = vadd.f32 %v8169_v47, %v7411_v62 }
 0x20a   :  { %v8212_v14 = vadd.f32 %v2928_v63, %v2640_v61  ;;  %v8215_v43 = vadd.f32 %v3089_v25, %v7788_v12  ;;  %3448 = vmatprep.mubr.bf16.mxu1 %v6512_v46  ;;  %5808 = vmatprep.mubr.bf16.mxu0 %v6513_v18  ;;  %v6510_v12 = vld [vmem:[%s9781_s0 + $0x528] ss:$36 sps:$4 sm:$0xff]   ;;  %v6518_v61 = vld [vmem:[%s9781_s0 + $0x1d0] ss:$36 sps:$4 sm:$0xff]  }
 0x20b   :  { %v2930_v44 = vpop.f32.mrf.mxu1  ;;  %v3091_v0 = vpop.f32.mrf.mxu0  ;;  %5937 = vmatpush3.msra.mxu0 %v4548_v6  ;;  %v6514_v46 = vld [vmem:[%s9781_s0 + $0x188] ss:$36 sps:$4 sm:$0xff]  }
 0x20c   :  { %5938 = vmatprep.subr.mxu0 %v4547_v29  ;;  %v4545_v6 = vld [vmem:[%s9784_s6 + $0x48] sm:$0xff] }
 0x20d   :  { %v2931_v42 = vpop.f32.mrf.mxu1  ;;  %v3092_v60 = vpop.f32.mrf.mxu0  ;;  %5939 = vmatpush3.msra.mxu0 %v4547_v29  ;;  %v2648_v29 = vadd.f32 %v8169_v47, %v7427_v7  ;;  %v4543_v7 = vld [vmem:[%s9784_s6 + $0x38] sm:$0xff] }
 0x20e   :  { %v8231_v18 = vadd.f32 %v2931_v42, %v2643_v58  ;;  %v8234_v62 = vadd.f32 %v3092_v60, %v7800_v15  ;;  %5940 = vmatprep.subr.mxu0 %v4546_v57  ;;  %v4544_v15 = vld [vmem:[%s9784_s6 + $0x40] sm:$0xff] }
 0x20f   :  { %v2933_v63 = vpop.f32.mrf.mxu1  ;;  %v3094_v25 = vpop.f32.mrf.mxu0  ;;  %5941 = vmatpush3.msra.mxu0 %v4546_v57 }
 0x210   :  { %5942 = vmatprep.subr.mxu0 %v4545_v6  ;;  %v6522_v25 = vld [vmem:[%s9781_s0 + $0x5bc] ss:$36 sps:$4 sm:$0xff]  }
 0x211   :  { %v2936_v44 = vpop.f32.mrf.mxu1  ;;  %v3097_v0 = vpop.f32.mrf.mxu0  ;;  %3449 = vmatmul.mubr.bf16.gmra.mxu1 %v6510_v12  ;;  %5809 = vmatmul.mubr.bf16.gmra.mxu0 %v6514_v46  ;;  %v2651_v12 = vadd.f32 %v8169_v47, %v7431_v11 }
 0x212   :  { %v8247_v58 = vadd.f32 %v2936_v44, %v2648_v29  ;;  %v8250_v42 = vadd.f32 %v3097_v0, %v7812_v20  ;;  %3456 = vmatprep.mubr.bf16.mxu1 %v6517_v1  ;;  %5812 = vmatprep.mubr.bf16.mxu0 %v6518_v61  ;;  %v6515_v20 = vld [vmem:[%s9781_s0 + $0x570] ss:$36 sps:$4 sm:$0xff]   ;;  %v6519_v1 = vld [vmem:[%s9781_s0 + $0x218] ss:$36 sps:$4 sm:$0xff]   ;;  %v6523_v29 = vld [vmem:[%s9781_s0 + $0x260] ss:$36 sps:$4 sm:$0xff]  }
 0x213   :  { %v2938_v57 = vpop.f32.mrf.mxu1  ;;  %v3099_v60 = vpop.f32.mrf.mxu0  ;;  %5943 = vmatpush3.msra.mxu0 %v4545_v6  ;;  %v4542_v6 = vld [vmem:[%s9784_s6 + $0x30] sm:$0xff] }
 0x214   :  { %5944 = vmatprep.subr.mxu0 %v4544_v15 }
 0x215   :  { %v2939_v46 = vpop.f32.mrf.mxu1  ;;  %v3100_v63 = vpop.f32.mrf.mxu0  ;;  %5945 = vmatpush3.msra.mxu0 %v4544_v15  ;;  %v2656_v15 = vadd.f32 %v8169_v47, %v7447_v19  ;;  %v2659_v19 = vadd.f32 %v8169_v47, %v7451_v23  ;;  %v6527_v23 = vld [vmem:[%s9781_s0 + $0x604] ss:$36 sps:$4 sm:$0xff]  }
 0x216   :  { %v8266_v61 = vadd.f32 %v2939_v46, %v2651_v12  ;;  %v8269_v11 = vadd.f32 %v3100_v63, %v7824_v56  ;;  %5946 = vmatprep.subr.mxu0 %v4543_v7 }
 0x217   :  { %v2941_v44 = vpop.f32.mrf.mxu1  ;;  %v3102_v0 = vpop.f32.mrf.mxu0  ;;  %5947 = vmatpush3.msra.mxu0 %v4543_v7  ;;  %v4541_v7 = vld [vmem:[%s9784_s6 + $0x28] sm:$0xff] }
 0x218   :  { %5948 = vmatprep.subr.mxu0 %v4542_v6  ;;  %v6528_v44 = vld [vmem:[%s9781_s0 + $0x2f0] ss:$36 sps:$4 sm:$0xff]  }
 0x219   :  { %v2944_v57 = vpop.f32.mrf.mxu1  ;;  %v3105_v60 = vpop.f32.mrf.mxu0  ;;  %3457 = vmatmul.mubr.bf16.gmra.mxu1 %v6515_v20  ;;  %5813 = vmatmul.mubr.bf16.gmra.mxu0 %v6519_v1 }
 0x21a   :  { %v8279_v56 = vadd.f32 %v2944_v57, %v2656_v15  ;;  %v8282_v12 = vadd.f32 %v3105_v60, %v7836_v16  ;;  %3464 = vmatprep.mubr.bf16.mxu1 %v6522_v25  ;;  %5816 = vmatprep.mubr.bf16.mxu0 %v6523_v29  ;;  %v6520_v16 = vld [vmem:[%s9781_s0 + $0x5b8] ss:$36 sps:$4 sm:$0xff]   ;;  %v6524_v25 = vld [vmem:[%s9781_s0 + $0x2a8] ss:$36 sps:$4 sm:$0xff]   ;;  %v2664_v57 = vadd.f32 %v8169_v47, %v7467_v31 }
 0x21b   :  { %v2946_v46 = vpop.f32.mrf.mxu1  ;;  %v3107_v63 = vpop.f32.mrf.mxu0  ;;  %5949 = vmatpush3.msra.mxu0 %v4542_v6 }
 0x21c   :  { %5950 = vmatprep.subr.mxu0 %v4541_v7 }
 0x21d   :  { %v2947_v20 = vpop.f32.mrf.mxu1  ;;  %v3108_v1 = vpop.f32.mrf.mxu0  ;;  %5951 = vmatpush3.msra.mxu0 %v4541_v7 }
 0x21e   :  { %v8295_v6 = vadd.f32 %v2947_v20, %v2659_v19  ;;  %v8298_v29 = vadd.f32 %v3108_v1, %v7848_v2  ;;  %v9854_v2 = vld [vmem:[#allocation9_spill] sm:$0xff]  ;;  %v4540_v1 = vld [vmem:[%s9784_s6 + $0x20] sm:$0xff] }
 0x21f   :  { %v2949_v0 = vpop.f32.mrf.mxu1  ;;  %v3110_v15 = vpop.f32.mrf.mxu0  ;;  %5952 = vmatprep.subr.mxu0 %v4540_v1 }
 0x220   :  { %v9856_v0 = vld [vmem:[#allocation2_spill] sm:$0xff]  ;;  %5953 = vmatpush3.msra.mxu0 %v4540_v1 }
 0x221   :  { %v2952_v60 = vpop.f32.mrf.mxu1  ;;  %v3113_v46 = vpop.f32.mrf.mxu0  ;;  %3465 = vmatmul.mubr.bf16.gmra.mxu1 %v6520_v16  ;;  %5817 = vmatmul.mubr.bf16.gmra.mxu0 %v6524_v25  ;;  %v2667_v31 = vadd.f32 %v8169_v47, %v9856_v0  ;;  %v6525_v25 = vld [vmem:[%s9781_s0 + $0x600] ss:$36 sps:$4 sm:$0xff]   ;;  %v9860_v0 = vld [vmem:[#allocation3_spill] sm:$0xff] }
 0x222   :  { %v8308_v63 = vadd.f32 %v2952_v60, %v2664_v57  ;;  %v8311_v7 = vadd.f32 %v3113_v46, %v9854_v2  ;;  %3472 = vmatprep.mubr.bf16.mxu1 %v6527_v23  ;;  %5820 = vmatprep.mubr.bf16.mxu0 %v6528_v44  ;;  %v6529_v23 = vld [vmem:[%s9781_s0 + $0x338] ss:$36 sps:$4 sm:$0xff]   ;;  %v9858_v57 = vld [vmem:[#allocation10_spill] sm:$0xff]  ;;  %v6532_v46 = vld [vmem:[%s9781_s0 + $0x64c] ss:$36 sps:$4 sm:$0xff]  }
 0x223   :  { %v2954_v19 = vpop.f32.mrf.mxu1  ;;  %v3115_v20 = vpop.f32.mrf.mxu0  ;;  %v6533_v2 = vld [vmem:[%s9781_s0 + $0x380] ss:$36 sps:$4 sm:$0xff]  }
 0x224   :  { %9853 = vst [vmem:[#allocation18_spill] sm:$0xff] %v8308_v63  ;;  %9855 = vst [vmem:[#allocation9_spill] sm:$0xff] %v8311_v7  ;;  %v2672_v7 = vadd.f32 %v8169_v47, %v9860_v0 }
 0x225   :  { %v2955_v15 = vpop.f32.mrf.mxu1  ;;  %v3116_v16 = vpop.f32.mrf.mxu0 }
 0x226   :  { %v8324_v44 = vadd.f32 %v2955_v15, %v2667_v31  ;;  %v8327_v60 = vadd.f32 %v3116_v16, %v9858_v57  ;;  %v9862_v15 = vld [vmem:[#allocation11_spill] sm:$0xff] }
 0x227   :  { %v2957_v19 = vpop.f32.mrf.mxu1  ;;  %v3118_v20 = vpop.f32.mrf.mxu0 }
 0x228   :  { %9857 = vst [vmem:[#allocation2_spill] sm:$0xff] %v8324_v44  ;;  %9859 = vst [vmem:[#allocation10_spill] sm:$0xff] %v8327_v60  ;;  %v4539_v19 = vld [vmem:[%s9784_s6 + $0x18] sm:$0xff]  ;;  %v9864_v20 = vld [vmem:[#allocation4_spill] sm:$0xff] }
 0x229   :  { %v2960_v63 = vpop.f32.mrf.mxu1  ;;  %v3121_v1 = vpop.f32.mrf.mxu0  ;;  %3473 = vmatmul.mubr.bf16.gmra.mxu1 %v6525_v25  ;;  %5821 = vmatmul.mubr.bf16.gmra.mxu0 %v6529_v23  ;;  %v2675_v0 = vadd.f32 %v8169_v47, %v9864_v20  ;;  %v9868_v20 = vld [vmem:[#allocation5_spill] sm:$0xff] }
 0x22a   :  { %v8337_v31 = vadd.f32 %v2960_v63, %v2672_v7  ;;  %v8340_v16 = vadd.f32 %v3121_v1, %v9862_v15  ;;  %3480 = vmatprep.mubr.bf16.mxu1 %v6532_v46  ;;  %5824 = vmatprep.mubr.bf16.mxu0 %v6533_v2  ;;  %v6530_v63 = vld [vmem:[%s9781_s0 + $0x648] ss:$36 sps:$4 sm:$0xff]   ;;  %v6537_v2 = vld [vmem:[%s9781_s0 + $0x694] ss:$36 sps:$4 sm:$0xff]  }
 0x22b   :  { %v2962_v57 = vpop.f32.mrf.mxu1  ;;  %v3123_v60 = vpop.f32.mrf.mxu0  ;;  %5954 = vmatprep.subr.mxu0 %v4539_v19  ;;  %v6534_v7 = vld [vmem:[%s9781_s0 + $0x3c8] ss:$36 sps:$4 sm:$0xff]   ;;  %v6538_v1 = vld [vmem:[%s9781_s0 + $0x410] ss:$36 sps:$4 sm:$0xff]  }
 0x22c   :  { %9861 = vst [vmem:[#allocation3_spill] sm:$0xff] %v8337_v31  ;;  %9863 = vst [vmem:[#allocation11_spill] sm:$0xff] %v8340_v16  ;;  %5955 = vmatpush3.msra.mxu0 %v4539_v19  ;;  %v9866_v60 = vld [vmem:[#allocation12_spill] sm:$0xff]  ;;  %v2680_v16 = vadd.f32 %v8169_v47, %v9868_v20 }
 0x22d   :  { %v2963_v44 = vpop.f32.mrf.mxu1  ;;  %v3124_v25 = vpop.f32.mrf.mxu0 }
 0x22e   :  { %v8353_v23 = vadd.f32 %v2963_v44, %v2675_v0  ;;  %v8356_v46 = vadd.f32 %v3124_v25, %v9866_v60  ;;  %v9870_v0 = vld [vmem:[#allocation13_spill] sm:$0xff] }
 0x22f   :  { %v2965_v15 = vpop.f32.mrf.mxu1  ;;  %v3126_v57 = vpop.f32.mrf.mxu0 }
 0x230   :  { %9865 = vst [vmem:[#allocation4_spill] sm:$0xff] %v8353_v23  ;;  %9867 = vst [vmem:[#allocation12_spill] sm:$0xff] %v8356_v46  ;;  %v4538_v15 = vld [vmem:[%s9784_s6 + $0x10] sm:$0xff]  ;;  %v9872_v57 = vld [vmem:[#allocation6_spill] sm:$0xff] }
 0x231   :  { %v2968_v31 = vpop.f32.mrf.mxu1  ;;  %v3129_v19 = vpop.f32.mrf.mxu0  ;;  %3481 = vmatmul.mubr.bf16.gmra.mxu1 %v6530_v63  ;;  %5825 = vmatmul.mubr.bf16.gmra.mxu0 %v6534_v7  ;;  %v2683_v20 = vadd.f32 %v8169_v47, %v9872_v57  ;;  %v9876_v57 = vld [vmem:[#allocation7_spill] sm:$0xff] }
 0x232   :  { %v8366_v44 = vadd.f32 %v2968_v31, %v2680_v16  ;;  %v8369_v25 = vadd.f32 %v3129_v19, %v9870_v0  ;;  %3488 = vmatprep.mubr.bf16.mxu1 %v6537_v2  ;;  %5828 = vmatprep.mubr.bf16.mxu0 %v6538_v1  ;;  %v6535_v31 = vld [vmem:[%s9781_s0 + $0x690] ss:$36 sps:$4 sm:$0xff]   ;;  %v6539_v16 = vld [vmem:[%s9781_s0 + $0x458] ss:$36 sps:$4 sm:$0xff]   ;;  %v6543_v19 = vld [vmem:[%s9781_s0 + $0x4a0] ss:$36 sps:$4 sm:$0xff]  }
 0x233   :  { %v2970_v60 = vpop.f32.mrf.mxu1  ;;  %v3131_v46 = vpop.f32.mrf.mxu0  ;;  %5956 = vmatprep.subr.mxu0 %v4538_v15  ;;  %v6542_v1 = vld [vmem:[%s9781_s0 + $0x6dc] ss:$36 sps:$4 sm:$0xff]  }
 0x234   :  { %9869 = vst [vmem:[#allocation5_spill] sm:$0xff] %v8366_v44  ;;  %9871 = vst [vmem:[#allocation13_spill] sm:$0xff] %v8369_v25  ;;  %5957 = vmatpush3.msra.mxu0 %v4538_v15  ;;  %v9874_v46 = vld [vmem:[#allocation14_spill] sm:$0xff]  ;;  %v2688_v25 = vadd.f32 %v8169_v47, %v9876_v57 }
 0x235   :  { %v2971_v23 = vpop.f32.mrf.mxu1  ;;  %v3132_v63 = vpop.f32.mrf.mxu0 }
 0x236   :  { %v8382_v7 = vadd.f32 %v2971_v23, %v2683_v20  ;;  %v8385_v2 = vadd.f32 %v3132_v63, %v9874_v46  ;;  %v9877_v20 = vld [vmem:[#allocation15_spill] sm:$0xff] }
 0x237   :  { %v2973_v0 = vpop.f32.mrf.mxu1  ;;  %v3134_v60 = vpop.f32.mrf.mxu0 }
 0x238   :  { %9873 = vst [vmem:[#allocation6_spill] sm:$0xff] %v8382_v7  ;;  %9875 = vst [vmem:[#allocation14_spill] sm:$0xff] %v8385_v2  ;;  %v4537_v0 = vld [vmem:[%s9784_s6 + $0x8] sm:$0xff]  ;;  %v9878_v60 = vld [vmem:[#allocation8_spill] sm:$0xff] }
 0x239   :  { %v2976_v44 = vpop.f32.mrf.mxu1  ;;  %v3137_v15 = vpop.f32.mrf.mxu0  ;;  %3489 = vmatmul.mubr.bf16.gmra.mxu1 %v6535_v31  ;;  %5829 = vmatmul.mubr.bf16.gmra.mxu0 %v6539_v16  ;;  %v2691_v57 = vadd.f32 %v8169_v47, %v9878_v60  ;;  %v6547_v47 = vld [vmem:[%s9781_s0 + $0x724] ss:$36 sps:$4 sm:$0xff]  }
 0x23a   :  { %v8395_v23 = vadd.f32 %v2976_v44, %v2688_v25  ;;  %v8398_v63 = vadd.f32 %v3137_v15, %v9877_v20  ;;  %3496 = vmatprep.mubr.bf16.mxu1 %v6542_v1  ;;  %5832 = vmatprep.mubr.bf16.mxu0 %v6543_v19  ;;  %v6540_v44 = vld [vmem:[%s9781_s0 + $0x6d8] ss:$36 sps:$4 sm:$0xff]   ;;  %v6544_v25 = vld [vmem:[%s9781_s0 + $0x4e8] ss:$36 sps:$4 sm:$0xff]   ;;  %v6548_v19 = vld [vmem:[%s9781_s0 + $0x530] ss:$36 sps:$4 sm:$0xff]  }
 0x23b   :  { %v2978_v46 = vpop.f32.mrf.mxu1  ;;  %v3139_v2 = vpop.f32.mrf.mxu0  ;;  %5958 = vmatprep.subr.mxu0 %v4537_v0 }
 0x23c   :  { %5959 = vmatpush3.msra.mxu0 %v4537_v0  ;;  %v9879_v2 = vld [vmem:[#allocation16_spill] sm:$0xff] }
 0x23d   :  { %v2979_v7 = vpop.f32.mrf.mxu1  ;;  %v3140_v31 = vpop.f32.mrf.mxu0 }
 0x23e   :  { %v8411_v16 = vadd.f32 %v2979_v7, %v2691_v57  ;;  %v8414_v1 = vadd.f32 %v3140_v31, %v9879_v2 }
 0x23f   :  { %v2981_v15 = vpop.f32.mrf.mxu1  ;;  %v3142_v20 = vpop.f32.mrf.mxu0 }
 0x240   :  { %9880 = vst [vmem:[#allocation7_spill] sm:$0xff] %v8414_v1  ;;  %v6545_v15 = vld [vmem:[%s9781_s0 + $0x720] ss:$36 sps:$4 sm:$0xff]  }
 0x241   :  { %v3145_v46 = vpop.f32.mrf.mxu0  ;;  %v3306_v60 = vpop.f32.mrf.mxu1  ;;  %3497 = vmatmul.mubr.bf16.gmra.mxu1 %v6540_v44  ;;  %5833 = vmatmul.mubr.bf16.gmra.mxu0 %v6544_v25  ;;  %v6549_v44 = vld [vmem:[%s9781_s0 + $0x578] ss:$36 sps:$4 sm:$0xff]   ;;  %v6552_v25 = vld [vmem:[%s9781_s0 + $0x76c] ss:$36 sps:$4 sm:$0xff]  }
 0x242   :  { %v8423_v7 = vadd.f32 %v3145_v46, %v7954_v30  ;;  %v8426_v0 = vadd.f32 %v3306_v60, %v7957_v41  ;;  %3504 = vmatprep.mubr.bf16.mxu1 %v6547_v47  ;;  %5836 = vmatprep.mubr.bf16.mxu0 %v6548_v19  ;;  %v6553_v47 = vld [vmem:[%s9781_s0 + $0x5c0] ss:$36 sps:$4 sm:$0xff]  }
 0x243   :  { %v3147_v57 = vpop.f32.mrf.mxu0  ;;  %v3308_v31 = vpop.f32.mrf.mxu1  ;;  %v4536_v19 = vld [vmem:[%s9784_s6] sm:$0xff] }
 0x244   :  { %5960 = vmatprep.subr.mxu0 %v4536_v19 }
 0x245   :  { %v3148_v2 = vpop.f32.mrf.mxu0  ;;  %v3309_v1 = vpop.f32.mrf.mxu1  ;;  %5961 = vmatpush3.msra.mxu0 %v4536_v19  ;;  %v6550_v19 = vld [vmem:[%s9781_s0 + $0x768] ss:$36 sps:$4 sm:$0xff]  }
 0x246   :  { %v8435_v30 = vadd.f32 %v3148_v2, %v7967_v59  ;;  %v8438_v41 = vadd.f32 %v3309_v1, %v7970_v39 }
 0x247   :  { %v3150_v20 = vpop.f32.mrf.mxu0  ;;  %v3311_v46 = vpop.f32.mrf.mxu1 }
 0x248   :  { %9881 = vst [vmem:[#allocation15_spill] sm:$0xff] %v8438_v41 }
 0x249   :  { %v3153_v59 = vpop.f32.mrf.mxu0  ;;  %v3314_v60 = vpop.f32.mrf.mxu1  ;;  %3505 = vmatmul.mubr.bf16.gmra.mxu1 %v6545_v15  ;;  %5837 = vmatmul.mubr.bf16.gmra.mxu0 %v6549_v44  ;;  %v6554_v15 = vld [vmem:[%s9781_s0 + $0x608] ss:$36 sps:$4 sm:$0xff]   ;;  %v9882_v44 = vld [vmem:[#allocation17_spill] sm:$0xff] }
 0x24a   :  { %v8450_v39 = vadd.f32 %v3153_v59, %v7980_v40  ;;  %v8453_v1 = vadd.f32 %v3314_v60, %v7983_v54  ;;  %3512 = vmatprep.mubr.bf16.mxu1 %v6552_v25  ;;  %5840 = vmatprep.mubr.bf16.mxu0 %v6553_v47  ;;  %v6557_v25 = vld [vmem:[%s9781_s0 + $0x7b4] ss:$36 sps:$4 sm:$0xff]  }
 0x24b   :  { %v3155_v57 = vpop.f32.mrf.mxu0  ;;  %v3316_v31 = vpop.f32.mrf.mxu1  ;;  %v6558_v47 = vld [vmem:[%s9781_s0 + $0x650] ss:$36 sps:$4 sm:$0xff]  }
 0x24d   :  { %v3156_v2 = vpop.f32.mrf.mxu0  ;;  %v3317_v41 = vpop.f32.mrf.mxu1 }
 0x24e   :  { %v8462_v40 = vadd.f32 %v3156_v2, %v7999_v27  ;;  %v8465_v54 = vadd.f32 %v3317_v41, %v9882_v44  ;;  %v6555_v2 = vld [vmem:[%s9781_s0 + $0x7b0] ss:$36 sps:$4 sm:$0xff]   ;;  %v6559_v44 = vld [vmem:[%s9781_s0 + $0x698] ss:$36 sps:$4 sm:$0xff]  }
 0x24f   :  { %v3158_v20 = vpop.f32.mrf.mxu0  ;;  %v3319_v46 = vpop.f32.mrf.mxu1 }
 0x251   :  { %v3161_v59 = vpop.f32.mrf.mxu0  ;;  %v3322_v60 = vpop.f32.mrf.mxu1  ;;  %3513 = vmatmul.mubr.bf16.gmra.mxu1 %v6550_v19  ;;  %5841 = vmatmul.mubr.bf16.gmra.mxu0 %v6554_v15 }
 0x252   :  { %v8474_v27 = vadd.f32 %v3161_v59, %v8012_v3  ;;  %v8477_v41 = vadd.f32 %v3322_v60, %v8015_v26  ;;  %3520 = vmatprep.mubr.bf16.mxu1 %v6557_v25  ;;  %5844 = vmatprep.mubr.bf16.mxu0 %v6558_v47  ;;  %v6562_v3 = vld [vmem:[%s9781_s0 + $0x7fc] ss:$36 sps:$4 sm:$0xff]  }
 0x253   :  { %v3163_v57 = vpop.f32.mrf.mxu0  ;;  %v3324_v31 = vpop.f32.mrf.mxu1  ;;  %v6563_v26 = vld [vmem:[%s9781_s0 + $0x6e0] ss:$36 sps:$4 sm:$0xff]  }
 0x254   :  { %9883 = vst [vmem:[#allocation8_spill] sm:$0xff] %v8474_v27 }
 0x255   :  { %v3164_v19 = vpop.f32.mrf.mxu0  ;;  %v3325_v15 = vpop.f32.mrf.mxu1 }
 0x256   :  { %v8492_v25 = vadd.f32 %v3164_v19, %v8025_v8  ;;  %v8495_v47 = vadd.f32 %v3325_v15, %v8028_v38  ;;  %v6560_v38 = vld [vmem:[%s9781_s0 + $0x7f8] ss:$36 sps:$4 sm:$0xff]   ;;  %v6564_v19 = vld [vmem:[%s9781_s0 + $0x728] ss:$36 sps:$4 sm:$0xff]  }
 0x257   :  { %v3166_v20 = vpop.f32.mrf.mxu0  ;;  %v3327_v46 = vpop.f32.mrf.mxu1 }
 0x259   :  { %v3169_v59 = vpop.f32.mrf.mxu0  ;;  %v3330_v60 = vpop.f32.mrf.mxu1  ;;  %3521 = vmatmul.mubr.bf16.gmra.mxu1 %v6555_v2  ;;  %5845 = vmatmul.mubr.bf16.gmra.mxu0 %v6559_v44 }
 0x25a   :  { %v8498_v57 = vadd.f32 %v3169_v59, %v8038_v55  ;;  %v8501_v31 = vadd.f32 %v3330_v60, %v8041_v53  ;;  %3528 = vmatprep.mubr.bf16.mxu1 %v6562_v3  ;;  %5848 = vmatprep.mubr.bf16.mxu0 %v6563_v26  ;;  %v6567_v55 = vld [vmem:[%s9781_s0 + $0x844] ss:$36 sps:$4 sm:$0xff]   ;;  %v6568_v53 = vld [vmem:[%s9781_s0 + $0x770] ss:$36 sps:$4 sm:$0xff]  }
 0x25b   :  { %v3171_v27 = vpop.f32.mrf.mxu0  ;;  %v3332_v8 = vpop.f32.mrf.mxu1 }
 0x25d   :  { %v3172_v2 = vpop.f32.mrf.mxu0  ;;  %v3333_v44 = vpop.f32.mrf.mxu1 }
 0x25e   :  { %v8516_v27 = vadd.f32 %v3172_v2, %v8051_v32  ;;  %v8519_v3 = vadd.f32 %v3333_v44, %v8054_v9  ;;  %v6565_v9 = vld [vmem:[%s9781_s0 + $0x840] ss:$36 sps:$4 sm:$0xff]   ;;  %v6569_v2 = vld [vmem:[%s9781_s0 + $0x7b8] ss:$36 sps:$4 sm:$0xff]  }
 0x25f   :  { %v3174_v26 = vpop.f32.mrf.mxu0  ;;  %v3335_v15 = vpop.f32.mrf.mxu1 }
 0x261   :  { %v3177_v20 = vpop.f32.mrf.mxu0  ;;  %v3338_v46 = vpop.f32.mrf.mxu1  ;;  %3529 = vmatmul.mubr.bf16.gmra.mxu1 %v6560_v38  ;;  %5849 = vmatmul.mubr.bf16.gmra.mxu0 %v6564_v19 }
 0x262   :  { %v8522_v59 = vadd.f32 %v3177_v20, %v8064_v45  ;;  %v8525_v60 = vadd.f32 %v3338_v46, %v8067_v22  ;;  %3536 = vmatprep.mubr.bf16.mxu1 %v6567_v55  ;;  %5852 = vmatprep.mubr.bf16.mxu0 %v6568_v53  ;;  %v6572_v45 = vld [vmem:[%s9781_s0 + $0x88c] ss:$36 sps:$4 sm:$0xff]   ;;  %v6573_v22 = vld [vmem:[%s9781_s0 + $0x800] ss:$36 sps:$4 sm:$0xff]  }
 0x263   :  { %v3179_v8 = vpop.f32.mrf.mxu0  ;;  %v3340_v32 = vpop.f32.mrf.mxu1 }
 0x265   :  { %v3180_v38 = vpop.f32.mrf.mxu0  ;;  %v3341_v19 = vpop.f32.mrf.mxu1 }
 0x266   :  { %v8540_v55 = vadd.f32 %v3180_v38, %v8077_v10  ;;  %v8543_v53 = vadd.f32 %v3341_v19, %v8080_v50  ;;  %v6570_v50 = vld [vmem:[%s9781_s0 + $0x888] ss:$36 sps:$4 sm:$0xff]  }
 0x267   :  { %v3182_v44 = vpop.f32.mrf.mxu0  ;;  %v3343_v26 = vpop.f32.mrf.mxu1 }
 0x268   :  { %9884 = vst [vmem:[#allocation16_spill] sm:$0xff] %v8540_v55 }
 0x269   :  { %v3185_v15 = vpop.f32.mrf.mxu0  ;;  %v3346_v20 = vpop.f32.mrf.mxu1  ;;  %3537 = vmatmul.mubr.bf16.gmra.mxu1 %v6565_v9  ;;  %5853 = vmatmul.mubr.bf16.gmra.mxu0 %v6569_v2  ;;  %v6574_v9 = vld [vmem:[%s9781_s0 + $0x848] ss:$36 sps:$4 sm:$0xff]   ;;  %v6577_v2 = vld [vmem:[%s9781_s0 + $0x8d4] ss:$36 sps:$4 sm:$0xff]  }
 0x26a   :  { %v8546_v46 = vadd.f32 %v3185_v15, %v8090_v17  ;;  %v8549_v8 = vadd.f32 %v3346_v20, %v8093_v5  ;;  %3544 = vmatprep.mubr.bf16.mxu1 %v6572_v45  ;;  %5856 = vmatprep.mubr.bf16.mxu0 %v6573_v22  ;;  %v6578_v45 = vld [vmem:[%s9781_s0 + $0x890] ss:$36 sps:$4 sm:$0xff]  }
 0x26b   :  { %v3187_v32 = vpop.f32.mrf.mxu0  ;;  %v3348_v10 = vpop.f32.mrf.mxu1 }
 0x26c   :  { %v6575_v10 = vld [vmem:[%s9781_s0 + $0x8d0] ss:$36 sps:$4 sm:$0xff]  }
 0x26d   :  { %v3188_v38 = vpop.f32.mrf.mxu0  ;;  %v3349_v55 = vpop.f32.mrf.mxu1 }
 0x26e   :  { %v8558_v17 = vadd.f32 %v3188_v38, %v8103_v13  ;;  %v8561_v5 = vadd.f32 %v3349_v55, %v8106_v28  ;;  %v6579_v38 = vld [vmem:[%s9781_s0 + $0x8d8] ss:$36 sps:$4 sm:$0xff]  }
 0x26f   :  { %v3190_v22 = vpop.f32.mrf.mxu0  ;;  %v3351_v19 = vpop.f32.mrf.mxu1 }
 0x271   :  { %v3193_v44 = vpop.f32.mrf.mxu0  ;;  %v3354_v26 = vpop.f32.mrf.mxu1  ;;  %3545 = vmatmul.mubr.bf16.gmra.mxu1 %v6570_v50  ;;  %5857 = vmatmul.mubr.bf16.gmra.mxu0 %v6574_v9  ;;  %v6580_v50 = vld [vmem:[%s9785_s1] sm:$0xff]  }
 0x272   :  { %v8570_v13 = vadd.f32 %v3193_v44, %v8116_v4  ;;  %v8573_v28 = vadd.f32 %v3354_v26, %v8119_v52  ;;  %3552 = vmatprep.mubr.bf16.mxu1 %v6577_v2  ;;  %5860 = vmatprep.mubr.bf16.mxu0 %v6578_v45 }
 0x273   :  { %v3195_v55 = vpop.f32.mrf.mxu0  ;;  %v3356_v15 = vpop.f32.mrf.mxu1 }
 0x274   :  { %v6581_v15 = vld [vmem:[%s9785_s1 + $0x8] sm:$0xff]  }
 0x275   :  { %v3196_v20 = vpop.f32.mrf.mxu0  ;;  %v3357_v32 = vpop.f32.mrf.mxu1 }
 0x276   :  { %v8582_v4 = vadd.f32 %v3196_v20, %v8129_v37  ;;  %v8585_v52 = vadd.f32 %v3357_v32, %v8132_v35 }
 0x277   :  { %v3198_v9 = vpop.f32.mrf.mxu0  ;;  %v3359_v2 = vpop.f32.mrf.mxu1 }
 0x279   :  { %v3201_v45 = vpop.f32.mrf.mxu0  ;;  %v3362_v22 = vpop.f32.mrf.mxu1  ;;  %3553 = vmatmul.mubr.bf16.gmra.mxu1 %v6575_v10  ;;  %5861 = vmatmul.mubr.bf16.gmra.mxu0 %v6579_v38 }
 0x27a   :  { %v8591_v19 = vadd.f32 %v3201_v45, %v8142_v51  ;;  %v8594_v37 = vadd.f32 %v3362_v22, %v8145_v34  ;;  %5866 = vmatprep.mubr.msk.bf16.mxu1 %vm4082_vm1, %v6580_v50  ;;  %v6582_v51 = vld [vmem:[%s9785_s1 + $0x10] sm:$0xff]  }
 0x27b   :  { %v3203_v35 = vpop.f32.mrf.mxu0  ;;  %v3364_v44 = vpop.f32.mrf.mxu1 }
 0x27c   :  { %v6583_v35 = vld [vmem:[%s9785_s1 + $0x18] sm:$0xff]  }
 0x27d   :  { %v3204_v26 = vpop.f32.mrf.mxu0  ;;  %v3365_v55 = vpop.f32.mrf.mxu1 }
 0x27e   :  { %v8601_v20 = vadd.f32 %v3204_v26, %v8155_v24  ;;  %v8604_v32 = vadd.f32 %v3365_v55, %v8158_v48 }
 0x27f   :  { %v3206_v34 = vpop.f32.mrf.mxu0  ;;  %v3367_v10 = vpop.f32.mrf.mxu1 }
 0x281   :  { %v3209_v38 = vpop.f32.mrf.mxu0  ;;  %v3370_v50 = vpop.f32.mrf.mxu1  ;;  %5867 = vmatmul.mubr.msk.bf16.vlgmr.msra.gmra.mxu1 %vm4082_vm1, %v6581_v15 }
 0x282   :  { %v8611_v9 = vadd.f32 %v3209_v38, %v8176_v36  ;;  %v8614_v2 = vadd.f32 %v3370_v50, %v8179_v33  ;;  %5870 = vmatprep.mubr.msk.bf16.mxu1 %vm4082_vm1, %v6582_v51  ;;  %v6584_v36 = vld [vmem:[%s9785_s1 + $0x20] sm:$0xff]  }
 0x283   :  { %v3211_v24 = vpop.f32.mrf.mxu0  ;;  %v3372_v48 = vpop.f32.mrf.mxu1 }
 0x284   :  { %v6585_v24 = vld [vmem:[%s9785_s1 + $0x28] sm:$0xff]  }
 0x285   :  { %v3212_v45 = vpop.f32.mrf.mxu0  ;;  %v3373_v22 = vpop.f32.mrf.mxu1 }
 0x286   :  { %v8621_v44 = vadd.f32 %v3212_v45, %v8196_v21  ;;  %v8624_v26 = vadd.f32 %v3373_v22, %v8199_v49 }
 0x287   :  { %v3214_v33 = vpop.f32.mrf.mxu0  ;;  %v3375_v55 = vpop.f32.mrf.mxu1 }
 0x289   :  { %v3217_v15 = vpop.f32.mrf.mxu0  ;;  %v3378_v51 = vpop.f32.mrf.mxu1  ;;  %5871 = vmatmul.mubr.msk.bf16.gmra.mxu1 %vm4082_vm1, %v6583_v35 }
 0x28a   :  { %v8631_v34 = vadd.f32 %v3217_v15, %v8212_v14  ;;  %v8634_v10 = vadd.f32 %v3378_v51, %v8215_v43  ;;  %5874 = vmatprep.mubr.msk.bf16.mxu1 %vm4082_vm1, %v6584_v36  ;;  %v6586_v14 = vld [vmem:[%s9785_s1 + $0x30] sm:$0xff]  }
 0x28b   :  { %v3219_v21 = vpop.f32.mrf.mxu0  ;;  %v3380_v49 = vpop.f32.mrf.mxu1 }
 0x28c   :  { %v6587_v21 = vld [vmem:[%s9785_s1 + $0x38] sm:$0xff]  }
 0x28d   :  { %v3220_v38 = vpop.f32.mrf.mxu0  ;;  %v3381_v50 = vpop.f32.mrf.mxu1 }
 0x28e   :  { %v8641_v48 = vadd.f32 %v3220_v38, %v8231_v18  ;;  %v8644_v45 = vadd.f32 %v3381_v50, %v8234_v62 }
 0x28f   :  { %v3222_v43 = vpop.f32.mrf.mxu0  ;;  %v3383_v22 = vpop.f32.mrf.mxu1 }
 0x291   :  { %v3225_v35 = vpop.f32.mrf.mxu0  ;;  %v3386_v36 = vpop.f32.mrf.mxu1  ;;  %5875 = vmatmul.mubr.msk.bf16.gmra.mxu1 %vm4082_vm1, %v6585_v24 }
 0x292   :  { %v8651_v33 = vadd.f32 %v3225_v35, %v8247_v58  ;;  %v8654_v55 = vadd.f32 %v3386_v36, %v8250_v42  ;;  %5878 = vmatprep.mubr.msk.bf16.mxu1 %vm4082_vm1, %v6586_v14  ;;  %v6588_v58 = vld [vmem:[%s9785_s1 + $0x40] sm:$0xff]  }
 0x293   :  { %v3227_v18 = vpop.f32.mrf.mxu0  ;;  %v3388_v62 = vpop.f32.mrf.mxu1 }
 0x294   :  { %9885 = vst [vmem:[#allocation17_spill] sm:$0xff] %v8651_v33  ;;  %v6589_v18 = vld [vmem:[%s9785_s1 + $0x48] sm:$0xff]  }
 0x295   :  { %v3228_v15 = vpop.f32.mrf.mxu0  ;;  %v3389_v51 = vpop.f32.mrf.mxu1 }
 0x296   :  { %v8661_v49 = vadd.f32 %v3228_v15, %v8266_v61  ;;  %v8664_v38 = vadd.f32 %v3389_v51, %v8269_v11 }
 0x297   :  { %v3230_v42 = vpop.f32.mrf.mxu0  ;;  %v3391_v50 = vpop.f32.mrf.mxu1 }
 0x298   :  { %9886 = vst [vmem:[#allocation19_spill] sm:$0xff] %v8661_v49  ;;  %v9889_v42 = vld [vmem:[#allocation18_spill] sm:$0xff] }
 0x299   :  { %v3233_v24 = vpop.f32.mrf.mxu0  ;;  %v3394_v14 = vpop.f32.mrf.mxu1  ;;  %5879 = vmatmul.mubr.msk.bf16.gmra.mxu1 %vm4082_vm1, %v6587_v21 }
 0x29a   :  { %v8671_v43 = vadd.f32 %v3233_v24, %v8279_v56  ;;  %v8674_v22 = vadd.f32 %v3394_v14, %v8282_v12  ;;  %5882 = vmatprep.mubr.msk.bf16.mxu1 %vm4082_vm1, %v6588_v58  ;;  %v6590_v56 = vld [vmem:[%s9785_s1 + $0x50] sm:$0xff]   ;;  %v9891_v24 = vld [vmem:[#allocation9_spill] sm:$0xff] }
 0x29b   :  { %v3235_v61 = vpop.f32.mrf.mxu0  ;;  %v3396_v11 = vpop.f32.mrf.mxu1 }
 0x29c   :  { %9887 = vst [vmem:[#allocation20_spill] sm:$0xff] %v8671_v43 }
 0x29d   :  { %v3236_v35 = vpop.f32.mrf.mxu0  ;;  %v3397_v36 = vpop.f32.mrf.mxu1 }
 0x29e   :  { %v8681_v62 = vadd.f32 %v3236_v35, %v8295_v6  ;;  %v8684_v15 = vadd.f32 %v3397_v36, %v8298_v29  ;;  %v6591_v35 = vld [vmem:[%s9785_s1 + $0x58] sm:$0xff]   ;;  %v9892_v36 = vld [vmem:[#allocation2_spill] sm:$0xff] }
 0x29f   :  { %v3238_v12 = vpop.f32.mrf.mxu0  ;;  %v3399_v51 = vpop.f32.mrf.mxu1 }
 0x2a0   :  { %9888 = vst [vmem:[#allocation21_spill] sm:$0xff] %v8681_v62 }
 0x2a1   :  { %v3241_v21 = vpop.f32.mrf.mxu0  ;;  %v3402_v58 = vpop.f32.mrf.mxu1  ;;  %5883 = vmatmul.mubr.msk.bf16.gmra.mxu1 %vm4082_vm1, %v6589_v18  ;;  %v9894_v18 = vld [vmem:[#allocation10_spill] sm:$0xff] }
 0x2a2   :  { %v8691_v50 = vadd.f32 %v3241_v21, %v9889_v42  ;;  %v8694_v14 = vadd.f32 %v3402_v58, %v9891_v24  ;;  %5886 = vmatprep.mubr.msk.bf16.mxu1 %vm4082_vm1, %v6590_v56  ;;  %v6592_v21 = vld [vmem:[%s9785_s1 + $0x60] sm:$0xff]  }
 0x2a3   :  { %v3243_v6 = vpop.f32.mrf.mxu0  ;;  %v3404_v29 = vpop.f32.mrf.mxu1 }
 0x2a4   :  { %9890 = vst [vmem:[#allocation18_spill] sm:$0xff] %v8691_v50  ;;  %v9895_v6 = vld [vmem:[#allocation3_spill] sm:$0xff] }
 0x2a5   :  { %v3244_v61 = vpop.f32.mrf.mxu0  ;;  %v3405_v11 = vpop.f32.mrf.mxu1  ;;  %v9897_v50 = vld [vmem:[#allocation11_spill] sm:$0xff] }
 0x2a6   :  { %v8701_v12 = vadd.f32 %v3244_v61, %v9892_v36  ;;  %v8704_v51 = vadd.f32 %v3405_v11, %v9894_v18 }
 0x2a7   :  { %v3246_v58 = vpop.f32.mrf.mxu0  ;;  %v3407_v56 = vpop.f32.mrf.mxu1 }
 0x2a8   :  { %9893 = vst [vmem:[#allocation9_spill] sm:$0xff] %v8701_v12  ;;  %v6593_v58 = vld [vmem:[%s9785_s1 + $0x68] sm:$0xff]   ;;  %v9898_v56 = vld [vmem:[#allocation4_spill] sm:$0xff] }
 0x2a9   :  { %v3249_v42 = vpop.f32.mrf.mxu0  ;;  %v3410_v24 = vpop.f32.mrf.mxu1  ;;  %5887 = vmatmul.mubr.msk.bf16.gmra.mxu1 %vm4082_vm1, %v6591_v35  ;;  %v9900_v35 = vld [vmem:[#allocation12_spill] sm:$0xff] }
 0x2aa   :  { %v8711_v29 = vadd.f32 %v3249_v42, %v9895_v6  ;;  %v8714_v62 = vadd.f32 %v3410_v24, %v9897_v50  ;;  %5890 = vmatprep.mubr.msk.bf16.mxu1 %vm4082_vm1, %v6592_v21  ;;  %v6594_v50 = vld [vmem:[%s9785_s1 + $0x70] sm:$0xff]  }
 0x2ab   :  { %v3251_v61 = vpop.f32.mrf.mxu0  ;;  %v3412_v11 = vpop.f32.mrf.mxu1 }
 0x2ac   :  { %9896 = vst [vmem:[#allocation2_spill] sm:$0xff] %v8711_v29  ;;  %v9901_v61 = vld [vmem:[#allocation5_spill] sm:$0xff] }
 0x2ad   :  { %v3252_v36 = vpop.f32.mrf.mxu0  ;;  %v3413_v18 = vpop.f32.mrf.mxu1  ;;  %v9902_v29 = vld [vmem:[#allocation13_spill] sm:$0xff] }
 0x2ae   :  { %v8721_v12 = vadd.f32 %v3252_v36, %v9898_v56  ;;  %v8724_v49 = vadd.f32 %v3413_v18, %v9900_v35 }
 0x2af   :  { %v3254_v42 = vpop.f32.mrf.mxu0  ;;  %v3415_v21 = vpop.f32.mrf.mxu1 }
 0x2b0   :  { %9899 = vst [vmem:[#allocation10_spill] sm:$0xff] %v8721_v12  ;;  %v6595_v42 = vld [vmem:[%s9785_s1 + $0x78] sm:$0xff]   ;;  %v9903_v21 = vld [vmem:[#allocation6_spill] sm:$0xff] }
 0x2b1   :  { %v3257_v24 = vpop.f32.mrf.mxu0  ;;  %v3418_v6 = vpop.f32.mrf.mxu1  ;;  %5891 = vmatmul.mubr.msk.bf16.gmra.mxu1 %vm4082_vm1, %v6593_v58  ;;  %v9905_v58 = vld [vmem:[#allocation14_spill] sm:$0xff] }
 0x2b2   :  { %v8731_v11 = vadd.f32 %v3257_v24, %v9901_v61  ;;  %v8734_v43 = vadd.f32 %v3418_v6, %v9902_v29  ;;  %5894 = vmatprep.mubr.msk.bf16.mxu1 %vm4082_vm1, %v6594_v50  ;;  %v6596_v29 = vld [vmem:[%s9785_s1 + $0x80] sm:$0xff]  }
 0x2b3   :  { %v3259_v36 = vpop.f32.mrf.mxu0  ;;  %v3420_v18 = vpop.f32.mrf.mxu1 }
 0x2b5   :  { %v3260_v56 = vpop.f32.mrf.mxu0  ;;  %v3421_v35 = vpop.f32.mrf.mxu1 }
 0x2b6   :  { %v8741_v12 = vadd.f32 %v3260_v56, %v9903_v21  ;;  %v8744_v33 = vadd.f32 %v3421_v35, %v9905_v58 }
 0x2b7   :  { %v3262_v24 = vpop.f32.mrf.mxu0  ;;  %v3423_v50 = vpop.f32.mrf.mxu1 }
 0x2b8   :  { %9904 = vst [vmem:[#allocation3_spill] sm:$0xff] %v8741_v12  ;;  %v6597_v24 = vld [vmem:[%s9785_s1 + $0x88] sm:$0xff]  }
 0x2b9   :  { %v3265_v6 = vpop.f32.mrf.mxu0  ;;  %v3426_v61 = vpop.f32.mrf.mxu1  ;;  %5895 = vmatmul.mubr.msk.bf16.gmra.mxu1 %vm4082_vm1, %v6595_v42  ;;  %v9908_v42 = vld [vmem:[#allocation7_spill] sm:$0xff] }
 0x2ba   :  { %v8751_v36 = vadd.f32 %v3265_v6, %v8395_v23  ;;  %v8754_v18 = vadd.f32 %v3426_v61, %v8398_v63  ;;  %5898 = vmatprep.mubr.msk.bf16.mxu1 %vm4082_vm1, %v6596_v29  ;;  %v6598_v23 = vld [vmem:[%s9785_s1 + $0x90] sm:$0xff]  }
 0x2bb   :  { %v3267_v56 = vpop.f32.mrf.mxu0  ;;  %v3428_v35 = vpop.f32.mrf.mxu1 }
 0x2bc   :  { %9906 = vst [vmem:[#allocation11_spill] sm:$0xff] %v8751_v36 }
 0x2bd   :  { %v3268_v21 = vpop.f32.mrf.mxu0  ;;  %v3429_v58 = vpop.f32.mrf.mxu1 }
 0x2be   :  { %v8761_v50 = vadd.f32 %v3268_v21, %v8411_v16  ;;  %v8764_v12 = vadd.f32 %v3429_v58, %v9908_v42 }
 0x2bf   :  { %v3270_v63 = vpop.f32.mrf.mxu0  ;;  %v3431_v29 = vpop.f32.mrf.mxu1 }
 0x2c0   :  { %9907 = vst [vmem:[#allocation4_spill] sm:$0xff] %v8761_v50  ;;  %v6599_v63 = vld [vmem:[%s9785_s1 + $0x98] sm:$0xff]  }
 0x2c1   :  { %v3434_v6 = vpop.f32.mrf.mxu1  ;;  %v5802_v61 = vpop.f32.mrf.mxu0  ;;  %5899 = vmatmul.mubr.msk.bf16.gmra.mxu1 %vm4082_vm1, %v6597_v24 }
 0x2c2   :  { %v8771_v56 = vadd.f32 %v3434_v6, %v8423_v7  ;;  %5902 = vmatprep.mubr.msk.bf16.mxu1 %vm4082_vm1, %v6598_v23  ;;  %v6600_v7 = vld [vmem:[%s9785_s1 + $0xa0] sm:$0xff]   ;;  %v8789_v23 = vadd.f32 %v5802_v61, %v8453_v1 }
 0x2c3   :  { %v3436_v16 = vpop.f32.mrf.mxu1  ;;  %v3595_v35 = vpop.f32.mrf.mxu0 }
 0x2c4   :  { %v8775_v21 = vadd.f32 %v3595_v35, %v8426_v0  ;;  %9909 = vst [vmem:[#allocation12_spill] sm:$0xff] %v8789_v23  ;;  %v9910_v16 = vld [vmem:[#allocation15_spill] sm:$0xff]  ;;  %v4474_v1 = vmul.f32 %v8789_v23, %v8789_v23 }
 0x2c5   :  { %v3437_v58 = vpop.f32.mrf.mxu1  ;;  %v5803_v42 = vpop.f32.mrf.mxu0 }
 0x2c6   :  { %v4472_v29 = vmul.f32 %v8775_v21, %v8775_v21  ;;  %v8783_v24 = vadd.f32 %v3437_v58, %v8435_v30  ;;  %v8798_v30 = vadd.f32 %v5803_v42, %v8465_v54  ;;  %v6601_v54 = vld [vmem:[%s9785_s1 + $0xa8] sm:$0xff]  }
 0x2c7   :  { %v3439_v0 = vpop.f32.mrf.mxu1  ;;  %v3598_v6 = vpop.f32.mrf.mxu0 }
 0x2c8   :  { %v8792_v35 = vadd.f32 %v3598_v6, %v9910_v16  ;;  %5962 = vmatprep.mubr.f32.mxu0 %v4472_v29  ;;  %9911 = vst [vmem:[#allocation5_spill] sm:$0xff] %v8798_v30  ;;  %v4475_v42 = vmul.f32 %v8798_v30, %v8798_v30 }
 0x2c9   :  { %v8794_v50 = vpop.f32.mrf.mxu1  ;;  %v5806_v36 = vpop.f32.mrf.mxu0  ;;  %5903 = vmatmul.mubr.msk.bf16.gmra.mxu1 %vm4082_vm1, %v6599_v63 }
 0x2ca   :  { %v4473_v58 = vmul.f32 %v8792_v35, %v8792_v35  ;;  %5906 = vmatprep.mubr.msk.bf16.mxu1 %vm4082_vm1, %v6600_v7  ;;  %v8821_v16 = vadd.f32 %v5806_v36, %v8501_v31 }
 0x2cb   :  { %v3444_v61 = vpop.f32.mrf.mxu1  ;;  %v3611_v0 = vpop.f32.mrf.mxu0 }
 0x2cc   :  { %v8806_v29 = vadd.f32 %v3611_v0, %v8477_v41  ;;  %5963 = vmatmul.mubr.f32.vlgmr.msra.gmra.mxu0 %v4473_v58  ;;  %v6602_v41 = vld [vmem:[%s9785_s1 + $0xb0] sm:$0xff]   ;;  %9913 = vst [vmem:[#allocation6_spill] sm:$0xff] %v8821_v16  ;;  %v4478_v31 = vmul.f32 %v8821_v16, %v8821_v16 }
 0x2cd   :  { %v8808_v6 = vpop.f32.mrf.mxu1  ;;  %v5807_v63 = vpop.f32.mrf.mxu0  ;;  %5965 = vmatprep.mubr.f32.mxu0 %v4474_v1 }
 0x2ce   :  { %9912 = vst [vmem:[#allocation13_spill] sm:$0xff] %v8806_v29  ;;  %v4476_v7 = vmul.f32 %v8806_v29, %v8806_v29  ;;  %v8830_v29 = vadd.f32 %v5807_v63, %v8519_v3  ;;  %v6603_v3 = vld [vmem:[%s9785_s1 + $0xb8] sm:$0xff]  }
 0x2cf   :  { %v3447_v58 = vpop.f32.mrf.mxu1  ;;  %v3614_v61 = vpop.f32.mrf.mxu0 }
 0x2d0   :  { %v8824_v1 = vadd.f32 %v3614_v61, %v8495_v47  ;;  %5966 = vmatmul.mubr.f32.gmra.mxu0 %v4475_v42  ;;  %v4479_v63 = vmul.f32 %v8830_v29, %v8830_v29 }
 0x2d1   :  { %v8826_v0 = vpop.f32.mrf.mxu1  ;;  %v5810_v23 = vpop.f32.mrf.mxu0  ;;  %5968 = vmatprep.mubr.f32.mxu0 %v4476_v7  ;;  %5907 = vmatmul.mubr.msk.bf16.gmra.mxu1 %vm4082_vm1, %v6601_v54 }
 0x2d2   :  { %v4477_v30 = vmul.f32 %v8824_v1, %v8824_v1  ;;  %5910 = vmatprep.mubr.msk.bf16.mxu1 %vm4082_vm1, %v6602_v41 }
 0x2d3   :  { %v3452_v47 = vpop.f32.mrf.mxu1  ;;  %v3627_v36 = vpop.f32.mrf.mxu0 }
 0x2d4   :  { %v8838_v42 = vadd.f32 %v3627_v36, %v8525_v60  ;;  %5969 = vmatmul.mubr.f32.gmra.mxu0 %v4477_v30  ;;  %v6604_v60 = vld [vmem:[%s9785_s1 + $0xc0] sm:$0xff]   ;;  %v8853_v30 = vadd.f32 %v5810_v23, %v8549_v8 }
 0x2d5   :  { %v8840_v7 = vpop.f32.mrf.mxu1  ;;  %v5811_v54 = vpop.f32.mrf.mxu0  ;;  %5971 = vmatprep.mubr.f32.mxu0 %v4478_v31 }
 0x2d6   :  { %9914 = vst [vmem:[#allocation14_spill] sm:$0xff] %v8838_v42  ;;  %v4480_v41 = vmul.f32 %v8838_v42, %v8838_v42  ;;  %9915 = vst [vmem:[#allocation7_spill] sm:$0xff] %v8853_v30  ;;  %v8862_v42 = vadd.f32 %v5811_v54, %v8561_v5  ;;  %v4482_v8 = vmul.f32 %v8853_v30, %v8853_v30  ;;  %v6605_v5 = vld [vmem:[%s9785_s1 + $0xc8] sm:$0xff]  }
 0x2d7   :  { %v3455_v58 = vpop.f32.mrf.mxu1  ;;  %v3630_v61 = vpop.f32.mrf.mxu0 }
 0x2d8   :  { %v8856_v31 = vadd.f32 %v3630_v61, %v8543_v53  ;;  %5972 = vmatmul.mubr.f32.gmra.mxu0 %v4479_v63  ;;  %v4483_v54 = vmul.f32 %v8862_v42, %v8862_v42 }
 0x2d9   :  { %v8858_v47 = vpop.f32.mrf.mxu1  ;;  %v5814_v36 = vpop.f32.mrf.mxu0  ;;  %5974 = vmatprep.mubr.f32.mxu0 %v4480_v41  ;;  %5911 = vmatmul.mubr.msk.bf16.gmra.mxu1 %vm4082_vm1, %v6603_v3 }
 0x2da   :  { %v4481_v16 = vmul.f32 %v8856_v31, %v8856_v31  ;;  %5914 = vmatprep.mubr.msk.bf16.mxu1 %vm4082_vm1, %v6604_v60 }
 0x2db   :  { %v3460_v53 = vpop.f32.mrf.mxu1  ;;  %v3643_v23 = vpop.f32.mrf.mxu0 }
 0x2dc   :  { %v8870_v63 = vadd.f32 %v3643_v23, %v8573_v28  ;;  %5975 = vmatmul.mubr.f32.gmra.mxu0 %v4481_v16  ;;  %v6606_v28 = vld [vmem:[%s9785_s1 + $0xd0] sm:$0xff]   ;;  %v8885_v16 = vadd.f32 %v5814_v36, %v8594_v37 }
 0x2dd   :  { %v8872_v41 = vpop.f32.mrf.mxu1  ;;  %v5815_v3 = vpop.f32.mrf.mxu0  ;;  %5977 = vmatprep.mubr.f32.mxu0 %v4482_v8 }
 0x2de   :  { %9916 = vst [vmem:[#allocation15_spill] sm:$0xff] %v8870_v63  ;;  %v4484_v60 = vmul.f32 %v8870_v63, %v8870_v63  ;;  %9917 = vst [vmem:[#allocation22_spill] sm:$0xff] %v8885_v16  ;;  %v8894_v63 = vadd.f32 %v5815_v3, %v8604_v32  ;;  %v4486_v37 = vmul.f32 %v8885_v16, %v8885_v16  ;;  %v6607_v32 = vld [vmem:[%s9785_s1 + $0xd8] sm:$0xff]  }
 0x2df   :  { %v3463_v58 = vpop.f32.mrf.mxu1  ;;  %v3646_v61 = vpop.f32.mrf.mxu0 }
 0x2e0   :  { %v8888_v8 = vadd.f32 %v3646_v61, %v8585_v52  ;;  %5978 = vmatmul.mubr.f32.gmra.mxu0 %v4483_v54  ;;  %v4487_v3 = vmul.f32 %v8894_v63, %v8894_v63 }
 0x2e1   :  { %v8890_v53 = vpop.f32.mrf.mxu1  ;;  %v5818_v23 = vpop.f32.mrf.mxu0  ;;  %5980 = vmatprep.mubr.f32.mxu0 %v4484_v60  ;;  %5915 = vmatmul.mubr.msk.bf16.gmra.mxu1 %vm4082_vm1, %v6605_v5 }
 0x2e2   :  { %v4485_v30 = vmul.f32 %v8888_v8, %v8888_v8  ;;  %5918 = vmatprep.mubr.msk.bf16.mxu1 %vm4082_vm1, %v6606_v28 }
 0x2e3   :  { %v3468_v52 = vpop.f32.mrf.mxu1  ;;  %v3659_v36 = vpop.f32.mrf.mxu0 }
 0x2e4   :  { %v8902_v54 = vadd.f32 %v3659_v36, %v8614_v2  ;;  %5981 = vmatmul.mubr.f32.gmra.mxu0 %v4485_v30  ;;  %v6608_v2 = vld [vmem:[%s9785_s1 + $0xe0] sm:$0xff]   ;;  %v8917_v30 = vadd.f32 %v5818_v23, %v8634_v10 }
 0x2e5   :  { %v8904_v60 = vpop.f32.mrf.mxu1  ;;  %v5819_v5 = vpop.f32.mrf.mxu0  ;;  %5983 = vmatprep.mubr.f32.mxu0 %v4486_v37 }
 0x2e6   :  { %9918 = vst [vmem:[#allocation23_spill] sm:$0xff] %v8902_v54  ;;  %v4488_v28 = vmul.f32 %v8902_v54, %v8902_v54  ;;  %9919 = vst [vmem:[#allocation24_spill] sm:$0xff] %v8917_v30  ;;  %v8926_v54 = vadd.f32 %v5819_v5, %v8644_v45  ;;  %v4490_v10 = vmul.f32 %v8917_v30, %v8917_v30  ;;  %v6609_v45 = vld [vmem:[%s9785_s1 + $0xe8] sm:$0xff]  }
 0x2e7   :  { %v3471_v58 = vpop.f32.mrf.mxu1  ;;  %v3662_v61 = vpop.f32.mrf.mxu0 }
 0x2e8   :  { %v8920_v37 = vadd.f32 %v3662_v61, %v8624_v26  ;;  %5984 = vmatmul.mubr.f32.gmra.mxu0 %v4487_v3  ;;  %v4491_v5 = vmul.f32 %v8926_v54, %v8926_v54 }
 0x2e9   :  { %v8922_v52 = vpop.f32.mrf.mxu1  ;;  %v5822_v36 = vpop.f32.mrf.mxu0  ;;  %5986 = vmatprep.mubr.f32.mxu0 %v4488_v28  ;;  %5919 = vmatmul.mubr.msk.bf16.gmra.mxu1 %vm4082_vm1, %v6607_v32 }
 0x2ea   :  { %v4489_v16 = vmul.f32 %v8920_v37, %v8920_v37  ;;  %5922 = vmatprep.mubr.msk.bf16.mxu1 %vm4082_vm1, %v6608_v2 }
 0x2eb   :  { %v3476_v26 = vpop.f32.mrf.mxu1  ;;  %v3675_v23 = vpop.f32.mrf.mxu0 }
 0x2ec   :  { %v8934_v3 = vadd.f32 %v3675_v23, %v8654_v55  ;;  %5987 = vmatmul.mubr.f32.gmra.mxu0 %v4489_v16  ;;  %v6610_v55 = vld [vmem:[%s9785_s1 + $0xf0] sm:$0xff]   ;;  %v8949_v16 = vadd.f32 %v5822_v36, %v8674_v22 }
 0x2ed   :  { %v8936_v28 = vpop.f32.mrf.mxu1  ;;  %v5823_v32 = vpop.f32.mrf.mxu0  ;;  %5989 = vmatprep.mubr.f32.mxu0 %v4490_v10 }
 0x2ee   :  { %9920 = vst [vmem:[#allocation25_spill] sm:$0xff] %v8934_v3  ;;  %v4492_v2 = vmul.f32 %v8934_v3, %v8934_v3  ;;  %v8958_v3 = vadd.f32 %v5823_v32, %v8684_v15  ;;  %v4494_v22 = vmul.f32 %v8949_v16, %v8949_v16  ;;  %v6611_v15 = vld [vmem:[%s9785_s1 + $0xf8] sm:$0xff]  }
 0x2ef   :  { %v3479_v58 = vpop.f32.mrf.mxu1  ;;  %v3678_v61 = vpop.f32.mrf.mxu0 }
 0x2f0   :  { %v8952_v10 = vadd.f32 %v3678_v61, %v8664_v38  ;;  %5990 = vmatmul.mubr.f32.gmra.mxu0 %v4491_v5  ;;  %v4495_v32 = vmul.f32 %v8958_v3, %v8958_v3 }
 0x2f1   :  { %v8954_v26 = vpop.f32.mrf.mxu1  ;;  %v5826_v23 = vpop.f32.mrf.mxu0  ;;  %5992 = vmatprep.mubr.f32.mxu0 %v4492_v2  ;;  %5923 = vmatmul.mubr.msk.bf16.gmra.mxu1 %vm4082_vm1, %v6609_v45 }
 0x2f2   :  { %v4493_v30 = vmul.f32 %v8952_v10, %v8952_v10  ;;  %5926 = vmatprep.mubr.msk.bf16.mxu1 %vm4082_vm1, %v6610_v55  ;;  %v8978_v58 = vadd.f32 %v5826_v23, %v8714_v62 }
 0x2f3   :  { %v3484_v38 = vpop.f32.mrf.mxu1  ;;  %v3691_v36 = vpop.f32.mrf.mxu0 }
 0x2f4   :  { %v8966_v5 = vadd.f32 %v3691_v36, %v8694_v14  ;;  %5993 = vmatmul.mubr.f32.gmra.mxu0 %v4493_v30  ;;  %9922 = vst [vmem:[#allocation27_spill] sm:$0xff] %v8978_v58  ;;  %v4498_v62 = vmul.f32 %v8978_v58, %v8978_v58 }
 0x2f5   :  { %v8968_v2 = vpop.f32.mrf.mxu1  ;;  %v5827_v45 = vpop.f32.mrf.mxu0  ;;  %5995 = vmatprep.mubr.f32.mxu0 %v4494_v22 }
 0x2f6   :  { %9921 = vst [vmem:[#allocation26_spill] sm:$0xff] %v8966_v5  ;;  %v4496_v55 = vmul.f32 %v8966_v5, %v8966_v5  ;;  %v8987_v36 = vadd.f32 %v5827_v45, %v8724_v49 }
 0x2f7   :  { %v3487_v14 = vpop.f32.mrf.mxu1  ;;  %v3694_v61 = vpop.f32.mrf.mxu0 }
 0x2f8   :  { %v8981_v30 = vadd.f32 %v3694_v61, %v8704_v51  ;;  %5996 = vmatmul.mubr.f32.gmra.mxu0 %v4495_v32  ;;  %v4499_v49 = vmul.f32 %v8987_v36, %v8987_v36 }
 0x2f9   :  { %v8983_v22 = vpop.f32.mrf.mxu1  ;;  %v5830_v38 = vpop.f32.mrf.mxu0  ;;  %5998 = vmatprep.mubr.f32.mxu0 %v4496_v55  ;;  %5927 = vmatmul.mubr.msk.bf16.gmra.mxu1 %vm4082_vm1, %v6611_v15 }
 0x2fa   :  { %v4497_v5 = vmul.f32 %v8981_v30, %v8981_v30  ;;  %v9003_v15 = vadd.f32 %v5830_v38, %v8754_v18 }
 0x2fb   :  { %v3492_v23 = vpop.f32.mrf.mxu1  ;;  %v3707_v14 = vpop.f32.mrf.mxu0 }
 0x2fc   :  { %v8994_v51 = vadd.f32 %v3707_v14, %v8734_v43  ;;  %5999 = vmatmul.mubr.f32.gmra.mxu0 %v4497_v5  ;;  %9924 = vst [vmem:[#allocation29_spill] sm:$0xff] %v9003_v15  ;;  %v4502_v18 = vmul.f32 %v9003_v15, %v9003_v15 }
 0x2fd   :  { %v8996_v32 = vpop.f32.mrf.mxu1  ;;  %v5831_v55 = vpop.f32.mrf.mxu0  ;;  %6001 = vmatprep.mubr.f32.mxu0 %v4498_v62 }
 0x2fe   :  { %9923 = vst [vmem:[#allocation28_spill] sm:$0xff] %v8994_v51  ;;  %v4500_v45 = vmul.f32 %v8994_v51, %v8994_v51  ;;  %v9011_v62 = vadd.f32 %v5831_v55, %v8764_v12 }
 0x2ff   :  { %v3495_v61 = vpop.f32.mrf.mxu1  ;;  %v3710_v23 = vpop.f32.mrf.mxu0 }
 0x300   :  { %v9006_v58 = vadd.f32 %v3710_v23, %v8744_v33  ;;  %6002 = vmatmul.mubr.f32.gmra.mxu0 %v4499_v49  ;;  %9925 = vst [vmem:[#allocation30_spill] sm:$0xff] %v9011_v62  ;;  %v3443_v33 = vadd.f32 %v8794_v50, %v8450_v39  ;;  %v4503_v12 = vmul.f32 %v9011_v62, %v9011_v62 }
 0x301   :  { %v9008_v43 = vpop.f32.mrf.mxu1  ;;  %v5834_v5 = vpop.f32.mrf.mxu0  ;;  %6004 = vmatprep.mubr.f32.mxu0 %v4500_v45 }
 0x302   :  { %v4501_v14 = vmul.f32 %v9006_v58, %v9006_v58  ;;  %v9028_v23 = vadd.f32 %v5834_v5, %v3443_v33 }
 0x303   :  { %v3500_v38 = vpop.f32.mrf.mxu1  ;;  %v3723_v61 = vpop.f32.mrf.mxu0 }
 0x304   :  { %v9018_v51 = vadd.f32 %v3723_v61, %v8771_v56  ;;  %6005 = vmatmul.mubr.f32.gmra.mxu0 %v4501_v14  ;;  %9927 = vst [vmem:[#allocation32_spill] sm:$0xff] %v9028_v23  ;;  %v3446_v56 = vadd.f32 %v8808_v6, %v8462_v40  ;;  %v4506_v33 = vmul.f32 %v9028_v23, %v9028_v23 }
 0x305   :  { %v9022_v49 = vpop.f32.mrf.mxu1  ;;  %v5835_v45 = vpop.f32.mrf.mxu0  ;;  %6007 = vmatprep.mubr.f32.mxu0 %v4502_v18  ;;  %v9929_v18 = vld [vmem:[#allocation8_spill] sm:$0xff] }
 0x306   :  { %9926 = vst [vmem:[#allocation31_spill] sm:$0xff] %v9018_v51  ;;  %v4504_v55 = vmul.f32 %v9018_v51, %v9018_v51  ;;  %v3451_v61 = vadd.f32 %v8826_v0, %v9929_v18  ;;  %v9039_v62 = vadd.f32 %v5835_v45, %v3446_v56  ;;  %v3454_v0 = vadd.f32 %v8840_v7, %v8492_v25 }
 0x307   :  { %v3503_v38 = vpop.f32.mrf.mxu1  ;;  %v3726_v15 = vpop.f32.mrf.mxu0  ;;  %v3467_v25 = vadd.f32 %v8890_v53, %v8522_v59  ;;  %v9936_v59 = vld [vmem:[#allocation16_spill] sm:$0xff] }
 0x308   :  { %v9033_v14 = vadd.f32 %v3726_v15, %v8783_v24  ;;  %6008 = vmatmul.mubr.f32.gmra.mxu0 %v4503_v12  ;;  %9930 = vst [vmem:[#allocation8_spill] sm:$0xff] %v9039_v62  ;;  %v3459_v15 = vadd.f32 %v8858_v47, %v8498_v57  ;;  %v4507_v45 = vmul.f32 %v9039_v62, %v9039_v62 }
 0x309   :  { %v9035_v39 = vpop.f32.mrf.mxu1  ;;  %v5838_v50 = vpop.f32.mrf.mxu0  ;;  %6010 = vmatprep.mubr.f32.mxu0 %v4504_v55  ;;  %v3462_v57 = vadd.f32 %v8872_v41, %v8516_v27  ;;  %v3470_v53 = vadd.f32 %v8904_v60, %v9936_v59  ;;  %v3483_v60 = vadd.f32 %v8954_v26, %v8570_v13  ;;  %v3486_v13 = vadd.f32 %v8968_v2, %v8582_v4 }
 0x30a   :  { %9928 = vst [vmem:[#allocation33_spill] sm:$0xff] %v9033_v14  ;;  %v4505_v5 = vmul.f32 %v9033_v14, %v9033_v14  ;;  %v9057_v56 = vadd.f32 %v5838_v50, %v3459_v15  ;;  %v3475_v15 = vadd.f32 %v8922_v52, %v8546_v46  ;;  %v3478_v46 = vadd.f32 %v8936_v28, %v8558_v17 }
 0x30b   :  { %v3508_v40 = vpop.f32.mrf.mxu1  ;;  %v3739_v6 = vpop.f32.mrf.mxu0  ;;  %v3491_v28 = vadd.f32 %v8983_v22, %v8591_v19  ;;  %v3499_v4 = vadd.f32 %v9008_v43, %v8611_v9  ;;  %v3502_v9 = vadd.f32 %v9022_v49, %v8621_v44  ;;  %v9947_v44 = vld [vmem:[#allocation17_spill] sm:$0xff] }
 0x30c   :  { %v9045_v24 = vadd.f32 %v3739_v6, %v3451_v61  ;;  %6011 = vmatmul.mubr.f32.gmra.mxu0 %v4505_v5  ;;  %9932 = vst [vmem:[#allocation35_spill] sm:$0xff] %v9057_v56  ;;  %v4510_v40 = vmul.f32 %v9057_v56, %v9057_v56 }
 0x30d   :  { %v9049_v12 = vpop.f32.mrf.mxu1  ;;  %v5839_v55 = vpop.f32.mrf.mxu0  ;;  %6013 = vmatprep.mubr.f32.mxu0 %v4506_v33 }
 0x30e   :  { %9931 = vst [vmem:[#allocation34_spill] sm:$0xff] %v9045_v24  ;;  %v4508_v38 = vmul.f32 %v9045_v24, %v9045_v24  ;;  %v9067_v7 = vadd.f32 %v5839_v55, %v3462_v57 }
 0x30f   :  { %v3511_v18 = vpop.f32.mrf.mxu1  ;;  %v3742_v61 = vpop.f32.mrf.mxu0 }
 0x310   :  { %v9061_v47 = vadd.f32 %v3742_v61, %v3454_v0  ;;  %6014 = vmatmul.mubr.f32.gmra.mxu0 %v4507_v45  ;;  %9934 = vst [vmem:[#allocation37_spill] sm:$0xff] %v9067_v7  ;;  %v4511_v55 = vmul.f32 %v9067_v7, %v9067_v7 }
 0x311   :  { %v9063_v5 = vpop.f32.mrf.mxu1  ;;  %v5842_v33 = vpop.f32.mrf.mxu0  ;;  %6016 = vmatprep.mubr.f32.mxu0 %v4508_v38 }
 0x312   :  { %9933 = vst [vmem:[#allocation36_spill] sm:$0xff] %v9061_v47  ;;  %v4509_v50 = vmul.f32 %v9061_v47, %v9061_v47  ;;  %v9085_v18 = vadd.f32 %v5842_v33, %v3475_v15  ;;  %v3515_v49 = vadd.f32 %v9063_v5, %v9947_v44 }
 0x313   :  { %v3516_v6 = vpop.f32.mrf.mxu1  ;;  %v3755_v27 = vpop.f32.mrf.mxu0 }
 0x314   :  { %v9073_v41 = vadd.f32 %v3755_v27, %v3467_v25  ;;  %6017 = vmatmul.mubr.f32.gmra.mxu0 %v4509_v50  ;;  %9937 = vst [vmem:[#allocation16_spill] sm:$0xff] %v9085_v18  ;;  %v4514_v6 = vmul.f32 %v9085_v18, %v9085_v18 }
 0x315   :  { %v9077_v0 = vpop.f32.mrf.mxu1  ;;  %v5843_v45 = vpop.f32.mrf.mxu0  ;;  %6019 = vmatprep.mubr.f32.mxu0 %v4510_v40 }
 0x316   :  { %9935 = vst [vmem:[#allocation38_spill] sm:$0xff] %v9073_v41  ;;  %v4512_v38 = vmul.f32 %v9073_v41, %v9073_v41  ;;  %v9093_v40 = vadd.f32 %v5843_v45, %v3478_v46 }
 0x317   :  { %v3519_v61 = vpop.f32.mrf.mxu1  ;;  %v3758_v57 = vpop.f32.mrf.mxu0 }
 0x318   :  { %v9089_v52 = vadd.f32 %v3758_v57, %v3470_v53  ;;  %6020 = vmatmul.mubr.f32.gmra.mxu0 %v4511_v55  ;;  %9939 = vst [vmem:[#allocation40_spill] sm:$0xff] %v9093_v40  ;;  %v4515_v26 = vmul.f32 %v9093_v40, %v9093_v40  ;;  %v3494_v57 = vadd.f32 %v8996_v32, %v8601_v20 }
 0x319   :  { %v3522_v25 = vpop.f32.mrf.mxu1  ;;  %v5846_v50 = vpop.f32.mrf.mxu0  ;;  %6022 = vmatprep.mubr.f32.mxu0 %v4512_v38  ;;  %v3507_v32 = vadd.f32 %v9035_v39, %v8631_v34 }
 0x31a   :  { %9938 = vst [vmem:[#allocation39_spill] sm:$0xff] %v9089_v52  ;;  %v4513_v33 = vmul.f32 %v9089_v52, %v9089_v52  ;;  %v9109_v55 = vadd.f32 %v5846_v50, %v3491_v28 }
 0x31b   :  { %v3524_v27 = vpop.f32.mrf.mxu1  ;;  %v3771_v15 = vpop.f32.mrf.mxu0 }
 0x31c   :  { %v9099_v17 = vadd.f32 %v3771_v15, %v3483_v60  ;;  %6023 = vmatmul.mubr.f32.gmra.mxu0 %v4513_v33  ;;  %9941 = vst [vmem:[#allocation42_spill] sm:$0xff] %v9109_v55  ;;  %v4518_v60 = vmul.f32 %v9109_v55, %v9109_v55 }
 0x31d   :  { %v3525_v59 = vpop.f32.mrf.mxu1  ;;  %v5847_v53 = vpop.f32.mrf.mxu0  ;;  %6025 = vmatprep.mubr.f32.mxu0 %v4514_v6 }
 0x31e   :  { %9940 = vst [vmem:[#allocation41_spill] sm:$0xff] %v9099_v17  ;;  %v4516_v45 = vmul.f32 %v9099_v17, %v9099_v17  ;;  %v9117_v2 = vadd.f32 %v5847_v53, %v3494_v57 }
 0x31f   :  { %v3527_v38 = vpop.f32.mrf.mxu1  ;;  %v3774_v61 = vpop.f32.mrf.mxu0 }
 0x320   :  { %v9113_v19 = vadd.f32 %v3774_v61, %v3486_v13  ;;  %6026 = vmatmul.mubr.f32.gmra.mxu0 %v4515_v26  ;;  %9943 = vst [vmem:[#allocation44_spill] sm:$0xff] %v9117_v2  ;;  %v4519_v43 = vmul.f32 %v9117_v2, %v9117_v2 }
 0x321   :  { %v3530_v22 = vpop.f32.mrf.mxu1  ;;  %v5850_v46 = vpop.f32.mrf.mxu0  ;;  %6028 = vmatprep.mubr.f32.mxu0 %v4516_v45  ;;  %v3510_v45 = vadd.f32 %v9049_v12, %v8641_v48  ;;  %v9950_v12 = vld [vmem:[#allocation20_spill] sm:$0xff] }
 0x322   :  { %9942 = vst [vmem:[#allocation43_spill] sm:$0xff] %v9113_v19  ;;  %v4517_v50 = vmul.f32 %v9113_v19, %v9113_v19  ;;  %v9133_v53 = vadd.f32 %v5850_v46, %v3507_v32  ;;  %v9951_v32 = vld [vmem:[#allocation19_spill] sm:$0xff] }
 0x323   :  { %v3532_v33 = vpop.f32.mrf.mxu1  ;;  %v3787_v6 = vpop.f32.mrf.mxu0  ;;  %v3518_v5 = vadd.f32 %v9077_v0, %v9951_v32 }
 0x324   :  { %v9123_v20 = vadd.f32 %v3787_v6, %v3499_v4  ;;  %6029 = vmatmul.mubr.f32.gmra.mxu0 %v4517_v50  ;;  %9945 = vst [vmem:[#allocation46_spill] sm:$0xff] %v9133_v53  ;;  %v4522_v46 = vmul.f32 %v9133_v53, %v9133_v53 }
 0x325   :  { %v3533_v27 = vpop.f32.mrf.mxu1  ;;  %v5851_v15 = vpop.f32.mrf.mxu0  ;;  %6031 = vmatprep.mubr.f32.mxu0 %v4518_v60  ;;  %v3523_v60 = vadd.f32 %v3522_v25, %v9950_v12 }
 0x326   :  { %9944 = vst [vmem:[#allocation45_spill] sm:$0xff] %v9123_v20  ;;  %v4520_v28 = vmul.f32 %v9123_v20, %v9123_v20  ;;  %v9141_v61 = vadd.f32 %v5851_v15, %v3510_v45  ;;  %v9270_v20 = vld [vmem:[%s9786_s7] ss:$0 sm:$0xff] }
 0x327   :  { %v3535_v13 = vpop.f32.mrf.mxu1  ;;  %v3790_v26 = vpop.f32.mrf.mxu0 }
 0x328   :  { %v9137_v34 = vadd.f32 %v3790_v26, %v3502_v9  ;;  %6032 = vmatmul.mubr.f32.gmra.mxu0 %v4519_v43  ;;  %9948 = vst [vmem:[#allocation17_spill] sm:$0xff] %v9141_v61  ;;  %v4523_v15 = vmul.f32 %v9141_v61, %v9141_v61  ;;  %v9953_v26 = vld [vmem:[#allocation21_spill] sm:$0xff] }
 0x329   :  { %v3538_v39 = vpop.f32.mrf.mxu1  ;;  %v5854_v38 = vpop.f32.mrf.mxu0  ;;  %6034 = vmatprep.mubr.f32.mxu0 %v4520_v28  ;;  %v3526_v45 = vadd.f32 %v3525_v59, %v9953_v26  ;;  %v9958_v59 = vld [vmem:[#allocation2_spill] sm:$0xff] }
 0x32a   :  { %9946 = vst [vmem:[#allocation47_spill] sm:$0xff] %v9137_v34  ;;  %v4521_v57 = vmul.f32 %v9137_v34, %v9137_v34  ;;  %v9156_v43 = vadd.f32 %v5854_v38, %v3523_v60  ;;  %v3539_v32 = vadd.f32 %v3538_v39, %v9958_v59  ;;  %v9964_v59 = vld [vmem:[#allocation11_spill] sm:$0xff] }
 0x32b   :  { %v3540_v4 = vpop.f32.mrf.mxu1  ;;  %v3803_v50 = vpop.f32.mrf.mxu0 }
 0x32c   :  { %v9147_v48 = vadd.f32 %v3803_v50, %v3515_v49  ;;  %6035 = vmatmul.mubr.f32.gmra.mxu0 %v4521_v57  ;;  %9952 = vst [vmem:[#allocation20_spill] sm:$0xff] %v9156_v43  ;;  %v9955_v57 = vld [vmem:[#allocation18_spill] sm:$0xff]  ;;  %v4526_v38 = vmul.f32 %v9156_v43, %v9156_v43 }
 0x32d   :  { %v3541_v33 = vpop.f32.mrf.mxu1  ;;  %v5855_v6 = vpop.f32.mrf.mxu0  ;;  %6037 = vmatprep.mubr.f32.mxu0 %v4522_v46  ;;  %v3531_v0 = vadd.f32 %v3530_v22, %v9955_v57  ;;  %v9961_v57 = vld [vmem:[#allocation10_spill] sm:$0xff] }
 0x32e   :  { %9949 = vst [vmem:[#allocation48_spill] sm:$0xff] %v9147_v48  ;;  %v4524_v9 = vmul.f32 %v9147_v48, %v9147_v48  ;;  %v9162_v46 = vadd.f32 %v5855_v6, %v3526_v45 }
 0x32f   :  { %v3543_v28 = vpop.f32.mrf.mxu1  ;;  %v3806_v13 = vpop.f32.mrf.mxu0 }
 0x330   :  { %v9159_v44 = vadd.f32 %v3806_v13, %v3518_v5  ;;  %6038 = vmatmul.mubr.f32.gmra.mxu0 %v4523_v15  ;;  %9956 = vst [vmem:[#allocation21_spill] sm:$0xff] %v9162_v46  ;;  %v4527_v6 = vmul.f32 %v9162_v46, %v9162_v46 }
 0x331   :  { %v3546_v25 = vpop.f32.mrf.mxu1  ;;  %v5858_v49 = vpop.f32.mrf.mxu0  ;;  %6040 = vmatprep.mubr.f32.mxu0 %v4524_v9  ;;  %v9959_v9 = vld [vmem:[#allocation9_spill] sm:$0xff] }
 0x332   :  { %9954 = vst [vmem:[#allocation19_spill] sm:$0xff] %v9159_v44  ;;  %v4525_v4 = vmul.f32 %v9159_v44, %v9159_v44  ;;  %v3534_v22 = vadd.f32 %v3533_v27, %v9959_v9  ;;  %v9176_v13 = vadd.f32 %v5858_v49, %v3539_v32  ;;  %v3547_v27 = vadd.f32 %v3546_v25, %v8731_v11 }
 0x333   :  { %v3548_v50 = vpop.f32.mrf.mxu1  ;;  %v3819_v12 = vpop.f32.mrf.mxu0 }
 0x334   :  { %v9168_v60 = vadd.f32 %v3819_v12, %v3531_v0  ;;  %6041 = vmatmul.mubr.f32.gmra.mxu0 %v4525_v4  ;;  %9960 = vst [vmem:[#allocation2_spill] sm:$0xff] %v9176_v13  ;;  %v3542_v0 = vadd.f32 %v3541_v33, %v9961_v57  ;;  %v4530_v49 = vmul.f32 %v9176_v13, %v9176_v13 }
 0x335   :  { %v3549_v5 = vpop.f32.mrf.mxu1  ;;  %v5859_v15 = vpop.f32.mrf.mxu0  ;;  %6043 = vmatprep.mubr.f32.mxu0 %v4526_v38 }
 0x336   :  { %9957 = vst [vmem:[#allocation18_spill] sm:$0xff] %v9168_v60  ;;  %v4528_v28 = vmul.f32 %v9168_v60, %v9168_v60  ;;  %v9182_v38 = vadd.f32 %v5859_v15, %v3542_v0 }
 0x337   :  { %v3551_v26 = vpop.f32.mrf.mxu1  ;;  %v3822_v45 = vpop.f32.mrf.mxu0 }
 0x338   :  { %v9179_v4 = vadd.f32 %v3822_v45, %v3534_v22  ;;  %6044 = vmatmul.mubr.f32.gmra.mxu0 %v4527_v6  ;;  %9963 = vst [vmem:[#allocation10_spill] sm:$0xff] %v9182_v38  ;;  %v4531_v25 = vmul.f32 %v9182_v38, %v9182_v38  ;;  %v9967_v45 = vld [vmem:[#allocation4_spill] sm:$0xff] }
 0x339   :  { %v3554_v39 = vpop.f32.mrf.mxu1  ;;  %v5862_v50 = vpop.f32.mrf.mxu0  ;;  %6046 = vmatprep.mubr.f32.mxu0 %v4528_v28  ;;  %v9966_v28 = vld [vmem:[#allocation3_spill] sm:$0xff] }
 0x33a   :  { %9962 = vst [vmem:[#allocation9_spill] sm:$0xff] %v9179_v4  ;;  %v4529_v12 = vmul.f32 %v9179_v4, %v9179_v4  ;;  %v3555_v32 = vadd.f32 %v3554_v39, %v9964_v59  ;;  %v3550_v11 = vadd.f32 %v3549_v5, %v9966_v28 }
 0x33b   :  { %v3556_v9 = vpop.f32.mrf.mxu1  ;;  %v3835_v33 = vpop.f32.mrf.mxu0 }
 0x33c   :  { %v9189_v22 = vadd.f32 %v3835_v33, %v3547_v27  ;;  %6047 = vmatmul.mubr.f32.gmra.mxu0 %v4529_v12  ;;  %v9197_v0 = vadd.f32 %v5862_v50, %v3555_v32 }
 0x33d   :  { %v3557_v6 = vpop.f32.mrf.mxu1  ;;  %v5863_v26 = vpop.f32.mrf.mxu0  ;;  %6049 = vmatprep.mubr.f32.mxu0 %v4530_v49 }
 0x33e   :  { %9965 = vst [vmem:[#allocation11_spill] sm:$0xff] %v9189_v22  ;;  %v4532_v15 = vmul.f32 %v9189_v22, %v9189_v22  ;;  %v3558_v57 = vadd.f32 %v3557_v6, %v9967_v45  ;;  %9968 = vst [vmem:[#allocation3_spill] sm:$0xff] %v9197_v0  ;;  %v4534_v9 = vmul.f32 %v9197_v0, %v9197_v0 }
 0x33f   :  { %v3559_v39 = vpop.f32.mrf.mxu1  ;;  %v3838_v59 = vpop.f32.mrf.mxu0 }
 0x340   :  { %v9199_v27 = vadd.f32 %v3838_v59, %v3550_v11  ;;  %6050 = vmatmul.mubr.f32.gmra.mxu0 %v4531_v25  ;;  %v9203_v49 = vadd.f32 %v5863_v26, %v3558_v57 }
 0x341   :  { %6052 = vmatprep.mubr.f32.mxu0 %v4532_v15  ;;  %v9201_v12 = vpop.f32.mrf.mxu1 }
 0x342   :  { %9969 = vst [vmem:[#allocation4_spill] sm:$0xff] %v9199_v27  ;;  %9970 = vst [vmem:[#allocation49_spill] sm:$0xff] %v9203_v49  ;;  %v4533_v5 = vmul.f32 %v9199_v27, %v9199_v27  ;;  %v4535_v32 = vmul.f32 %v9203_v49, %v9203_v49 }
 0x343   :  { %v9209_v33 = vpop.f32.mrf.mxu1 }
 0x344   :  { %6053 = vmatmul.mubr.f32.gmra.mxu0 %v4533_v5 }
 0x345   :  { %6055 = vmatprep.mubr.f32.mxu0 %v4534_v9  ;;  %v9211_v50 = vpop.f32.mrf.mxu1 }
 0x347   :  { %v4220_v6 = vpop.f32.mrf.mxu1 }
 0x348   :  { %6056 = vmatmul.mubr.f32.gmra.mxu0 %v4535_v32 }
 0x349   :  { %v9215_v28 = vpop.f32.mrf.mxu1 }
 0x34b   :  { %v9217_v26 = vpop.f32.mrf.mxu1 }
 0x34d   :  { %v9219_v11 = vpop.f32.mrf.mxu1 }
 0x34f   :  { %v9221_v25 = vpop.f32.mrf.mxu1 }
 0x351   :  { %v9223_v15 = vpop.f32.mrf.mxu1 }
 0x353   :  { %v9225_v45 = vpop.f32.mrf.mxu1 }
 0x355   :  { %v9227_v57 = vpop.f32.mrf.mxu1 }
 0x357   :  { %v9229_v39 = vpop.f32.mrf.mxu1 }
 0x359   :  { %v9231_v59 = vpop.f32.mrf.mxu1 }
 0x35b   :  { %v9233_v5 = vpop.f32.mrf.mxu1 }
 0x35d   :  { %v9235_v9 = vpop.f32.mrf.mxu1 }
 0x35f   :  { %v9237_v32 = vpop.f32.mrf.mxu1 }
 0x361   :  { %v9239_v0 = vpop.f32.mrf.mxu1 }
 0x363   :  { %v9241_v49 = vpop.f32.mrf.mxu1 }
 0x365   :  { %v9243_v22 = vpop.f32.mrf.mxu1 }
 0x367   :  { %v9245_v27 = vpop.f32.mrf.mxu1 }
 0x369   :  { %v9247_v13 = vpop.f32.mrf.mxu1 }
 0x36b   :  { %v9249_v38 = vpop.f32.mrf.mxu1 }
 0x36d   :  { %v9251_v60 = vpop.f32.mrf.mxu1 }
 0x36f   :  { %v9253_v4 = vpop.f32.mrf.mxu1 }
 0x371   :  { %v9255_v43 = vpop.f32.mrf.mxu1 }
 0x373   :  { %v9257_v46 = vpop.f32.mrf.mxu1 }
 0x375   :  { %v9259_v48 = vpop.f32.mrf.mxu1 }
 0x377   :  { %v9261_v44 = vpop.f32.mrf.mxu1 }
 0x379   :  { %v9263_v53 = vpop.f32.mrf.mxu1 }
 0x37b   :  { %v9265_v61 = vpop.f32.mrf.mxu1 }
 0x37d   :  { %v9272_v55 = vpop.f32.mrf.mxu1 }
 0x37f   :  { %v9276_v40 = vpop.f32.mrf.mxu1 }
 0x381   :  { %v9280_v24 = vpop.f32.mrf.mxu1 }
 0x382   :  { %9971 = vst [vmem:[#allocation50_spill] sm:$0xff] %v9280_v24 }
 0x38c   :  { %v5964_v34 = vpop.f32.mrf.mxu0 }
 0x38d   :  { %v4631_v2 = vadd.f32 %v5964_v34, %v9270_v20 }
 0x38e   :  { %v4625_v17 = vpop.f32.mrf.mxu0 }
 0x38f   :  { %6612 = vrsqrt.f32 %v4631_v2  ;;  %v4626_v19 = vadd.f32 %v9270_v20, %v4625_v17  ;;  %v9289_v2 = vpop.f32.mrf.mxu1 }
 0x390   :  { %v5967_v18 = vpop.f32.mrf.mxu0  ;;  %9972 = vst [vmem:[#allocation51_spill] sm:$0xff] %v9289_v2 }
 0x391   :  { %6614 = vrsqrt.f32 %v4626_v19  ;;  %v4641_v41 = vadd.f32 %v5967_v18, %v9270_v20  ;;  %v9287_v19 = vld [vmem:[%s9787_s5] ss:$0 sm:$0xff] }
 0x392   :  { %v4635_v52 = vpop.f32.mrf.mxu0 }
 0x393   :  { %6616 = vrsqrt.f32 %v4641_v41  ;;  %v4636_v56 = vadd.f32 %v9270_v20, %v4635_v52 }
 0x394   :  { %v5970_v7 = vpop.f32.mrf.mxu0 }
 0x395   :  { %6618 = vrsqrt.f32 %v4636_v56  ;;  %v4651_v34 = vadd.f32 %v5970_v7, %v9270_v20  ;;  %v4221_v7 = vadd.f32 %v9287_v19, %v4220_v6 }
 0x396   :  { %v4645_v47 = vpop.f32.mrf.mxu0 }
 0x397   :  { %6620 = vrsqrt.f32 %v4651_v34  ;;  %v4646_v17 = vadd.f32 %v9270_v20, %v4645_v47  ;;  %v9294_v47 = vpop.f32.mrf.mxu1 }
 0x398   :  { %v5973_v18 = vpop.f32.mrf.mxu0  ;;  %9973 = vst [vmem:[#allocation52_spill] sm:$0xff] %v9294_v47  ;;  %v4229_v47 = vadd.f32 %v9211_v50, %v9287_v19  ;;  %v9975_v50 = vld [vmem:[#allocation12_spill] sm:$0xff] }
 0x399   :  { %6622 = vrsqrt.f32 %v4646_v17  ;;  %v4661_v41 = vadd.f32 %v5973_v18, %v9270_v20  ;;  %v4218_v17 = vadd.f32 %v9287_v19, %v9209_v33  ;;  %v9304_v14 = vpop.f32.mrf.mxu1  ;;  %v4237_v33 = vadd.f32 %v9287_v19, %v9221_v25 }
 0x39a   :  { %v4655_v52 = vpop.f32.mrf.mxu0 }
 0x39b   :  { %6624 = vrsqrt.f32 %v4661_v41  ;;  %v4656_v56 = vadd.f32 %v9270_v20, %v4655_v52 }
 0x39c   :  { %v6613_v34 = vpop.eup %6612  ;;  %v5976_v23 = vpop.f32.mrf.mxu0 }
 0x39d   :  { %6626 = vrsqrt.f32 %v4656_v56  ;;  %v5009_v24 = vmul.f32 %v6613_v34, %v8792_v35  ;;  %v4671_v62 = vadd.f32 %v5976_v23, %v9270_v20  ;;  %v9974_v23 = vld [vmem:[#allocation5_spill] sm:$0xff] }
 0x39e   :  { %v6615_v51 = vpop.eup %6614  ;;  %v4665_v18 = vpop.f32.mrf.mxu0 }
 0x39f   :  { %v5008_v41 = vmul.f32 %v6615_v51, %v8775_v21  ;;  %v5073_v2 = vadd.f32 %v5009_v24, %v4221_v7  ;;  %6628 = vrsqrt.f32 %v4671_v62  ;;  %v4666_v6 = vadd.f32 %v9270_v20, %v4665_v18 }
 0x3a0   :  { %v6617_v52 = vpop.eup %6616  ;;  %v5979_v56 = vpop.f32.mrf.mxu0  ;;  %v4226_v62 = vadd.f32 %v9201_v12, %v9287_v19 }
 0x3a1   :  { %v5072_v35 = vadd.f32 %v5008_v41, %v4218_v17  ;;  %v5011_v34 = vmul.f32 %v6617_v52, %v9974_v23  ;;  %5137 = vst [vmem:[%s9788_s8 + $0x8] sm:$0xff] %v5073_v2  ;;  %6630 = vrsqrt.f32 %v4666_v6  ;;  %v4681_v21 = vadd.f32 %v5979_v56, %v9270_v20  ;;  %v9320_v6 = vpop.f32.mrf.mxu1  ;;  %v9976_v23 = vld [vmem:[#allocation13_spill] sm:$0xff] }
 0x3a2   :  { %v6619_v51 = vpop.eup %6618  ;;  %v4675_v24 = vpop.f32.mrf.mxu0 }
 0x3a3   :  { %v5010_v7 = vmul.f32 %v6619_v51, %v9975_v50  ;;  %5136 = vst [vmem:[%s9788_s8] sm:$0xff] %v5072_v35  ;;  %v5075_v17 = vadd.f32 %v5011_v34, %v4229_v47  ;;  %6632 = vrsqrt.f32 %v4681_v21  ;;  %v4676_v2 = vadd.f32 %v9270_v20, %v4675_v24  ;;  %v9336_v50 = vpop.f32.mrf.mxu1 }
 0x3a4   :  { %v6621_v18 = vpop.eup %6620  ;;  %v5982_v41 = vpop.f32.mrf.mxu0  ;;  %v4234_v47 = vadd.f32 %v9287_v19, %v9217_v26 }
 0x3a5   :  { %v5074_v52 = vadd.f32 %v5010_v7, %v4226_v62  ;;  %5139 = vst [vmem:[%s9788_s8 + $0x18] sm:$0xff] %v5075_v17  ;;  %6634 = vrsqrt.f32 %v4676_v2  ;;  %v5013_v12 = vmul.f32 %v6621_v18, %v8824_v1  ;;  %v4691_v25 = vadd.f32 %v5982_v41, %v9270_v20  ;;  %v9977_v41 = vld [vmem:[#allocation6_spill] sm:$0xff] }
 0x3a6   :  { %v6623_v56 = vpop.eup %6622  ;;  %v4685_v35 = vpop.f32.mrf.mxu0  ;;  %v4245_v1 = vadd.f32 %v9219_v11, %v9287_v19  ;;  %v4242_v2 = vadd.f32 %v9215_v28, %v9287_v19  ;;  %v4253_v11 = vadd.f32 %v9287_v19, %v9229_v39 }
 0x3a7   :  { %5138 = vst [vmem:[%s9788_s8 + $0x10] sm:$0xff] %v5074_v52  ;;  %v5012_v34 = vmul.f32 %v6623_v56, %v9976_v23  ;;  %v5077_v21 = vadd.f32 %v5013_v12, %v4237_v33  ;;  %6636 = vrsqrt.f32 %v4691_v25  ;;  %v4686_v51 = vadd.f32 %v9270_v20, %v4685_v35 }
 0x3a8   :  { %v6625_v62 = vpop.eup %6624  ;;  %v5985_v24 = vpop.f32.mrf.mxu0 }
 0x3a9   :  { %v5076_v7 = vadd.f32 %v5012_v34, %v4234_v47  ;;  %v5015_v26 = vmul.f32 %v6625_v62, %v8830_v29  ;;  %5141 = vst [vmem:[%s9788_s8 + $0x28] sm:$0xff] %v5077_v21  ;;  %6638 = vrsqrt.f32 %v4686_v51  ;;  %v4701_v33 = vadd.f32 %v5985_v24, %v9270_v20  ;;  %v9352_v47 = vpop.f32.mrf.mxu1  ;;  %v9978_v51 = vld [vmem:[#allocation14_spill] sm:$0xff] }
 0x3aa   :  { %v6627_v17 = vpop.eup %6626  ;;  %v4695_v18 = vpop.f32.mrf.mxu0  ;;  %v4250_v34 = vadd.f32 %v9287_v19, %v9225_v45 }
 0x3ab   :  { %v5014_v52 = vmul.f32 %v6627_v17, %v9977_v41  ;;  %5140 = vst [vmem:[%s9788_s8 + $0x20] sm:$0xff] %v5076_v7  ;;  %v5079_v29 = vadd.f32 %v5015_v26, %v4245_v1  ;;  %6640 = vrsqrt.f32 %v4701_v33  ;;  %v4696_v12 = vadd.f32 %v9270_v20, %v4695_v18  ;;  %v9368_v33 = vpop.f32.mrf.mxu1 }
 0x3ac   :  { %v6629_v25 = vpop.eup %6628  ;;  %v5988_v56 = vpop.f32.mrf.mxu0 }
 0x3ad   :  { %v5078_v35 = vadd.f32 %v5014_v52, %v4242_v2  ;;  %5143 = vst [vmem:[%s9788_s8 + $0x38] sm:$0xff] %v5079_v29  ;;  %6642 = vrsqrt.f32 %v4696_v12  ;;  %v5017_v28 = vmul.f32 %v6629_v25, %v8856_v31  ;;  %v4711_v39 = vadd.f32 %v5988_v56, %v9270_v20  ;;  %v9979_v52 = vld [vmem:[#allocation7_spill] sm:$0xff] }
 0x3ae   :  { %v6631_v23 = vpop.eup %6630  ;;  %v4705_v21 = vpop.f32.mrf.mxu0  ;;  %v4261_v31 = vadd.f32 %v9227_v57, %v9287_v19  ;;  %v4269_v57 = vadd.f32 %v9287_v19, %v9237_v32 }
 0x3af   :  { %5142 = vst [vmem:[%s9788_s8 + $0x30] sm:$0xff] %v5078_v35  ;;  %v5016_v62 = vmul.f32 %v6631_v23, %v9978_v51  ;;  %v5081_v1 = vadd.f32 %v5017_v28, %v4253_v11  ;;  %6644 = vrsqrt.f32 %v4711_v39  ;;  %v4706_v24 = vadd.f32 %v9270_v20, %v4705_v21  ;;  %v9384_v35 = vpop.f32.mrf.mxu1  ;;  %v9980_v21 = vld [vmem:[#allocation15_spill] sm:$0xff] }
 0x3b0   :  { %v6633_v7 = vpop.eup %6632  ;;  %v5991_v26 = vpop.f32.mrf.mxu0  ;;  %v4258_v11 = vadd.f32 %v9223_v15, %v9287_v19  ;;  %v4266_v23 = vadd.f32 %v9287_v19, %v9233_v5 }
 0x3b1   :  { %v5080_v17 = vadd.f32 %v5016_v62, %v4250_v34  ;;  %v5019_v45 = vmul.f32 %v6633_v7, %v8862_v42  ;;  %5145 = vst [vmem:[%s9788_s8 + $0x48] sm:$0xff] %v5081_v1  ;;  %6646 = vrsqrt.f32 %v4706_v24  ;;  %v4721_v2 = vadd.f32 %v5991_v26, %v9270_v20 }
 0x3b2   :  { %v6635_v18 = vpop.eup %6634  ;;  %v4715_v41 = vpop.f32.mrf.mxu0 }
 0x3b3   :  { %v5018_v29 = vmul.f32 %v6635_v18, %v9979_v52  ;;  %5144 = vst [vmem:[%s9788_s8 + $0x40] sm:$0xff] %v5080_v17  ;;  %v5083_v42 = vadd.f32 %v5019_v45, %v4261_v31  ;;  %6648 = vrsqrt.f32 %v4721_v2  ;;  %v4716_v12 = vadd.f32 %v9270_v20, %v4715_v41  ;;  %v9400_v31 = vpop.f32.mrf.mxu1 }
 0x3b4   :  { %v6637_v25 = vpop.eup %6636  ;;  %v5994_v56 = vpop.f32.mrf.mxu0  ;;  %v4274_v2 = vadd.f32 %v9231_v59, %v9287_v19 }
 0x3b5   :  { %v5082_v28 = vadd.f32 %v5018_v29, %v4258_v11  ;;  %5147 = vst [vmem:[%s9788_s8 + $0x58] sm:$0xff] %v5083_v42  ;;  %6650 = vrsqrt.f32 %v4716_v12  ;;  %v5021_v15 = vmul.f32 %v6637_v25, %v8888_v8  ;;  %v4731_v32 = vadd.f32 %v5994_v56, %v9270_v20  ;;  %v9981_v11 = vld [vmem:[#allocation22_spill] sm:$0xff]  ;;  %v9416_v42 = vpop.f32.mrf.mxu1 }
 0x3b6   :  { %v6639_v39 = vpop.eup %6638  ;;  %v4725_v34 = vpop.f32.mrf.mxu0  ;;  %v4277_v8 = vadd.f32 %v9235_v9, %v9287_v19  ;;  %v4285_v9 = vadd.f32 %v9287_v19, %v9245_v27  ;;  %v4282_v56 = vadd.f32 %v9287_v19, %v9241_v49 }
 0x3b7   :  { %5146 = vst [vmem:[%s9788_s8 + $0x50] sm:$0xff] %v5082_v28  ;;  %v5020_v51 = vmul.f32 %v6639_v39, %v9980_v21  ;;  %v5085_v62 = vadd.f32 %v5021_v15, %v4269_v57  ;;  %6652 = vrsqrt.f32 %v4731_v32  ;;  %v4726_v1 = vadd.f32 %v9270_v20, %v4725_v34  ;;  %v9982_v15 = vld [vmem:[#allocation23_spill] sm:$0xff] }
 0x3b8   :  { %v6641_v24 = vpop.eup %6640  ;;  %v5997_v7 = vpop.f32.mrf.mxu0 }
 0x3b9   :  { %v5084_v26 = vadd.f32 %v5020_v51, %v4266_v23  ;;  %v5023_v5 = vmul.f32 %v6641_v24, %v8894_v63  ;;  %5149 = vst [vmem:[%s9788_s8 + $0x68] sm:$0xff] %v5085_v62  ;;  %6654 = vrsqrt.f32 %v4726_v1  ;;  %v4741_v17 = vadd.f32 %v5997_v7, %v9270_v20  ;;  %v9432_v51 = vpop.f32.mrf.mxu1 }
 0x3ba   :  { %v6643_v45 = vpop.eup %6642  ;;  %v4735_v18 = vpop.f32.mrf.mxu0 }
 0x3bb   :  { %v5022_v41 = vmul.f32 %v6643_v45, %v9981_v11  ;;  %5148 = vst [vmem:[%s9788_s8 + $0x60] sm:$0xff] %v5084_v26  ;;  %v5087_v63 = vadd.f32 %v5023_v5, %v4277_v8  ;;  %6656 = vrsqrt.f32 %v4741_v17  ;;  %v4736_v57 = vadd.f32 %v9270_v20, %v4735_v18  ;;  %v9983_v26 = vld [vmem:[#allocation24_spill] sm:$0xff]  ;;  %v9448_v18 = vpop.f32.mrf.mxu1 }
 0x3bc   :  { %v6645_v52 = vpop.eup %6644  ;;  %v6000_v29 = vpop.f32.mrf.mxu0  ;;  %v4290_v8 = vadd.f32 %v9239_v0, %v9287_v19 }
 0x3bd   :  { %v5086_v12 = vadd.f32 %v5022_v41, %v4274_v2  ;;  %5151 = vst [vmem:[%s9788_s8 + $0x78] sm:$0xff] %v5087_v63  ;;  %6658 = vrsqrt.f32 %v4736_v57  ;;  %v5025_v27 = vmul.f32 %v6645_v52, %v8920_v37  ;;  %v4751_v59 = vadd.f32 %v6000_v29, %v9270_v20  ;;  %v9984_v57 = vld [vmem:[#allocation25_spill] sm:$0xff] }
 0x3be   :  { %v6647_v25 = vpop.eup %6646  ;;  %v4745_v28 = vpop.f32.mrf.mxu0  ;;  %v4293_v37 = vadd.f32 %v9243_v22, %v9287_v19  ;;  %v4301_v22 = vadd.f32 %v9287_v19, %v9253_v4  ;;  %v4298_v41 = vadd.f32 %v9287_v19, %v9249_v38 }
 0x3bf   :  { %5150 = vst [vmem:[%s9788_s8 + $0x70] sm:$0xff] %v5086_v12  ;;  %v5024_v32 = vmul.f32 %v6647_v25, %v9982_v15  ;;  %v5089_v39 = vadd.f32 %v5025_v27, %v4285_v9  ;;  %6660 = vrsqrt.f32 %v4751_v59  ;;  %v4746_v23 = vadd.f32 %v9270_v20, %v4745_v28  ;;  %v9464_v25 = vpop.f32.mrf.mxu1 }
 0x3c0   :  { %v6649_v34 = vpop.eup %6648  ;;  %v6003_v21 = vpop.f32.mrf.mxu0 }
 0x3c1   :  { %v5088_v62 = vadd.f32 %v5024_v32, %v4282_v56  ;;  %v5027_v49 = vmul.f32 %v6649_v34, %v8926_v54  ;;  %5153 = vst [vmem:[%s9788_s8 + $0x88] sm:$0xff] %v5089_v39  ;;  %6662 = vrsqrt.f32 %v4746_v23  ;;  %v4761_v1 = vadd.f32 %v6003_v21, %v9270_v20 }
 0x3c2   :  { %v6651_v24 = vpop.eup %6650  ;;  %v4755_v7 = vpop.f32.mrf.mxu0  ;;  %v4306_v32 = vadd.f32 %v9247_v13, %v9287_v19 }
 0x3c3   :  { %v5026_v5 = vmul.f32 %v6651_v24, %v9983_v26  ;;  %5152 = vst [vmem:[%s9788_s8 + $0x80] sm:$0xff] %v5088_v62  ;;  %v5091_v54 = vadd.f32 %v5027_v49, %v4293_v37  ;;  %6664 = vrsqrt.f32 %v4761_v1  ;;  %v4756_v17 = vadd.f32 %v9270_v20, %v4755_v7  ;;  %v9480_v62 = vpop.f32.mrf.mxu1 }
 0x3c4   :  { %v6653_v45 = vpop.eup %6652  ;;  %v6006_v2 = vpop.f32.mrf.mxu0  ;;  %v4314_v1 = vadd.f32 %v9287_v19, %v9257_v46 }
 0x3c5   :  { %v5090_v9 = vadd.f32 %v5026_v5, %v4290_v8  ;;  %5155 = vst [vmem:[%s9788_s8 + $0x98] sm:$0xff] %v5091_v54  ;;  %6666 = vrsqrt.f32 %v4756_v17  ;;  %v5029_v4 = vmul.f32 %v6653_v45, %v8952_v10  ;;  %v4771_v0 = vadd.f32 %v6006_v2, %v9270_v20  ;;  %v9985_v8 = vld [vmem:[#allocation26_spill] sm:$0xff]  ;;  %v9496_v17 = vpop.f32.mrf.mxu1 }
 0x3c6   :  { %v6655_v11 = vpop.eup %6654  ;;  %v4765_v63 = vpop.f32.mrf.mxu0  ;;  %v4309_v10 = vadd.f32 %v9251_v60, %v9287_v19  ;;  %v4317_v60 = vadd.f32 %v9287_v19, %v9261_v44 }
 0x3c7   :  { %5154 = vst [vmem:[%s9788_s8 + $0x90] sm:$0xff] %v5090_v9  ;;  %v5028_v52 = vmul.f32 %v6655_v11, %v9984_v57  ;;  %v5093_v29 = vadd.f32 %v5029_v4, %v4301_v22  ;;  %6668 = vrsqrt.f32 %v4771_v0  ;;  %v4766_v12 = vadd.f32 %v9270_v20, %v4765_v63  ;;  %v9986_v11 = vld [vmem:[#allocation27_spill] sm:$0xff] }
 0x3c8   :  { %v6657_v27 = vpop.eup %6656  ;;  %v6009_v59 = vpop.f32.mrf.mxu0  ;;  %v4322_v4 = vadd.f32 %v9255_v43, %v9287_v19 }
 0x3c9   :  { %v5092_v56 = vadd.f32 %v5028_v52, %v4298_v41  ;;  %v5031_v38 = vmul.f32 %v6657_v27, %v8958_v3  ;;  %5157 = vst [vmem:[%s9788_s8 + $0xa8] sm:$0xff] %v5093_v29  ;;  %6670 = vrsqrt.f32 %v4766_v12  ;;  %v4781_v28 = vadd.f32 %v6009_v59, %v9270_v20  ;;  %v9512_v29 = vpop.f32.mrf.mxu1 }
 0x3ca   :  { %v6659_v15 = vpop.eup %6658  ;;  %v4775_v39 = vpop.f32.mrf.mxu0 }
 0x3cb   :  { %v5030_v23 = vmul.f32 %v6659_v15, %v8949_v16  ;;  %5156 = vst [vmem:[%s9788_s8 + $0xa0] sm:$0xff] %v5092_v56  ;;  %v5095_v3 = vadd.f32 %v5031_v38, %v4309_v10  ;;  %6672 = vrsqrt.f32 %v4781_v28  ;;  %v4776_v34 = vadd.f32 %v9270_v20, %v4775_v39  ;;  %v9987_v56 = vld [vmem:[#allocation28_spill] sm:$0xff] }
 0x3cc   :  { %v6661_v37 = vpop.eup %6660  ;;  %v6012_v21 = vpop.f32.mrf.mxu0  ;;  %v4330_v10 = vadd.f32 %v9287_v19, %v9265_v61  ;;  %v9988_v61 = vld [vmem:[#allocation30_spill] sm:$0xff] }
 0x3cd   :  { %v5094_v49 = vadd.f32 %v5030_v23, %v4306_v32  ;;  %5159 = vst [vmem:[%s9788_s8 + $0xb8] sm:$0xff] %v5095_v3  ;;  %6674 = vrsqrt.f32 %v4776_v34  ;;  %v5033_v16 = vmul.f32 %v6661_v37, %v8981_v30  ;;  %v4791_v44 = vadd.f32 %v6012_v21, %v9270_v20 }
 0x3ce   :  { %v6663_v13 = vpop.eup %6662  ;;  %v4785_v24 = vpop.f32.mrf.mxu0  ;;  %v4325_v30 = vadd.f32 %v9259_v48, %v9287_v19  ;;  %v4333_v48 = vadd.f32 %v9287_v19, %v9276_v40  ;;  %v4338_v21 = vadd.f32 %v9263_v53, %v9287_v19 }
 0x3cf   :  { %5158 = vst [vmem:[%s9788_s8 + $0xb0] sm:$0xff] %v5094_v49  ;;  %v5032_v7 = vmul.f32 %v6663_v13, %v9985_v8  ;;  %v5097_v22 = vadd.f32 %v5033_v16, %v4317_v60  ;;  %6676 = vrsqrt.f32 %v4791_v44  ;;  %v4786_v26 = vadd.f32 %v9270_v20, %v4785_v24  ;;  %v9528_v60 = vpop.f32.mrf.mxu1  ;;  %v9989_v16 = vld [vmem:[#allocation29_spill] sm:$0xff] }
 0x3d0   :  { %v6665_v5 = vpop.eup %6664  ;;  %v6015_v54 = vpop.f32.mrf.mxu0 }
 0x3d1   :  { %v5096_v45 = vadd.f32 %v5032_v7, %v4314_v1  ;;  %v5035_v46 = vmul.f32 %v6665_v5, %v8987_v36  ;;  %5161 = vst [vmem:[%s9788_s8 + $0xc8] sm:$0xff] %v5097_v22  ;;  %6678 = vrsqrt.f32 %v4786_v26  ;;  %v4801_v2 = vadd.f32 %v6015_v54, %v9270_v20  ;;  %v9544_v7 = vpop.f32.mrf.mxu1 }
 0x3d2   :  { %v6667_v9 = vpop.eup %6666  ;;  %v4795_v0 = vpop.f32.mrf.mxu0 }
 0x3d3   :  { %v5034_v41 = vmul.f32 %v6667_v9, %v9986_v11  ;;  %5160 = vst [vmem:[%s9788_s8 + $0xc0] sm:$0xff] %v5096_v45  ;;  %v5099_v36 = vadd.f32 %v5035_v46, %v4325_v30  ;;  %6680 = vrsqrt.f32 %v4801_v2  ;;  %v4796_v63 = vadd.f32 %v9270_v20, %v4795_v0  ;;  %v9991_v30 = vld [vmem:[#allocation51_spill] sm:$0xff] }
 0x3d4   :  { %v6669_v57 = vpop.eup %6668  ;;  %v6018_v52 = vpop.f32.mrf.mxu0  ;;  %v4346_v54 = vadd.f32 %v9287_v19, %v9991_v30  ;;  %v9992_v46 = vld [vmem:[#allocation31_spill] sm:$0xff] }
 0x3d5   :  { %v5098_v12 = vadd.f32 %v5034_v41, %v4322_v4  ;;  %5163 = vst [vmem:[%s9788_s8 + $0xd8] sm:$0xff] %v5099_v36  ;;  %6682 = vrsqrt.f32 %v4796_v63  ;;  %v5037_v40 = vmul.f32 %v6669_v57, %v9006_v58  ;;  %v4811_v43 = vadd.f32 %v6018_v52, %v9270_v20  ;;  %v9560_v36 = vpop.f32.mrf.mxu1  ;;  %v9994_v57 = vld [vmem:[#allocation8_spill] sm:$0xff] }
 0x3d6   :  { %v6671_v27 = vpop.eup %6670  ;;  %v4805_v59 = vpop.f32.mrf.mxu0  ;;  %v4341_v58 = vadd.f32 %v9272_v55, %v9287_v19  ;;  %v4349_v55 = vadd.f32 %v9287_v19, %v9304_v14  ;;  %v9990_v14 = vld [vmem:[#allocation33_spill] sm:$0xff] }
 0x3d7   :  { %5162 = vst [vmem:[%s9788_s8 + $0xd0] sm:$0xff] %v5098_v12  ;;  %v5036_v38 = vmul.f32 %v6671_v27, %v9987_v56  ;;  %v5101_v28 = vadd.f32 %v5037_v40, %v4333_v48  ;;  %6684 = vrsqrt.f32 %v4811_v43  ;;  %v4806_v15 = vadd.f32 %v9270_v20, %v4805_v59  ;;  %v9993_v48 = vld [vmem:[#allocation52_spill] sm:$0xff]  ;;  %v9995_v43 = vld [vmem:[#allocation50_spill] sm:$0xff] }
 0x3d8   :  { %v6673_v32 = vpop.eup %6672  ;;  %v6021_v39 = vpop.f32.mrf.mxu0  ;;  %v4357_v11 = vadd.f32 %v9993_v48, %v9287_v19  ;;  %v4354_v27 = vadd.f32 %v9995_v43, %v9287_v19  ;;  %v4365_v59 = vadd.f32 %v9287_v19, %v9368_v33  ;;  %v9996_v56 = vld [vmem:[#allocation32_spill] sm:$0xff] }
 0x3d9   :  { %v5100_v23 = vadd.f32 %v5036_v38, %v4330_v10  ;;  %v5039_v3 = vmul.f32 %v6673_v32, %v9988_v61  ;;  %5165 = vst [vmem:[%s9788_s8 + $0xe8] sm:$0xff] %v5101_v28  ;;  %6686 = vrsqrt.f32 %v4806_v15  ;;  %v4821_v34 = vadd.f32 %v6021_v39, %v9270_v20  ;;  %v9576_v39 = vpop.f32.mrf.mxu1  ;;  %v9997_v33 = vld [vmem:[#allocation36_spill] sm:$0xff] }
 0x3da   :  { %v6675_v37 = vpop.eup %6674  ;;  %v4815_v49 = vpop.f32.mrf.mxu0 }
 0x3db   :  { %v5038_v44 = vmul.f32 %v6675_v37, %v9989_v16  ;;  %5164 = vst [vmem:[%s9788_s8 + $0xe0] sm:$0xff] %v5100_v23  ;;  %v5103_v13 = vadd.f32 %v5039_v3, %v4341_v58  ;;  %6688 = vrsqrt.f32 %v4821_v34  ;;  %v4816_v1 = vadd.f32 %v9270_v20, %v4815_v49  ;;  %v9998_v49 = vld [vmem:[#allocation34_spill] sm:$0xff] }
 0x3dc   :  { %v6677_v24 = vpop.eup %6676  ;;  %v6024_v8 = vpop.f32.mrf.mxu0  ;;  %v4362_v37 = vadd.f32 %v9287_v19, %v9336_v50  ;;  %v9999_v50 = vld [vmem:[#allocation37_spill] sm:$0xff] }
 0x3dd   :  { %v5102_v22 = vadd.f32 %v5038_v44, %v4338_v21  ;;  %5167 = vst [vmem:[%s9788_s8 + $0xf8] sm:$0xff] %v5103_v13  ;;  %6690 = vrsqrt.f32 %v4816_v1  ;;  %v5041_v53 = vmul.f32 %v6677_v24, %v9990_v14  ;;  %v4831_v26 = vadd.f32 %v6024_v8, %v9270_v20  ;;  %v9592_v8 = vpop.f32.mrf.mxu1 }
 0x3de   :  { %v6679_v5 = vpop.eup %6678  ;;  %v4825_v45 = vpop.f32.mrf.mxu0  ;;  %v4373_v1 = vadd.f32 %v9352_v47, %v9287_v19  ;;  %v4381_v47 = vadd.f32 %v9287_v19, %v9432_v51 }
 0x3df   :  { %5166 = vst [vmem:[%s9788_s8 + $0xf0] sm:$0xff] %v5102_v22  ;;  %v5040_v2 = vmul.f32 %v6679_v5, %v9992_v46  ;;  %v5105_v9 = vadd.f32 %v5041_v53, %v4349_v55  ;;  %6692 = vrsqrt.f32 %v4831_v26  ;;  %v4826_v4 = vadd.f32 %v9270_v20, %v4825_v45 }
 0x3e0   :  { %v6681_v0 = vpop.eup %6680  ;;  %v6027_v41 = vpop.f32.mrf.mxu0  ;;  %v4370_v5 = vadd.f32 %v9320_v6, %v9287_v19  ;;  %v10001_v6 = vld [vmem:[#allocation39_spill] sm:$0xff] }
 0x3e1   :  { %v5104_v63 = vadd.f32 %v5040_v2, %v4346_v54  ;;  %v5043_v52 = vmul.f32 %v6681_v0, %v9994_v57  ;;  %5169 = vst [vmem:[%s9788_s8 + $0x108] sm:$0xff] %v5105_v9  ;;  %6694 = vrsqrt.f32 %v4826_v4  ;;  %v4841_v12 = vadd.f32 %v6027_v41, %v9270_v20  ;;  %v10000_v54 = vld [vmem:[#allocation35_spill] sm:$0xff]  ;;  %v9608_v0 = vpop.f32.mrf.mxu1 }
 0x3e2   :  { %v6683_v40 = vpop.eup %6682  ;;  %v4835_v10 = vpop.f32.mrf.mxu0 }
 0x3e3   :  { %v5042_v38 = vmul.f32 %v6683_v40, %v9996_v56  ;;  %5168 = vst [vmem:[%s9788_s8 + $0x100] sm:$0xff] %v5104_v63  ;;  %v5107_v28 = vadd.f32 %v5043_v52, %v4357_v11  ;;  %6696 = vrsqrt.f32 %v4841_v12  ;;  %v4836_v15 = vadd.f32 %v9270_v20, %v4835_v10  ;;  %v10002_v52 = vld [vmem:[#allocation38_spill] sm:$0xff]  ;;  %v9624_v56 = vpop.f32.mrf.mxu1 }
 0x3e4   :  { %v6685_v32 = vpop.eup %6684  ;;  %v6030_v58 = vpop.f32.mrf.mxu0  ;;  %v4378_v63 = vadd.f32 %v9287_v19, %v9400_v31  ;;  %v4389_v10 = vadd.f32 %v9416_v42, %v9287_v19  ;;  %v10003_v31 = vld [vmem:[#allocation40_spill] sm:$0xff]  ;;  %v4397_v42 = vadd.f32 %v9287_v19, %v9496_v17 }
 0x3e5   :  { %v5106_v23 = vadd.f32 %v5042_v38, %v4354_v27  ;;  %5171 = vst [vmem:[%s9788_s8 + $0x118] sm:$0xff] %v5107_v28  ;;  %6698 = vrsqrt.f32 %v4836_v15  ;;  %v5045_v61 = vmul.f32 %v6685_v32, %v9997_v33  ;;  %v4851_v3 = vadd.f32 %v6030_v58, %v9270_v20  ;;  %v10004_v33 = vld [vmem:[#allocation16_spill] sm:$0xff] }
 0x3e6   :  { %v6687_v34 = vpop.eup %6686  ;;  %v4845_v21 = vpop.f32.mrf.mxu0  ;;  %v4386_v58 = vadd.f32 %v9384_v35, %v9287_v19  ;;  %v10005_v35 = vld [vmem:[#allocation43_spill] sm:$0xff] }
 0x3e7   :  { %5170 = vst [vmem:[%s9788_s8 + $0x110] sm:$0xff] %v5106_v23  ;;  %v5044_v55 = vmul.f32 %v6687_v34, %v9998_v49  ;;  %v5109_v16 = vadd.f32 %v5045_v61, %v4365_v59  ;;  %6700 = vrsqrt.f32 %v4851_v3  ;;  %v4846_v44 = vadd.f32 %v9270_v20, %v4845_v21  ;;  %v9640_v49 = vpop.f32.mrf.mxu1 }
 0x3e8   :  { %v6689_v13 = vpop.eup %6688  ;;  %v6033_v24 = vpop.f32.mrf.mxu0 }
 0x3e9   :  { %v5108_v22 = vadd.f32 %v5044_v55, %v4362_v37  ;;  %v5047_v14 = vmul.f32 %v6689_v13, %v9999_v50  ;;  %5173 = vst [vmem:[%s9788_s8 + $0x128] sm:$0xff] %v5109_v16  ;;  %6702 = vrsqrt.f32 %v4846_v44  ;;  %v4861_v53 = vadd.f32 %v6033_v24, %v9270_v20  ;;  %v10006_v24 = vld [vmem:[#allocation41_spill] sm:$0xff] }
 0x3ea   :  { %v6691_v26 = vpop.eup %6690  ;;  %v4855_v30 = vpop.f32.mrf.mxu0  ;;  %v4394_v13 = vadd.f32 %v9287_v19, %v9464_v25  ;;  %v10007_v25 = vld [vmem:[#allocation44_spill] sm:$0xff] }
 0x3eb   :  { %v5046_v45 = vmul.f32 %v6691_v26, %v10000_v54  ;;  %5172 = vst [vmem:[%s9788_s8 + $0x120] sm:$0xff] %v5108_v22  ;;  %v5111_v46 = vadd.f32 %v5047_v14, %v4373_v1  ;;  %6704 = vrsqrt.f32 %v4861_v53  ;;  %v4856_v2 = vadd.f32 %v9270_v20, %v4855_v30  ;;  %v9656_v30 = vpop.f32.mrf.mxu1 }
 0x3ec   :  { %v6693_v9 = vpop.eup %6692  ;;  %v6036_v4 = vpop.f32.mrf.mxu0  ;;  %v4405_v26 = vadd.f32 %v9480_v62, %v9287_v19  ;;  %v4413_v62 = vadd.f32 %v9287_v19, %v9560_v36 }
 0x3ed   :  { %v5110_v48 = vadd.f32 %v5046_v45, %v4370_v5  ;;  %5175 = vst [vmem:[%s9788_s8 + $0x138] sm:$0xff] %v5111_v46  ;;  %6706 = vrsqrt.f32 %v4856_v2  ;;  %v5049_v51 = vmul.f32 %v6693_v9, %v10001_v6  ;;  %v4871_v11 = vadd.f32 %v6036_v4, %v9270_v20  ;;  %v10008_v4 = vld [vmem:[#allocation42_spill] sm:$0xff] }
 0x3ee   :  { %v6695_v41 = vpop.eup %6694  ;;  %v4865_v57 = vpop.f32.mrf.mxu0  ;;  %v4402_v2 = vadd.f32 %v9448_v18, %v9287_v19  ;;  %v10009_v18 = vld [vmem:[#allocation47_spill] sm:$0xff] }
 0x3ef   :  { %5174 = vst [vmem:[%s9788_s8 + $0x130] sm:$0xff] %v5110_v48  ;;  %v5048_v12 = vmul.f32 %v6695_v41, %v10002_v52  ;;  %v5113_v40 = vadd.f32 %v5049_v51, %v4381_v47  ;;  %6708 = vrsqrt.f32 %v4871_v11  ;;  %v4866_v43 = vadd.f32 %v9270_v20, %v4865_v57 }
 0x3f0   :  { %v6697_v27 = vpop.eup %6696  ;;  %v6039_v59 = vpop.f32.mrf.mxu0 }
 0x3f1   :  { %v5112_v38 = vadd.f32 %v5048_v12, %v4378_v63  ;;  %v5051_v28 = vmul.f32 %v6697_v27, %v10003_v31  ;;  %5177 = vst [vmem:[%s9788_s8 + $0x148] sm:$0xff] %v5113_v40  ;;  %6710 = vrsqrt.f32 %v4866_v43  ;;  %v4881_v15 = vadd.f32 %v6039_v59, %v9270_v20  ;;  %v9672_v63 = vpop.f32.mrf.mxu1  ;;  %v10010_v27 = vld [vmem:[#allocation45_spill] sm:$0xff] }
 0x3f2   :  { %v6699_v32 = vpop.eup %6698  ;;  %v4875_v23 = vpop.f32.mrf.mxu0  ;;  %v4410_v40 = vadd.f32 %v9287_v19, %v9528_v60 }
 0x3f3   :  { %v5050_v61 = vmul.f32 %v6699_v32, %v10004_v33  ;;  %5176 = vst [vmem:[%s9788_s8 + $0x140] sm:$0xff] %v5112_v38  ;;  %v5115_v3 = vadd.f32 %v5051_v28, %v4389_v10  ;;  %6712 = vrsqrt.f32 %v4881_v15  ;;  %v4876_v34 = vadd.f32 %v9270_v20, %v4875_v23  ;;  %v4444_v32 = vpop.f32.mrf.mxu1  ;;  %v10011_v23 = vld [vmem:[#allocation17_spill] sm:$0xff] }
 0x3f4   :  { %v6701_v37 = vpop.eup %6700  ;;  %v6042_v21 = vpop.f32.mrf.mxu0  ;;  %v4421_v28 = vadd.f32 %v9544_v7, %v9287_v19  ;;  %v4429_v7 = vadd.f32 %v9287_v19, %v9624_v56 }
 0x3f5   :  { %v5114_v55 = vadd.f32 %v5050_v61, %v4386_v58  ;;  %5179 = vst [vmem:[%s9788_s8 + $0x158] sm:$0xff] %v5115_v3  ;;  %6714 = vrsqrt.f32 %v4876_v34  ;;  %v5053_v17 = vmul.f32 %v6701_v37, %v10005_v35  ;;  %v4891_v16 = vadd.f32 %v6042_v21, %v9270_v20  ;;  %v10012_v34 = vld [vmem:[#allocation46_spill] sm:$0xff] }
 0x3f6   :  { %v6703_v44 = vpop.eup %6702  ;;  %v4885_v1 = vpop.f32.mrf.mxu0  ;;  %v4418_v61 = vadd.f32 %v9512_v29, %v9287_v19  ;;  %v10013_v29 = vld [vmem:[#allocation19_spill] sm:$0xff] }
 0x3f7   :  { %5178 = vst [vmem:[%s9788_s8 + $0x150] sm:$0xff] %v5114_v55  ;;  %v5052_v22 = vmul.f32 %v6703_v44, %v10006_v24  ;;  %v5117_v50 = vadd.f32 %v5053_v17, %v4397_v42  ;;  %6716 = vrsqrt.f32 %v4891_v16  ;;  %v4886_v14 = vadd.f32 %v9270_v20, %v4885_v1  ;;  %v9702_v16 = vpop.f32.mrf.mxu1 }
 0x3f8   :  { %v6705_v53 = vpop.eup %6704  ;;  %v6045_v5 = vpop.f32.mrf.mxu0  ;;  %v4426_v24 = vadd.f32 %v9287_v19, %v9592_v8 }
 0x3f9   :  { %v5116_v47 = vadd.f32 %v5052_v22, %v4394_v13  ;;  %v5055_v54 = vmul.f32 %v6705_v53, %v10007_v25  ;;  %5181 = vst [vmem:[%s9788_s8 + $0x168] sm:$0xff] %v5117_v50  ;;  %6718 = vrsqrt.f32 %v4886_v14  ;;  %v4901_v45 = vadd.f32 %v6045_v5, %v9270_v20  ;;  %v10014_v50 = vld [vmem:[#allocation48_spill] sm:$0xff] }
 0x3fa   :  { %v6707_v46 = vpop.eup %6706  ;;  %v4895_v9 = vpop.f32.mrf.mxu0 }
 0x3fb   :  { %v5054_v48 = vmul.f32 %v6707_v46, %v10008_v4  ;;  %5180 = vst [vmem:[%s9788_s8 + $0x160] sm:$0xff] %v5116_v47  ;;  %v5119_v6 = vadd.f32 %v5055_v54, %v4405_v26  ;;  %6720 = vrsqrt.f32 %v4901_v45  ;;  %v4896_v51 = vadd.f32 %v9270_v20, %v4895_v9  ;;  %v4457_v54 = vpop.f32.mrf.mxu1  ;;  %v10015_v46 = vld [vmem:[#allocation21_spill] sm:$0xff] }
 0x3fc   :  { %v6709_v11 = vpop.eup %6708  ;;  %v6048_v41 = vpop.f32.mrf.mxu0  ;;  %v4437_v47 = vadd.f32 %v9608_v0, %v9287_v19  ;;  %v10016_v0 = vld [vmem:[#allocation20_spill] sm:$0xff] }
 0x3fd   :  { %v5118_v57 = vadd.f32 %v5054_v48, %v4402_v2  ;;  %5183 = vst [vmem:[%s9788_s8 + $0x178] sm:$0xff] %v5119_v6  ;;  %6722 = vrsqrt.f32 %v4896_v51  ;;  %v5057_v36 = vmul.f32 %v6709_v11, %v10009_v18  ;;  %v4911_v52 = vadd.f32 %v6048_v41, %v9270_v20 }
 0x3fe   :  { %v6711_v12 = vpop.eup %6710  ;;  %v4905_v43 = vpop.f32.mrf.mxu0  ;;  %v4445_v48 = vadd.f32 %v9287_v19, %v4444_v32  ;;  %v4450_v32 = vadd.f32 %v9640_v49, %v9287_v19  ;;  %v6741_v49 = vld [vmem:[%s9787_s5] ss:$0 sm:$0xff] }
 0x3ff   :  { %5182 = vst [vmem:[%s9788_s8 + $0x170] sm:$0xff] %v5118_v57  ;;  %v5056_v10 = vmul.f32 %v6711_v12, %v10010_v27  ;;  %v5121_v59 = vadd.f32 %v5057_v36, %v4413_v62  ;;  %6724 = vrsqrt.f32 %v4911_v52  ;;  %v4906_v38 = vadd.f32 %v9270_v20, %v4905_v43  ;;  %v5929_v57 = vpop.f32.mrf.mxu1 }
 0x400   :  { %v6713_v31 = vpop.eup %6712  ;;  %v6051_v15 = vpop.f32.mrf.mxu0  ;;  %v4434_v62 = vadd.f32 %v9576_v39, %v9287_v19  ;;  %v10017_v39 = vld [vmem:[#allocation9_spill] sm:$0xff]  ;;  %v4442_v12 = vadd.f32 %v9287_v19, %v9656_v30  ;;  %v10020_v30 = vld [vmem:[#allocation2_spill] sm:$0xff] }
 0x401   :  { %v5120_v58 = vadd.f32 %v5056_v10, %v4410_v40  ;;  %v5059_v60 = vmul.f32 %v6713_v31, %v10011_v23  ;;  %5185 = vst [vmem:[%s9788_s8 + $0x188] sm:$0xff] %v5121_v59  ;;  %6726 = vrsqrt.f32 %v4906_v38  ;;  %v4921_v42 = vadd.f32 %v6051_v15, %v9270_v20  ;;  %v10018_v40 = vld [vmem:[#allocation18_spill] sm:$0xff]  ;;  %v4460_v10 = vpop.f32.mrf.mxu1 }
 0x402   :  { %v6715_v33 = vpop.eup %6714  ;;  %v4915_v3 = vpop.f32.mrf.mxu0  ;;  %v4453_v38 = vadd.f32 %v9672_v63, %v9287_v19  ;;  %v10019_v31 = vld [vmem:[#allocation10_spill] sm:$0xff] }
 0x403   :  { %v5058_v37 = vmul.f32 %v6715_v33, %v10012_v34  ;;  %5184 = vst [vmem:[%s9788_s8 + $0x180] sm:$0xff] %v5120_v58  ;;  %v5123_v21 = vadd.f32 %v5059_v60, %v4421_v28  ;;  %6728 = vrsqrt.f32 %v4921_v42  ;;  %v4916_v55 = vadd.f32 %v9270_v20, %v4915_v3  ;;  %v10021_v33 = vld [vmem:[#allocation4_spill] sm:$0xff]  ;;  %v10022_v34 = vld [vmem:[#allocation11_spill] sm:$0xff] }
 0x404   :  { %v6717_v35 = vpop.eup %6716  ;;  %v6054_v17 = vpop.f32.mrf.mxu0  ;;  %v4461_v60 = vadd.f32 %v9287_v19, %v4460_v10 }
 0x405   :  { %v5122_v44 = vadd.f32 %v5058_v37, %v4418_v61  ;;  %5187 = vst [vmem:[%s9788_s8 + $0x198] sm:$0xff] %v5123_v21  ;;  %6730 = vrsqrt.f32 %v4916_v55  ;;  %v5061_v56 = vmul.f32 %v6717_v35, %v10013_v29  ;;  %v4931_v13 = vadd.f32 %v6054_v17, %v9270_v20  ;;  %v10023_v17 = vld [vmem:[#allocation49_spill] sm:$0xff] }
 0x406   :  { %v6719_v1 = vpop.eup %6718  ;;  %v4925_v22 = vpop.f32.mrf.mxu0  ;;  %v4469_v35 = vadd.f32 %v6741_v49, %v5929_v57 }
 0x407   :  { %5186 = vst [vmem:[%s9788_s8 + $0x190] sm:$0xff] %v5122_v44  ;;  %v5060_v14 = vmul.f32 %v6719_v1, %v10014_v50  ;;  %v5125_v53 = vadd.f32 %v5061_v56, %v4429_v7  ;;  %6732 = vrsqrt.f32 %v4931_v13  ;;  %v4926_v26 = vadd.f32 %v9270_v20, %v4925_v22  ;;  %v10024_v13 = vld [vmem:[#allocation3_spill] sm:$0xff] }
 0x408   :  { %v6721_v5 = vpop.eup %6720  ;;  %v6057_v25 = vpop.f32.mrf.mxu0  ;;  %v4458_v7 = vadd.f32 %v6741_v49, %v4457_v54  ;;  %v4466_v56 = vadd.f32 %v6741_v49, %v9702_v16 }
 0x409   :  { %v5124_v45 = vadd.f32 %v5060_v14, %v4426_v24  ;;  %v5063_v8 = vmul.f32 %v6721_v5, %v10015_v46  ;;  %5189 = vst [vmem:[%s9788_s8 + $0x1a8] sm:$0xff] %v5125_v53  ;;  %6734 = vrsqrt.f32 %v4926_v26  ;;  %v4941_v2 = vadd.f32 %v6057_v25, %v9270_v20 }
 0x40a   :  { %v6723_v9 = vpop.eup %6722  ;;  %v4935_v4 = vpop.f32.mrf.mxu0 }
 0x40b   :  { %v5062_v6 = vmul.f32 %v6723_v9, %v10016_v0  ;;  %5188 = vst [vmem:[%s9788_s8 + $0x1a0] sm:$0xff] %v5124_v45  ;;  %v5127_v51 = vadd.f32 %v5063_v8, %v4437_v47  ;;  %6736 = vrsqrt.f32 %v4941_v2  ;;  %v4936_v11 = vadd.f32 %v9270_v20, %v4935_v4 }
 0x40c   :  { %v6725_v41 = vpop.eup %6724 }
 0x40d   :  { %v5126_v18 = vadd.f32 %v5062_v6, %v4434_v62  ;;  %5191 = vst [vmem:[%s9788_s8 + $0x1b8] sm:$0xff] %v5127_v51  ;;  %6738 = vrsqrt.f32 %v4936_v11  ;;  %v5065_v36 = vmul.f32 %v6725_v41, %v10017_v39 }
 0x40e   :  { %v6727_v52 = vpop.eup %6726 }
 0x40f   :  { %5190 = vst [vmem:[%s9788_s8 + $0x1b0] sm:$0xff] %v5126_v18  ;;  %v5064_v20 = vmul.f32 %v6727_v52, %v10018_v40  ;;  %v5129_v43 = vadd.f32 %v5065_v36, %v4445_v48 }
 0x410   :  { %v6729_v27 = vpop.eup %6728 }
 0x411   :  { %v5128_v59 = vadd.f32 %v5064_v20, %v4442_v12  ;;  %v5067_v28 = vmul.f32 %v6729_v27, %v10019_v31  ;;  %5193 = vst [vmem:[%s9788_s8 + $0x1c8] sm:$0xff] %v5129_v43 }
 0x412   :  { %v6731_v15 = vpop.eup %6730 }
 0x413   :  { %v5066_v58 = vmul.f32 %v6731_v15, %v10020_v30  ;;  %5192 = vst [vmem:[%s9788_s8 + $0x1c0] sm:$0xff] %v5128_v59  ;;  %v5131_v23 = vadd.f32 %v5067_v28, %v4453_v38 }
 0x414   :  { %v6733_v63 = vpop.eup %6732 }
 0x415   :  { %v5130_v42 = vadd.f32 %v5066_v58, %v4450_v32  ;;  %5195 = vst [vmem:[%s9788_s8 + $0x1d8] sm:$0xff] %v5131_v23  ;;  %v5069_v61 = vmul.f32 %v6733_v63, %v10021_v33 }
 0x416   :  { %v6735_v3 = vpop.eup %6734 }
 0x417   :  { %5194 = vst [vmem:[%s9788_s8 + $0x1d0] sm:$0xff] %v5130_v42  ;;  %v5068_v19 = vmul.f32 %v6735_v3, %v10022_v34  ;;  %v5133_v37 = vadd.f32 %v5069_v61, %v4461_v60 }
 0x418   :  { %v6737_v21 = vpop.eup %6736 }
 0x419   :  { %v5132_v55 = vadd.f32 %v5068_v19, %v4458_v7  ;;  %v5071_v44 = vmul.f32 %v6737_v21, %v10023_v17  ;;  %5197 = vst [vmem:[%s9788_s8 + $0x1e8] sm:$0xff] %v5133_v37 }
 0x41a   :  { %v6739_v29 = vpop.eup %6738 }
 0x41b   :  { %v5070_v1 = vmul.f32 %v6739_v29, %v10024_v13  ;;  %5196 = vst [vmem:[%s9788_s8 + $0x1e0] sm:$0xff] %v5132_v55  ;;  %v5135_v24 = vadd.f32 %v5071_v44, %v4469_v35 }
 0x41d   :  { %v5134_v22 = vadd.f32 %v5070_v1, %v4466_v56  ;;  %5199 = vst [vmem:[%s9788_s8 + $0x1f8] sm:$0xff] %v5135_v24 }
 0x41f   :  { %5198 = vst [vmem:[%s9788_s8 + $0x1f0] sm:$0xff] %v5134_v22 }

// kernel: reference_encoder_pallas.10
= control target key start
LH: loop header
LB: loop body
LE: loop exit
PB: predicated region body
PF: predicated region fallthrough
CT: control target
= control target key end

     0   :  { %s3887_s2 = inlined_call_operand.vmem [shape: bf16[1152,128], index: 2, kind: input, shape index: {}]   ;;  %s3888_s0 = inlined_call_operand.vmem [shape: bf16[128,1152], index: 0, kind: input, shape index: {}]   ;;  %s3889_s4 = inlined_call_operand.vmem [shape: bf16[128,128], index: 4, kind: input, shape index: {}]   ;;  %s3890_s6 = inlined_call_operand.vmem [shape: f32[128,128], index: 6, kind: input, shape index: {}]   ;;  %s3891_s1 = inlined_call_operand.vmem [shape: bf16[128,128], index: 1, kind: input, shape index: {}]   ;;  %s3892_s3 = inlined_call_operand.vmem [shape: f32[1,128], index: 3, kind: input, shape index: {}]   ;;  %s3893_s7 = inlined_call_operand.vmem [shape: f32[1,128], index: 7, kind: input, shape index: {}]   ;;  %s3894_s5 = inlined_call_operand.vmem [shape: f32[1,128], index: 5, kind: input, shape index: {}]   ;;  %s3895_s8 = inlined_call_operand.vmem [shape: f32[128,128], index: 8, kind: output, shape index: {}]  }
   0x1   :  { %v2665_v0 = vld [vmem:[%s3887_s2 + $0x78] sm:$0xff]   ;;  %v2669_v4 = vld [vmem:[%s3887_s2 + $0x70] sm:$0xff]   ;;  %v2673_v8 = vld [vmem:[%s3887_s2 + $0x68] sm:$0xff]  }
   0x2   :  { %v2666_v1 = vld [vmem:[%s3887_s2 + $0x38] sm:$0xff]   ;;  %2193 = vmatprep.subr.bf16.mxu0 %v2665_v0  ;;  %v2670_v5 = vld [vmem:[%s3887_s2 + $0x30] sm:$0xff]   ;;  %v2674_v9 = vld [vmem:[%s3887_s2 + $0x28] sm:$0xff]  }
   0x3   :  { %v2667_v2 = vld [vmem:[%s3887_s2 + $0xf8] sm:$0xff]   ;;  %2194 = vmatpush3.bf16.msra.mxu0 %v2666_v1  ;;  %v2671_v6 = vld [vmem:[%s3887_s2 + $0xf0] sm:$0xff]   ;;  %v2675_v10 = vld [vmem:[%s3887_s2 + $0xe8] sm:$0xff]  }
   0x4   :  { %v2668_v3 = vld [vmem:[%s3887_s2 + $0xb8] sm:$0xff]   ;;  %2257 = vmatprep.subr.bf16.mxu1 %v2667_v2  ;;  %2195 = vmatprep.subr.bf16.mxu0 %v2669_v4  ;;  %v2672_v7 = vld [vmem:[%s3887_s2 + $0xb0] sm:$0xff]   ;;  %v2676_v11 = vld [vmem:[%s3887_s2 + $0xa8] sm:$0xff]  }
   0x5   :  { %2258 = vmatpush3.bf16.msra.mxu1 %v2668_v3  ;;  %v2677_v12 = vld [vmem:[%s3887_s2 + $0x60] sm:$0xff]   ;;  %v2681_v16 = vld [vmem:[%s3887_s2 + $0x58] sm:$0xff]   ;;  %v2685_v20 = vld [vmem:[%s3887_s2 + $0x50] sm:$0xff]  }
   0x6   :  { %2259 = vmatprep.subr.bf16.mxu1 %v2671_v6  ;;  %v2678_v13 = vld [vmem:[%s3887_s2 + $0x20] sm:$0xff]   ;;  %v2682_v17 = vld [vmem:[%s3887_s2 + $0x18] sm:$0xff]   ;;  %v2686_v21 = vld [vmem:[%s3887_s2 + $0x10] sm:$0xff]  }
   0x7   :  { %2196 = vmatpush3.bf16.msra.mxu0 %v2670_v5  ;;  %v2679_v14 = vld [vmem:[%s3887_s2 + $0xe0] sm:$0xff]   ;;  %v2683_v18 = vld [vmem:[%s3887_s2 + $0xd8] sm:$0xff]   ;;  %v2687_v22 = vld [vmem:[%s3887_s2 + $0xd0] sm:$0xff]  }
   0x8   :  { %2197 = vmatprep.subr.bf16.mxu0 %v2673_v8  ;;  %v2680_v15 = vld [vmem:[%s3887_s2 + $0xa0] sm:$0xff]   ;;  %v2684_v19 = vld [vmem:[%s3887_s2 + $0x98] sm:$0xff]   ;;  %v2688_v23 = vld [vmem:[%s3887_s2 + $0x90] sm:$0xff]  }
   0x9   :  { %2260 = vmatpush3.bf16.msra.mxu1 %v2672_v7  ;;  %v2689_v24 = vld [vmem:[%s3887_s2 + $0x48] sm:$0xff]   ;;  %v2693_v28 = vld [vmem:[%s3887_s2 + $0x40] sm:$0xff]   ;;  %v2700_v34 = vld [vmem:[%s3887_s2 + $0x178] sm:$0xff]  }
   0xa   :  { %2261 = vmatprep.subr.bf16.mxu1 %v2675_v10  ;;  %v2690_v25 = vld [vmem:[%s3887_s2 + $0x8] sm:$0xff]   ;;  %v2694_v29 = vld [vmem:[%s3887_s2] sm:$0xff]   ;;  %v2704_v37 = vld [vmem:[%s3887_s2 + $0x138] sm:$0xff]  }
   0xb   :  { %2198 = vmatpush3.bf16.msra.mxu0 %v2674_v9  ;;  %v2691_v26 = vld [vmem:[%s3887_s2 + $0xc8] sm:$0xff]   ;;  %v2695_v30 = vld [vmem:[%s3887_s2 + $0xc0] sm:$0xff]   ;;  %v2708_v40 = vld [vmem:[%s3887_s2 + $0x170] sm:$0xff]  }
   0xc   :  { %2199 = vmatprep.subr.bf16.mxu0 %v2677_v12  ;;  %v2692_v27 = vld [vmem:[%s3887_s2 + $0x88] sm:$0xff]   ;;  %v2696_v31 = vld [vmem:[%s3888_s0] ss:$36 sps:$4 sm:$0xff]   ;;  %v2709_v41 = vld [vmem:[%s3888_s0 + $0x54] ss:$36 sps:$4 sm:$0xff]  }
   0xd   :  { %2262 = vmatpush3.bf16.msra.mxu1 %v2676_v11  ;;  %v2698_v32 = vld [vmem:[%s3888_s0 + $0x4] ss:$36 sps:$4 sm:$0xff]   ;;  %v2703_v36 = vld [vmem:[%s3888_s0 + $0xc] ss:$36 sps:$4 sm:$0xff]   ;;  %v2713_v44 = vld [vmem:[%s3888_s0 + $0x94] ss:$36 sps:$4 sm:$0xff]  }
   0xe   :  { %2263 = vmatprep.subr.bf16.mxu1 %v2679_v14  ;;  %v2699_v33 = vld [vmem:[%s3887_s2 + $0x80] sm:$0xff]   ;;  %1093 = vmatprep.mubr.bf16.mxu0 %v2698_v32  ;;  %v2701_v35 = vld [vmem:[%s3888_s0 + $0x8] ss:$36 sps:$4 sm:$0xff]   ;;  %v2711_v42 = vld [vmem:[%s3887_s2 + $0x130] sm:$0xff]  }
   0xf   :  { %2200 = vmatpush3.bf16.msra.mxu0 %v2678_v13  ;;  %1190 = vmatprep.mubr.bf16.mxu1 %v2703_v36  ;;  %v2705_v38 = vld [vmem:[%s3888_s0 + $0x4c] ss:$36 sps:$4 sm:$0xff]   ;;  %v2717_v46 = vld [vmem:[%s3888_s0 + $0x9c] ss:$36 sps:$4 sm:$0xff]   ;;  %v2725_v53 = vld [vmem:[%s3888_s0 + $0xe4] ss:$36 sps:$4 sm:$0xff]  }
  0x10   :  { %2201 = vmatprep.subr.bf16.mxu0 %v2681_v16  ;;  %v2707_v39 = vld [vmem:[%s3888_s0 + $0x48] ss:$36 sps:$4 sm:$0xff]   ;;  %v2712_v43 = vld [vmem:[%s3888_s0 + $0x50] ss:$36 sps:$4 sm:$0xff]   ;;  %v2721_v49 = vld [vmem:[%s3888_s0 + $0xdc] ss:$36 sps:$4 sm:$0xff]  }
  0x11   :  { %2264 = vmatpush3.bf16.msra.mxu1 %v2680_v15  ;;  %v2716_v45 = vld [vmem:[%s3887_s2 + $0x168] sm:$0xff]   ;;  %v2715_v48 = vld [vmem:[%s3888_s0 + $0x90] ss:$36 sps:$4 sm:$0xff]   ;;  %v2724_v50 = vld [vmem:[%s3887_s2 + $0x160] sm:$0xff]  }
  0x12   :  { %2265 = vmatprep.subr.bf16.mxu1 %v2683_v18  ;;  %v2719_v47 = vld [vmem:[%s3887_s2 + $0x128] sm:$0xff]   ;;  %v2720_v51 = vld [vmem:[%s3888_s0 + $0x98] ss:$36 sps:$4 sm:$0xff]   ;;  %v2727_v52 = vld [vmem:[%s3887_s2 + $0x120] sm:$0xff]  }
  0x13   :  { %2202 = vmatpush3.bf16.msra.mxu0 %v2682_v17  ;;  %v2732_v54 = vld [vmem:[%s3887_s2 + $0x158] sm:$0xff]   ;;  %v2729_v57 = vld [vmem:[%s3888_s0 + $0x124] ss:$36 sps:$4 sm:$0xff]   ;;  %v2739_v61 = vld [vmem:[%s3887_s2 + $0x1f0] sm:$0xff]  }
  0x14   :  { %2203 = vmatprep.subr.bf16.mxu0 %v2685_v20  ;;  %v2723_v55 = vld [vmem:[%s3888_s0 + $0xd8] ss:$36 sps:$4 sm:$0xff]   ;;  %v2728_v60 = vld [vmem:[%s3888_s0 + $0xe0] ss:$36 sps:$4 sm:$0xff]   ;;  %v2734_v62 = vld [vmem:[%s3888_s0 + $0x12c] ss:$36 sps:$4 sm:$0xff]  }
  0x15   :  { %2266 = vmatpush3.bf16.msra.mxu1 %v2684_v19  ;;  %v2733_v56 = vld [vmem:[%s3887_s2 + $0x1f8] sm:$0xff]   ;;  %v2742_v63 = vld [vmem:[%s3887_s2 + $0x1b0] sm:$0xff]   ;;  %v2731_v1 = vld [vmem:[%s3888_s0 + $0x120] ss:$36 sps:$4 sm:$0xff]  }
  0x16   :  { %2267 = vmatprep.subr.bf16.mxu1 %v2687_v22  ;;  %v2736_v58 = vld [vmem:[%s3887_s2 + $0x118] sm:$0xff]   ;;  %v2744_v0 = vld [vmem:[%s3887_s2 + $0x150] sm:$0xff]   ;;  %v2738_v4 = vld [vmem:[%s3888_s0 + $0x128] ss:$36 sps:$4 sm:$0xff]  }
  0x17   :  { %2204 = vmatpush3.bf16.msra.mxu0 %v2686_v21  ;;  %v2737_v59 = vld [vmem:[%s3887_s2 + $0x1b8] sm:$0xff]   ;;  %v2740_v2 = vld [vmem:[%s3888_s0 + $0x16c] ss:$36 sps:$4 sm:$0xff]   ;;  %v2751_v7 = vld [vmem:[%s3887_s2 + $0x1e0] sm:$0xff]  }
  0x18   :  { %2205 = vmatprep.subr.bf16.mxu0 %v2689_v24  ;;  %v2747_v3 = vld [vmem:[%s3887_s2 + $0x110] sm:$0xff]   ;;  %v2749_v5 = vld [vmem:[%s3887_s2 + $0x1e8] sm:$0xff]   ;;  %v2754_v9 = vld [vmem:[%s3887_s2 + $0x1a0] sm:$0xff]  }
  0x19   :  { %2268 = vmatpush3.bf16.msra.mxu1 %v2688_v23  ;;  %v2750_v6 = vld [vmem:[%s3887_s2 + $0x1a8] sm:$0xff]   ;;  %v2745_v8 = vld [vmem:[%s3888_s0 + $0x174] ss:$36 sps:$4 sm:$0xff]   ;;  %v2757_v15 = vld [vmem:[%s3888_s0 + $0x1bc] ss:$36 sps:$4 sm:$0xff]  }
  0x1a   :  { %2269 = vmatprep.subr.bf16.mxu1 %v2691_v26  ;;  %v2756_v10 = vld [vmem:[%s3887_s2 + $0x148] sm:$0xff]   ;;  %v2748_v12 = vld [vmem:[%s3888_s0 + $0x170] ss:$36 sps:$4 sm:$0xff]   ;;  %v2761_v16 = vld [vmem:[%s3887_s2 + $0x1d8] sm:$0xff]  }
  0x1b   :  { %2206 = vmatpush3.bf16.msra.mxu0 %v2690_v25  ;;  %v2743_v11 = vld [vmem:[%s3888_s0 + $0x168] ss:$36 sps:$4 sm:$0xff]   ;;  %v2752_v13 = vld [vmem:[%s3888_s0 + $0x1b4] ss:$36 sps:$4 sm:$0xff]   ;;  %v2768_v21 = vld [vmem:[%s3887_s2 + $0x140] sm:$0xff]  }
  0x1c   :  { %2207 = vmatprep.subr.bf16.mxu0 %v2693_v28  ;;  %v2759_v14 = vld [vmem:[%s3887_s2 + $0x108] sm:$0xff]   ;;  %v2762_v17 = vld [vmem:[%s3887_s2 + $0x198] sm:$0xff]   ;;  %v2763_v18 = vld [vmem:[%s3887_s2 + $0x1d0] sm:$0xff]  }
  0x1d   :  { %2270 = vmatpush3.bf16.msra.mxu1 %v2692_v27  ;;  %v2755_v19 = vld [vmem:[%s3888_s0 + $0x1b0] ss:$36 sps:$4 sm:$0xff]   ;;  %v2764_v22 = vld [vmem:[%s3888_s0 + $0x1fc] ss:$36 sps:$4 sm:$0xff]   ;;  %v2769_v25 = vld [vmem:[%s3888_s0 + $0x204] ss:$36 sps:$4 sm:$0xff]  }
  0x1e   :  { %2271 = vmatprep.subr.bf16.mxu1 %v2695_v30  ;;  %v2766_v20 = vld [vmem:[%s3887_s2 + $0x190] sm:$0xff]   ;;  %v2760_v23 = vld [vmem:[%s3888_s0 + $0x1b8] ss:$36 sps:$4 sm:$0xff]   ;;  %v2771_v24 = vld [vmem:[%s3887_s2 + $0x100] sm:$0xff]  }
  0x1f   :  { %2208 = vmatpush3.bf16.msra.mxu0 %v2694_v29  ;;  %v2773_v26 = vld [vmem:[%s3887_s2 + $0x1c8] sm:$0xff]   ;;  %v2775_v28 = vld [vmem:[%s3887_s2 + $0x1c0] sm:$0xff]   ;;  %v2767_v29 = vld [vmem:[%s3888_s0 + $0x1f8] ss:$36 sps:$4 sm:$0xff]  }
  0x20   :  { %2321 = vmatprep.subr.bf16.mxu0 %v2700_v34  ;;  %v2774_v27 = vld [vmem:[%s3887_s2 + $0x188] sm:$0xff]   ;;  %v2779_v30 = vld [vmem:[%s3887_s2 + $0x180] sm:$0xff]   ;;  %v2778_v32 = vld [vmem:[%s3888_s0 + $0x14] ss:$36 sps:$4 sm:$0xff]  }
  0x21   :  { %2272 = vmatpush3.bf16.msra.mxu1 %v2699_v33  ;;  %v2772_v33 = vld [vmem:[%s3888_s0 + $0x200] ss:$36 sps:$4 sm:$0xff]  }
  0x22   :  { %1094 = vmatmul.mubr.bf16.vlgmr.msra.gmra.mxu0 %v2696_v31  ;;  %2385 = vmatprep.subr.bf16.mxu1 %v2733_v56  ;;  %v2780_v31 = vld [vmem:[%s3887_s2 + $0x238] sm:$0xff]   ;;  %v2804_v56 = vld [vmem:[%s3888_s0 + $0xf0] ss:$36 sps:$4 sm:$0xff]  }
  0x23   :  { %2322 = vmatpush3.bf16.msra.mxu0 %v2704_v37  ;;  %1101 = vmatprep.mubr.bf16.mxu0 %v2705_v38  ;;  %v2783_v34 = vld [vmem:[%s3888_s0 + $0x1c] ss:$36 sps:$4 sm:$0xff]   ;;  %v2787_v37 = vld [vmem:[%s3887_s2 + $0x230] sm:$0xff]  }
  0x24   :  { %1191 = vmatmul.mubr.bf16.vlgmr.msra.gmra.mxu1 %v2701_v35  ;;  %2323 = vmatprep.subr.bf16.mxu0 %v2708_v40  ;;  %v2776_v35 = vld [vmem:[%s3888_s0 + $0x10] ss:$36 sps:$4 sm:$0xff]   ;;  %v2784_v36 = vld [vmem:[%s3888_s0 + $0x5c] ss:$36 sps:$4 sm:$0xff]   ;;  %v2794_v40 = vld [vmem:[%s3887_s2 + $0x228] sm:$0xff]  }
  0x25   :  { %1198 = vmatprep.mubr.bf16.mxu1 %v2709_v41  ;;  %2386 = vmatpush3.bf16.msra.mxu1 %v2737_v59  ;;  %v2781_v38 = vld [vmem:[%s3888_s0 + $0x18] ss:$36 sps:$4 sm:$0xff]  }
  0x26   :  { %2387 = vmatprep.subr.bf16.mxu1 %v2739_v61  ;;  %v2786_v41 = vld [vmem:[%s3888_s0 + $0x58] ss:$36 sps:$4 sm:$0xff]   ;;  %v2816_v61 = vld [vmem:[%s3888_s0 + $0x184] ss:$36 sps:$4 sm:$0xff]  }
  0x27   :  { %2324 = vmatpush3.bf16.msra.mxu0 %v2711_v42  ;;  %v2791_v42 = vld [vmem:[%s3888_s0 + $0xa4] ss:$36 sps:$4 sm:$0xff]   ;;  %v2812_v59 = vld [vmem:[%s3888_s0 + $0x17c] ss:$36 sps:$4 sm:$0xff]  }
  0x28   :  { %2325 = vmatprep.subr.bf16.mxu0 %v2716_v45  ;;  %v2795_v45 = vld [vmem:[%s3888_s0 + $0xac] ss:$36 sps:$4 sm:$0xff]  }
  0x29   :  { %2388 = vmatpush3.bf16.msra.mxu1 %v2742_v63  ;;  %v2819_v63 = vld [vmem:[%s3888_s0 + $0x1c4] ss:$36 sps:$4 sm:$0xff]  }
  0x2a   :  { %1102 = vmatmul.mubr.bf16.gmra.mxu0 %v2707_v39  ;;  %2389 = vmatprep.subr.bf16.mxu1 %v2749_v5  ;;  %v2788_v39 = vld [vmem:[%s3888_s0 + $0x64] ss:$36 sps:$4 sm:$0xff]   ;;  %v2830_v5 = vld [vmem:[%s3888_s0 + $0x214] ss:$36 sps:$4 sm:$0xff]  }
  0x2b   :  { %1109 = vmatprep.mubr.bf16.mxu0 %v2713_v44  ;;  %2326 = vmatpush3.bf16.msra.mxu0 %v2719_v47  ;;  %v2790_v44 = vld [vmem:[%s3888_s0 + $0x60] ss:$36 sps:$4 sm:$0xff]  }
  0x2c   :  { %1199 = vmatmul.mubr.bf16.gmra.mxu1 %v2712_v43  ;;  %2327 = vmatprep.subr.bf16.mxu0 %v2724_v50  ;;  %v2801_v43 = vld [vmem:[%s3887_s2 + $0x220] sm:$0xff]   ;;  %v2797_v50 = vld [vmem:[%s3888_s0 + $0xa8] ss:$36 sps:$4 sm:$0xff]  }
  0x2d   :  { %1206 = vmatprep.mubr.bf16.mxu1 %v2717_v46  ;;  %2390 = vmatpush3.bf16.msra.mxu1 %v2750_v6  ;;  %v2808_v46 = vld [vmem:[%s3887_s2 + $0x218] sm:$0xff]   ;;  %v2793_v47 = vld [vmem:[%s3888_s0 + $0xa0] ss:$36 sps:$4 sm:$0xff]   ;;  %v2828_v6 = vld [vmem:[%s3888_s0 + $0x208] ss:$36 sps:$4 sm:$0xff]  }
  0x2e   :  { %2391 = vmatprep.subr.bf16.mxu1 %v2751_v7  ;;  %v2833_v7 = vld [vmem:[%s3888_s0 + $0x20] ss:$36 sps:$4 sm:$0xff]  }
  0x2f   :  { %2328 = vmatpush3.bf16.msra.mxu0 %v2727_v52  ;;  %v2822_v52 = vld [vmem:[%s3887_s2 + $0x208] sm:$0xff]  }
  0x30   :  { %2329 = vmatprep.subr.bf16.mxu0 %v2732_v54  ;;  %v2805_v54 = vld [vmem:[%s3888_s0 + $0x134] ss:$36 sps:$4 sm:$0xff]  }
  0x31   :  { %2392 = vmatpush3.bf16.msra.mxu1 %v2754_v9  ;;  %v2834_v9 = vld [vmem:[%s3888_s0 + $0x68] ss:$36 sps:$4 sm:$0xff]  }
  0x32   :  { %1110 = vmatmul.mubr.bf16.gmra.mxu0 %v2715_v48  ;;  %2393 = vmatprep.subr.bf16.mxu1 %v2761_v16  ;;  %v2798_v48 = vld [vmem:[%s3888_s0 + $0xec] ss:$36 sps:$4 sm:$0xff]  }
  0x33   :  { %1117 = vmatprep.mubr.bf16.mxu0 %v2721_v49  ;;  %2330 = vmatpush3.bf16.msra.mxu0 %v2736_v58  ;;  %v2815_v49 = vld [vmem:[%s3887_s2 + $0x210] sm:$0xff]  }
  0x34   :  { %1207 = vmatmul.mubr.bf16.gmra.mxu1 %v2720_v51  ;;  %2331 = vmatprep.subr.bf16.mxu0 %v2744_v0  ;;  %v2802_v51 = vld [vmem:[%s3888_s0 + $0xf4] ss:$36 sps:$4 sm:$0xff]   ;;  %v2818_v0 = vld [vmem:[%s3888_s0 + $0x180] ss:$36 sps:$4 sm:$0xff]  }
  0x35   :  { %1214 = vmatprep.mubr.bf16.mxu1 %v2725_v53  ;;  %2394 = vmatpush3.bf16.msra.mxu1 %v2762_v17  ;;  %v2800_v53 = vld [vmem:[%s3888_s0 + $0xe8] ss:$36 sps:$4 sm:$0xff]   ;;  %v2807_v58 = vld [vmem:[%s3888_s0 + $0x130] ss:$36 sps:$4 sm:$0xff]  }
  0x36   :  { %2395 = vmatprep.subr.bf16.mxu1 %v2763_v18  ;;  %v2839_v16 = vld [vmem:[%s3888_s0 + $0x1d0] ss:$36 sps:$4 sm:$0xff]   ;;  %v2843_v17 = vld [vmem:[%s3889_s4 + $0x28] sm:$0xff]   ;;  %v2840_v18 = vld [vmem:[%s3888_s0 + $0x218] ss:$36 sps:$4 sm:$0xff]  }
  0x37   :  { %2332 = vmatpush3.bf16.msra.mxu0 %v2747_v3  ;;  %v2826_v3 = vld [vmem:[%s3888_s0 + $0x20c] ss:$36 sps:$4 sm:$0xff]  }
  0x38   :  { %2333 = vmatprep.subr.bf16.mxu0 %v2756_v10  ;;  %v2835_v10 = vld [vmem:[%s3888_s0 + $0xb0] ss:$36 sps:$4 sm:$0xff]  }
  0x39   :  { %2396 = vmatpush3.bf16.msra.mxu1 %v2766_v20  ;;  %v2845_v20 = vld [vmem:[%s3889_s4 + $0x18] sm:$0xff]  }
  0x3a   :  { %1118 = vmatmul.mubr.bf16.gmra.mxu0 %v2723_v55  ;;  %2397 = vmatprep.subr.bf16.mxu1 %v2773_v26  ;;  %v2829_v55 = vld [vmem:[%s3887_s2 + $0x200] sm:$0xff]  }
  0x3b   :  { %1125 = vmatprep.mubr.bf16.mxu0 %v2729_v57  ;;  %2334 = vmatpush3.bf16.msra.mxu0 %v2759_v14  ;;  %v2809_v57 = vld [vmem:[%s3888_s0 + $0x13c] ss:$36 sps:$4 sm:$0xff]   ;;  %v2842_v14 = vld [vmem:[%s3889_s4 + $0x30] sm:$0xff]  }
  0x3c   :  { %1215 = vmatmul.mubr.bf16.gmra.mxu1 %v2728_v60  ;;  %2335 = vmatprep.subr.bf16.mxu0 %v2768_v21  ;;  %v2811_v60 = vld [vmem:[%s3888_s0 + $0x138] ss:$36 sps:$4 sm:$0xff]   ;;  %v2846_v21 = vld [vmem:[%s3889_s4 + $0x10] sm:$0xff]   ;;  %v2848_v26 = vld [vmem:[%s3889_s4] sm:$0xff]  }
  0x3d   :  { %1222 = vmatprep.mubr.bf16.mxu1 %v2734_v62  ;;  %2398 = vmatpush3.bf16.msra.mxu1 %v2774_v27  ;;  %v2814_v62 = vld [vmem:[%s3888_s0 + $0x178] ss:$36 sps:$4 sm:$0xff]   ;;  %v1806_v27 = vld [vmem:[%s3890_s6 + $0x60] sm:$0xff] }
  0x3e   :  { %2399 = vmatprep.subr.bf16.mxu1 %v2775_v28  ;;  %v1805_v28 = vld [vmem:[%s3890_s6 + $0x58] sm:$0xff] }
  0x3f   :  { %2336 = vmatpush3.bf16.msra.mxu0 %v2771_v24  ;;  %v1808_v24 = vld [vmem:[%s3890_s6 + $0x70] sm:$0xff] }
  0x40   :  { %2513 = vmatprep.subr.bf16.mxu0 %v2780_v31 }
  0x41   :  { %2400 = vmatpush3.bf16.msra.mxu1 %v2779_v30  ;;  %v1804_v30 = vld [vmem:[%s3890_s6 + $0x50] sm:$0xff] }
  0x42   :  { %1126 = vmatmul.mubr.bf16.gmra.mxu0 %v2731_v1  ;;  %v2823_v1 = vld [vmem:[%s3888_s0 + $0x1cc] ss:$36 sps:$4 sm:$0xff]  }
  0x43   :  { %1133 = vmatprep.mubr.bf16.mxu0 %v2740_v2  ;;  %v2821_v2 = vld [vmem:[%s3888_s0 + $0x1c0] ss:$36 sps:$4 sm:$0xff]  }
  0x44   :  { %1223 = vmatmul.mubr.bf16.gmra.mxu1 %v2738_v4  ;;  %v2825_v4 = vld [vmem:[%s3888_s0 + $0x1c8] ss:$36 sps:$4 sm:$0xff]  }
  0x45   :  { %1230 = vmatprep.mubr.bf16.mxu1 %v2745_v8  ;;  %v2832_v8 = vld [vmem:[%s3888_s0 + $0x210] ss:$36 sps:$4 sm:$0xff]  }
  0x4a   :  { %1134 = vmatmul.mubr.bf16.gmra.mxu0 %v2743_v11  ;;  %v2841_v11 = vld [vmem:[%s3889_s4 + $0x38] sm:$0xff]  }
  0x4b   :  { %1141 = vmatprep.mubr.bf16.mxu0 %v2752_v13  ;;  %2545 = vmatprep.subr.bf16.mxu1 %v2841_v11  ;;  %v2837_v13 = vld [vmem:[%s3888_s0 + $0x140] ss:$36 sps:$4 sm:$0xff]  }
  0x4c   :  { %1231 = vmatmul.mubr.bf16.gmra.mxu1 %v2748_v12  ;;  %v2836_v12 = vld [vmem:[%s3888_s0 + $0xf8] ss:$36 sps:$4 sm:$0xff]  }
  0x4d   :  { %1238 = vmatprep.mubr.bf16.mxu1 %v2757_v15  ;;  %v2838_v15 = vld [vmem:[%s3888_s0 + $0x188] ss:$36 sps:$4 sm:$0xff]  }
  0x52   :  { %1142 = vmatmul.mubr.bf16.gmra.mxu0 %v2755_v19  ;;  %v2844_v19 = vld [vmem:[%s3889_s4 + $0x20] sm:$0xff]  }
  0x53   :  { %1149 = vmatprep.mubr.bf16.mxu0 %v2764_v22  ;;  %v1809_v22 = vld [vmem:[%s3890_s6 + $0x78] sm:$0xff] }
  0x54   :  { %1239 = vmatmul.mubr.bf16.gmra.mxu1 %v2760_v23  ;;  %v2847_v23 = vld [vmem:[%s3889_s4 + $0x8] sm:$0xff]  }
  0x55   :  { %1246 = vmatprep.mubr.bf16.mxu1 %v2769_v25  ;;  %v1807_v25 = vld [vmem:[%s3890_s6 + $0x68] sm:$0xff] }
  0x5a   :  { %1150 = vmatmul.mubr.bf16.gmra.mxu0 %v2767_v29  ;;  %v2849_v29 = vld [vmem:[%s3891_s1] sm:$0xff]  }
  0x5b   :  { %1287 = vmatprep.mubr.bf16.mxu0 %v2778_v32  ;;  %v1803_v32 = vld [vmem:[%s3890_s6 + $0x48] sm:$0xff] }
  0x5c   :  { %1247 = vmatmul.mubr.bf16.gmra.mxu1 %v2772_v33  ;;  %v3420_v33 = vld [vmem:[%s3890_s6 + $0x40] sm:$0xff] }
  0x5d   :  { %1384 = vmatprep.mubr.bf16.mxu1 %v2783_v34  ;;  %v3427_v34 = vld [vmem:[%s3890_s6 + $0x38] sm:$0xff] }
  0x62   :  { %1288 = vmatmul.mubr.bf16.vlgmr.msra.gmra.mxu0 %v2776_v35  ;;  %v2851_v35 = vld [vmem:[%s3891_s1 + $0x10] sm:$0xff]  }
  0x63   :  { %2514 = vmatpush3.bf16.msra.mxu0 %v2780_v31  ;;  %1295 = vmatprep.mubr.bf16.mxu0 %v2784_v36  ;;  %v2850_v31 = vld [vmem:[%s3891_s1 + $0x8] sm:$0xff]   ;;  %v2852_v36 = vld [vmem:[%s3891_s1 + $0x18] sm:$0xff]  }
  0x64   :  { %2515 = vmatprep.subr.bf16.mxu0 %v2787_v37  ;;  %1385 = vmatmul.mubr.bf16.vlgmr.msra.gmra.mxu1 %v2781_v38  ;;  %v3447_v38 = vld [vmem:[%s3890_s6 + $0x28] sm:$0xff] }
  0x65   :  { %1392 = vmatprep.mubr.bf16.mxu1 %v2788_v39  ;;  %2546 = vmatpush3.bf16.msra.mxu1 %v2841_v11 }
  0x66   :  { %2547 = vmatprep.subr.bf16.mxu1 %v2842_v14 }
  0x67   :  { %2516 = vmatpush3.bf16.msra.mxu0 %v2787_v37  ;;  %v3440_v37 = vld [vmem:[%s3890_s6 + $0x30] sm:$0xff] }
  0x68   :  { %2517 = vmatprep.subr.bf16.mxu0 %v2794_v40 }
  0x69   :  { %2548 = vmatpush3.bf16.msra.mxu1 %v2842_v14 }
  0x6a   :  { %1296 = vmatmul.mubr.bf16.gmra.mxu0 %v2786_v41  ;;  %2549 = vmatprep.subr.bf16.mxu1 %v2843_v17  ;;  %v3459_v41 = vld [vmem:[%s3892_s3] ss:$0 sm:$0xff] }
  0x6b   :  { %1303 = vmatprep.mubr.bf16.mxu0 %v2791_v42  ;;  %2518 = vmatpush3.bf16.msra.mxu0 %v2794_v40  ;;  %v3454_v40 = vld [vmem:[%s3890_s6 + $0x20] sm:$0xff]  ;;  %3898 = vst [vmem:[#allocation2_spill] sm:$0xff] %v3459_v41 }
  0x6c   :  { %2519 = vmatprep.subr.bf16.mxu0 %v2801_v43  ;;  %1393 = vmatmul.mubr.bf16.gmra.mxu1 %v2790_v44 }
  0x6d   :  { %1400 = vmatprep.mubr.bf16.mxu1 %v2795_v45  ;;  %2550 = vmatpush3.bf16.msra.mxu1 %v2843_v17  ;;  %v3466_v45 = vld [vmem:[%s3890_s6 + $0x18] sm:$0xff] }
  0x6e   :  { %2551 = vmatprep.subr.bf16.mxu1 %v2844_v19 }
  0x6f   :  { %2520 = vmatpush3.bf16.msra.mxu0 %v2801_v43 }
  0x70   :  { %2521 = vmatprep.subr.bf16.mxu0 %v2808_v46 }
  0x71   :  { %2552 = vmatpush3.bf16.msra.mxu1 %v2844_v19 }
  0x72   :  { %1304 = vmatmul.mubr.bf16.gmra.mxu0 %v2793_v47  ;;  %2553 = vmatprep.subr.bf16.mxu1 %v2845_v20 }
  0x73   :  { %1311 = vmatprep.mubr.bf16.mxu0 %v2798_v48  ;;  %2522 = vmatpush3.bf16.msra.mxu0 %v2808_v46  ;;  %v2853_v46 = vld [vmem:[%s3891_s1 + $0x20] sm:$0xff]   ;;  %v2854_v48 = vld [vmem:[%s3891_s1 + $0x28] sm:$0xff]  }
  0x74   :  { %2523 = vmatprep.subr.bf16.mxu0 %v2815_v49  ;;  %1401 = vmatmul.mubr.bf16.gmra.mxu1 %v2797_v50 }
  0x75   :  { %1408 = vmatprep.mubr.bf16.mxu1 %v2802_v51  ;;  %2554 = vmatpush3.bf16.msra.mxu1 %v2845_v20  ;;  %v1796_v51 = vld [vmem:[%s3890_s6 + $0x10] sm:$0xff] }
  0x76   :  { %2555 = vmatprep.subr.bf16.mxu1 %v2846_v21 }
  0x77   :  { %2524 = vmatpush3.bf16.msra.mxu0 %v2815_v49 }
  0x78   :  { %2525 = vmatprep.subr.bf16.mxu0 %v2822_v52 }
  0x79   :  { %2556 = vmatpush3.bf16.msra.mxu1 %v2846_v21 }
  0x7a   :  { %1312 = vmatmul.mubr.bf16.gmra.mxu0 %v2800_v53  ;;  %2557 = vmatprep.subr.bf16.mxu1 %v2847_v23 }
  0x7b   :  { %1319 = vmatprep.mubr.bf16.mxu0 %v2805_v54  ;;  %2526 = vmatpush3.bf16.msra.mxu0 %v2822_v52 }
  0x7c   :  { %2527 = vmatprep.subr.bf16.mxu0 %v2829_v55  ;;  %1409 = vmatmul.mubr.bf16.gmra.mxu1 %v2804_v56  ;;  %v1795_v56 = vld [vmem:[%s3890_s6 + $0x8] sm:$0xff] }
  0x7d   :  { %1416 = vmatprep.mubr.bf16.mxu1 %v2809_v57  ;;  %2558 = vmatpush3.bf16.msra.mxu1 %v2847_v23 }
  0x7e   :  { %2559 = vmatprep.subr.bf16.mxu1 %v2848_v26 }
  0x7f   :  { %2528 = vmatpush3.bf16.msra.mxu0 %v2829_v55 }
  0x80   :  { %2577 = vmatprep.subr.mxu0 %v1809_v22 }
  0x81   :  { %2560 = vmatpush3.bf16.msra.mxu1 %v2848_v26 }
  0x82   :  { %1320 = vmatmul.mubr.bf16.gmra.mxu0 %v2807_v58  ;;  %2633 = vmatprep.subr.mxu1 %v1809_v22 }
  0x83   :  { %1327 = vmatprep.mubr.bf16.mxu0 %v2812_v59 }
  0x84   :  { %1417 = vmatmul.mubr.bf16.gmra.mxu1 %v2811_v60 }
  0x85   :  { %1424 = vmatprep.mubr.bf16.mxu1 %v2816_v61  ;;  %v1794_v61 = vld [vmem:[%s3890_s6] sm:$0xff] }
  0x8a   :  { %1328 = vmatmul.mubr.bf16.gmra.mxu0 %v2814_v62 }
  0x8b   :  { %1335 = vmatprep.mubr.bf16.mxu0 %v2819_v63 }
  0x8c   :  { %1425 = vmatmul.mubr.bf16.gmra.mxu1 %v2818_v0 }
  0x8d   :  { %1432 = vmatprep.mubr.bf16.mxu1 %v2823_v1 }
  0x92   :  { %1336 = vmatmul.mubr.bf16.gmra.mxu0 %v2821_v2  ;;  %v2855_v2 = vld [vmem:[%s3891_s1 + $0x30] sm:$0xff]  }
  0x93   :  { %1343 = vmatprep.mubr.bf16.mxu0 %v2826_v3 }
  0x94   :  { %1433 = vmatmul.mubr.bf16.gmra.mxu1 %v2825_v4 }
  0x95   :  { %1440 = vmatprep.mubr.bf16.mxu1 %v2830_v5  ;;  %v2856_v5 = vld [vmem:[%s3891_s1 + $0x38] sm:$0xff]  }
  0x9a   :  { %1344 = vmatmul.mubr.bf16.gmra.mxu0 %v2828_v6 }
  0x9b   :  { %2529 = vmatprep.mubr.bf16.mxu0 %v2833_v7 }
  0x9c   :  { %1441 = vmatmul.mubr.bf16.gmra.mxu1 %v2832_v8 }
  0x9d   :  { %2561 = vmatprep.mubr.bf16.mxu1 %v2849_v29 }
  0xa2   :  { %2530 = vmatmul.mubr.bf16.vlgmr.msra.gmra.mxu0 %v2834_v9 }
  0xa3   :  { %2533 = vmatprep.mubr.bf16.mxu0 %v2835_v10  ;;  %2578 = vmatpush3.msra.mxu0 %v1809_v22 }
  0xa4   :  { %2579 = vmatprep.subr.mxu0 %v1808_v24  ;;  %2562 = vmatmul.mubr.bf16.vlgmr.msra.gmra.mxu1 %v2850_v31 }
  0xa5   :  { %2580 = vmatpush3.msra.mxu0 %v1808_v24  ;;  %2649 = vmatpush3.msra.mxu1 %v1809_v22 }
  0xa6   :  { %2581 = vmatprep.subr.mxu0 %v1807_v25  ;;  %2634 = vmatprep.subr.mxu1 %v1808_v24 }
  0xa7   :  { %2582 = vmatpush3.msra.mxu0 %v1807_v25  ;;  %2650 = vmatpush3.msra.mxu1 %v1808_v24 }
  0xa8   :  { %2583 = vmatprep.subr.mxu0 %v1806_v27  ;;  %2635 = vmatprep.subr.mxu1 %v1807_v25 }
  0xa9   :  { %2584 = vmatpush3.msra.mxu0 %v1806_v27  ;;  %2651 = vmatpush3.msra.mxu1 %v1807_v25 }
  0xaa   :  { %2534 = vmatmul.mubr.bf16.gmra.mxu0 %v2836_v12  ;;  %2585 = vmatprep.subr.mxu0 %v1805_v28 }
  0xab   :  { %2537 = vmatprep.mubr.bf16.mxu0 %v2837_v13  ;;  %2586 = vmatpush3.msra.mxu0 %v1805_v28 }
  0xac   :  { %2587 = vmatprep.subr.mxu0 %v1804_v30  ;;  %2565 = vmatprep.mubr.bf16.mxu1 %v2851_v35 }
  0xad   :  { %2588 = vmatpush3.msra.mxu0 %v1804_v30  ;;  %2636 = vmatprep.subr.mxu1 %v1806_v27 }
  0xae   :  { %2589 = vmatprep.subr.mxu0 %v1803_v32  ;;  %2566 = vmatmul.mubr.bf16.gmra.mxu1 %v2852_v36 }
  0xaf   :  { %2590 = vmatpush3.msra.mxu0 %v1803_v32  ;;  %2652 = vmatpush3.msra.mxu1 %v1806_v27 }
  0xb0   :  { %2591 = vmatprep.subr.mxu0 %v3420_v33  ;;  %2637 = vmatprep.subr.mxu1 %v1805_v28 }
  0xb1   :  { %2592 = vmatpush3.msra.mxu0 %v3420_v33  ;;  %2653 = vmatpush3.msra.mxu1 %v1805_v28 }
  0xb2   :  { %2538 = vmatmul.mubr.bf16.gmra.mxu0 %v2838_v15  ;;  %2593 = vmatprep.subr.mxu0 %v3427_v34 }
  0xb3   :  { %2541 = vmatprep.mubr.bf16.mxu0 %v2839_v16  ;;  %2594 = vmatpush3.msra.mxu0 %v3427_v34 }
  0xb4   :  { %2595 = vmatprep.subr.mxu0 %v3440_v37  ;;  %2638 = vmatprep.subr.mxu1 %v1804_v30 }
  0xb5   :  { %2596 = vmatpush3.msra.mxu0 %v3440_v37  ;;  %2654 = vmatpush3.msra.mxu1 %v1804_v30 }
  0xb6   :  { %2597 = vmatprep.subr.mxu0 %v3447_v38  ;;  %2569 = vmatprep.mubr.bf16.mxu1 %v2853_v46 }
  0xb7   :  { %2598 = vmatpush3.msra.mxu0 %v3447_v38  ;;  %2639 = vmatprep.subr.mxu1 %v1803_v32 }
  0xb8   :  { %2599 = vmatprep.subr.mxu0 %v3454_v40  ;;  %2570 = vmatmul.mubr.bf16.gmra.mxu1 %v2854_v48 }
  0xb9   :  { %2600 = vmatpush3.msra.mxu0 %v3454_v40  ;;  %2655 = vmatpush3.msra.mxu1 %v1803_v32 }
  0xba   :  { %2542 = vmatmul.mubr.bf16.gmra.mxu0 %v2840_v18  ;;  %2601 = vmatprep.subr.mxu0 %v3466_v45 }
  0xbb   :  { %2602 = vmatpush3.msra.mxu0 %v3466_v45  ;;  %2640 = vmatprep.subr.mxu1 %v3420_v33 }
  0xbc   :  { %2603 = vmatprep.subr.mxu0 %v1796_v51  ;;  %2656 = vmatpush3.msra.mxu1 %v3420_v33 }
  0xbd   :  { %2604 = vmatpush3.msra.mxu0 %v1796_v51  ;;  %2641 = vmatprep.subr.mxu1 %v3427_v34 }
  0xbe   :  { %2605 = vmatprep.subr.mxu0 %v1795_v56  ;;  %2657 = vmatpush3.msra.mxu1 %v3427_v34 }
  0xbf   :  { %2606 = vmatpush3.msra.mxu0 %v1795_v56  ;;  %2573 = vmatprep.mubr.bf16.mxu1 %v2855_v2 }
  0xc0   :  { %2607 = vmatprep.subr.mxu0 %v1794_v61  ;;  %2642 = vmatprep.subr.mxu1 %v3440_v37 }
  0xc1   :  { %2608 = vmatpush3.msra.mxu0 %v1794_v61  ;;  %2658 = vmatpush3.msra.mxu1 %v3440_v37 }
  0xc2   :  { %2574 = vmatmul.mubr.bf16.gmra.mxu1 %v2856_v5  ;;  %2643 = vmatprep.subr.mxu1 %v3447_v38 }
  0xc3   :  { %2659 = vmatpush3.msra.mxu1 %v3447_v38 }
  0xc4   :  { %2644 = vmatprep.subr.mxu1 %v3454_v40 }
  0xc5   :  { %2660 = vmatpush3.msra.mxu1 %v3454_v40 }
  0xc6   :  { %2645 = vmatprep.subr.mxu1 %v3466_v45 }
  0xc7   :  { %2661 = vmatpush3.msra.mxu1 %v3466_v45 }
  0xc8   :  { %2646 = vmatprep.subr.mxu1 %v1796_v51 }
  0xc9   :  { %2662 = vmatpush3.msra.mxu1 %v1796_v51 }
  0xca   :  { %2647 = vmatprep.subr.mxu1 %v1795_v56 }
  0xcb   :  { %2663 = vmatpush3.msra.mxu1 %v1795_v56 }
  0xcc   :  { %2648 = vmatprep.subr.mxu1 %v1794_v61 }
  0xcd   :  { %2664 = vmatpush3.msra.mxu1 %v1794_v61 }
  0xe2   :  { %v2209_v39 = vpop.f32.mrf.mxu0 }
  0xe4   :  { %v2210_v42 = vpop.f32.mrf.mxu0  ;;  %v2273_v44 = vpop.f32.mrf.mxu1 }
  0xe5   :  { %v2211_v43 = vadd.f32 %v2210_v42, %v2209_v39 }
  0xe6   :  { %v2212_v47 = vpop.f32.mrf.mxu0  ;;  %v2274_v50 = vpop.f32.mrf.mxu1 }
  0xe7   :  { %v1096_v49 = vadd.f32 %v2211_v43, %v3459_v41  ;;  %v2275_v52 = vadd.f32 %v2274_v50, %v2273_v44 }
  0xe8   :  { %v2213_v53 = vpop.f32.mrf.mxu0  ;;  %v2276_v55 = vpop.f32.mrf.mxu1 }
  0xe9   :  { %v2214_v54 = vadd.f32 %v2213_v53, %v2212_v47  ;;  %v3483_v57 = vadd.f32 %v2275_v52, %v1096_v49 }
  0xea   :  { %v2215_v58 = vpop.f32.mrf.mxu0  ;;  %v2277_v60 = vpop.f32.mrf.mxu1 }
  0xeb   :  { %v1099_v59 = vadd.f32 %v2214_v54, %v3459_v41  ;;  %v2278_v62 = vadd.f32 %v2277_v60, %v2276_v55 }
  0xec   :  { %v2216_v63 = vpop.f32.mrf.mxu0  ;;  %v2279_v1 = vpop.f32.mrf.mxu1 }
  0xed   :  { %v2217_v0 = vadd.f32 %v2216_v63, %v2215_v58  ;;  %v3495_v3 = vadd.f32 %v2278_v62, %v1099_v59 }
  0xee   :  { %v2218_v4 = vpop.f32.mrf.mxu0  ;;  %v2280_v7 = vpop.f32.mrf.mxu1 }
  0xef   :  { %v1104_v6 = vadd.f32 %v2217_v0, %v3459_v41  ;;  %v2281_v8 = vadd.f32 %v2280_v7, %v2279_v1 }
  0xf0   :  { %v2219_v9 = vpop.f32.mrf.mxu0  ;;  %v2282_v11 = vpop.f32.mrf.mxu1 }
  0xf1   :  { %v2220_v10 = vadd.f32 %v2219_v9, %v2218_v4  ;;  %v3505_v12 = vadd.f32 %v2281_v8, %v1104_v6 }
  0xf2   :  { %v2221_v13 = vpop.f32.mrf.mxu0  ;;  %v2283_v15 = vpop.f32.mrf.mxu1 }
  0xf3   :  { %v1107_v14 = vadd.f32 %v2220_v10, %v3459_v41  ;;  %v2284_v16 = vadd.f32 %v2283_v15, %v2282_v11 }
  0xf4   :  { %v2222_v17 = vpop.f32.mrf.mxu0  ;;  %v2285_v19 = vpop.f32.mrf.mxu1 }
  0xf5   :  { %v2223_v18 = vadd.f32 %v2222_v17, %v2221_v13  ;;  %v3512_v20 = vadd.f32 %v2284_v16, %v1107_v14 }
  0xf6   :  { %v2224_v21 = vpop.f32.mrf.mxu0  ;;  %v2286_v23 = vpop.f32.mrf.mxu1 }
  0xf7   :  { %v1112_v22 = vadd.f32 %v2223_v18, %v3459_v41  ;;  %v2287_v24 = vadd.f32 %v2286_v23, %v2285_v19 }
  0xf8   :  { %v2225_v25 = vpop.f32.mrf.mxu0  ;;  %v2288_v27 = vpop.f32.mrf.mxu1 }
  0xf9   :  { %v2226_v26 = vadd.f32 %v2225_v25, %v2224_v21  ;;  %v3516_v28 = vadd.f32 %v2287_v24, %v1112_v22 }
  0xfa   :  { %v2227_v29 = vpop.f32.mrf.mxu0  ;;  %v2289_v31 = vpop.f32.mrf.mxu1 }
  0xfb   :  { %v1115_v30 = vadd.f32 %v2226_v26, %v3459_v41  ;;  %v2290_v32 = vadd.f32 %v2289_v31, %v2288_v27 }
  0xfc   :  { %v2228_v33 = vpop.f32.mrf.mxu0  ;;  %v2291_v35 = vpop.f32.mrf.mxu1 }
  0xfd   :  { %v2229_v34 = vadd.f32 %v2228_v33, %v2227_v29  ;;  %v3519_v36 = vadd.f32 %v2290_v32, %v1115_v30 }
  0xfe   :  { %v2230_v37 = vpop.f32.mrf.mxu0  ;;  %v2292_v39 = vpop.f32.mrf.mxu1 }
  0xff   :  { %v1120_v38 = vadd.f32 %v2229_v34, %v3459_v41  ;;  %v2293_v40 = vadd.f32 %v2292_v39, %v2291_v35 }
 0x100   :  { %v2231_v42 = vpop.f32.mrf.mxu0  ;;  %v2294_v44 = vpop.f32.mrf.mxu1 }
 0x101   :  { %v2232_v43 = vadd.f32 %v2231_v42, %v2230_v37  ;;  %v3522_v45 = vadd.f32 %v2293_v40, %v1120_v38 }
 0x102   :  { %v2233_v46 = vpop.f32.mrf.mxu0  ;;  %v2295_v48 = vpop.f32.mrf.mxu1 }
 0x103   :  { %v1123_v47 = vadd.f32 %v2232_v43, %v3459_v41  ;;  %v2296_v49 = vadd.f32 %v2295_v48, %v2294_v44 }
 0x104   :  { %v2234_v50 = vpop.f32.mrf.mxu0  ;;  %v2297_v52 = vpop.f32.mrf.mxu1 }
 0x105   :  { %v2235_v51 = vadd.f32 %v2234_v50, %v2233_v46  ;;  %v3525_v53 = vadd.f32 %v2296_v49, %v1123_v47 }
 0x106   :  { %v2236_v54 = vpop.f32.mrf.mxu0  ;;  %v2298_v56 = vpop.f32.mrf.mxu1 }
 0x107   :  { %v1128_v55 = vadd.f32 %v2235_v51, %v3459_v41  ;;  %v2299_v58 = vadd.f32 %v2298_v56, %v2297_v52 }
 0x108   :  { %v2237_v59 = vpop.f32.mrf.mxu0  ;;  %v2300_v61 = vpop.f32.mrf.mxu1 }
 0x109   :  { %v2238_v60 = vadd.f32 %v2237_v59, %v2236_v54  ;;  %v3528_v62 = vadd.f32 %v2299_v58, %v1128_v55 }
 0x10a   :  { %v2239_v63 = vpop.f32.mrf.mxu0  ;;  %v2301_v1 = vpop.f32.mrf.mxu1 }
 0x10b   :  { %v1131_v0 = vadd.f32 %v2238_v60, %v3459_v41  ;;  %v2302_v2 = vadd.f32 %v2301_v1, %v2300_v61 }
 0x10c   :  { %v2240_v4 = vpop.f32.mrf.mxu0  ;;  %v2303_v6 = vpop.f32.mrf.mxu1 }
 0x10d   :  { %v2241_v5 = vadd.f32 %v2240_v4, %v2239_v63  ;;  %v3531_v7 = vadd.f32 %v2302_v2, %v1131_v0 }
 0x10e   :  { %v2242_v8 = vpop.f32.mrf.mxu0  ;;  %v2304_v10 = vpop.f32.mrf.mxu1 }
 0x10f   :  { %3899 = vst [vmem:[#allocation3_spill] sm:$0xff] %v3531_v7  ;;  %v1136_v9 = vadd.f32 %v2241_v5, %v3459_v41  ;;  %v2305_v11 = vadd.f32 %v2304_v10, %v2303_v6 }
 0x110   :  { %v2243_v13 = vpop.f32.mrf.mxu0  ;;  %v2306_v15 = vpop.f32.mrf.mxu1 }
 0x111   :  { %v2244_v14 = vadd.f32 %v2243_v13, %v2242_v8  ;;  %v3534_v16 = vadd.f32 %v2305_v11, %v1136_v9 }
 0x112   :  { %v2245_v17 = vpop.f32.mrf.mxu0  ;;  %v2307_v19 = vpop.f32.mrf.mxu1 }
 0x113   :  { %3900 = vst [vmem:[#allocation4_spill] sm:$0xff] %v3534_v16  ;;  %v1139_v18 = vadd.f32 %v2244_v14, %v3459_v41  ;;  %v2308_v21 = vadd.f32 %v2307_v19, %v2306_v15 }
 0x114   :  { %v2246_v22 = vpop.f32.mrf.mxu0  ;;  %v2309_v24 = vpop.f32.mrf.mxu1 }
 0x115   :  { %v2247_v23 = vadd.f32 %v2246_v22, %v2245_v17  ;;  %v3537_v25 = vadd.f32 %v2308_v21, %v1139_v18 }
 0x116   :  { %v2248_v26 = vpop.f32.mrf.mxu0  ;;  %v2310_v29 = vpop.f32.mrf.mxu1 }
 0x117   :  { %3901 = vst [vmem:[#allocation5_spill] sm:$0xff] %v3537_v25  ;;  %v1144_v27 = vadd.f32 %v2247_v23, %v3459_v41  ;;  %v2311_v30 = vadd.f32 %v2310_v29, %v2309_v24 }
 0x118   :  { %v2249_v31 = vpop.f32.mrf.mxu0  ;;  %v2312_v33 = vpop.f32.mrf.mxu1 }
 0x119   :  { %v2250_v32 = vadd.f32 %v2249_v31, %v2248_v26  ;;  %v3540_v34 = vadd.f32 %v2311_v30, %v1144_v27 }
 0x11a   :  { %v2251_v35 = vpop.f32.mrf.mxu0  ;;  %v2313_v38 = vpop.f32.mrf.mxu1 }
 0x11b   :  { %3902 = vst [vmem:[#allocation6_spill] sm:$0xff] %v3540_v34  ;;  %v1147_v37 = vadd.f32 %v2250_v32, %v3459_v41  ;;  %v2314_v39 = vadd.f32 %v2313_v38, %v2312_v33 }
 0x11c   :  { %v2252_v40 = vpop.f32.mrf.mxu0  ;;  %v3545_v43 = vpop.f32.mrf.mxu1 }
 0x11d   :  { %v3543_v42 = vadd.f32 %v2252_v40, %v2251_v35  ;;  %3904 = vst [vmem:[#allocation8_spill] sm:$0xff] %v3545_v43  ;;  %v3547_v44 = vadd.f32 %v2314_v39, %v1147_v37 }
 0x11e   :  { %v2254_v46 = vpop.f32.mrf.mxu0  ;;  %v3549_v47 = vpop.f32.mrf.mxu1 }
 0x11f   :  { %3903 = vst [vmem:[#allocation7_spill] sm:$0xff] %v3543_v42  ;;  %3905 = vst [vmem:[#allocation9_spill] sm:$0xff] %v3547_v44 }
 0x120   :  { %3906 = vst [vmem:[#allocation10_spill] sm:$0xff] %v3549_v47  ;;  %v2255_v48 = vpop.f32.mrf.mxu0  ;;  %v3553_v50 = vpop.f32.mrf.mxu1 }
 0x121   :  { %v3551_v49 = vadd.f32 %v2255_v48, %v2254_v46  ;;  %3908 = vst [vmem:[#allocation12_spill] sm:$0xff] %v3553_v50 }
 0x122   :  { %v2337_v51 = vpop.f32.mrf.mxu0  ;;  %v3555_v52 = vpop.f32.mrf.mxu1 }
 0x123   :  { %3907 = vst [vmem:[#allocation11_spill] sm:$0xff] %v3551_v49  ;;  %3909 = vst [vmem:[#allocation13_spill] sm:$0xff] %v3555_v52 }
 0x124   :  { %v2338_v54 = vpop.f32.mrf.mxu0  ;;  %v2401_v55 = vpop.f32.mrf.mxu1 }
 0x126   :  { %v2340_v56 = vpop.f32.mrf.mxu0  ;;  %v2402_v58 = vpop.f32.mrf.mxu1 }
 0x128   :  { %v2341_v59 = vpop.f32.mrf.mxu0  ;;  %v3557_v60 = vpop.f32.mrf.mxu1 }
 0x12a   :  { %v2343_v61 = vpop.f32.mrf.mxu0  ;;  %v2405_v63 = vpop.f32.mrf.mxu1 }
 0x12c   :  { %v2344_v0 = vpop.f32.mrf.mxu0  ;;  %v2407_v1 = vpop.f32.mrf.mxu1 }
 0x12d   :  { %v2345_v7 = vadd.f32 %v2344_v0, %v2343_v61  ;;  %v2406_v61 = vadd.f32 %v2405_v63, %v3557_v60 }
 0x12e   :  { %v2346_v2 = vpop.f32.mrf.mxu0  ;;  %v2408_v4 = vpop.f32.mrf.mxu1 }
 0x130   :  { %v2347_v5 = vpop.f32.mrf.mxu0  ;;  %v2410_v6 = vpop.f32.mrf.mxu1 }
 0x132   :  { %v2349_v8 = vpop.f32.mrf.mxu0  ;;  %v2411_v9 = vpop.f32.mrf.mxu1 }
 0x134   :  { %v2350_v10 = vpop.f32.mrf.mxu0  ;;  %v2413_v11 = vpop.f32.mrf.mxu1 }
 0x136   :  { %v2352_v13 = vpop.f32.mrf.mxu0  ;;  %v2414_v14 = vpop.f32.mrf.mxu1 }
 0x138   :  { %v2353_v15 = vpop.f32.mrf.mxu0  ;;  %v3559_v17 = vpop.f32.mrf.mxu1 }
 0x13a   :  { %v2355_v18 = vpop.f32.mrf.mxu0  ;;  %v3561_v19 = vpop.f32.mrf.mxu1 }
 0x13c   :  { %v2356_v21 = vpop.f32.mrf.mxu0  ;;  %v3563_v22 = vpop.f32.mrf.mxu1 }
 0x13e   :  { %v2358_v23 = vpop.f32.mrf.mxu0  ;;  %v3565_v24 = vpop.f32.mrf.mxu1 }
 0x140   :  { %v2359_v26 = vpop.f32.mrf.mxu0  ;;  %v3567_v27 = vpop.f32.mrf.mxu1 }
 0x142   :  { %v2361_v29 = vpop.f32.mrf.mxu0  ;;  %v3569_v30 = vpop.f32.mrf.mxu1 }
 0x144   :  { %v2362_v31 = vpop.f32.mrf.mxu0  ;;  %v3571_v32 = vpop.f32.mrf.mxu1 }
 0x146   :  { %v3573_v33 = vpop.f32.mrf.mxu0  ;;  %v3575_v35 = vpop.f32.mrf.mxu1 }
 0x148   :  { %v3577_v37 = vpop.f32.mrf.mxu0  ;;  %v3579_v38 = vpop.f32.mrf.mxu1 }
 0x149   :  { %3910 = vst [vmem:[#allocation14_spill] sm:$0xff] %v3579_v38 }
 0x14a   :  { %v3581_v39 = vpop.f32.mrf.mxu0  ;;  %v3583_v40 = vpop.f32.mrf.mxu1 }
 0x14b   :  { %3911 = vst [vmem:[#allocation15_spill] sm:$0xff] %v3583_v40  ;;  %v2339_v40 = vadd.f32 %v2338_v54, %v2337_v51 }
 0x14c   :  { %v3585_v46 = vpop.f32.mrf.mxu0  ;;  %v3587_v48 = vpop.f32.mrf.mxu1 }
 0x14d   :  { %3912 = vst [vmem:[#allocation16_spill] sm:$0xff] %v3587_v48 }
 0x14e   :  { %v3589_v44 = vpop.f32.mrf.mxu0  ;;  %v3593_v25 = vpop.f32.mrf.mxu1 }
 0x14f   :  { %3914 = vst [vmem:[#allocation18_spill] sm:$0xff] %v3593_v25 }
 0x150   :  { %v3591_v34 = vpop.f32.mrf.mxu0  ;;  %v3599_v49 = vpop.f32.mrf.mxu1 }
 0x151   :  { %3913 = vst [vmem:[#allocation17_spill] sm:$0xff] %v3591_v34  ;;  %3917 = vst [vmem:[#allocation21_spill] sm:$0xff] %v3599_v49  ;;  %v2342_v49 = vadd.f32 %v2341_v59, %v2340_v56  ;;  %v2351_v34 = vadd.f32 %v2350_v10, %v2349_v8  ;;  %v2415_v59 = vadd.f32 %v2414_v14, %v2413_v11 }
 0x152   :  { %v3595_v52 = vpop.f32.mrf.mxu0  ;;  %v3605_v42 = vpop.f32.mrf.mxu1 }
 0x153   :  { %3915 = vst [vmem:[#allocation19_spill] sm:$0xff] %v3595_v52  ;;  %3920 = vst [vmem:[#allocation24_spill] sm:$0xff] %v3605_v42  ;;  %v2403_v52 = vadd.f32 %v2402_v58, %v2401_v55  ;;  %v2409_v42 = vadd.f32 %v2408_v4, %v2407_v1  ;;  %v1293_v54 = vadd.f32 %v2342_v49, %v3495_v3 }
 0x154   :  { %v3597_v50 = vpop.f32.mrf.mxu0  ;;  %v3611_v48 = vpop.f32.mrf.mxu1  ;;  %v2412_v55 = vadd.f32 %v2411_v9, %v2410_v6  ;;  %v1306_v58 = vadd.f32 %v2351_v34, %v3516_v28  ;;  %v2354_v4 = vadd.f32 %v2353_v15, %v2352_v13  ;;  %v2421_v34 = vadd.f32 %v3565_v24, %v3563_v22 }
 0x155   :  { %3916 = vst [vmem:[#allocation20_spill] sm:$0xff] %v3597_v50  ;;  %v1290_v50 = vadd.f32 %v2339_v40, %v3483_v57  ;;  %v1390_v49 = vadd.f32 %v2406_v61, %v1293_v54  ;;  %v2418_v6 = vadd.f32 %v3561_v19, %v3559_v17  ;;  %v2424_v13 = vadd.f32 %v3569_v30, %v3567_v27 }
 0x156   :  { %v3601_v47 = vpop.f32.mrf.mxu0  ;;  %v1403_v63 = vadd.f32 %v2415_v59, %v1306_v58  ;;  %v2427_v15 = vadd.f32 %v3575_v35, %v3571_v32  ;;  %v2369_v17 = vadd.f32 %v3585_v46, %v3581_v39  ;;  %v3924_v32 = vld [vmem:[#allocation4_spill] sm:$0xff]  ;;  %v3930_v58 = vld [vmem:[#allocation14_spill] sm:$0xff] }
 0x157   :  { %3918 = vst [vmem:[#allocation22_spill] sm:$0xff] %v3601_v47  ;;  %v2348_v47 = vadd.f32 %v2347_v5, %v2346_v2  ;;  %v1387_v0 = vadd.f32 %v2403_v52, %v1290_v50  ;;  %v1309_v5 = vadd.f32 %v2354_v4, %v3519_v36  ;;  %v3933_v4 = vld [vmem:[#allocation7_spill] sm:$0xff] }
 0x158   :  { %v3603_v43 = vpop.f32.mrf.mxu0  ;;  %v3923_v27 = vld [vmem:[#allocation17_spill] sm:$0xff]  ;;  %v1330_v35 = vadd.f32 %v2369_v17, %v3924_v32 }
 0x159   :  { %3919 = vst [vmem:[#allocation23_spill] sm:$0xff] %v3603_v43  ;;  %v1298_v43 = vadd.f32 %v2345_v7, %v3505_v12  ;;  %v1301_v57 = vadd.f32 %v2348_v47, %v3512_v20  ;;  %v2357_v12 = vadd.f32 %v2356_v21, %v2355_v18  ;;  %v2360_v20 = vadd.f32 %v2359_v26, %v2358_v23 }
 0x15a   :  { %v3607_v41 = vpop.f32.mrf.mxu0  ;;  %v3927_v40 = vld [vmem:[#allocation19_spill] sm:$0xff] }
 0x15b   :  { %3921 = vst [vmem:[#allocation25_spill] sm:$0xff] %v3607_v41  ;;  %v3619_v41 = vpop.f32.mrf.mxu1  ;;  %v1395_v1 = vadd.f32 %v2409_v42, %v1298_v43  ;;  %v1398_v47 = vadd.f32 %v2412_v55, %v1301_v57  ;;  %v1314_v28 = vadd.f32 %v2357_v12, %v3522_v45  ;;  %v2363_v42 = vadd.f32 %v2362_v31, %v2361_v29  ;;  %v3929_v57 = vld [vmem:[#allocation3_spill] sm:$0xff] }
 0x15c   :  { %v3609_v38 = vpop.f32.mrf.mxu0  ;;  %v1317_v11 = vadd.f32 %v2360_v20, %v3525_v53  ;;  %v2366_v53 = vadd.f32 %v3577_v37, %v3573_v33  ;;  %v2372_v29 = vadd.f32 %v3923_v27, %v3589_v44  ;;  %v3925_v33 = vld [vmem:[#allocation16_spill] sm:$0xff]  ;;  %v3926_v37 = vld [vmem:[#allocation18_spill] sm:$0xff]  ;;  %v3931_v44 = vld [vmem:[#allocation15_spill] sm:$0xff]  ;;  %v2439_v17 = vadd.f32 %v3619_v41, %v3611_v48 }
 0x15d   :  { %v3627_v7 = vpop.f32.mrf.mxu1  ;;  %v1322_v36 = vadd.f32 %v2363_v42, %v3528_v62  ;;  %v1411_v19 = vadd.f32 %v2421_v34, %v1314_v28  ;;  %v1406_v62 = vadd.f32 %v2418_v6, %v1309_v5  ;;  %v2433_v39 = vadd.f32 %v3926_v37, %v3925_v33  ;;  %v3928_v46 = vld [vmem:[#allocation20_spill] sm:$0xff]  ;;  %v3939_v6 = vld [vmem:[#allocation5_spill] sm:$0xff] }
 0x15e   :  { %v3613_v25 = vpop.f32.mrf.mxu0  ;;  %v1414_v30 = vadd.f32 %v2424_v13, %v1317_v11  ;;  %v1325_v55 = vadd.f32 %v2366_v53, %v3929_v57  ;;  %v2430_v59 = vadd.f32 %v3931_v44, %v3930_v58  ;;  %v3947_v44 = vld [vmem:[#allocation9_spill] sm:$0xff] }
 0x15f   :  { %3922 = vst [vmem:[#allocation26_spill] sm:$0xff] %v3613_v25  ;;  %v3638_v43 = vpop.f32.mrf.mxu1 }
 0x160   :  { %v3616_v16 = vpop.f32.mrf.mxu0  ;;  %v1422_v32 = vadd.f32 %v2430_v59, %v1325_v55 }
 0x161   :  { %v2443_v18 = vpop.f32.mrf.mxu1 }
 0x162   :  { %v2531_v51 = vpop.f32.mrf.mxu0 }
 0x163   :  { %v3631_v50 = vadd.f32 %v2531_v51, %v1395_v1  ;;  %v2375_v51 = vadd.f32 %v3928_v46, %v3927_v40  ;;  %v2444_v54 = vpop.f32.mrf.mxu1 }
 0x164   :  { %v1483_v25 = vpop.f32.mrf.mxu0 }
 0x165   :  { %v3624_v56 = vadd.f32 %v1483_v25, %v1387_v0  ;;  %v1780_v45 = vmul.f32 %v3631_v50, %v3631_v50  ;;  %v1419_v0 = vadd.f32 %v2427_v15, %v1322_v36  ;;  %v3942_v36 = vld [vmem:[#allocation6_spill] sm:$0xff]  ;;  %v2446_v53 = vpop.f32.mrf.mxu1 }
 0x166   :  { %v2532_v2 = vpop.f32.mrf.mxu0  ;;  %v1338_v15 = vadd.f32 %v2375_v51, %v3942_v36  ;;  %v3946_v48 = vld [vmem:[#allocation26_spill] sm:$0xff]  ;;  %v2445_v51 = vadd.f32 %v2444_v54, %v2443_v18 }
 0x167   :  { %v1778_v3 = vmul.f32 %v3624_v56, %v3624_v56  ;;  %v3643_v8 = vadd.f32 %v2532_v2, %v1398_v47  ;;  %v3932_v2 = vld [vmem:[#allocation2_spill] sm:$0xff]  ;;  %v3936_v47 = vld [vmem:[#allocation11_spill] sm:$0xff] }
 0x168   :  { %v1486_v52 = vpop.f32.mrf.mxu0  ;;  %v1155_v28 = vadd.f32 %v3936_v47, %v3932_v2  ;;  %v1435_v58 = vadd.f32 %v2439_v17, %v1338_v15 }
 0x169   :  { %v3633_v25 = vadd.f32 %v1486_v52, %v1390_v49  ;;  %2609 = vmatprep.mubr.f32.mxu0 %v1778_v3  ;;  %v1781_v22 = vmul.f32 %v3643_v8, %v3643_v8  ;;  %v1152_v3 = vadd.f32 %v3933_v4, %v3932_v2  ;;  %v3934_v49 = vld [vmem:[#allocation8_spill] sm:$0xff]  ;;  %v3935_v52 = vld [vmem:[#allocation10_spill] sm:$0xff] }
 0x16a   :  { %v2535_v60 = vpop.f32.mrf.mxu0  ;;  %v2317_v20 = vadd.f32 %v3935_v52, %v3934_v49 }
 0x16b   :  { %v1779_v9 = vmul.f32 %v3633_v25, %v3633_v25  ;;  %v3665_v24 = vadd.f32 %v2535_v60, %v1411_v19  ;;  %v3937_v60 = vld [vmem:[#allocation12_spill] sm:$0xff]  ;;  %v3943_v19 = vld [vmem:[#allocation25_spill] sm:$0xff] }
 0x16c   :  { %v1499_v10 = vpop.f32.mrf.mxu0  ;;  %v1249_v33 = vadd.f32 %v2317_v20, %v1152_v3 }
 0x16d   :  { %v3652_v14 = vadd.f32 %v1499_v10, %v1403_v63  ;;  %2610 = vmatmul.mubr.f32.vlgmr.msra.gmra.mxu0 %v1779_v9  ;;  %v1784_v34 = vmul.f32 %v3665_v24, %v3665_v24  ;;  %v3938_v63 = vld [vmem:[#allocation13_spill] sm:$0xff]  ;;  %v1333_v9 = vadd.f32 %v2372_v29, %v3939_v6  ;;  %v3941_v10 = vld [vmem:[#allocation24_spill] sm:$0xff] }
 0x16e   :  { %v2536_v21 = vpop.f32.mrf.mxu0  ;;  %2612 = vmatprep.mubr.f32.mxu0 %v1780_v45  ;;  %v2320_v5 = vadd.f32 %v3938_v63, %v3937_v60  ;;  %v3940_v45 = vld [vmem:[#allocation21_spill] sm:$0xff] }
 0x16f   :  { %v1782_v23 = vmul.f32 %v3652_v14, %v3652_v14  ;;  %v3679_v12 = vadd.f32 %v2536_v21, %v1414_v30  ;;  %v2436_v11 = vadd.f32 %v3941_v10, %v3940_v45  ;;  %v2381_v21 = vadd.f32 %v3609_v38, %v3943_v19 }
 0x170   :  { %v1502_v26 = vpop.f32.mrf.mxu0  ;;  %v2384_v38 = vadd.f32 %v3616_v16, %v3946_v48  ;;  %v1252_v40 = vadd.f32 %v2320_v5, %v1155_v28 }
 0x171   :  { %v3669_v31 = vadd.f32 %v1502_v26, %v1406_v62  ;;  %2613 = vmatmul.mubr.f32.gmra.mxu0 %v1781_v22  ;;  %v1427_v22 = vadd.f32 %v2433_v39, %v1330_v35  ;;  %v3944_v62 = vld [vmem:[#allocation22_spill] sm:$0xff]  ;;  %v3945_v26 = vld [vmem:[#allocation23_spill] sm:$0xff]  ;;  %v1785_v29 = vmul.f32 %v3679_v12, %v3679_v12  ;;  %v1430_v35 = vadd.f32 %v2436_v11, %v1333_v9 }
 0x172   :  { %v2539_v61 = vpop.f32.mrf.mxu0  ;;  %2615 = vmatprep.mubr.f32.mxu0 %v1782_v23  ;;  %v2378_v27 = vadd.f32 %v3945_v26, %v3944_v62  ;;  %v1346_v46 = vadd.f32 %v2381_v21, %v1249_v33  ;;  %v1349_v4 = vadd.f32 %v2384_v38, %v1252_v40 }
 0x173   :  { %v1783_v1 = vmul.f32 %v3669_v31, %v3669_v31  ;;  %v3709_v37 = vadd.f32 %v2539_v61, %v1427_v22  ;;  %v2442_v61 = vadd.f32 %v3638_v43, %v3627_v7  ;;  %v3761_v22 = vld [vmem:[%s3893_s7] ss:$0 sm:$0xff] }
 0x174   :  { %v1515_v42 = vpop.f32.mrf.mxu0  ;;  %v1341_v55 = vadd.f32 %v2378_v27, %v3947_v44  ;;  %v1443_v54 = vadd.f32 %v2445_v51, %v1346_v46  ;;  %v3781_v44 = vld [vmem:[%s3894_s5] ss:$0 sm:$0xff] }
 0x175   :  { %v3696_v13 = vadd.f32 %v1515_v42, %v1419_v0  ;;  %2616 = vmatmul.mubr.f32.gmra.mxu0 %v1783_v1  ;;  %v2447_v0 = vpop.f32.mrf.mxu1  ;;  %v1788_v1 = vmul.f32 %v3709_v37, %v3709_v37 }
 0x176   :  { %v2540_v23 = vpop.f32.mrf.mxu0  ;;  %2618 = vmatprep.mubr.f32.mxu0 %v1784_v34  ;;  %v2448_v3 = vadd.f32 %v2447_v0, %v2446_v53  ;;  %v1438_v52 = vadd.f32 %v2442_v61, %v1341_v55 }
 0x177   :  { %v1786_v30 = vmul.f32 %v3696_v13, %v3696_v13  ;;  %v3718_v59 = vadd.f32 %v2540_v23, %v1430_v35  ;;  %v3742_v6 = vpop.f32.mrf.mxu1 }
 0x178   :  { %v1518_v41 = vpop.f32.mrf.mxu0  ;;  %v1446_v28 = vadd.f32 %v2448_v3, %v1349_v4 }
 0x179   :  { %v3713_v39 = vadd.f32 %v1518_v41, %v1422_v32  ;;  %2619 = vmatmul.mubr.f32.gmra.mxu0 %v1785_v29  ;;  %2621 = vmatprep.mubr.f32.mxu1 %v1786_v30  ;;  %v1789_v7 = vmul.f32 %v3718_v59, %v3718_v59  ;;  %v1715_v9 = vpop.f32.mrf.mxu1 }
 0x17a   :  { %v2543_v57 = vpop.f32.mrf.mxu0 }
 0x17b   :  { %v1787_v16 = vmul.f32 %v3713_v39, %v3713_v39  ;;  %v3730_v20 = vadd.f32 %v2543_v57, %v1443_v54  ;;  %v2564_v45 = vpop.f32.mrf.mxu1 }
 0x17c   :  { %v1531_v2 = vpop.f32.mrf.mxu0 }
 0x17d   :  { %v3724_v18 = vadd.f32 %v1531_v2, %v1435_v58  ;;  %2622 = vmatmul.mubr.f32.vlgmr.msra.gmra.mxu1 %v1787_v16  ;;  %v1792_v63 = vmul.f32 %v3730_v20, %v3730_v20  ;;  %v1718_v10 = vpop.f32.mrf.mxu1 }
 0x17e   :  { %v2544_v49 = vpop.f32.mrf.mxu0  ;;  %2624 = vmatprep.mubr.f32.mxu1 %v1788_v1  ;;  %v1719_v4 = vadd.f32 %v3781_v44, %v1718_v10 }
 0x17f   :  { %v1790_v43 = vmul.f32 %v3724_v18, %v3724_v18  ;;  %v3734_v42 = vadd.f32 %v2544_v49, %v1446_v28  ;;  %v3744_v11 = vpop.f32.mrf.mxu1 }
 0x180   :  { %v1534_v47 = vpop.f32.mrf.mxu0 }
 0x181   :  { %v3732_v34 = vadd.f32 %v1534_v47, %v1438_v52  ;;  %2625 = vmatmul.mubr.f32.gmra.mxu1 %v1789_v7  ;;  %v1793_v5 = vmul.f32 %v3734_v42, %v3734_v42  ;;  %v3746_v36 = vpop.f32.mrf.mxu1  ;;  %v1716_v7 = vadd.f32 %v3781_v44, %v1715_v9 }
 0x182   :  { %2627 = vmatprep.mubr.f32.mxu1 %v1790_v43 }
 0x183   :  { %v1791_v60 = vmul.f32 %v3732_v34, %v3732_v34  ;;  %v3748_v15 = vpop.f32.mrf.mxu1 }
 0x185   :  { %2628 = vmatmul.mubr.f32.gmra.mxu1 %v1791_v60  ;;  %v3750_v17 = vpop.f32.mrf.mxu1 }
 0x186   :  { %2630 = vmatprep.mubr.f32.mxu1 %v1792_v63  ;;  %v1727_v63 = vadd.f32 %v2564_v45, %v3781_v44 }
 0x187   :  { %v3752_v19 = vpop.f32.mrf.mxu1 }
 0x189   :  { %2631 = vmatmul.mubr.f32.gmra.mxu1 %v1793_v5  ;;  %v3754_v21 = vpop.f32.mrf.mxu1 }
 0x18b   :  { %v3756_v53 = vpop.f32.mrf.mxu1 }
 0x18d   :  { %v3763_v23 = vpop.f32.mrf.mxu1 }
 0x18f   :  { %v3766_v29 = vpop.f32.mrf.mxu1 }
 0x191   :  { %v3770_v41 = vpop.f32.mrf.mxu1 }
 0x193   :  { %v3774_v46 = vpop.f32.mrf.mxu1 }
 0x195   :  { %v3783_v55 = vpop.f32.mrf.mxu1 }
 0x22d   :  { %v2611_v62 = vpop.f32.mrf.mxu0 }
 0x22e   :  { %v1889_v26 = vadd.f32 %v2611_v62, %v3761_v22 }
 0x22f   :  { %v1883_v27 = vpop.f32.mrf.mxu0 }
 0x230   :  { %2857 = vrsqrt.f32 %v1889_v26  ;;  %v1884_v30 = vadd.f32 %v3761_v22, %v1883_v27 }
 0x231   :  { %v2614_v32 = vpop.f32.mrf.mxu0 }
 0x232   :  { %2859 = vrsqrt.f32 %v1884_v30  ;;  %v1899_v33 = vadd.f32 %v2614_v32, %v3761_v22 }
 0x233   :  { %v1893_v48 = vpop.f32.mrf.mxu0 }
 0x234   :  { %2861 = vrsqrt.f32 %v1899_v33  ;;  %v1894_v38 = vadd.f32 %v3761_v22, %v1893_v48 }
 0x235   :  { %v2617_v35 = vpop.f32.mrf.mxu0 }
 0x236   :  { %2863 = vrsqrt.f32 %v1894_v38  ;;  %v1909_v40 = vadd.f32 %v2617_v35, %v3761_v22 }
 0x237   :  { %v1903_v51 = vpop.f32.mrf.mxu0 }
 0x238   :  { %2865 = vrsqrt.f32 %v1909_v40  ;;  %v1904_v0 = vadd.f32 %v3761_v22, %v1903_v51 }
 0x239   :  { %v2620_v57 = vpop.f32.mrf.mxu0 }
 0x23a   :  { %2867 = vrsqrt.f32 %v1904_v0  ;;  %v1919_v58 = vadd.f32 %v2620_v57, %v3761_v22 }
 0x23b   :  { %v1913_v61 = vpop.f32.mrf.mxu0 }
 0x23c   :  { %2869 = vrsqrt.f32 %v1919_v58  ;;  %v1914_v16 = vadd.f32 %v3761_v22, %v1913_v61 }
 0x23d   :  { %v2858_v1 = vpop.eup %2857  ;;  %v2623_v2 = vpop.f32.mrf.mxu1 }
 0x23e   :  { %v1979_v3 = vmul.f32 %v2858_v1, %v3633_v25  ;;  %2871 = vrsqrt.f32 %v1914_v16  ;;  %v1929_v54 = vadd.f32 %v2623_v2, %v3761_v22 }
 0x23f   :  { %v2860_v49 = vpop.eup %2859  ;;  %v1923_v43 = vpop.f32.mrf.mxu1 }
 0x240   :  { %v1995_v52 = vadd.f32 %v1979_v3, %v1719_v4  ;;  %v1978_v47 = vmul.f32 %v2860_v49, %v3624_v56  ;;  %2873 = vrsqrt.f32 %v1929_v54  ;;  %v1924_v28 = vadd.f32 %v3761_v22, %v1923_v43 }
 0x241   :  { %v2862_v60 = vpop.eup %2861  ;;  %v2626_v5 = vpop.f32.mrf.mxu1  ;;  %v1724_v56 = vadd.f32 %v3742_v6, %v3781_v44  ;;  %v1748_v43 = vadd.f32 %v3781_v44, %v3754_v21  ;;  %v1756_v21 = vadd.f32 %v3752_v19, %v3781_v44  ;;  %v1764_v19 = vadd.f32 %v3781_v44, %v3770_v41 }
 0x242   :  { %2011 = vst [vmem:[%s3895_s8 + $0x8] sm:$0xff] %v1995_v52  ;;  %v1994_v25 = vadd.f32 %v1978_v47, %v1716_v7  ;;  %v1981_v10 = vmul.f32 %v2862_v60, %v3643_v8  ;;  %2875 = vrsqrt.f32 %v1924_v28  ;;  %v1939_v9 = vadd.f32 %v2626_v5, %v3761_v22 }
 0x243   :  { %v2864_v62 = vpop.eup %2863  ;;  %v1933_v26 = vpop.f32.mrf.mxu1  ;;  %v1735_v8 = vadd.f32 %v3781_v44, %v3750_v17  ;;  %v1759_v52 = vadd.f32 %v3756_v53, %v3781_v44  ;;  %v1767_v53 = vadd.f32 %v3781_v44, %v3783_v55  ;;  %v1775_v55 = vadd.f32 %v3774_v46, %v3781_v44 }
 0x244   :  { %2010 = vst [vmem:[%s3895_s8] sm:$0xff] %v1994_v25  ;;  %v1997_v45 = vadd.f32 %v1981_v10, %v1727_v63  ;;  %v1980_v27 = vmul.f32 %v2864_v62, %v3631_v50  ;;  %2877 = vrsqrt.f32 %v1939_v9  ;;  %v1934_v30 = vadd.f32 %v3761_v22, %v1933_v26 }
 0x245   :  { %v2866_v32 = vpop.eup %2865  ;;  %v2629_v33 = vpop.f32.mrf.mxu1  ;;  %v1732_v50 = vadd.f32 %v3781_v44, %v3746_v36  ;;  %v1772_v41 = vadd.f32 %v3766_v29, %v3781_v44 }
 0x246   :  { %2013 = vst [vmem:[%s3895_s8 + $0x18] sm:$0xff] %v1997_v45  ;;  %v1996_v6 = vadd.f32 %v1980_v27, %v1724_v56  ;;  %v1983_v48 = vmul.f32 %v2866_v32, %v3669_v31  ;;  %2879 = vrsqrt.f32 %v1934_v30  ;;  %v1949_v38 = vadd.f32 %v2629_v33, %v3761_v22 }
 0x247   :  { %v2868_v35 = vpop.eup %2867  ;;  %v1943_v40 = vpop.f32.mrf.mxu1  ;;  %v1743_v31 = vadd.f32 %v3748_v15, %v3781_v44 }
 0x248   :  { %2012 = vst [vmem:[%s3895_s8 + $0x10] sm:$0xff] %v1996_v6  ;;  %v1999_v17 = vadd.f32 %v1983_v48, %v1735_v8  ;;  %v1982_v51 = vmul.f32 %v2868_v35, %v3652_v14  ;;  %2881 = vrsqrt.f32 %v1949_v38  ;;  %v1944_v0 = vadd.f32 %v3761_v22, %v1943_v40 }
 0x249   :  { %v2870_v57 = vpop.eup %2869  ;;  %v2632_v58 = vpop.f32.mrf.mxu1  ;;  %v1740_v14 = vadd.f32 %v3744_v11, %v3781_v44 }
 0x24a   :  { %2015 = vst [vmem:[%s3895_s8 + $0x28] sm:$0xff] %v1999_v17  ;;  %v1998_v36 = vadd.f32 %v1982_v51, %v1732_v50  ;;  %v1985_v61 = vmul.f32 %v2870_v57, %v3679_v12  ;;  %2883 = vrsqrt.f32 %v1944_v0  ;;  %v1959_v16 = vadd.f32 %v2632_v58, %v3761_v22 }
 0x24b   :  { %v2872_v1 = vpop.eup %2871  ;;  %v1953_v2 = vpop.f32.mrf.mxu1  ;;  %v1751_v12 = vadd.f32 %v3781_v44, %v3763_v23 }
 0x24c   :  { %2014 = vst [vmem:[%s3895_s8 + $0x20] sm:$0xff] %v1998_v36  ;;  %v2001_v15 = vadd.f32 %v1985_v61, %v1743_v31  ;;  %v1984_v4 = vmul.f32 %v2872_v1, %v3665_v24  ;;  %2885 = vrsqrt.f32 %v1959_v16  ;;  %v1954_v3 = vadd.f32 %v3761_v22, %v1953_v2 }
 0x24d   :  { %v2874_v54 = vpop.eup %2873 }
 0x24e   :  { %2017 = vst [vmem:[%s3895_s8 + $0x38] sm:$0xff] %v2001_v15  ;;  %v2000_v11 = vadd.f32 %v1984_v4, %v1740_v14  ;;  %v1987_v49 = vmul.f32 %v2874_v54, %v3713_v39  ;;  %2887 = vrsqrt.f32 %v1954_v3 }
 0x24f   :  { %v2876_v7 = vpop.eup %2875 }
 0x250   :  { %2016 = vst [vmem:[%s3895_s8 + $0x30] sm:$0xff] %v2000_v11  ;;  %v2003_v24 = vadd.f32 %v1987_v49, %v1751_v12  ;;  %v1986_v22 = vmul.f32 %v2876_v7, %v3696_v13 }
 0x251   :  { %v2878_v23 = vpop.eup %2877 }
 0x252   :  { %2019 = vst [vmem:[%s3895_s8 + $0x48] sm:$0xff] %v2003_v24  ;;  %v2002_v39 = vadd.f32 %v1986_v22, %v1748_v43  ;;  %v1989_v47 = vmul.f32 %v2878_v23, %v3718_v59 }
 0x253   :  { %v2880_v28 = vpop.eup %2879 }
 0x254   :  { %2018 = vst [vmem:[%s3895_s8 + $0x40] sm:$0xff] %v2002_v39  ;;  %v2005_v13 = vadd.f32 %v1989_v47, %v1759_v52  ;;  %v1988_v60 = vmul.f32 %v2880_v28, %v3709_v37 }
 0x255   :  { %v2882_v63 = vpop.eup %2881 }
 0x256   :  { %2021 = vst [vmem:[%s3895_s8 + $0x58] sm:$0xff] %v2005_v13  ;;  %v2004_v59 = vadd.f32 %v1988_v60, %v1756_v21  ;;  %v1991_v5 = vmul.f32 %v2882_v63, %v3732_v34 }
 0x257   :  { %v2884_v25 = vpop.eup %2883 }
 0x258   :  { %2020 = vst [vmem:[%s3895_s8 + $0x50] sm:$0xff] %v2004_v59  ;;  %v2007_v37 = vadd.f32 %v1991_v5, %v1767_v53  ;;  %v1990_v10 = vmul.f32 %v2884_v25, %v3724_v18 }
 0x259   :  { %v2886_v9 = vpop.eup %2885 }
 0x25a   :  { %2023 = vst [vmem:[%s3895_s8 + $0x68] sm:$0xff] %v2007_v37  ;;  %v2006_v34 = vadd.f32 %v1990_v10, %v1764_v19  ;;  %v1993_v62 = vmul.f32 %v2886_v9, %v3734_v42 }
 0x25b   :  { %v2888_v56 = vpop.eup %2887 }
 0x25c   :  { %2022 = vst [vmem:[%s3895_s8 + $0x60] sm:$0xff] %v2006_v34  ;;  %v2009_v18 = vadd.f32 %v1993_v62, %v1775_v55  ;;  %v1992_v26 = vmul.f32 %v2888_v56, %v3730_v20 }
 0x25e   :  { %2025 = vst [vmem:[%s3895_s8 + $0x78] sm:$0xff] %v2009_v18  ;;  %v2008_v46 = vadd.f32 %v1992_v26, %v1772_v41 }
 0x260   :  { %2024 = vst [vmem:[%s3895_s8 + $0x70] sm:$0xff] %v2008_v46 }

// kernel: reference_encoder_pallas.11
= control target key start
LH: loop header
LB: loop body
LE: loop exit
PB: predicated region body
PF: predicated region fallthrough
CT: control target
= control target key end

     0   :  { %s1611_s1 = inlined_call_operand.vmem [shape: bf16[1152,128], index: 1, kind: input, shape index: {}]   ;;  %s1612_s0 = inlined_call_operand.vmem [shape: bf16[32,1152], index: 0, kind: input, shape index: {}]   ;;  %s1613_s2 = inlined_call_operand.vmem [shape: f32[1,128], index: 2, kind: input, shape index: {}]   ;;  %s1614_s3 = inlined_call_operand.vmem [shape: f32[32,128], index: 3, kind: output, shape index: {}]  }
   0x1   :  { %v1208_v0 = vld [vmem:[%s1611_s1 + $0x78] sm:$0xff]   ;;  %v1212_v4 = vld [vmem:[%s1611_s1 + $0x70] sm:$0xff]   ;;  %v1216_v8 = vld [vmem:[%s1611_s1 + $0x68] sm:$0xff]  }
   0x2   :  { %v1209_v1 = vld [vmem:[%s1611_s1 + $0x38] sm:$0xff]   ;;  %1066 = vmatprep.subr.bf16.mxu0 %v1208_v0  ;;  %v1213_v5 = vld [vmem:[%s1611_s1 + $0x30] sm:$0xff]   ;;  %v1217_v9 = vld [vmem:[%s1611_s1 + $0x28] sm:$0xff]  }
   0x3   :  { %v1210_v2 = vld [vmem:[%s1611_s1 + $0xf8] sm:$0xff]   ;;  %1067 = vmatpush3.bf16.msra.mxu0 %v1209_v1  ;;  %v1214_v6 = vld [vmem:[%s1611_s1 + $0xf0] sm:$0xff]   ;;  %v1218_v10 = vld [vmem:[%s1611_s1 + $0xe8] sm:$0xff]  }
   0x4   :  { %v1211_v3 = vld [vmem:[%s1611_s1 + $0xb8] sm:$0xff]   ;;  %1094 = vmatprep.subr.bf16.mxu1 %v1210_v2  ;;  %1068 = vmatprep.subr.bf16.mxu0 %v1212_v4  ;;  %v1215_v7 = vld [vmem:[%s1611_s1 + $0xb0] sm:$0xff]   ;;  %v1219_v11 = vld [vmem:[%s1611_s1 + $0xa8] sm:$0xff]  }
   0x5   :  { %1095 = vmatpush3.bf16.msra.mxu1 %v1211_v3  ;;  %v1220_v12 = vld [vmem:[%s1611_s1 + $0x60] sm:$0xff]   ;;  %v1224_v16 = vld [vmem:[%s1611_s1 + $0x58] sm:$0xff]   ;;  %v1228_v20 = vld [vmem:[%s1611_s1 + $0x50] sm:$0xff]  }
   0x6   :  { %1096 = vmatprep.subr.bf16.mxu1 %v1214_v6  ;;  %v1221_v13 = vld [vmem:[%s1611_s1 + $0x20] sm:$0xff]   ;;  %v1225_v17 = vld [vmem:[%s1611_s1 + $0x18] sm:$0xff]   ;;  %v1229_v21 = vld [vmem:[%s1611_s1 + $0x10] sm:$0xff]  }
   0x7   :  { %1069 = vmatpush3.bf16.msra.mxu0 %v1213_v5  ;;  %v1222_v14 = vld [vmem:[%s1611_s1 + $0xe0] sm:$0xff]   ;;  %v1226_v18 = vld [vmem:[%s1611_s1 + $0xd8] sm:$0xff]   ;;  %v1230_v22 = vld [vmem:[%s1611_s1 + $0xd0] sm:$0xff]  }
   0x8   :  { %1070 = vmatprep.subr.bf16.mxu0 %v1216_v8  ;;  %v1223_v15 = vld [vmem:[%s1611_s1 + $0xa0] sm:$0xff]   ;;  %v1227_v19 = vld [vmem:[%s1611_s1 + $0x98] sm:$0xff]   ;;  %v1231_v23 = vld [vmem:[%s1611_s1 + $0x90] sm:$0xff]  }
   0x9   :  { %1097 = vmatpush3.bf16.msra.mxu1 %v1215_v7  ;;  %v1232_v24 = vld [vmem:[%s1611_s1 + $0x48] sm:$0xff]   ;;  %v1236_v28 = vld [vmem:[%s1611_s1 + $0x40] sm:$0xff]   ;;  %v1243_v34 = vld [vmem:[%s1611_s1 + $0x178] sm:$0xff]  }
   0xa   :  { %1098 = vmatprep.subr.bf16.mxu1 %v1218_v10  ;;  %v1233_v25 = vld [vmem:[%s1611_s1 + $0x8] sm:$0xff]   ;;  %v1237_v29 = vld [vmem:[%s1611_s1] sm:$0xff]   ;;  %v1247_v37 = vld [vmem:[%s1611_s1 + $0x138] sm:$0xff]  }
   0xb   :  { %1071 = vmatpush3.bf16.msra.mxu0 %v1217_v9  ;;  %v1234_v26 = vld [vmem:[%s1611_s1 + $0xc8] sm:$0xff]   ;;  %v1238_v30 = vld [vmem:[%s1611_s1 + $0xc0] sm:$0xff]   ;;  %v1248_v38 = vld [vmem:[%s1611_s1 + $0x1f8] sm:$0xff]  }
   0xc   :  { %1072 = vmatprep.subr.bf16.mxu0 %v1220_v12  ;;  %v1235_v27 = vld [vmem:[%s1611_s1 + $0x88] sm:$0xff]   ;;  %v1239_v31 = vld [vmem:[%s1612_s0] ss:$36 sps:$4 sm:$0xff]   ;;  %v1249_v39 = vld [vmem:[%s1611_s1 + $0x1b8] sm:$0xff]  }
   0xd   :  { %1099 = vmatpush3.bf16.msra.mxu1 %v1219_v11  ;;  %v1241_v32 = vld [vmem:[%s1612_s0 + $0x4] ss:$36 sps:$4 sm:$0xff]   ;;  %v1246_v36 = vld [vmem:[%s1612_s0 + $0xc] ss:$36 sps:$4 sm:$0xff]   ;;  %v1262_v52 = vld [vmem:[%s1611_s1 + $0x158] sm:$0xff]  }
   0xe   :  { %1100 = vmatprep.subr.bf16.mxu1 %v1222_v14  ;;  %v1242_v33 = vld [vmem:[%s1611_s1 + $0x80] sm:$0xff]   ;;  %742 = vmatprep.mubr.bf16.mxu0 %v1241_v32  ;;  %v1244_v35 = vld [vmem:[%s1612_s0 + $0x8] ss:$36 sps:$4 sm:$0xff]   ;;  %v1250_v40 = vld [vmem:[%s1611_s1 + $0x170] sm:$0xff]  }
   0xf   :  { %1073 = vmatpush3.bf16.msra.mxu0 %v1221_v13  ;;  %791 = vmatprep.mubr.bf16.mxu1 %v1246_v36  ;;  %v1251_v41 = vld [vmem:[%s1611_s1 + $0x130] sm:$0xff]   ;;  %v1254_v44 = vld [vmem:[%s1611_s1 + $0x168] sm:$0xff]   ;;  %v1258_v48 = vld [vmem:[%s1611_s1 + $0x160] sm:$0xff]  }
  0x10   :  { %1074 = vmatprep.subr.bf16.mxu0 %v1224_v16  ;;  %v1252_v42 = vld [vmem:[%s1611_s1 + $0x1f0] sm:$0xff]   ;;  %v1255_v45 = vld [vmem:[%s1611_s1 + $0x128] sm:$0xff]   ;;  %v1259_v49 = vld [vmem:[%s1611_s1 + $0x120] sm:$0xff]  }
  0x11   :  { %1101 = vmatpush3.bf16.msra.mxu1 %v1223_v15  ;;  %v1253_v43 = vld [vmem:[%s1611_s1 + $0x1b0] sm:$0xff]   ;;  %v1256_v46 = vld [vmem:[%s1611_s1 + $0x1e8] sm:$0xff]   ;;  %v1260_v50 = vld [vmem:[%s1611_s1 + $0x1e0] sm:$0xff]  }
  0x12   :  { %1102 = vmatprep.subr.bf16.mxu1 %v1226_v18  ;;  %v1257_v47 = vld [vmem:[%s1611_s1 + $0x1a8] sm:$0xff]   ;;  %v1261_v51 = vld [vmem:[%s1611_s1 + $0x1a0] sm:$0xff]   ;;  %v1263_v53 = vld [vmem:[%s1611_s1 + $0x118] sm:$0xff]  }
  0x13   :  { %1075 = vmatpush3.bf16.msra.mxu0 %v1225_v17  ;;  %v1264_v54 = vld [vmem:[%s1612_s0 + $0x4c] ss:$36 sps:$4 sm:$0xff]   ;;  %v1266_v55 = vld [vmem:[%s1611_s1 + $0x1d8] sm:$0xff]   ;;  %v1280_v4 = vld [vmem:[%s1611_s1 + $0x140] sm:$0xff]  }
  0x14   :  { %1076 = vmatprep.subr.bf16.mxu0 %v1228_v20  ;;  %v1267_v56 = vld [vmem:[%s1612_s0 + $0x48] ss:$36 sps:$4 sm:$0xff]   ;;  %v1268_v57 = vld [vmem:[%s1611_s1 + $0x198] sm:$0xff]   ;;  %v1271_v59 = vld [vmem:[%s1611_s1 + $0x150] sm:$0xff]  }
  0x15   :  { %1103 = vmatpush3.bf16.msra.mxu1 %v1227_v19  ;;  %v1269_v58 = vld [vmem:[%s1612_s0 + $0x54] ss:$36 sps:$4 sm:$0xff]   ;;  %v1276_v0 = vld [vmem:[%s1611_s1 + $0x148] sm:$0xff]   ;;  %v1281_v5 = vld [vmem:[%s1611_s1 + $0x100] sm:$0xff]  }
  0x16   :  { %1104 = vmatprep.subr.bf16.mxu1 %v1230_v22  ;;  %v1272_v60 = vld [vmem:[%s1612_s0 + $0x50] ss:$36 sps:$4 sm:$0xff]   ;;  %v1277_v1 = vld [vmem:[%s1611_s1 + $0x108] sm:$0xff]   ;;  %v1282_v6 = vld [vmem:[%s1611_s1 + $0x1c0] sm:$0xff]  }
  0x17   :  { %1077 = vmatpush3.bf16.msra.mxu0 %v1229_v21  ;;  %v1273_v61 = vld [vmem:[%s1611_s1 + $0x110] sm:$0xff]   ;;  %v1278_v2 = vld [vmem:[%s1611_s1 + $0x1c8] sm:$0xff]   ;;  %v1286_v9 = vld [vmem:[%s1611_s1 + $0x180] sm:$0xff]  }
  0x18   :  { %1078 = vmatprep.subr.bf16.mxu0 %v1232_v24  ;;  %v1274_v62 = vld [vmem:[%s1611_s1 + $0x1d0] sm:$0xff]   ;;  %v1279_v3 = vld [vmem:[%s1611_s1 + $0x188] sm:$0xff]   ;;  %v1287_v10 = vld [vmem:[%s1611_s1 + $0x238] sm:$0xff]  }
  0x19   :  { %1105 = vmatpush3.bf16.msra.mxu1 %v1231_v23  ;;  %v1275_v63 = vld [vmem:[%s1611_s1 + $0x190] sm:$0xff]   ;;  %v1288_v11 = vld [vmem:[%s1612_s0 + $0x18] ss:$36 sps:$4 sm:$0xff]   ;;  %v1295_v16 = vld [vmem:[%s1611_s1 + $0x228] sm:$0xff]  }
  0x1a   :  { %1106 = vmatprep.subr.bf16.mxu1 %v1234_v26  ;;  %v1283_v7 = vld [vmem:[%s1612_s0 + $0x10] ss:$36 sps:$4 sm:$0xff]   ;;  %v1290_v12 = vld [vmem:[%s1612_s0 + $0x1c] ss:$36 sps:$4 sm:$0xff]   ;;  %v1296_v17 = vld [vmem:[%s1612_s0 + $0x64] ss:$36 sps:$4 sm:$0xff]  }
  0x1b   :  { %1079 = vmatpush3.bf16.msra.mxu0 %v1233_v25  ;;  %v1285_v8 = vld [vmem:[%s1612_s0 + $0x14] ss:$36 sps:$4 sm:$0xff]   ;;  %v1292_v14 = vld [vmem:[%s1612_s0 + $0x5c] ss:$36 sps:$4 sm:$0xff]   ;;  %v1302_v23 = vld [vmem:[%s1611_s1 + $0x208] sm:$0xff]  }
  0x1c   :  { %1080 = vmatprep.subr.bf16.mxu0 %v1236_v28  ;;  %v1291_v13 = vld [vmem:[%s1611_s1 + $0x230] sm:$0xff]   ;;  %v1294_v15 = vld [vmem:[%s1612_s0 + $0x58] ss:$36 sps:$4 sm:$0xff]   ;;  %v1298_v18 = vld [vmem:[%s1612_s0 + $0x60] ss:$36 sps:$4 sm:$0xff]  }
  0x1d   :  { %1107 = vmatpush3.bf16.msra.mxu1 %v1235_v27  ;;  %v1299_v19 = vld [vmem:[%s1611_s1 + $0x220] sm:$0xff]   ;;  %v1300_v20 = vld [vmem:[%s1611_s1 + $0x218] sm:$0xff]   ;;  %v1301_v22 = vld [vmem:[%s1611_s1 + $0x210] sm:$0xff]  }
  0x1e   :  { %1108 = vmatprep.subr.bf16.mxu1 %v1238_v30  ;;  %v1304_v21 = vld [vmem:[%s1612_s0 + $0x20] ss:$36 sps:$4 sm:$0xff]   ;;  %v1305_v25 = vld [vmem:[%s1612_s0 + $0x68] ss:$36 sps:$4 sm:$0xff]  }
  0x1f   :  { %1081 = vmatpush3.bf16.msra.mxu0 %v1237_v29  ;;  %v1303_v24 = vld [vmem:[%s1611_s1 + $0x200] sm:$0xff]  }
  0x20   :  { %1122 = vmatprep.subr.bf16.mxu0 %v1243_v34 }
  0x21   :  { %1109 = vmatpush3.bf16.msra.mxu1 %v1242_v33 }
  0x22   :  { %743 = vmatmul.mubr.bf16.vlgmr.msra.gmra.mxu0 %v1239_v31  ;;  %1150 = vmatprep.subr.bf16.mxu1 %v1248_v38 }
  0x23   :  { %1123 = vmatpush3.bf16.msra.mxu0 %v1247_v37  ;;  %750 = vmatprep.mubr.bf16.mxu0 %v1264_v54 }
  0x24   :  { %792 = vmatmul.mubr.bf16.vlgmr.msra.gmra.mxu1 %v1244_v35  ;;  %1124 = vmatprep.subr.bf16.mxu0 %v1250_v40 }
  0x25   :  { %1151 = vmatpush3.bf16.msra.mxu1 %v1249_v39  ;;  %799 = vmatprep.mubr.bf16.mxu1 %v1269_v58 }
  0x26   :  { %1152 = vmatprep.subr.bf16.mxu1 %v1252_v42 }
  0x27   :  { %1125 = vmatpush3.bf16.msra.mxu0 %v1251_v41 }
  0x28   :  { %1126 = vmatprep.subr.bf16.mxu0 %v1254_v44 }
  0x29   :  { %1153 = vmatpush3.bf16.msra.mxu1 %v1253_v43 }
  0x2a   :  { %1154 = vmatprep.subr.bf16.mxu1 %v1256_v46  ;;  %751 = vmatmul.mubr.bf16.gmra.mxu0 %v1267_v56 }
  0x2b   :  { %1127 = vmatpush3.bf16.msra.mxu0 %v1255_v45  ;;  %840 = vmatprep.mubr.bf16.mxu0 %v1285_v8 }
  0x2c   :  { %1128 = vmatprep.subr.bf16.mxu0 %v1258_v48  ;;  %800 = vmatmul.mubr.bf16.gmra.mxu1 %v1272_v60 }
  0x2d   :  { %1155 = vmatpush3.bf16.msra.mxu1 %v1257_v47  ;;  %889 = vmatprep.mubr.bf16.mxu1 %v1290_v12 }
  0x2e   :  { %1156 = vmatprep.subr.bf16.mxu1 %v1260_v50 }
  0x2f   :  { %1129 = vmatpush3.bf16.msra.mxu0 %v1259_v49 }
  0x30   :  { %1130 = vmatprep.subr.bf16.mxu0 %v1262_v52 }
  0x31   :  { %1157 = vmatpush3.bf16.msra.mxu1 %v1261_v51 }
  0x32   :  { %1158 = vmatprep.subr.bf16.mxu1 %v1266_v55  ;;  %v975_v55 = vld [vmem:[%s1613_s2] ss:$0 sm:$0xff] }
  0x33   :  { %1131 = vmatpush3.bf16.msra.mxu0 %v1263_v53 }
  0x34   :  { %1132 = vmatprep.subr.bf16.mxu0 %v1271_v59 }
  0x35   :  { %1159 = vmatpush3.bf16.msra.mxu1 %v1268_v57 }
  0x36   :  { %1160 = vmatprep.subr.bf16.mxu1 %v1274_v62 }
  0x37   :  { %1133 = vmatpush3.bf16.msra.mxu0 %v1273_v61 }
  0x38   :  { %1134 = vmatprep.subr.bf16.mxu0 %v1276_v0 }
  0x39   :  { %1161 = vmatpush3.bf16.msra.mxu1 %v1275_v63 }
  0x3a   :  { %1162 = vmatprep.subr.bf16.mxu1 %v1278_v2 }
  0x3b   :  { %1135 = vmatpush3.bf16.msra.mxu0 %v1277_v1 }
  0x3c   :  { %1136 = vmatprep.subr.bf16.mxu0 %v1280_v4 }
  0x3d   :  { %1163 = vmatpush3.bf16.msra.mxu1 %v1279_v3 }
  0x3e   :  { %1164 = vmatprep.subr.bf16.mxu1 %v1282_v6 }
  0x3f   :  { %1137 = vmatpush3.bf16.msra.mxu0 %v1281_v5 }
  0x40   :  { %1188 = vmatprep.subr.bf16.mxu0 %v1287_v10 }
  0x41   :  { %1165 = vmatpush3.bf16.msra.mxu1 %v1286_v9 }
  0x42   :  { %841 = vmatmul.mubr.bf16.vlgmr.msra.gmra.mxu0 %v1283_v7 }
  0x43   :  { %1189 = vmatpush3.bf16.msra.mxu0 %v1287_v10  ;;  %848 = vmatprep.mubr.bf16.mxu0 %v1292_v14 }
  0x44   :  { %890 = vmatmul.mubr.bf16.vlgmr.msra.gmra.mxu1 %v1288_v11  ;;  %1190 = vmatprep.subr.bf16.mxu0 %v1291_v13 }
  0x45   :  { %897 = vmatprep.mubr.bf16.mxu1 %v1296_v17 }
  0x47   :  { %1191 = vmatpush3.bf16.msra.mxu0 %v1291_v13 }
  0x48   :  { %1192 = vmatprep.subr.bf16.mxu0 %v1295_v16 }
  0x4a   :  { %849 = vmatmul.mubr.bf16.gmra.mxu0 %v1294_v15 }
  0x4b   :  { %1193 = vmatpush3.bf16.msra.mxu0 %v1295_v16  ;;  %1204 = vmatprep.mubr.bf16.mxu0 %v1304_v21 }
  0x4c   :  { %898 = vmatmul.mubr.bf16.gmra.mxu1 %v1298_v18  ;;  %1194 = vmatprep.subr.bf16.mxu0 %v1299_v19 }
  0x4f   :  { %1195 = vmatpush3.bf16.msra.mxu0 %v1299_v19 }
  0x50   :  { %1196 = vmatprep.subr.bf16.mxu0 %v1300_v20 }
  0x53   :  { %1197 = vmatpush3.bf16.msra.mxu0 %v1300_v20 }
  0x54   :  { %1198 = vmatprep.subr.bf16.mxu0 %v1301_v22 }
  0x57   :  { %1199 = vmatpush3.bf16.msra.mxu0 %v1301_v22 }
  0x58   :  { %1200 = vmatprep.subr.bf16.mxu0 %v1302_v23 }
  0x5b   :  { %1201 = vmatpush3.bf16.msra.mxu0 %v1302_v23 }
  0x5c   :  { %1202 = vmatprep.subr.bf16.mxu0 %v1303_v24 }
  0x5f   :  { %1203 = vmatpush3.bf16.msra.mxu0 %v1303_v24 }
  0x62   :  { %1205 = vmatmul.mubr.bf16.vlgmr.msra.gmra.mxu0 %v1305_v25 }
  0xe2   :  { %v1082_v26 = vpop.f32.mrf.mxu0 }
  0xe4   :  { %v1110_v27 = vpop.f32.mrf.mxu1  ;;  %v1083_v28 = vpop.f32.mrf.mxu0 }
  0xe5   :  { %v1084_v54 = vadd.f32 %v1083_v28, %v1082_v26 }
  0xe6   :  { %v1111_v29 = vpop.f32.mrf.mxu1  ;;  %v1085_v30 = vpop.f32.mrf.mxu0 }
  0xe7   :  { %v745_v62 = vadd.f32 %v1084_v54, %v975_v55  ;;  %v1112_v63 = vadd.f32 %v1111_v29, %v1110_v27 }
  0xe8   :  { %v1113_v31 = vpop.f32.mrf.mxu1  ;;  %v1086_v32 = vpop.f32.mrf.mxu0 }
  0xe9   :  { %v1087_v61 = vadd.f32 %v1086_v32, %v1085_v30  ;;  %v794_v9 = vadd.f32 %v1112_v63, %v745_v62 }
  0xea   :  { %v1088_v33 = vpop.f32.mrf.mxu0  ;;  %v1114_v34 = vpop.f32.mrf.mxu1 }
  0xeb   :  { %v748_v7 = vadd.f32 %v1087_v61, %v975_v55  ;;  %v1115_v8 = vadd.f32 %v1114_v34, %v1113_v31 }
  0xec   :  { %v1116_v35 = vpop.f32.mrf.mxu1  ;;  %v1089_v36 = vpop.f32.mrf.mxu0 }
  0xed   :  { %v1090_v53 = vadd.f32 %v1089_v36, %v1088_v33  ;;  %v797_v18 = vadd.f32 %v1115_v8, %v748_v7 }
  0xee   :  { %v1117_v37 = vpop.f32.mrf.mxu1  ;;  %v1091_v38 = vpop.f32.mrf.mxu0 }
  0xef   :  { %v753_v58 = vadd.f32 %v1090_v53, %v975_v55  ;;  %v1118_v59 = vadd.f32 %v1117_v37, %v1116_v35 }
  0xf0   :  { %v1119_v39 = vpop.f32.mrf.mxu1  ;;  %v1092_v40 = vpop.f32.mrf.mxu0 }
  0xf1   :  { %v1093_v60 = vadd.f32 %v1092_v40, %v1091_v38  ;;  %v802_v3 = vadd.f32 %v1118_v59, %v753_v58 }
  0xf2   :  { %v1120_v42 = vpop.f32.mrf.mxu1 }
  0xf3   :  { %v756_v4 = vadd.f32 %v1093_v60, %v975_v55  ;;  %v1121_v5 = vadd.f32 %v1120_v42, %v1119_v39 }
  0xf5   :  { %v805_v15 = vadd.f32 %v1121_v5, %v756_v4 }
 0x102   :  { %v1138_v41 = vpop.f32.mrf.mxu0 }
 0x104   :  { %v1139_v43 = vpop.f32.mrf.mxu0  ;;  %v1166_v44 = vpop.f32.mrf.mxu1 }
 0x105   :  { %v1140_v6 = vadd.f32 %v1139_v43, %v1138_v41 }
 0x106   :  { %v1141_v45 = vpop.f32.mrf.mxu0  ;;  %v1167_v46 = vpop.f32.mrf.mxu1 }
 0x107   :  { %v843_v16 = vadd.f32 %v1140_v6, %v794_v9  ;;  %v1168_v17 = vadd.f32 %v1167_v46, %v1166_v44 }
 0x108   :  { %v1142_v47 = vpop.f32.mrf.mxu0  ;;  %v1169_v48 = vpop.f32.mrf.mxu1 }
 0x109   :  { %v1143_v13 = vadd.f32 %v1142_v47, %v1141_v45  ;;  %v892_v26 = vadd.f32 %v1168_v17, %v843_v16 }
 0x10a   :  { %v1144_v49 = vpop.f32.mrf.mxu0  ;;  %v1170_v50 = vpop.f32.mrf.mxu1 }
 0x10b   :  { %v846_v22 = vadd.f32 %v1143_v13, %v797_v18  ;;  %v1171_v23 = vadd.f32 %v1170_v50, %v1169_v48 }
 0x10c   :  { %v1145_v51 = vpop.f32.mrf.mxu0  ;;  %v1172_v52 = vpop.f32.mrf.mxu1 }
 0x10d   :  { %v1146_v0 = vadd.f32 %v1145_v51, %v1144_v49  ;;  %v895_v32 = vadd.f32 %v1171_v23, %v846_v22 }
 0x10e   :  { %v1147_v56 = vpop.f32.mrf.mxu0  ;;  %v1173_v57 = vpop.f32.mrf.mxu1 }
 0x10f   :  { %v851_v10 = vadd.f32 %v1146_v0, %v802_v3  ;;  %v1174_v11 = vadd.f32 %v1173_v57, %v1172_v52 }
 0x110   :  { %v1148_v1 = vpop.f32.mrf.mxu0  ;;  %v1175_v2 = vpop.f32.mrf.mxu1 }
 0x111   :  { %v1149_v12 = vadd.f32 %v1148_v1, %v1147_v56  ;;  %v900_v21 = vadd.f32 %v1174_v11, %v851_v10 }
 0x112   :  { %v1176_v14 = vpop.f32.mrf.mxu1 }
 0x113   :  { %v854_v19 = vadd.f32 %v1149_v12, %v805_v15  ;;  %v1177_v20 = vadd.f32 %v1176_v14, %v1175_v2 }
 0x115   :  { %v903_v30 = vadd.f32 %v1177_v20, %v854_v19 }
 0x122   :  { %v1206_v24 = vpop.f32.mrf.mxu0 }
 0x123   :  { %v949_v25 = vadd.f32 %v1206_v24, %v900_v21 }
 0x124   :  { %v940_v27 = vpop.f32.mrf.mxu0 }
 0x125   :  { %vm957_vm0 = vcmp.ge.f32.partialorder %v949_v25, 0.0  ;;  %v961_v28 = vmul.f32 0.01, %v949_v25  ;;  %v941_v29 = vadd.f32 %v940_v27, %v892_v26 }
 0x126   :  { %v1207_v31 = vpop.f32.mrf.mxu0 }
 0x127   :  { %v965_v33 = vsel %vm957_vm0, %v949_v25, %v961_v28  ;;  %vm955_vm1 = vcmp.ge.f32.partialorder %v941_v29, 0.0  ;;  %v959_v34 = vmul.f32 0.01, %v941_v29  ;;  %v952_v35 = vadd.f32 %v1207_v31, %v903_v30 }
 0x128   :  { %969 = vst [vmem:[%s1614_s3 + $0x10] sm:$0xff] %v965_v33  ;;  %v943_v36 = vpop.f32.mrf.mxu0 }
 0x129   :  { %v963_v37 = vsel %vm955_vm1, %v941_v29, %v959_v34  ;;  %vm958_vm2 = vcmp.ge.f32.partialorder %v952_v35, 0.0  ;;  %v962_v38 = vmul.f32 0.01, %v952_v35  ;;  %v944_v39 = vadd.f32 %v943_v36, %v895_v32 }
 0x12a   :  { %967 = vst [vmem:[%s1614_s3] sm:$0xff] %v963_v37 }
 0x12b   :  { %v966_v40 = vsel %vm958_vm2, %v952_v35, %v962_v38  ;;  %vm956_vm3 = vcmp.ge.f32.partialorder %v944_v39, 0.0  ;;  %v960_v41 = vmul.f32 0.01, %v944_v39 }
 0x12c   :  { %970 = vst [vmem:[%s1614_s3 + $0x18] sm:$0xff] %v966_v40 }
 0x12d   :  { %v964_v42 = vsel %vm956_vm3, %v944_v39, %v960_v41 }
 0x12e   :  { %968 = vst [vmem:[%s1614_s3 + $0x8] sm:$0xff] %v964_v42 }

// kernel: reference_encoder_pallas.12
= control target key start
LH: loop header
LB: loop body
LE: loop exit
PB: predicated region body
PF: predicated region fallthrough
CT: control target
= control target key end

     0   :  { %s2133_s2 = inlined_call_operand.vmem [shape: bf16[1152,128], index: 2, kind: input, shape index: {}]   ;;  %s2134_s0 = inlined_call_operand.vmem [shape: bf16[32,1152], index: 0, kind: input, shape index: {}]   ;;  %s2135_s4 = inlined_call_operand.vmem [shape: bf16[128,128], index: 4, kind: input, shape index: {}]   ;;  %s2136_s1 = inlined_call_operand.vmem [shape: bf16[32,128], index: 1, kind: input, shape index: {}]   ;;  %s2137_s6 = inlined_call_operand.vmem [shape: f32[128,128], index: 6, kind: input, shape index: {}]   ;;  %s2138_s3 = inlined_call_operand.vmem [shape: f32[1,128], index: 3, kind: input, shape index: {}]   ;;  %s2139_s7 = inlined_call_operand.vmem [shape: f32[1,128], index: 7, kind: input, shape index: {}]   ;;  %s2140_s5 = inlined_call_operand.vmem [shape: f32[1,128], index: 5, kind: input, shape index: {}]   ;;  %s2141_s8 = inlined_call_operand.vmem [shape: f32[32,128], index: 8, kind: output, shape index: {}]  }
   0x1   :  { %v1603_v0 = vld [vmem:[%s2133_s2 + $0x78] sm:$0xff]   ;;  %v1607_v4 = vld [vmem:[%s2133_s2 + $0x70] sm:$0xff]   ;;  %v1611_v8 = vld [vmem:[%s2133_s2 + $0x68] sm:$0xff]  }
   0x2   :  { %v1604_v1 = vld [vmem:[%s2133_s2 + $0x38] sm:$0xff]   ;;  %1341 = vmatprep.subr.bf16.mxu0 %v1603_v0  ;;  %v1608_v5 = vld [vmem:[%s2133_s2 + $0x30] sm:$0xff]   ;;  %v1612_v9 = vld [vmem:[%s2133_s2 + $0x28] sm:$0xff]  }
   0x3   :  { %v1605_v2 = vld [vmem:[%s2133_s2 + $0xf8] sm:$0xff]   ;;  %1342 = vmatpush3.bf16.msra.mxu0 %v1604_v1  ;;  %v1609_v6 = vld [vmem:[%s2133_s2 + $0xf0] sm:$0xff]   ;;  %v1613_v10 = vld [vmem:[%s2133_s2 + $0xe8] sm:$0xff]  }
   0x4   :  { %v1606_v3 = vld [vmem:[%s2133_s2 + $0xb8] sm:$0xff]   ;;  %1369 = vmatprep.subr.bf16.mxu1 %v1605_v2  ;;  %1343 = vmatprep.subr.bf16.mxu0 %v1607_v4  ;;  %v1610_v7 = vld [vmem:[%s2133_s2 + $0xb0] sm:$0xff]   ;;  %v1614_v11 = vld [vmem:[%s2133_s2 + $0xa8] sm:$0xff]  }
   0x5   :  { %1370 = vmatpush3.bf16.msra.mxu1 %v1606_v3  ;;  %v1615_v12 = vld [vmem:[%s2133_s2 + $0x60] sm:$0xff]   ;;  %v1619_v16 = vld [vmem:[%s2133_s2 + $0x58] sm:$0xff]   ;;  %v1623_v20 = vld [vmem:[%s2133_s2 + $0x50] sm:$0xff]  }
   0x6   :  { %1371 = vmatprep.subr.bf16.mxu1 %v1609_v6  ;;  %v1616_v13 = vld [vmem:[%s2133_s2 + $0x20] sm:$0xff]   ;;  %v1620_v17 = vld [vmem:[%s2133_s2 + $0x18] sm:$0xff]   ;;  %v1624_v21 = vld [vmem:[%s2133_s2 + $0x10] sm:$0xff]  }
   0x7   :  { %1344 = vmatpush3.bf16.msra.mxu0 %v1608_v5  ;;  %v1617_v14 = vld [vmem:[%s2133_s2 + $0xe0] sm:$0xff]   ;;  %v1621_v18 = vld [vmem:[%s2133_s2 + $0xd8] sm:$0xff]   ;;  %v1625_v22 = vld [vmem:[%s2133_s2 + $0xd0] sm:$0xff]  }
   0x8   :  { %1345 = vmatprep.subr.bf16.mxu0 %v1611_v8  ;;  %v1618_v15 = vld [vmem:[%s2133_s2 + $0xa0] sm:$0xff]   ;;  %v1622_v19 = vld [vmem:[%s2133_s2 + $0x98] sm:$0xff]   ;;  %v1626_v23 = vld [vmem:[%s2133_s2 + $0x90] sm:$0xff]  }
   0x9   :  { %1372 = vmatpush3.bf16.msra.mxu1 %v1610_v7  ;;  %v1627_v24 = vld [vmem:[%s2133_s2 + $0x48] sm:$0xff]   ;;  %v1631_v28 = vld [vmem:[%s2133_s2 + $0x40] sm:$0xff]   ;;  %v1638_v34 = vld [vmem:[%s2133_s2 + $0x178] sm:$0xff]  }
   0xa   :  { %1373 = vmatprep.subr.bf16.mxu1 %v1613_v10  ;;  %v1628_v25 = vld [vmem:[%s2133_s2 + $0x8] sm:$0xff]   ;;  %v1632_v29 = vld [vmem:[%s2133_s2] sm:$0xff]   ;;  %v1642_v37 = vld [vmem:[%s2133_s2 + $0x138] sm:$0xff]  }
   0xb   :  { %1346 = vmatpush3.bf16.msra.mxu0 %v1612_v9  ;;  %v1629_v26 = vld [vmem:[%s2133_s2 + $0xc8] sm:$0xff]   ;;  %v1633_v30 = vld [vmem:[%s2133_s2 + $0xc0] sm:$0xff]   ;;  %v1643_v38 = vld [vmem:[%s2133_s2 + $0x1f8] sm:$0xff]  }
   0xc   :  { %1347 = vmatprep.subr.bf16.mxu0 %v1615_v12  ;;  %v1630_v27 = vld [vmem:[%s2133_s2 + $0x88] sm:$0xff]   ;;  %v1634_v31 = vld [vmem:[%s2134_s0] ss:$36 sps:$4 sm:$0xff]   ;;  %v1644_v39 = vld [vmem:[%s2133_s2 + $0x1b8] sm:$0xff]  }
   0xd   :  { %1374 = vmatpush3.bf16.msra.mxu1 %v1614_v11  ;;  %v1636_v32 = vld [vmem:[%s2134_s0 + $0x4] ss:$36 sps:$4 sm:$0xff]   ;;  %v1641_v36 = vld [vmem:[%s2134_s0 + $0xc] ss:$36 sps:$4 sm:$0xff]   ;;  %v1657_v52 = vld [vmem:[%s2133_s2 + $0x158] sm:$0xff]  }
   0xe   :  { %1375 = vmatprep.subr.bf16.mxu1 %v1617_v14  ;;  %v1637_v33 = vld [vmem:[%s2133_s2 + $0x80] sm:$0xff]   ;;  %757 = vmatprep.mubr.bf16.mxu0 %v1636_v32  ;;  %v1639_v35 = vld [vmem:[%s2134_s0 + $0x8] ss:$36 sps:$4 sm:$0xff]   ;;  %v1645_v40 = vld [vmem:[%s2133_s2 + $0x170] sm:$0xff]  }
   0xf   :  { %1348 = vmatpush3.bf16.msra.mxu0 %v1616_v13  ;;  %806 = vmatprep.mubr.bf16.mxu1 %v1641_v36  ;;  %v1646_v41 = vld [vmem:[%s2133_s2 + $0x130] sm:$0xff]   ;;  %v1649_v44 = vld [vmem:[%s2133_s2 + $0x168] sm:$0xff]   ;;  %v1653_v48 = vld [vmem:[%s2133_s2 + $0x160] sm:$0xff]  }
  0x10   :  { %1349 = vmatprep.subr.bf16.mxu0 %v1619_v16  ;;  %v1647_v42 = vld [vmem:[%s2133_s2 + $0x1f0] sm:$0xff]   ;;  %v1650_v45 = vld [vmem:[%s2133_s2 + $0x128] sm:$0xff]   ;;  %v1654_v49 = vld [vmem:[%s2133_s2 + $0x120] sm:$0xff]  }
  0x11   :  { %1376 = vmatpush3.bf16.msra.mxu1 %v1618_v15  ;;  %v1648_v43 = vld [vmem:[%s2133_s2 + $0x1b0] sm:$0xff]   ;;  %v1651_v46 = vld [vmem:[%s2133_s2 + $0x1e8] sm:$0xff]   ;;  %v1655_v50 = vld [vmem:[%s2133_s2 + $0x1e0] sm:$0xff]  }
  0x12   :  { %1377 = vmatprep.subr.bf16.mxu1 %v1621_v18  ;;  %v1652_v47 = vld [vmem:[%s2133_s2 + $0x1a8] sm:$0xff]   ;;  %v1656_v51 = vld [vmem:[%s2133_s2 + $0x1a0] sm:$0xff]   ;;  %v1658_v53 = vld [vmem:[%s2133_s2 + $0x118] sm:$0xff]  }
  0x13   :  { %1350 = vmatpush3.bf16.msra.mxu0 %v1620_v17  ;;  %v1659_v54 = vld [vmem:[%s2134_s0 + $0x4c] ss:$36 sps:$4 sm:$0xff]   ;;  %v1661_v55 = vld [vmem:[%s2133_s2 + $0x1d8] sm:$0xff]   ;;  %v1675_v4 = vld [vmem:[%s2133_s2 + $0x140] sm:$0xff]  }
  0x14   :  { %1351 = vmatprep.subr.bf16.mxu0 %v1623_v20  ;;  %v1662_v56 = vld [vmem:[%s2134_s0 + $0x48] ss:$36 sps:$4 sm:$0xff]   ;;  %v1663_v57 = vld [vmem:[%s2133_s2 + $0x198] sm:$0xff]   ;;  %v1666_v59 = vld [vmem:[%s2133_s2 + $0x150] sm:$0xff]  }
  0x15   :  { %1378 = vmatpush3.bf16.msra.mxu1 %v1622_v19  ;;  %v1664_v58 = vld [vmem:[%s2134_s0 + $0x54] ss:$36 sps:$4 sm:$0xff]   ;;  %v1671_v0 = vld [vmem:[%s2133_s2 + $0x148] sm:$0xff]   ;;  %v1676_v5 = vld [vmem:[%s2133_s2 + $0x100] sm:$0xff]  }
  0x16   :  { %1379 = vmatprep.subr.bf16.mxu1 %v1625_v22  ;;  %v1667_v60 = vld [vmem:[%s2134_s0 + $0x50] ss:$36 sps:$4 sm:$0xff]   ;;  %v1672_v1 = vld [vmem:[%s2133_s2 + $0x108] sm:$0xff]   ;;  %v1677_v6 = vld [vmem:[%s2133_s2 + $0x1c0] sm:$0xff]  }
  0x17   :  { %1352 = vmatpush3.bf16.msra.mxu0 %v1624_v21  ;;  %v1668_v61 = vld [vmem:[%s2133_s2 + $0x110] sm:$0xff]   ;;  %v1673_v2 = vld [vmem:[%s2133_s2 + $0x1c8] sm:$0xff]   ;;  %v1681_v9 = vld [vmem:[%s2133_s2 + $0x180] sm:$0xff]  }
  0x18   :  { %1353 = vmatprep.subr.bf16.mxu0 %v1627_v24  ;;  %v1669_v62 = vld [vmem:[%s2133_s2 + $0x1d0] sm:$0xff]   ;;  %v1674_v3 = vld [vmem:[%s2133_s2 + $0x188] sm:$0xff]   ;;  %v1682_v10 = vld [vmem:[%s2133_s2 + $0x238] sm:$0xff]  }
  0x19   :  { %1380 = vmatpush3.bf16.msra.mxu1 %v1626_v23  ;;  %v1670_v63 = vld [vmem:[%s2133_s2 + $0x190] sm:$0xff]   ;;  %v1683_v11 = vld [vmem:[%s2134_s0 + $0x18] ss:$36 sps:$4 sm:$0xff]   ;;  %v1690_v16 = vld [vmem:[%s2133_s2 + $0x228] sm:$0xff]  }
  0x1a   :  { %1381 = vmatprep.subr.bf16.mxu1 %v1629_v26  ;;  %v1678_v7 = vld [vmem:[%s2134_s0 + $0x10] ss:$36 sps:$4 sm:$0xff]   ;;  %v1685_v12 = vld [vmem:[%s2134_s0 + $0x1c] ss:$36 sps:$4 sm:$0xff]   ;;  %v1691_v17 = vld [vmem:[%s2134_s0 + $0x64] ss:$36 sps:$4 sm:$0xff]  }
  0x1b   :  { %1354 = vmatpush3.bf16.msra.mxu0 %v1628_v25  ;;  %v1680_v8 = vld [vmem:[%s2134_s0 + $0x14] ss:$36 sps:$4 sm:$0xff]   ;;  %v1687_v14 = vld [vmem:[%s2134_s0 + $0x5c] ss:$36 sps:$4 sm:$0xff]   ;;  %v1697_v23 = vld [vmem:[%s2133_s2 + $0x208] sm:$0xff]  }
  0x1c   :  { %1355 = vmatprep.subr.bf16.mxu0 %v1631_v28  ;;  %v1686_v13 = vld [vmem:[%s2133_s2 + $0x230] sm:$0xff]   ;;  %v1689_v15 = vld [vmem:[%s2134_s0 + $0x58] ss:$36 sps:$4 sm:$0xff]   ;;  %v1693_v18 = vld [vmem:[%s2134_s0 + $0x60] ss:$36 sps:$4 sm:$0xff]  }
  0x1d   :  { %1382 = vmatpush3.bf16.msra.mxu1 %v1630_v27  ;;  %v1694_v19 = vld [vmem:[%s2133_s2 + $0x220] sm:$0xff]   ;;  %v1695_v20 = vld [vmem:[%s2133_s2 + $0x218] sm:$0xff]   ;;  %v1696_v22 = vld [vmem:[%s2133_s2 + $0x210] sm:$0xff]  }
  0x1e   :  { %1383 = vmatprep.subr.bf16.mxu1 %v1633_v30  ;;  %v1699_v21 = vld [vmem:[%s2134_s0 + $0x20] ss:$36 sps:$4 sm:$0xff]   ;;  %v1700_v25 = vld [vmem:[%s2134_s0 + $0x68] ss:$36 sps:$4 sm:$0xff]   ;;  %v1701_v26 = vld [vmem:[%s2135_s4 + $0x38] sm:$0xff]  }
  0x1f   :  { %1356 = vmatpush3.bf16.msra.mxu0 %v1632_v29  ;;  %v1698_v24 = vld [vmem:[%s2133_s2 + $0x200] sm:$0xff]   ;;  %v1702_v27 = vld [vmem:[%s2135_s4 + $0x30] sm:$0xff]   ;;  %v1703_v28 = vld [vmem:[%s2135_s4 + $0x28] sm:$0xff]  }
  0x20   :  { %1397 = vmatprep.subr.bf16.mxu0 %v1638_v34  ;;  %v1704_v29 = vld [vmem:[%s2135_s4 + $0x20] sm:$0xff]   ;;  %v1705_v30 = vld [vmem:[%s2135_s4 + $0x18] sm:$0xff]   ;;  %v1707_v32 = vld [vmem:[%s2135_s4 + $0x8] sm:$0xff]  }
  0x21   :  { %1384 = vmatpush3.bf16.msra.mxu1 %v1637_v33  ;;  %v1708_v33 = vld [vmem:[%s2135_s4] sm:$0xff]   ;;  %v1125_v36 = vld [vmem:[%s2137_s6 + $0x78] sm:$0xff] }
  0x22   :  { %758 = vmatmul.mubr.bf16.vlgmr.msra.gmra.mxu0 %v1634_v31  ;;  %1425 = vmatprep.subr.bf16.mxu1 %v1643_v38  ;;  %v1706_v31 = vld [vmem:[%s2135_s4 + $0x10] sm:$0xff]   ;;  %v1709_v34 = vld [vmem:[%s2136_s1] sm:$0xff]   ;;  %v1123_v38 = vld [vmem:[%s2137_s6 + $0x68] sm:$0xff] }
  0x23   :  { %1398 = vmatpush3.bf16.msra.mxu0 %v1642_v37  ;;  %765 = vmatprep.mubr.bf16.mxu0 %v1659_v54  ;;  %v1124_v37 = vld [vmem:[%s2137_s6 + $0x70] sm:$0xff] }
  0x24   :  { %807 = vmatmul.mubr.bf16.vlgmr.msra.gmra.mxu1 %v1639_v35  ;;  %1399 = vmatprep.subr.bf16.mxu0 %v1645_v40  ;;  %v1710_v35 = vld [vmem:[%s2136_s1 + $0x8] sm:$0xff]   ;;  %v1121_v40 = vld [vmem:[%s2137_s6 + $0x58] sm:$0xff] }
  0x25   :  { %1426 = vmatpush3.bf16.msra.mxu1 %v1644_v39  ;;  %814 = vmatprep.mubr.bf16.mxu1 %v1664_v58  ;;  %v1122_v39 = vld [vmem:[%s2137_s6 + $0x60] sm:$0xff] }
  0x26   :  { %1427 = vmatprep.subr.bf16.mxu1 %v1647_v42  ;;  %v1119_v42 = vld [vmem:[%s2137_s6 + $0x48] sm:$0xff] }
  0x27   :  { %1400 = vmatpush3.bf16.msra.mxu0 %v1646_v41  ;;  %v1120_v41 = vld [vmem:[%s2137_s6 + $0x50] sm:$0xff] }
  0x28   :  { %1401 = vmatprep.subr.bf16.mxu0 %v1649_v44  ;;  %v1117_v44 = vld [vmem:[%s2137_s6 + $0x38] sm:$0xff] }
  0x29   :  { %1428 = vmatpush3.bf16.msra.mxu1 %v1648_v43  ;;  %v1118_v43 = vld [vmem:[%s2137_s6 + $0x40] sm:$0xff] }
  0x2a   :  { %1429 = vmatprep.subr.bf16.mxu1 %v1651_v46  ;;  %766 = vmatmul.mubr.bf16.gmra.mxu0 %v1662_v56  ;;  %v1115_v46 = vld [vmem:[%s2137_s6 + $0x28] sm:$0xff] }
  0x2b   :  { %1402 = vmatpush3.bf16.msra.mxu0 %v1650_v45  ;;  %855 = vmatprep.mubr.bf16.mxu0 %v1680_v8  ;;  %v1116_v45 = vld [vmem:[%s2137_s6 + $0x30] sm:$0xff] }
  0x2c   :  { %1403 = vmatprep.subr.bf16.mxu0 %v1653_v48  ;;  %815 = vmatmul.mubr.bf16.gmra.mxu1 %v1667_v60  ;;  %v1113_v48 = vld [vmem:[%s2137_s6 + $0x18] sm:$0xff] }
  0x2d   :  { %1430 = vmatpush3.bf16.msra.mxu1 %v1652_v47  ;;  %904 = vmatprep.mubr.bf16.mxu1 %v1685_v12  ;;  %v1114_v47 = vld [vmem:[%s2137_s6 + $0x20] sm:$0xff] }
  0x2e   :  { %1431 = vmatprep.subr.bf16.mxu1 %v1655_v50  ;;  %v1111_v50 = vld [vmem:[%s2137_s6 + $0x8] sm:$0xff] }
  0x2f   :  { %1404 = vmatpush3.bf16.msra.mxu0 %v1654_v49  ;;  %v1112_v49 = vld [vmem:[%s2137_s6 + $0x10] sm:$0xff] }
  0x30   :  { %1405 = vmatprep.subr.bf16.mxu0 %v1657_v52 }
  0x31   :  { %1432 = vmatpush3.bf16.msra.mxu1 %v1656_v51  ;;  %v1110_v51 = vld [vmem:[%s2137_s6] sm:$0xff] }
  0x32   :  { %1433 = vmatprep.subr.bf16.mxu1 %v1661_v55 }
  0x33   :  { %1406 = vmatpush3.bf16.msra.mxu0 %v1658_v53 }
  0x34   :  { %1407 = vmatprep.subr.bf16.mxu0 %v1666_v59 }
  0x35   :  { %1434 = vmatpush3.bf16.msra.mxu1 %v1663_v57 }
  0x36   :  { %1435 = vmatprep.subr.bf16.mxu1 %v1669_v62 }
  0x37   :  { %1408 = vmatpush3.bf16.msra.mxu0 %v1668_v61 }
  0x38   :  { %1409 = vmatprep.subr.bf16.mxu0 %v1671_v0 }
  0x39   :  { %1436 = vmatpush3.bf16.msra.mxu1 %v1670_v63 }
  0x3a   :  { %1437 = vmatprep.subr.bf16.mxu1 %v1673_v2 }
  0x3b   :  { %1410 = vmatpush3.bf16.msra.mxu0 %v1672_v1 }
  0x3c   :  { %1411 = vmatprep.subr.bf16.mxu0 %v1675_v4 }
  0x3d   :  { %1438 = vmatpush3.bf16.msra.mxu1 %v1674_v3 }
  0x3e   :  { %1439 = vmatprep.subr.bf16.mxu1 %v1677_v6 }
  0x3f   :  { %1412 = vmatpush3.bf16.msra.mxu0 %v1676_v5 }
  0x40   :  { %1493 = vmatprep.subr.bf16.mxu0 %v1682_v10 }
  0x41   :  { %1440 = vmatpush3.bf16.msra.mxu1 %v1681_v9 }
  0x42   :  { %856 = vmatmul.mubr.bf16.vlgmr.msra.gmra.mxu0 %v1678_v7  ;;  %1513 = vmatprep.subr.bf16.mxu1 %v1701_v26 }
  0x43   :  { %1494 = vmatpush3.bf16.msra.mxu0 %v1682_v10  ;;  %863 = vmatprep.mubr.bf16.mxu0 %v1687_v14 }
  0x44   :  { %905 = vmatmul.mubr.bf16.vlgmr.msra.gmra.mxu1 %v1683_v11  ;;  %1495 = vmatprep.subr.bf16.mxu0 %v1686_v13 }
  0x45   :  { %912 = vmatprep.mubr.bf16.mxu1 %v1691_v17  ;;  %1514 = vmatpush3.bf16.msra.mxu1 %v1701_v26  ;;  %v1238_v17 = vld [vmem:[%s2138_s3] ss:$0 sm:$0xff] }
  0x46   :  { %1515 = vmatprep.subr.bf16.mxu1 %v1702_v27 }
  0x47   :  { %1496 = vmatpush3.bf16.msra.mxu0 %v1686_v13 }
  0x48   :  { %1497 = vmatprep.subr.bf16.mxu0 %v1690_v16 }
  0x49   :  { %1516 = vmatpush3.bf16.msra.mxu1 %v1702_v27 }
  0x4a   :  { %864 = vmatmul.mubr.bf16.gmra.mxu0 %v1689_v15  ;;  %1517 = vmatprep.subr.bf16.mxu1 %v1703_v28 }
  0x4b   :  { %1498 = vmatpush3.bf16.msra.mxu0 %v1690_v16  ;;  %1509 = vmatprep.mubr.bf16.mxu0 %v1699_v21 }
  0x4c   :  { %913 = vmatmul.mubr.bf16.gmra.mxu1 %v1693_v18  ;;  %1499 = vmatprep.subr.bf16.mxu0 %v1694_v19 }
  0x4d   :  { %1518 = vmatpush3.bf16.msra.mxu1 %v1703_v28  ;;  %1529 = vmatprep.mubr.bf16.mxu1 %v1709_v34 }
  0x4e   :  { %1519 = vmatprep.subr.bf16.mxu1 %v1704_v29 }
  0x4f   :  { %1500 = vmatpush3.bf16.msra.mxu0 %v1694_v19 }
  0x50   :  { %1501 = vmatprep.subr.bf16.mxu0 %v1695_v20 }
  0x51   :  { %1520 = vmatpush3.bf16.msra.mxu1 %v1704_v29 }
  0x52   :  { %1521 = vmatprep.subr.bf16.mxu1 %v1705_v30 }
  0x53   :  { %1502 = vmatpush3.bf16.msra.mxu0 %v1695_v20 }
  0x54   :  { %1503 = vmatprep.subr.bf16.mxu0 %v1696_v22 }
  0x55   :  { %1522 = vmatpush3.bf16.msra.mxu1 %v1705_v30 }
  0x56   :  { %1523 = vmatprep.subr.bf16.mxu1 %v1706_v31 }
  0x57   :  { %1504 = vmatpush3.bf16.msra.mxu0 %v1696_v22 }
  0x58   :  { %1505 = vmatprep.subr.bf16.mxu0 %v1697_v23 }
  0x59   :  { %1524 = vmatpush3.bf16.msra.mxu1 %v1706_v31 }
  0x5a   :  { %1525 = vmatprep.subr.bf16.mxu1 %v1707_v32 }
  0x5b   :  { %1506 = vmatpush3.bf16.msra.mxu0 %v1697_v23 }
  0x5c   :  { %1507 = vmatprep.subr.bf16.mxu0 %v1698_v24 }
  0x5d   :  { %1526 = vmatpush3.bf16.msra.mxu1 %v1707_v32 }
  0x5e   :  { %1527 = vmatprep.subr.bf16.mxu1 %v1708_v33 }
  0x5f   :  { %1508 = vmatpush3.bf16.msra.mxu0 %v1698_v24 }
  0x60   :  { %1533 = vmatprep.subr.mxu0 %v1125_v36 }
  0x61   :  { %1528 = vmatpush3.bf16.msra.mxu1 %v1708_v33 }
  0x62   :  { %1510 = vmatmul.mubr.bf16.vlgmr.msra.gmra.mxu0 %v1700_v25  ;;  %1571 = vmatprep.subr.mxu1 %v1125_v36 }
  0x63   :  { %1534 = vmatpush3.msra.mxu0 %v1125_v36 }
  0x64   :  { %1530 = vmatmul.mubr.bf16.vlgmr.msra.gmra.mxu1 %v1710_v35  ;;  %1535 = vmatprep.subr.mxu0 %v1124_v37 }
  0x65   :  { %1587 = vmatpush3.msra.mxu1 %v1125_v36  ;;  %1536 = vmatpush3.msra.mxu0 %v1124_v37 }
  0x66   :  { %1572 = vmatprep.subr.mxu1 %v1124_v37  ;;  %1537 = vmatprep.subr.mxu0 %v1123_v38 }
  0x67   :  { %1588 = vmatpush3.msra.mxu1 %v1124_v37  ;;  %1538 = vmatpush3.msra.mxu0 %v1123_v38 }
  0x68   :  { %1573 = vmatprep.subr.mxu1 %v1123_v38  ;;  %1539 = vmatprep.subr.mxu0 %v1122_v39 }
  0x69   :  { %1589 = vmatpush3.msra.mxu1 %v1123_v38  ;;  %1540 = vmatpush3.msra.mxu0 %v1122_v39 }
  0x6a   :  { %1574 = vmatprep.subr.mxu1 %v1122_v39  ;;  %1541 = vmatprep.subr.mxu0 %v1121_v40 }
  0x6b   :  { %1590 = vmatpush3.msra.mxu1 %v1122_v39  ;;  %1542 = vmatpush3.msra.mxu0 %v1121_v40 }
  0x6c   :  { %1575 = vmatprep.subr.mxu1 %v1121_v40  ;;  %1543 = vmatprep.subr.mxu0 %v1120_v41 }
  0x6d   :  { %1591 = vmatpush3.msra.mxu1 %v1121_v40  ;;  %1544 = vmatpush3.msra.mxu0 %v1120_v41 }
  0x6e   :  { %1576 = vmatprep.subr.mxu1 %v1120_v41  ;;  %1545 = vmatprep.subr.mxu0 %v1119_v42 }
  0x6f   :  { %1592 = vmatpush3.msra.mxu1 %v1120_v41  ;;  %1546 = vmatpush3.msra.mxu0 %v1119_v42 }
  0x70   :  { %1577 = vmatprep.subr.mxu1 %v1119_v42  ;;  %1547 = vmatprep.subr.mxu0 %v1118_v43 }
  0x71   :  { %1593 = vmatpush3.msra.mxu1 %v1119_v42  ;;  %1548 = vmatpush3.msra.mxu0 %v1118_v43 }
  0x72   :  { %1578 = vmatprep.subr.mxu1 %v1118_v43  ;;  %1549 = vmatprep.subr.mxu0 %v1117_v44 }
  0x73   :  { %1594 = vmatpush3.msra.mxu1 %v1118_v43  ;;  %1550 = vmatpush3.msra.mxu0 %v1117_v44 }
  0x74   :  { %1579 = vmatprep.subr.mxu1 %v1117_v44  ;;  %1551 = vmatprep.subr.mxu0 %v1116_v45 }
  0x75   :  { %1595 = vmatpush3.msra.mxu1 %v1117_v44  ;;  %1552 = vmatpush3.msra.mxu0 %v1116_v45 }
  0x76   :  { %1580 = vmatprep.subr.mxu1 %v1116_v45  ;;  %1553 = vmatprep.subr.mxu0 %v1115_v46 }
  0x77   :  { %1596 = vmatpush3.msra.mxu1 %v1116_v45  ;;  %1554 = vmatpush3.msra.mxu0 %v1115_v46 }
  0x78   :  { %1581 = vmatprep.subr.mxu1 %v1115_v46  ;;  %1555 = vmatprep.subr.mxu0 %v1114_v47 }
  0x79   :  { %1597 = vmatpush3.msra.mxu1 %v1115_v46  ;;  %1556 = vmatpush3.msra.mxu0 %v1114_v47 }
  0x7a   :  { %1582 = vmatprep.subr.mxu1 %v1114_v47  ;;  %1557 = vmatprep.subr.mxu0 %v1113_v48 }
  0x7b   :  { %1598 = vmatpush3.msra.mxu1 %v1114_v47  ;;  %1558 = vmatpush3.msra.mxu0 %v1113_v48 }
  0x7c   :  { %1583 = vmatprep.subr.mxu1 %v1113_v48  ;;  %1559 = vmatprep.subr.mxu0 %v1112_v49 }
  0x7d   :  { %1599 = vmatpush3.msra.mxu1 %v1113_v48  ;;  %1560 = vmatpush3.msra.mxu0 %v1112_v49 }
  0x7e   :  { %1584 = vmatprep.subr.mxu1 %v1112_v49  ;;  %1561 = vmatprep.subr.mxu0 %v1111_v50 }
  0x7f   :  { %1600 = vmatpush3.msra.mxu1 %v1112_v49  ;;  %1562 = vmatpush3.msra.mxu0 %v1111_v50 }
  0x80   :  { %1585 = vmatprep.subr.mxu1 %v1111_v50  ;;  %1563 = vmatprep.subr.mxu0 %v1110_v51 }
  0x81   :  { %1601 = vmatpush3.msra.mxu1 %v1111_v50  ;;  %1564 = vmatpush3.msra.mxu0 %v1110_v51 }
  0x82   :  { %1586 = vmatprep.subr.mxu1 %v1110_v51 }
  0x83   :  { %1602 = vmatpush3.msra.mxu1 %v1110_v51 }
  0xe2   :  { %v1357_v52 = vpop.f32.mrf.mxu0 }
  0xe4   :  { %v1385_v53 = vpop.f32.mrf.mxu1  ;;  %v1358_v54 = vpop.f32.mrf.mxu0 }
  0xe5   :  { %v1359_v16 = vadd.f32 %v1358_v54, %v1357_v52 }
  0xe6   :  { %v1386_v55 = vpop.f32.mrf.mxu1  ;;  %v1360_v56 = vpop.f32.mrf.mxu0 }
  0xe7   :  { %v760_v23 = vadd.f32 %v1359_v16, %v1238_v17  ;;  %v1387_v24 = vadd.f32 %v1386_v55, %v1385_v53 }
  0xe8   :  { %v1388_v57 = vpop.f32.mrf.mxu1  ;;  %v1361_v58 = vpop.f32.mrf.mxu0 }
  0xe9   :  { %v1362_v25 = vadd.f32 %v1361_v58, %v1360_v56  ;;  %v809_v33 = vadd.f32 %v1387_v24, %v760_v23 }
  0xea   :  { %v1363_v59 = vpop.f32.mrf.mxu0  ;;  %v1389_v60 = vpop.f32.mrf.mxu1 }
  0xeb   :  { %v763_v34 = vadd.f32 %v1362_v25, %v1238_v17  ;;  %v1390_v35 = vadd.f32 %v1389_v60, %v1388_v57 }
  0xec   :  { %v1391_v61 = vpop.f32.mrf.mxu1  ;;  %v1364_v62 = vpop.f32.mrf.mxu0 }
  0xed   :  { %v1365_v15 = vadd.f32 %v1364_v62, %v1363_v59  ;;  %v812_v44 = vadd.f32 %v1390_v35, %v763_v34 }
  0xee   :  { %v1392_v63 = vpop.f32.mrf.mxu1  ;;  %v1366_v0 = vpop.f32.mrf.mxu0 }
  0xef   :  { %v768_v20 = vadd.f32 %v1365_v15, %v1238_v17  ;;  %v1393_v21 = vadd.f32 %v1392_v63, %v1391_v61 }
  0xf0   :  { %v1394_v1 = vpop.f32.mrf.mxu1  ;;  %v1367_v2 = vpop.f32.mrf.mxu0 }
  0xf1   :  { %v1368_v22 = vadd.f32 %v1367_v2, %v1366_v0  ;;  %v817_v29 = vadd.f32 %v1393_v21, %v768_v20 }
  0xf2   :  { %v1395_v4 = vpop.f32.mrf.mxu1 }
  0xf3   :  { %v771_v30 = vadd.f32 %v1368_v22, %v1238_v17  ;;  %v1396_v31 = vadd.f32 %v1395_v4, %v1394_v1 }
  0xf5   :  { %v820_v40 = vadd.f32 %v1396_v31, %v771_v30 }
 0x102   :  { %v1413_v3 = vpop.f32.mrf.mxu0 }
 0x104   :  { %v1414_v5 = vpop.f32.mrf.mxu0  ;;  %v1441_v6 = vpop.f32.mrf.mxu1 }
 0x105   :  { %v1415_v32 = vadd.f32 %v1414_v5, %v1413_v3  ;;  %v1340_v5 = vld [vmem:[%s2139_s7] ss:$0 sm:$0xff] }
 0x106   :  { %v1416_v7 = vpop.f32.mrf.mxu0  ;;  %v1442_v8 = vpop.f32.mrf.mxu1 }
 0x107   :  { %v858_v41 = vadd.f32 %v1415_v32, %v809_v33  ;;  %v1443_v42 = vadd.f32 %v1442_v8, %v1441_v6 }
 0x108   :  { %v1417_v9 = vpop.f32.mrf.mxu0  ;;  %v1444_v10 = vpop.f32.mrf.mxu1 }
 0x109   :  { %v1418_v43 = vadd.f32 %v1417_v9, %v1416_v7  ;;  %v907_v52 = vadd.f32 %v1443_v42, %v858_v41 }
 0x10a   :  { %v1419_v11 = vpop.f32.mrf.mxu0  ;;  %v1445_v12 = vpop.f32.mrf.mxu1 }
 0x10b   :  { %v861_v49 = vadd.f32 %v1418_v43, %v812_v44  ;;  %v1446_v50 = vadd.f32 %v1445_v12, %v1444_v10 }
 0x10c   :  { %v1420_v13 = vpop.f32.mrf.mxu0  ;;  %v1447_v14 = vpop.f32.mrf.mxu1 }
 0x10d   :  { %v1421_v26 = vadd.f32 %v1420_v13, %v1419_v11  ;;  %v910_v60 = vadd.f32 %v1446_v50, %v861_v49 }
 0x10e   :  { %v1422_v18 = vpop.f32.mrf.mxu0  ;;  %v1448_v19 = vpop.f32.mrf.mxu1 }
 0x10f   :  { %v866_v36 = vadd.f32 %v1421_v26, %v817_v29  ;;  %v1449_v37 = vadd.f32 %v1448_v19, %v1447_v14  ;;  %v1329_v14 = vld [vmem:[%s2140_s5] ss:$0 sm:$0xff] }
 0x110   :  { %v1423_v27 = vpop.f32.mrf.mxu0  ;;  %v1450_v28 = vpop.f32.mrf.mxu1 }
 0x111   :  { %v1424_v38 = vadd.f32 %v1423_v27, %v1422_v18  ;;  %v915_v47 = vadd.f32 %v1449_v37, %v866_v36 }
 0x112   :  { %v1451_v39 = vpop.f32.mrf.mxu1 }
 0x113   :  { %v869_v45 = vadd.f32 %v1424_v38, %v820_v40  ;;  %v1452_v46 = vadd.f32 %v1451_v39, %v1450_v28 }
 0x115   :  { %v918_v56 = vadd.f32 %v1452_v46, %v869_v45 }
 0x122   :  { %v1511_v48 = vpop.f32.mrf.mxu0 }
 0x123   :  { %v964_v51 = vadd.f32 %v1511_v48, %v915_v47 }
 0x124   :  { %v955_v53 = vpop.f32.mrf.mxu0  ;;  %v1531_v1 = vpop.f32.mrf.mxu1 }
 0x125   :  { %v1108_v54 = vmul.f32 %v964_v51, %v964_v51  ;;  %v956_v55 = vadd.f32 %v955_v53, %v907_v52  ;;  %v1100_v24 = vadd.f32 %v1531_v1, %v1329_v14 }
 0x126   :  { %v1512_v57 = vpop.f32.mrf.mxu0  ;;  %v1091_v2 = vpop.f32.mrf.mxu1 }
 0x127   :  { %v1106_v58 = vmul.f32 %v956_v55, %v956_v55  ;;  %v967_v59 = vadd.f32 %v1512_v57, %v918_v56  ;;  %1568 = vmatprep.mubr.f32.mxu1 %v1108_v54  ;;  %v1092_v26 = vadd.f32 %v1329_v14, %v1091_v2 }
 0x128   :  { %v958_v61 = vpop.f32.mrf.mxu0  ;;  %v1532_v3 = vpop.f32.mrf.mxu1 }
 0x129   :  { %v1109_v62 = vmul.f32 %v967_v59, %v967_v59  ;;  %v959_v63 = vadd.f32 %v958_v61, %v910_v60  ;;  %1565 = vmatprep.mubr.f32.mxu0 %v1106_v58  ;;  %v1103_v16 = vadd.f32 %v1532_v3, %v1329_v14 }
 0x12a   :  { %v1094_v4 = vpop.f32.mrf.mxu1 }
 0x12b   :  { %v1107_v0 = vmul.f32 %v959_v63, %v959_v63  ;;  %1569 = vmatmul.mubr.f32.vlgmr.msra.gmra.mxu1 %v1109_v62  ;;  %v1095_v20 = vadd.f32 %v1329_v14, %v1094_v4 }
 0x12d   :  { %1566 = vmatmul.mubr.f32.vlgmr.msra.gmra.mxu0 %v1107_v0 }
 0x1eb   :  { %v1570_v6 = vpop.f32.mrf.mxu1 }
 0x1ec   :  { %v1215_v7 = vadd.f32 %v1570_v6, %v1340_v5 }
 0x1ed   :  { %v1567_v8 = vpop.f32.mrf.mxu0  ;;  %v1209_v9 = vpop.f32.mrf.mxu1 }
 0x1ee   :  { %1711 = vrsqrt.f32 %v1215_v7  ;;  %v1205_v10 = vadd.f32 %v1567_v8, %v1340_v5  ;;  %v1210_v11 = vadd.f32 %v1340_v5, %v1209_v9 }
 0x1ef   :  { %v1199_v12 = vpop.f32.mrf.mxu0 }
 0x1f0   :  { %1713 = vrsqrt.f32 %v1205_v10  ;;  %v1200_v13 = vadd.f32 %v1340_v5, %v1199_v12 }
 0x1f1   :  { %1715 = vrsqrt.f32 %v1210_v11 }
 0x1f2   :  { %1717 = vrsqrt.f32 %v1200_v13 }
 0x1fb   :  { %v1712_v15 = vpop.eup %1711 }
 0x1fc   :  { %v1225_v17 = vmul.f32 %v1712_v15, %v967_v59 }
 0x1fd   :  { %v1714_v18 = vpop.eup %1713 }
 0x1fe   :  { %v1716_v19 = vpop.eup %1715  ;;  %v1229_v21 = vadd.f32 %v1225_v17, %v1103_v16  ;;  %v1223_v22 = vmul.f32 %v1714_v18, %v959_v63 }
 0x1ff   :  { %v1718_v23 = vpop.eup %1717  ;;  %v1224_v25 = vmul.f32 %v1716_v19, %v964_v51 }
 0x200   :  { %1233 = vst [vmem:[%s2141_s8 + $0x18] sm:$0xff] %v1229_v21  ;;  %v1227_v27 = vadd.f32 %v1223_v22, %v1095_v20  ;;  %v1222_v28 = vmul.f32 %v1718_v23, %v956_v55 }
 0x201   :  { %v1228_v29 = vadd.f32 %v1224_v25, %v1100_v24 }
 0x202   :  { %1231 = vst [vmem:[%s2141_s8 + $0x8] sm:$0xff] %v1227_v27  ;;  %v1226_v30 = vadd.f32 %v1222_v28, %v1092_v26 }
 0x203   :  { %1232 = vst [vmem:[%s2141_s8 + $0x10] sm:$0xff] %v1228_v29 }
 0x204   :  { %1230 = vst [vmem:[%s2141_s8] sm:$0xff] %v1226_v30 }

// kernel: reference_encoder_pallas.13
= control target key start
LH: loop header
LB: loop body
LE: loop exit
PB: predicated region body
PF: predicated region fallthrough
CT: control target
= control target key end

     0   :  { %vm1157_vm0 = vmmov 0   ;;  %s1416_s0 = inlined_call_operand.vmem [shape: bf16[8,1152], index: 0, kind: input, shape index: {}]   ;;  %s1417_s1 = inlined_call_operand.vmem [shape: bf16[1152,128], index: 1, kind: input, shape index: {}]   ;;  %s1418_s2 = inlined_call_operand.vmem [shape: f32[1,128], index: 2, kind: input, shape index: {}]   ;;  %s1419_s3 = inlined_call_operand.hbm [shape: f32[8,128], index: 3, kind: output, shape index: {}]  }
   0x1   :  { %v1053_v0 = vld [vmem:[%s1417_s1 + $0x78] sm:$0xff]   ;;  %v1057_v4 = vld [vmem:[%s1417_s1 + $0x70] sm:$0xff]   ;;  %v1061_v8 = vld [vmem:[%s1417_s1 + $0x68] sm:$0xff]  }
   0x2   :  { %v1054_v1 = vld [vmem:[%s1417_s1 + $0x38] sm:$0xff]   ;;  %933 = vmatprep.subr.bf16.mxu0 %v1053_v0  ;;  %v1058_v5 = vld [vmem:[%s1417_s1 + $0x30] sm:$0xff]   ;;  %v1062_v9 = vld [vmem:[%s1417_s1 + $0x28] sm:$0xff]  }
   0x3   :  { %v1055_v2 = vld [vmem:[%s1417_s1 + $0xf8] sm:$0xff]   ;;  %934 = vmatpush3.bf16.msra.mxu0 %v1054_v1  ;;  %v1059_v6 = vld [vmem:[%s1417_s1 + $0xf0] sm:$0xff]   ;;  %v1063_v10 = vld [vmem:[%s1417_s1 + $0xe8] sm:$0xff]  }
   0x4   :  { %v1056_v3 = vld [vmem:[%s1417_s1 + $0xb8] sm:$0xff]   ;;  %955 = vmatprep.subr.bf16.mxu1 %v1055_v2  ;;  %935 = vmatprep.subr.bf16.mxu0 %v1057_v4  ;;  %v1060_v7 = vld [vmem:[%s1417_s1 + $0xb0] sm:$0xff]   ;;  %v1064_v11 = vld [vmem:[%s1417_s1 + $0xa8] sm:$0xff]  }
   0x5   :  { %956 = vmatpush3.bf16.msra.mxu1 %v1056_v3  ;;  %v1065_v12 = vld [vmem:[%s1417_s1 + $0x60] sm:$0xff]   ;;  %v1069_v16 = vld [vmem:[%s1417_s1 + $0x58] sm:$0xff]   ;;  %v1073_v20 = vld [vmem:[%s1417_s1 + $0x50] sm:$0xff]  }
   0x6   :  { %957 = vmatprep.subr.bf16.mxu1 %v1059_v6  ;;  %v1066_v13 = vld [vmem:[%s1417_s1 + $0x20] sm:$0xff]   ;;  %v1070_v17 = vld [vmem:[%s1417_s1 + $0x18] sm:$0xff]   ;;  %v1074_v21 = vld [vmem:[%s1417_s1 + $0x10] sm:$0xff]  }
   0x7   :  { %936 = vmatpush3.bf16.msra.mxu0 %v1058_v5  ;;  %v1067_v14 = vld [vmem:[%s1417_s1 + $0xe0] sm:$0xff]   ;;  %v1071_v18 = vld [vmem:[%s1417_s1 + $0xd8] sm:$0xff]   ;;  %v1075_v22 = vld [vmem:[%s1417_s1 + $0xd0] sm:$0xff]  }
   0x8   :  { %937 = vmatprep.subr.bf16.mxu0 %v1061_v8  ;;  %v1068_v15 = vld [vmem:[%s1417_s1 + $0xa0] sm:$0xff]   ;;  %v1072_v19 = vld [vmem:[%s1417_s1 + $0x98] sm:$0xff]   ;;  %v1076_v23 = vld [vmem:[%s1417_s1 + $0x90] sm:$0xff]  }
   0x9   :  { %958 = vmatpush3.bf16.msra.mxu1 %v1060_v7  ;;  %v1077_v24 = vld [vmem:[%s1417_s1 + $0x48] sm:$0xff]   ;;  %v1081_v28 = vld [vmem:[%s1417_s1 + $0x40] sm:$0xff]   ;;  %v1087_v35 = vld [vmem:[%s1417_s1 + $0x178] sm:$0xff]  }
   0xa   :  { %959 = vmatprep.subr.bf16.mxu1 %v1063_v10  ;;  %v1078_v25 = vld [vmem:[%s1417_s1 + $0x8] sm:$0xff]   ;;  %v1082_v29 = vld [vmem:[%s1417_s1] sm:$0xff]   ;;  %v1090_v39 = vld [vmem:[%s1417_s1 + $0x138] sm:$0xff]  }
   0xb   :  { %938 = vmatpush3.bf16.msra.mxu0 %v1062_v9  ;;  %v1079_v26 = vld [vmem:[%s1417_s1 + $0xc8] sm:$0xff]   ;;  %v1083_v30 = vld [vmem:[%s1417_s1 + $0xc0] sm:$0xff]   ;;  %v1091_v40 = vld [vmem:[%s1417_s1 + $0x1f8] sm:$0xff]   ;;  %v1156_v9 = vmov 0.0  }
   0xc   :  { %939 = vmatprep.subr.bf16.mxu0 %v1065_v12  ;;  %v1080_v27 = vld [vmem:[%s1417_s1 + $0x88] sm:$0xff]   ;;  %v16_v31 = vld [vmem:[%s1416_s0] sm:$0xff]  ;;  %v1092_v41 = vld [vmem:[%s1417_s1 + $0x1b8] sm:$0xff]  }
   0xd   :  { %960 = vmatpush3.bf16.msra.mxu1 %v1064_v11  ;;  %v852_v32 = vcombine.low %v16_v31, %v16_v31  ;;  %v853_v33 = vcombine.high %v16_v31, %v16_v31  ;;  %v1086_v34 = vld [vmem:[%s1417_s1 + $0x80] sm:$0xff]   ;;  %v17_v36 = vld [vmem:[%s1416_s0 + $0x8] sm:$0xff]  ;;  %v1093_v42 = vld [vmem:[%s1417_s1 + $0x170] sm:$0xff]  }
   0xe   :  { %961 = vmatprep.subr.bf16.mxu1 %v1067_v14  ;;  %v854_v37 = vcombine.low %v17_v36, %v17_v36  ;;  %v855_v38 = vcombine.high %v17_v36, %v17_v36  ;;  %v1094_v43 = vld [vmem:[%s1417_s1 + $0x130] sm:$0xff]   ;;  %v1097_v46 = vld [vmem:[%s1417_s1 + $0x168] sm:$0xff]   ;;  %v1101_v50 = vld [vmem:[%s1417_s1 + $0x160] sm:$0xff]  }
   0xf   :  { %940 = vmatpush3.bf16.msra.mxu0 %v1066_v13  ;;  %668 = vmatprep.mubr.bf16.mxu0 %v853_v33  ;;  %v1095_v44 = vld [vmem:[%s1417_s1 + $0x1f0] sm:$0xff]   ;;  %v1098_v47 = vld [vmem:[%s1417_s1 + $0x128] sm:$0xff]   ;;  %v1102_v51 = vld [vmem:[%s1417_s1 + $0x120] sm:$0xff]  }
  0x10   :  { %941 = vmatprep.subr.bf16.mxu0 %v1069_v16  ;;  %708 = vmatprep.mubr.bf16.mxu1 %v855_v38  ;;  %v1096_v45 = vld [vmem:[%s1417_s1 + $0x1b0] sm:$0xff]   ;;  %v1099_v48 = vld [vmem:[%s1417_s1 + $0x1e8] sm:$0xff]   ;;  %v1103_v52 = vld [vmem:[%s1417_s1 + $0x1e0] sm:$0xff]  }
  0x11   :  { %962 = vmatpush3.bf16.msra.mxu1 %v1068_v15  ;;  %v1100_v49 = vld [vmem:[%s1417_s1 + $0x1a8] sm:$0xff]   ;;  %v1104_v53 = vld [vmem:[%s1417_s1 + $0x1a0] sm:$0xff]   ;;  %v1105_v54 = vld [vmem:[%s1417_s1 + $0x158] sm:$0xff]  }
  0x12   :  { %963 = vmatprep.subr.bf16.mxu1 %v1071_v18  ;;  %v1106_v55 = vld [vmem:[%s1417_s1 + $0x118] sm:$0xff]   ;;  %v1109_v58 = vld [vmem:[%s1417_s1 + $0x150] sm:$0xff]   ;;  %v1113_v62 = vld [vmem:[%s1417_s1 + $0x148] sm:$0xff]  }
  0x13   :  { %942 = vmatpush3.bf16.msra.mxu0 %v1070_v17  ;;  %v1107_v56 = vld [vmem:[%s1417_s1 + $0x1d8] sm:$0xff]   ;;  %v1110_v59 = vld [vmem:[%s1417_s1 + $0x110] sm:$0xff]   ;;  %v1114_v63 = vld [vmem:[%s1417_s1 + $0x108] sm:$0xff]  }
  0x14   :  { %943 = vmatprep.subr.bf16.mxu0 %v1073_v20  ;;  %v1108_v57 = vld [vmem:[%s1417_s1 + $0x198] sm:$0xff]   ;;  %v1111_v60 = vld [vmem:[%s1417_s1 + $0x1d0] sm:$0xff]   ;;  %v1115_v0 = vld [vmem:[%s1417_s1 + $0x1c8] sm:$0xff]  }
  0x15   :  { %964 = vmatpush3.bf16.msra.mxu1 %v1072_v19  ;;  %v1112_v61 = vld [vmem:[%s1417_s1 + $0x190] sm:$0xff]   ;;  %v1116_v1 = vld [vmem:[%s1417_s1 + $0x188] sm:$0xff]   ;;  %v1117_v2 = vld [vmem:[%s1417_s1 + $0x140] sm:$0xff]  }
  0x16   :  { %965 = vmatprep.subr.bf16.mxu1 %v1075_v22  ;;  %v1118_v3 = vld [vmem:[%s1417_s1 + $0x100] sm:$0xff]   ;;  %v18_v5 = vld [vmem:[%s1416_s0 + $0x10] sm:$0xff]  ;;  %v19_v10 = vld [vmem:[%s1416_s0 + $0x18] sm:$0xff] }
  0x17   :  { %944 = vmatpush3.bf16.msra.mxu0 %v1074_v21  ;;  %v1119_v4 = vld [vmem:[%s1417_s1 + $0x1c0] sm:$0xff]   ;;  %v856_v6 = vcombine.low %v18_v5, %v18_v5  ;;  %v857_v7 = vcombine.high %v18_v5, %v18_v5  ;;  %v858_v11 = vcombine.low %v19_v10, %v19_v10  ;;  %v859_v12 = vcombine.high %v19_v10, %v19_v10  ;;  %v1125_v13 = vld [vmem:[%s1417_s1 + $0x238] sm:$0xff]   ;;  %v1126_v14 = vld [vmem:[%s1417_s1 + $0x230] sm:$0xff]  }
  0x18   :  { %945 = vmatprep.subr.bf16.mxu0 %v1077_v24  ;;  %v1122_v8 = vld [vmem:[%s1417_s1 + $0x180] sm:$0xff]   ;;  %v1127_v15 = vld [vmem:[%s1417_s1 + $0x228] sm:$0xff]  }
  0x19   :  { %966 = vmatpush3.bf16.msra.mxu1 %v1076_v23 }
  0x1a   :  { %967 = vmatprep.subr.bf16.mxu1 %v1079_v26 }
  0x1b   :  { %946 = vmatpush3.bf16.msra.mxu0 %v1078_v25 }
  0x1c   :  { %947 = vmatprep.subr.bf16.mxu0 %v1081_v28 }
  0x1d   :  { %968 = vmatpush3.bf16.msra.mxu1 %v1080_v27 }
  0x1e   :  { %969 = vmatprep.subr.bf16.mxu1 %v1083_v30 }
  0x1f   :  { %948 = vmatpush3.bf16.msra.mxu0 %v1082_v29 }
  0x20   :  { %977 = vmatprep.subr.bf16.mxu0 %v1087_v35 }
  0x21   :  { %970 = vmatpush3.bf16.msra.mxu1 %v1086_v34 }
  0x22   :  { %669 = vmatmul.mubr.bf16.vlgmr.msra.gmra.mxu0 %v852_v32  ;;  %999 = vmatprep.subr.bf16.mxu1 %v1091_v40 }
  0x23   :  { %978 = vmatpush3.bf16.msra.mxu0 %v1090_v39  ;;  %748 = vmatprep.mubr.bf16.mxu0 %v857_v7 }
  0x24   :  { %709 = vmatmul.mubr.bf16.vlgmr.msra.gmra.mxu1 %v854_v37  ;;  %979 = vmatprep.subr.bf16.mxu0 %v1093_v42 }
  0x25   :  { %1000 = vmatpush3.bf16.msra.mxu1 %v1092_v41  ;;  %788 = vmatprep.mubr.bf16.mxu1 %v859_v12 }
  0x26   :  { %1001 = vmatprep.subr.bf16.mxu1 %v1095_v44 }
  0x27   :  { %980 = vmatpush3.bf16.msra.mxu0 %v1094_v43 }
  0x28   :  { %981 = vmatprep.subr.bf16.mxu0 %v1097_v46 }
  0x29   :  { %1002 = vmatpush3.bf16.msra.mxu1 %v1096_v45 }
  0x2a   :  { %1003 = vmatprep.subr.bf16.mxu1 %v1099_v48 }
  0x2b   :  { %982 = vmatpush3.bf16.msra.mxu0 %v1098_v47 }
  0x2c   :  { %983 = vmatprep.subr.bf16.mxu0 %v1101_v50 }
  0x2d   :  { %1004 = vmatpush3.bf16.msra.mxu1 %v1100_v49 }
  0x2e   :  { %1005 = vmatprep.subr.bf16.mxu1 %v1103_v52 }
  0x2f   :  { %984 = vmatpush3.bf16.msra.mxu0 %v1102_v51 }
  0x30   :  { %985 = vmatprep.subr.bf16.mxu0 %v1105_v54 }
  0x31   :  { %1006 = vmatpush3.bf16.msra.mxu1 %v1104_v53 }
  0x32   :  { %1007 = vmatprep.subr.bf16.mxu1 %v1107_v56 }
  0x33   :  { %986 = vmatpush3.bf16.msra.mxu0 %v1106_v55 }
  0x34   :  { %987 = vmatprep.subr.bf16.mxu0 %v1109_v58 }
  0x35   :  { %1008 = vmatpush3.bf16.msra.mxu1 %v1108_v57 }
  0x36   :  { %1009 = vmatprep.subr.bf16.mxu1 %v1111_v60 }
  0x37   :  { %988 = vmatpush3.bf16.msra.mxu0 %v1110_v59 }
  0x38   :  { %989 = vmatprep.subr.bf16.mxu0 %v1113_v62 }
  0x39   :  { %1010 = vmatpush3.bf16.msra.mxu1 %v1112_v61 }
  0x3a   :  { %1011 = vmatprep.subr.bf16.mxu1 %v1115_v0 }
  0x3b   :  { %990 = vmatpush3.bf16.msra.mxu0 %v1114_v63 }
  0x3c   :  { %991 = vmatprep.subr.bf16.mxu0 %v1117_v2 }
  0x3d   :  { %1012 = vmatpush3.bf16.msra.mxu1 %v1116_v1 }
  0x3e   :  { %1013 = vmatprep.subr.bf16.mxu1 %v1119_v4 }
  0x3f   :  { %992 = vmatpush3.bf16.msra.mxu0 %v1118_v3 }
  0x40   :  { %1030 = vmatprep.subr.bf16.mxu0 %v1156_v9 }
  0x41   :  { %1014 = vmatpush3.bf16.msra.mxu1 %v1122_v8 }
  0x42   :  { %749 = vmatmul.mubr.bf16.vlgmr.msra.gmra.mxu0 %v856_v6 }
  0x43   :  { %1031 = vmatpush3.bf16.msra.mxu0 %v1125_v13  ;;  %1046 = vmatprep.mubr.msk.bf16.mxu0 %vm1157_vm0, %v1156_v9 }
  0x44   :  { %789 = vmatmul.mubr.bf16.vlgmr.msra.gmra.mxu1 %v858_v11  ;;  %1032 = vmatprep.subr.bf16.mxu0 %v1156_v9 }
  0x47   :  { %1033 = vmatpush3.bf16.msra.mxu0 %v1126_v14 }
  0x48   :  { %1034 = vmatprep.subr.bf16.mxu0 %v1156_v9 }
  0x49   :  { %8 = vsyncpa [#allocation3], 0  ;;  %v1128_v16 = vld [vmem:[%s1417_s1 + $0x220] sm:$0xff]   ;;  %v1129_v17 = vld [vmem:[%s1417_s1 + $0x218] sm:$0xff]   ;;  %s1158_s4 = smov [#allocation2]  }
  0x4a   :  { %v1130_v18 = vld [vmem:[%s1417_s1 + $0x210] sm:$0xff]   ;;  %v1131_v19 = vld [vmem:[%s1417_s1 + $0x208] sm:$0xff]   ;;  %v1132_v20 = vld [vmem:[%s1417_s1 + $0x200] sm:$0xff]   ;;  %s843_s5 = sshll.u32 %s1158_s4, 4  ;;  %s844_s5 = int_to_ptr.vmem [resolvable:$true] %s843_s5 }
  0x4b   :  { %1035 = vmatpush3.bf16.msra.mxu0 %v1127_v15  ;;  %v1133_v21 = vld [vmem:[%s1416_s0 + $0x20] ss:$0 sps:$4 sm:$0xff]   ;;  %s1134_s6 = scalar_lea.vmem %s844_s5, 128  ;;  %p1139_p1 = scmp.lt.s32.totalorder %s844_s5, %s844_s5 }
  0x4c   :  { %1036 = vmatprep.subr.bf16.mxu0 %v1156_v9  ;;  %v851_v39 = vld [vmem:[%s1418_s2] ss:$0 sm:$0xff]  ;;  %p1135_p0 = scmp.ne.s32.totalorder %s844_s5, %s1134_s6  ;;  %p1140_p2 = scmp.lt.s32.totalorder %s1134_s6, %s1134_s6 }
  0x4e   :  { %p1141_p3 = por %p1140_p2, %p1139_p1 }
  0x4f   :  { %1037 = vmatpush3.bf16.msra.mxu0 %v1128_v16 }
  0x50   :  { %1038 = vmatprep.subr.bf16.mxu0 %v1156_v9  ;;  %p1142_p4 = pnand %p1141_p3, %p1135_p0 }
  0x53   :  { %1039 = vmatpush3.bf16.msra.mxu0 %v1129_v17 }
  0x54   :  { %1040 = vmatprep.subr.bf16.mxu0 %v1156_v9 }
  0x57   :  { %1041 = vmatpush3.bf16.msra.mxu0 %v1130_v18 }
  0x58   :  { %1042 = vmatprep.subr.bf16.mxu0 %v1156_v9 }
  0x5b   :  { %1043 = vmatpush3.bf16.msra.mxu0 %v1131_v19 }
  0x5c   :  { %1044 = vmatprep.subr.bf16.mxu0 %v1156_v9 }
  0x5f   :  { %1045 = vmatpush3.bf16.msra.mxu0 %v1132_v20 }
  0x62   :  { %1047 = vmatmul.mubr.bf16.vlgmr.msra.gmra.mxu0 %v1133_v21 }
  0xe2   :  { %v949_v22 = vpop.f32.mrf.mxu0 }
  0xe4   :  { %v950_v23 = vpop.f32.mrf.mxu0  ;;  %v971_v24 = vpop.f32.mrf.mxu1 }
  0xe5   :  { %v951_v38 = vadd.f32 %v950_v23, %v949_v22 }
  0xe6   :  { %v952_v25 = vpop.f32.mrf.mxu0  ;;  %v972_v26 = vpop.f32.mrf.mxu1 }
  0xe7   :  { %v671_v40 = vadd.f32 %v951_v38, %v851_v39  ;;  %v973_v41 = vadd.f32 %v972_v26, %v971_v24 }
  0xe8   :  { %v953_v27 = vpop.f32.mrf.mxu0  ;;  %v974_v28 = vpop.f32.mrf.mxu1 }
  0xe9   :  { %v711_v43 = vadd.f32 %v973_v41, %v671_v40 }
  0xea   :  { %v975_v29 = vpop.f32.mrf.mxu1 }
 0x102   :  { %v993_v30 = vpop.f32.mrf.mxu0 }
 0x104   :  { %v994_v31 = vpop.f32.mrf.mxu0  ;;  %v1015_v32 = vpop.f32.mrf.mxu1 }
 0x105   :  { %v995_v42 = vadd.f32 %v994_v31, %v993_v30 }
 0x106   :  { %v996_v33 = vpop.f32.mrf.mxu0  ;;  %v1016_v34 = vpop.f32.mrf.mxu1 }
 0x107   :  { %v751_v44 = vadd.f32 %v995_v42, %v711_v43  ;;  %v1017_v45 = vadd.f32 %v1016_v34, %v1015_v32 }
 0x108   :  { %v997_v35 = vpop.f32.mrf.mxu0  ;;  %v1018_v36 = vpop.f32.mrf.mxu1 }
 0x109   :  { %v791_v46 = vadd.f32 %v1017_v45, %v751_v44 }
 0x10a   :  { %v1019_v37 = vpop.f32.mrf.mxu1 }
 0x122   :  { %v830_v47 = vpop.f32.mrf.mxu0 }
 0x123   :  { %v831_v48 = vadd.f32 %v830_v47, %v791_v46 }
 0x124   :  { %v1048_v49 = vpop.f32.mrf.mxu0 }
 0x125   :  { %836 = vst [vmem:[#allocation2] sm:$0xff] %v831_v48 }
 0x126   :  { %v833_v50 = vpop.f32.mrf.mxu0 }
 0x127   :  { %1145 = shalt.err (!%p1142_p4)
}
 0x128   :  { %846 = dma.vmem_to_hbm [thread:$0]  %s844_s5, 128, %s1419_s3, [#allocation3]   ;;  %v1049_v51 = vpop.f32.mrf.mxu0 }
 0x129   :  { %1154 = dma.done.wait [#allocation3], 128  }
 0x12a   :  { %1155 = vsyncadd [#allocation3], 4294967168 }
 0x12b   :  { %850 = vsyncpa [#allocation3], 1 }

</bundles_post_ra>
